<compile_context>
chip_gen: v5e
topology: v5e:2x2
jax: 0.10.0
libtpu: 0.0.40
codegen_flags: <defaults>
</compile_context>

<pallas_src>
import functools
import math

import numpy as np
import jax
import jax.numpy as jnp
from jax.experimental import pallas as pl
from jax.experimental.pallas import tpu as pltpu

LANE = 128                 # lane width / per-gate slot width
NGATES = 4                 # i, f, o, g
GW = NGATES * LANE         # 512 gate lanes per LSTM


# --------------------------------------------------------------------------- kernel
def _autoencoder_kernel(x_ref,                      # [T*B, LANE]  bf16, time-major
                        w1x_ref,                    # [LANE, GW]   bf16  enc1 W_ih
                        wa_ref,                     # [LANE, 2*GW] bf16  [enc1 W_hh | enc2 W_ih]
                        wb_ref,                     # [LANE, GW]   bf16  enc2 W_hh
                        b1_ref, b2_ref,             # [1, GW]      f32
                        w3_ref, b3_ref,             # dec1 input block + fused bias
                        w4_ref, b4_ref,             # dec2 input block + fused bias
                        wh_ref, bh_ref,             # block-diagonal classification head
                        out_ref,                    # [B, target_size*LANE] f32
                        *, num_classes, target_size, time_steps):
    S = LANE
    B = out_ref.shape[0]
    T = time_steps

    # Hoisted enc1 input projection: ONE [T*B,128]x[128,512] bf16 matmul (fills bf16
    # sublane granules at M = T*B) computed off the recurrent dependence chain.
    xp = jnp.dot(x_ref[...], w1x_ref[...],
                 preferred_element_type=jnp.float32)          # [T*B, GW] f32

    wa = wa_ref[...]
    wb = wb_ref[...]
    # Hoist bias broadcasts out of the unrolled recurrence (JAX does not CSE
    # broadcast_in_dim; re-broadcasting per timestep adds VALU filler work).
    b1 = jnp.broadcast_to(b1_ref[...], (B, GW))
    b2 = jnp.broadcast_to(b2_ref[...], (B, GW))

    def gate_math(gates, c):
        # gate slots: [ i | f | o | g ], each 128 lanes (zero past the true width,
        # which keeps the padded lanes of h and c exactly zero through time).
        sig = jax.nn.sigmoid(gates[:, :3 * S])      # i, f, o in one contiguous pass
        g = jnp.tanh(gates[:, 3 * S:])
        i_g = sig[:, :S]
        f_g = sig[:, S:2 * S]
        o_g = sig[:, 2 * S:]
        c_new = f_g * c + i_g * g
        return o_g * jnp.tanh(c_new), c_new

    zeros = jnp.zeros((B, S), jnp.float32)

    # enc1 step 0: h1_{-1} = 0 -> gates are just the hoisted x-proj plus bias.
    h1, c1 = gate_math(xp[0:B] + b1, zeros)
    h2, c2 = zeros, zeros

    # ---- Shifted fusion: iteration t computes enc1 step t+1 and enc2 step t.
    # (T static and small -> fully unrolled; see scaling note in the header.)
    for t in range(T - 1):
        ga = jnp.dot(h1.astype(jnp.bfloat16), wa,
                     preferred_element_type=jnp.float32)       # [B, 2*GW]
        g1 = ga[:, :GW] + xp[(t + 1) * B:(t + 2) * B] + b1     # enc1 gates, step t+1
        g2 = ga[:, GW:] + b2                                   # enc2 gates, step t
        if t > 0:    # h2_{-1} = 0 -> the recurrent matmul is exactly zero at t = 0
            g2 = g2 + jnp.dot(h2.astype(jnp.bfloat16), wb,
                              preferred_element_type=jnp.float32)
        h1, c1 = gate_math(g1, c1)     # independent of the enc2 gate_math below
        h2, c2 = gate_math(g2, c2)

    # ---- Epilogue: enc2 step T-1 consumes h1_{T-1}.
    g2 = jnp.dot(h1.astype(jnp.bfloat16), wa[:, GW:],
                 preferred_element_type=jnp.float32) + b2
    if T > 1:
        g2 = g2 + jnp.dot(h2.astype(jnp.bfloat16), wb,
                          preferred_element_type=jnp.float32)
    h2, c2 = gate_math(g2, c2)         # h2 = encoder h_n
    # TODO(synk): the reference Encoder calls pad_packed_sequence on a dense tensor
    # (would raise in PyTorch); its result is unused downstream, so it is skipped.

    # ---- Decoder: encoder h_n becomes a length-1 sequence; h0 = c0 = 0 so the
    # recurrent matmuls are exactly zero (b_hh is folded into b3/b4).
    g3 = jnp.dot(h2.astype(jnp.bfloat16), w3_ref[...],
                 preferred_element_type=jnp.float32) + b3_ref[...]
    h3, _ = gate_math(g3, zeros)
    g4 = jnp.dot(h3.astype(jnp.bfloat16), w4_ref[...],
                 preferred_element_type=jnp.float32) + b4_ref[...]
    h4, _ = gate_math(g4, zeros)

    # ---- Fused classification head: one block-diagonal matmul (each of the
    # target_size output groups in its own 128-lane slot), grouped log_softmax,
    # one lane-dense store.
    logits = jnp.dot(h4.astype(jnp.bfloat16), wh_ref[...],
                     preferred_element_type=jnp.float32) + bh_ref[...]
    cls_mask = jax.lax.broadcasted_iota(jnp.int32, (B, S), 1) < num_classes
    pieces = []
    for i in range(target_size):
        s_i = logits[:, i * S:(i + 1) * S]                     # lane-aligned slot
        m_i = jnp.max(jnp.where(cls_mask, s_i, -1e30), axis=-1, keepdims=True)
        z_i = s_i - m_i
        denom = jnp.sum(jnp.where(cls_mask, jnp.exp(z_i), 0.0), axis=-1,
                        keepdims=True)
        pieces.append(z_i - jnp.log(denom))
    out_ref[...] = jnp.concatenate(pieces, axis=-1)            # [B, target_size*128]


# ----------------------------------------------------------------------- host-side
def recurrent_autoencoder(x, packed_params, *, num_classes, target_size):
    """x: [B, T, F] float32. Returns [target_size, B, num_classes] log-probs."""
    B, T, F = x.shape
    assert F <= LANE, "feature_len must fit a single 128-lane slot"
    B_pad = max(16, ((B + 15) // 16) * 16)     # fill the bf16 [16,128] sublane granule

    # Time-major, feature-padded, pre-cast to bf16 host-side (halves input traffic
    # and removes all in-loop input casts); flattened so timestep t is the
    # sublane-aligned row block [t*B_pad, (t+1)*B_pad).
    x_tm = jnp.transpose(x, (1, 0, 2)).astype(jnp.bfloat16)
    x_pad = jnp.zeros((T, B_pad, LANE), jnp.bfloat16).at[:, :B, :F].set(x_tm)
    x_flat = x_pad.reshape(T * B_pad, LANE)

    kern = functools.partial(_autoencoder_kernel, num_classes=num_classes,
                             target_size=target_size, time_steps=T)
    vmem = pl.BlockSpec(memory_space=pltpu.MemorySpace.VMEM)
    args = (x_flat,) + tuple(packed_params)
    # Whole-array VMEM specs: total residency ~1 MiB at these shapes.  Before
    # scaling batch, add a batch grid (dimension_semantics=("parallel",)) or raise
    # vmem_limit_bytes to avoid VMEM OOM / spills.
    out_flat = pl.pallas_call(
        kern,
        out_shape=jax.ShapeDtypeStruct((B_pad, target_size * LANE), jnp.float32),
        in_specs=[vmem] * len(args),
        out_specs=vmem,
    )(*args)

    # Lane-dense kernel output -> [target_size, B, num_classes] (layout plumbing).
    out = out_flat[:B].reshape(B, target_size, LANE)[:, :, :num_classes]
    return jnp.transpose(out, (1, 0, 2))


# ------------------------------------------------------------------ weight packing
def _pack_lstm(p, hidden):
    """PyTorch LSTM params -> (W_ih, W_hh, bias) in the kernel's lane layout.

    Torch gate order (i, f, g, o) is remapped to slots (i, f, o, g); every gate gets
    a 128-lane slot.  Padding columns/rows and bias are zero so padded h/c lanes stay
    exactly zero through the recurrence.  b_ih + b_hh are fused into one bias row."""
    w_ih = np.asarray(p["w_ih"], np.float32)            # [4H, in]
    w_hh = np.asarray(p["w_hh"], np.float32)            # [4H, H]
    b = np.asarray(p["b_ih"], np.float32) + np.asarray(p["b_hh"], np.float32)
    in_dim = w_ih.shape[1]
    wi = np.zeros((LANE, GW), np.float32)
    wh = np.zeros((LANE, GW), np.float32)
    bb = np.zeros((1, GW), np.float32)
    for slot, pt in enumerate((0, 1, 3, 2)):            # slots i,f,o,g <- torch i,f,g,o
        rsl = slice(pt * hidden, (pt + 1) * hidden)
        csl = slice(slot * LANE, slot * LANE + hidden)
        wi[:in_dim, csl] = w_ih[rsl].T
        wh[:hidden, csl] = w_hh[rsl].T
        bb[0, csl] = b[rsl]
    return wi, wh, bb


def _pack_head(w_cls, b_cls, seq_len, num_classes, target_size):
    """Linear(seq_len -> C) applied to target_size chunks -> one block-diagonal
    matmul whose i-th output group occupies its own 128-lane slot."""
    w_cls = np.asarray(w_cls, np.float32)               # [C, seq_len]
    b_cls = np.asarray(b_cls, np.float32)               # [C]
    w = np.zeros((LANE, target_size * LANE), np.float32)
    b = np.zeros((1, target_size * LANE), np.float32)
    for i in range(target_size):
        w[i * seq_len:(i + 1) * seq_len, i * LANE:i * LANE + num_classes] = w_cls.T
        b[0, i * LANE:i * LANE + num_classes] = b_cls
    return jnp.asarray(w, jnp.bfloat16), jnp.asarray(b, jnp.float32)


def pack_params(raw, *, embedding_dim, num_classes, target_size):
    """One-time host-side repack of PyTorch-shaped weights into the kernel layout."""
    E = embedding_dim
    H1 = 2 * E
    seq_len = H1 // target_size
    assert H1 <= LANE and E <= LANE and num_classes <= LANE
    assert H1 == seq_len * target_size
    w1i, w1h, b1 = _pack_lstm(raw["enc1"], H1)          # LSTM(F   -> 2E)
    w2i, w2h, b2 = _pack_lstm(raw["enc2"], E)           # LSTM(2E  -> E)
    w3i, _, b3 = _pack_lstm(raw["dec1"], E)             # LSTM(E   -> E), single step
    w4i, _, b4 = _pack_lstm(raw["dec2"], H1)            # LSTM(E   -> 2E), single step
    # Fused recurrent weight taking h1 as input: [enc1 W_hh | enc2 W_ih].
    wa = np.concatenate([w1h, w2i], axis=1)             # [128, 1024]
    wh, bh = _pack_head(raw["w_cls"], raw["b_cls"], seq_len, num_classes, target_size)
    bf = lambda a: jnp.asarray(a, jnp.bfloat16)
    f32 = lambda a: jnp.asarray(a, jnp.float32)
    return (bf(w1i), bf(wa), bf(w2h), f32(b1), f32(b2),
            bf(w3i), f32(b3), bf(w4i), f32(b4), wh, bh)


# ------------------------------------------------------------- init & f32 reference
def init_raw_params(key, feature_len, embedding_dim, num_classes, target_size):
    """Deterministic synthetic init mirroring nn.LSTM / nn.Linear shapes."""
    E = embedding_dim
    H1 = 2 * E
    seq_len = H1 // target_size

    def u(k, shape, scale):
        return jax.random.uniform(k, shape, jnp.float32, -scale, scale)

    def lstm(k, in_dim, hidden):
        s = 1.0 / math.sqrt(hidden)
        k0, k1, k2, k3 = jax.random.split(k, 4)
        return dict(w_ih=u(k0, (4 * hidden, in_dim), s),
                    w_hh=u(k1, (4 * hidden, hidden), s),
                    b_ih=u(k2, (4 * hidden,), s),
                    b_hh=u(k3, (4 * hidden,), s))

    ks = jax.random.split(key, 6)
    s = 1.0 / math.sqrt(seq_len)
    return dict(enc1=lstm(ks[0], feature_len, H1),
                enc2=lstm(ks[1], H1, E),
                dec1=lstm(ks[2], E, E),
                dec2=lstm(ks[3], E, H1),
                w_cls=u(ks[4], (num_classes, seq_len), s),
                b_cls=u(ks[5], (num_classes,), s))


def _lstm_ref(x_seq, p):
    """Pure-JAX f32 LSTM (torch gate order i,f,g,o), h0 = c0 = 0."""
    w_ih, w_hh = p["w_ih"], p["w_hh"]
    b = p["b_ih"] + p["b_hh"]
    H = w_hh.shape[1]
    B = x_seq.shape[0]
    h = jnp.zeros((B, H), jnp.float32)
    c = jnp.zeros((B, H), jnp.float32)
    outs = []
    for t in range(x_seq.shape[1]):
        g = x_seq[:, t] @ w_ih.T + h @ w_hh.T + b
        i = jax.nn.sigmoid(g[:, 0 * H:1 * H])
        f = jax.nn.sigmoid(g[:, 1 * H:2 * H])
        gg = jnp.tanh(g[:, 2 * H:3 * H])
        o = jax.nn.sigmoid(g[:, 3 * H:4 * H])
        c = f * c + i * gg
        h = o * jnp.tanh(c)
        outs.append(h)
    return jnp.stack(outs, axis=1), h


def autoencoder_ref(x, raw, *, embedding_dim, num_classes, target_size):
    """f32 reference of the PyTorch forward pass for tolerance validation."""
    H1 = 2 * embedding_dim
    seq_len = H1 // target_size
    o1, _ = _lstm_ref(x, raw["enc1"])
    _, h_n = _lstm_ref(o1, raw["enc2"])
    d1, _ = _lstm_ref(h_n[:, None, :], raw["dec1"])
    d2, _ = _lstm_ref(d1, raw["dec2"])                  # [B, 1, 2E]
    logits = jnp.stack(
        [d2[:, 0, i * seq_len:(i + 1) * seq_len] @ raw["w_cls"].T + raw["b_cls"]
         for i in range(target_size)], axis=0)          # [target_size, B, C]
    return jax.nn.log_softmax(logits, axis=2)


if __name__ == "__main__":
    # feature_len=4, embedding_dim=24 -> hidden=48, seq_len=48/6=8, classes=5.
    feature_len = 4
    embedding_dim = 24
    num_classes = 5
    target_size = 6
    batch = 2
    T = 8

    key = jax.random.PRNGKey(0)
    kx, kp = jax.random.split(key)
    x = jax.random.normal(kx, (batch, T, feature_len), jnp.float32)
    raw = init_raw_params(kp, feature_len, embedding_dim, num_classes, target_size)
    packed = pack_params(raw, embedding_dim=embedding_dim,
                         num_classes=num_classes, target_size=target_size)

    out = recurrent_autoencoder(x, packed,
                                num_classes=num_classes, target_size=target_size)
    out = jax.block_until_ready(out)
    assert out.shape == (target_size, batch, num_classes)
    assert out.dtype == jnp.float32
    # log_softmax rows must (log-)normalize to ~0 (exp-sum to 1).
    assert bool(jnp.allclose(jnp.sum(jnp.exp(out), axis=2), 1.0, atol=1e-4))
    # Validate against the f32 reference (bf16 matmul operands + 8-step recurrence
    # accumulate a small, bounded drift; structural/packing bugs would be O(1)).
    ref = autoencoder_ref(x, raw, embedding_dim=embedding_dim,
                          num_classes=num_classes, target_size=target_size)
    assert bool(jnp.allclose(out, ref, atol=1e-1)), float(jnp.max(jnp.abs(out - ref)))
    print("KERNEL_OK")
</pallas_src>

<mosaic_0001>
module attributes {stable_mosaic.version = 11 : i64} {
  func.func @_autoencoder_kernel(%arg0: memref<128x128xbf16, #tpu.memory_space<vmem>>, %arg1: memref<128x512xbf16, #tpu.memory_space<vmem>>, %arg2: memref<128x1024xbf16, #tpu.memory_space<vmem>>, %arg3: memref<128x512xbf16, #tpu.memory_space<vmem>>, %arg4: memref<1x512xf32, #tpu.memory_space<vmem>>, %arg5: memref<1x512xf32, #tpu.memory_space<vmem>>, %arg6: memref<128x512xbf16, #tpu.memory_space<vmem>>, %arg7: memref<1x512xf32, #tpu.memory_space<vmem>>, %arg8: memref<128x512xbf16, #tpu.memory_space<vmem>>, %arg9: memref<1x512xf32, #tpu.memory_space<vmem>>, %arg10: memref<128x768xbf16, #tpu.memory_space<vmem>>, %arg11: memref<1x768xf32, #tpu.memory_space<vmem>>, %arg12: memref<16x768xf32, #tpu.memory_space<vmem>>) attributes {dimension_semantics = [], scalar_prefetch = 0 : i64, scratch_operands = 0 : i64, tpu.core_type = #tpu.core_type<tc>} {
    %c0 = arith.constant 0 : index
    %c0_0 = arith.constant 0 : index
    %0 = vector.load %arg0[%c0, %c0_0] : memref<128x128xbf16, #tpu.memory_space<vmem>>, vector<128x128xbf16>
    %c0_1 = arith.constant 0 : index
    %c0_2 = arith.constant 0 : index
    %1 = vector.load %arg1[%c0_1, %c0_2] : memref<128x512xbf16, #tpu.memory_space<vmem>>, vector<128x512xbf16>
    %cst = arith.constant dense<0.000000e+00> : vector<128x512xf32>
    %2 = tpu.matmul %0, %1, %cst {dimension_numbers = #tpu.dot_dimension_numbers<[1], [0], [0], [1], [0, 0, 1, 1], [], []>} : vector<128x128xbf16>, vector<128x512xbf16>, vector<128x512xf32> -> vector<128x512xf32>
    %c0_3 = arith.constant 0 : index
    %c0_4 = arith.constant 0 : index
    %3 = vector.load %arg2[%c0_3, %c0_4] : memref<128x1024xbf16, #tpu.memory_space<vmem>>, vector<128x1024xbf16>
    %c0_5 = arith.constant 0 : index
    %c0_6 = arith.constant 0 : index
    %4 = vector.load %arg3[%c0_5, %c0_6] : memref<128x512xbf16, #tpu.memory_space<vmem>>, vector<128x512xbf16>
    %c0_7 = arith.constant 0 : index
    %c0_8 = arith.constant 0 : index
    %5 = vector.load %arg4[%c0_7, %c0_8] : memref<1x512xf32, #tpu.memory_space<vmem>>, vector<1x512xf32>
    %6 = vector.shape_cast %5 : vector<1x512xf32> to vector<1x512xf32>
    %7 = vector.broadcast %6 : vector<1x512xf32> to vector<16x512xf32>
    %c0_9 = arith.constant 0 : index
    %c0_10 = arith.constant 0 : index
    %8 = vector.load %arg5[%c0_9, %c0_10] : memref<1x512xf32, #tpu.memory_space<vmem>>, vector<1x512xf32>
    %9 = vector.shape_cast %8 : vector<1x512xf32> to vector<1x512xf32>
    %10 = vector.broadcast %9 : vector<1x512xf32> to vector<16x512xf32>
    %cst_11 = arith.constant 0.000000e+00 : f32
    %11 = vector.broadcast %cst_11 : f32 to vector<16x128xf32>
    %12 = vector.extract_strided_slice %2 {offsets = [0, 0], sizes = [16, 512], strides = [1, 1]} : vector<128x512xf32> to vector<16x512xf32>
    %13 = arith.addf %12, %7 : vector<16x512xf32>
    %14 = vector.extract_strided_slice %13 {offsets = [0, 0], sizes = [16, 384], strides = [1, 1]} : vector<16x512xf32> to vector<16x384xf32>
    %15 = arith.negf %14 : vector<16x384xf32>
    %16 = math.exp %15 : vector<16x384xf32>
    %cst_12 = arith.constant 1.000000e+00 : f32
    %17 = vector.broadcast %cst_12 : f32 to vector<16x384xf32>
    %18 = arith.addf %17, %16 : vector<16x384xf32>
    %19 = arith.divf %17, %18 : vector<16x384xf32>
    %20 = vector.extract_strided_slice %13 {offsets = [0, 384], sizes = [16, 128], strides = [1, 1]} : vector<16x512xf32> to vector<16x128xf32>
    %21 = math.tanh %20 : vector<16x128xf32>
    %22 = vector.extract_strided_slice %19 {offsets = [0, 0], sizes = [16, 128], strides = [1, 1]} : vector<16x384xf32> to vector<16x128xf32>
    %23 = vector.extract_strided_slice %19 {offsets = [0, 128], sizes = [16, 128], strides = [1, 1]} : vector<16x384xf32> to vector<16x128xf32>
    %24 = vector.extract_strided_slice %19 {offsets = [0, 256], sizes = [16, 128], strides = [1, 1]} : vector<16x384xf32> to vector<16x128xf32>
    %25 = arith.mulf %23, %11 : vector<16x128xf32>
    %26 = arith.mulf %22, %21 : vector<16x128xf32>
    %27 = arith.addf %25, %26 : vector<16x128xf32>
    %28 = math.tanh %27 : vector<16x128xf32>
    %29 = arith.mulf %24, %28 : vector<16x128xf32>
    %30 = arith.truncf %29 : vector<16x128xf32> to vector<16x128xbf16>
    %cst_13 = arith.constant dense<0.000000e+00> : vector<16x1024xf32>
    %31 = tpu.matmul %30, %3, %cst_13 {dimension_numbers = #tpu.dot_dimension_numbers<[1], [0], [0], [1], [0, 0, 1, 1], [], []>} : vector<16x128xbf16>, vector<128x1024xbf16>, vector<16x1024xf32> -> vector<16x1024xf32>
    %32 = vector.extract_strided_slice %31 {offsets = [0, 0], sizes = [16, 512], strides = [1, 1]} : vector<16x1024xf32> to vector<16x512xf32>
    %33 = vector.extract_strided_slice %2 {offsets = [16, 0], sizes = [16, 512], strides = [1, 1]} : vector<128x512xf32> to vector<16x512xf32>
    %34 = arith.addf %32, %33 : vector<16x512xf32>
    %35 = arith.addf %34, %7 : vector<16x512xf32>
    %36 = vector.extract_strided_slice %31 {offsets = [0, 512], sizes = [16, 512], strides = [1, 1]} : vector<16x1024xf32> to vector<16x512xf32>
    %37 = arith.addf %36, %10 : vector<16x512xf32>
    %38 = vector.extract_strided_slice %35 {offsets = [0, 0], sizes = [16, 384], strides = [1, 1]} : vector<16x512xf32> to vector<16x384xf32>
    %39 = arith.negf %38 : vector<16x384xf32>
    %40 = math.exp %39 : vector<16x384xf32>
    %cst_14 = arith.constant 1.000000e+00 : f32
    %41 = vector.broadcast %cst_14 : f32 to vector<16x384xf32>
    %42 = arith.addf %41, %40 : vector<16x384xf32>
    %43 = arith.divf %41, %42 : vector<16x384xf32>
    %44 = vector.extract_strided_slice %35 {offsets = [0, 384], sizes = [16, 128], strides = [1, 1]} : vector<16x512xf32> to vector<16x128xf32>
    %45 = math.tanh %44 : vector<16x128xf32>
    %46 = vector.extract_strided_slice %43 {offsets = [0, 0], sizes = [16, 128], strides = [1, 1]} : vector<16x384xf32> to vector<16x128xf32>
    %47 = vector.extract_strided_slice %43 {offsets = [0, 128], sizes = [16, 128], strides = [1, 1]} : vector<16x384xf32> to vector<16x128xf32>
    %48 = vector.extract_strided_slice %43 {offsets = [0, 256], sizes = [16, 128], strides = [1, 1]} : vector<16x384xf32> to vector<16x128xf32>
    %49 = arith.mulf %47, %27 : vector<16x128xf32>
    %50 = arith.mulf %46, %45 : vector<16x128xf32>
    %51 = arith.addf %49, %50 : vector<16x128xf32>
    %52 = math.tanh %51 : vector<16x128xf32>
    %53 = arith.mulf %48, %52 : vector<16x128xf32>
    %54 = vector.extract_strided_slice %37 {offsets = [0, 0], sizes = [16, 384], strides = [1, 1]} : vector<16x512xf32> to vector<16x384xf32>
    %55 = arith.negf %54 : vector<16x384xf32>
    %56 = math.exp %55 : vector<16x384xf32>
    %cst_15 = arith.constant 1.000000e+00 : f32
    %57 = vector.broadcast %cst_15 : f32 to vector<16x384xf32>
    %58 = arith.addf %57, %56 : vector<16x384xf32>
    %59 = arith.divf %57, %58 : vector<16x384xf32>
    %60 = vector.extract_strided_slice %37 {offsets = [0, 384], sizes = [16, 128], strides = [1, 1]} : vector<16x512xf32> to vector<16x128xf32>
    %61 = math.tanh %60 : vector<16x128xf32>
    %62 = vector.extract_strided_slice %59 {offsets = [0, 0], sizes = [16, 128], strides = [1, 1]} : vector<16x384xf32> to vector<16x128xf32>
    %63 = vector.extract_strided_slice %59 {offsets = [0, 128], sizes = [16, 128], strides = [1, 1]} : vector<16x384xf32> to vector<16x128xf32>
    %64 = vector.extract_strided_slice %59 {offsets = [0, 256], sizes = [16, 128], strides = [1, 1]} : vector<16x384xf32> to vector<16x128xf32>
    %65 = arith.mulf %63, %11 : vector<16x128xf32>
    %66 = arith.mulf %62, %61 : vector<16x128xf32>
    %67 = arith.addf %65, %66 : vector<16x128xf32>
    %68 = math.tanh %67 : vector<16x128xf32>
    %69 = arith.mulf %64, %68 : vector<16x128xf32>
    %70 = arith.truncf %53 : vector<16x128xf32> to vector<16x128xbf16>
    %cst_16 = arith.constant dense<0.000000e+00> : vector<16x1024xf32>
    %71 = tpu.matmul %70, %3, %cst_16 {dimension_numbers = #tpu.dot_dimension_numbers<[1], [0], [0], [1], [0, 0, 1, 1], [], []>} : vector<16x128xbf16>, vector<128x1024xbf16>, vector<16x1024xf32> -> vector<16x1024xf32>
    %72 = vector.extract_strided_slice %71 {offsets = [0, 0], sizes = [16, 512], strides = [1, 1]} : vector<16x1024xf32> to vector<16x512xf32>
    %73 = vector.extract_strided_slice %2 {offsets = [32, 0], sizes = [16, 512], strides = [1, 1]} : vector<128x512xf32> to vector<16x512xf32>
    %74 = arith.addf %72, %73 : vector<16x512xf32>
    %75 = arith.addf %74, %7 : vector<16x512xf32>
    %76 = vector.extract_strided_slice %71 {offsets = [0, 512], sizes = [16, 512], strides = [1, 1]} : vector<16x1024xf32> to vector<16x512xf32>
    %77 = arith.addf %76, %10 : vector<16x512xf32>
    %78 = arith.truncf %69 : vector<16x128xf32> to vector<16x128xbf16>
    %cst_17 = arith.constant dense<0.000000e+00> : vector<16x512xf32>
    %79 = tpu.matmul %78, %4, %cst_17 {dimension_numbers = #tpu.dot_dimension_numbers<[1], [0], [0], [1], [0, 0, 1, 1], [], []>} : vector<16x128xbf16>, vector<128x512xbf16>, vector<16x512xf32> -> vector<16x512xf32>
    %80 = arith.addf %77, %79 : vector<16x512xf32>
    %81 = vector.extract_strided_slice %75 {offsets = [0, 0], sizes = [16, 384], strides = [1, 1]} : vector<16x512xf32> to vector<16x384xf32>
    %82 = arith.negf %81 : vector<16x384xf32>
    %83 = math.exp %82 : vector<16x384xf32>
    %cst_18 = arith.constant 1.000000e+00 : f32
    %84 = vector.broadcast %cst_18 : f32 to vector<16x384xf32>
    %85 = arith.addf %84, %83 : vector<16x384xf32>
    %86 = arith.divf %84, %85 : vector<16x384xf32>
    %87 = vector.extract_strided_slice %75 {offsets = [0, 384], sizes = [16, 128], strides = [1, 1]} : vector<16x512xf32> to vector<16x128xf32>
    %88 = math.tanh %87 : vector<16x128xf32>
    %89 = vector.extract_strided_slice %86 {offsets = [0, 0], sizes = [16, 128], strides = [1, 1]} : vector<16x384xf32> to vector<16x128xf32>
    %90 = vector.extract_strided_slice %86 {offsets = [0, 128], sizes = [16, 128], strides = [1, 1]} : vector<16x384xf32> to vector<16x128xf32>
    %91 = vector.extract_strided_slice %86 {offsets = [0, 256], sizes = [16, 128], strides = [1, 1]} : vector<16x384xf32> to vector<16x128xf32>
    %92 = arith.mulf %90, %51 : vector<16x128xf32>
    %93 = arith.mulf %89, %88 : vector<16x128xf32>
    %94 = arith.addf %92, %93 : vector<16x128xf32>
    %95 = math.tanh %94 : vector<16x128xf32>
    %96 = arith.mulf %91, %95 : vector<16x128xf32>
    %97 = vector.extract_strided_slice %80 {offsets = [0, 0], sizes = [16, 384], strides = [1, 1]} : vector<16x512xf32> to vector<16x384xf32>
    %98 = arith.negf %97 : vector<16x384xf32>
    %99 = math.exp %98 : vector<16x384xf32>
    %cst_19 = arith.constant 1.000000e+00 : f32
    %100 = vector.broadcast %cst_19 : f32 to vector<16x384xf32>
    %101 = arith.addf %100, %99 : vector<16x384xf32>
    %102 = arith.divf %100, %101 : vector<16x384xf32>
    %103 = vector.extract_strided_slice %80 {offsets = [0, 384], sizes = [16, 128], strides = [1, 1]} : vector<16x512xf32> to vector<16x128xf32>
    %104 = math.tanh %103 : vector<16x128xf32>
    %105 = vector.extract_strided_slice %102 {offsets = [0, 0], sizes = [16, 128], strides = [1, 1]} : vector<16x384xf32> to vector<16x128xf32>
    %106 = vector.extract_strided_slice %102 {offsets = [0, 128], sizes = [16, 128], strides = [1, 1]} : vector<16x384xf32> to vector<16x128xf32>
    %107 = vector.extract_strided_slice %102 {offsets = [0, 256], sizes = [16, 128], strides = [1, 1]} : vector<16x384xf32> to vector<16x128xf32>
    %108 = arith.mulf %106, %67 : vector<16x128xf32>
    %109 = arith.mulf %105, %104 : vector<16x128xf32>
    %110 = arith.addf %108, %109 : vector<16x128xf32>
    %111 = math.tanh %110 : vector<16x128xf32>
    %112 = arith.mulf %107, %111 : vector<16x128xf32>
    %113 = arith.truncf %96 : vector<16x128xf32> to vector<16x128xbf16>
    %cst_20 = arith.constant dense<0.000000e+00> : vector<16x1024xf32>
    %114 = tpu.matmul %113, %3, %cst_20 {dimension_numbers = #tpu.dot_dimension_numbers<[1], [0], [0], [1], [0, 0, 1, 1], [], []>} : vector<16x128xbf16>, vector<128x1024xbf16>, vector<16x1024xf32> -> vector<16x1024xf32>
    %115 = vector.extract_strided_slice %114 {offsets = [0, 0], sizes = [16, 512], strides = [1, 1]} : vector<16x1024xf32> to vector<16x512xf32>
    %116 = vector.extract_strided_slice %2 {offsets = [48, 0], sizes = [16, 512], strides = [1, 1]} : vector<128x512xf32> to vector<16x512xf32>
    %117 = arith.addf %115, %116 : vector<16x512xf32>
    %118 = arith.addf %117, %7 : vector<16x512xf32>
    %119 = vector.extract_strided_slice %114 {offsets = [0, 512], sizes = [16, 512], strides = [1, 1]} : vector<16x1024xf32> to vector<16x512xf32>
    %120 = arith.addf %119, %10 : vector<16x512xf32>
    %121 = arith.truncf %112 : vector<16x128xf32> to vector<16x128xbf16>
    %cst_21 = arith.constant dense<0.000000e+00> : vector<16x512xf32>
    %122 = tpu.matmul %121, %4, %cst_21 {dimension_numbers = #tpu.dot_dimension_numbers<[1], [0], [0], [1], [0, 0, 1, 1], [], []>} : vector<16x128xbf16>, vector<128x512xbf16>, vector<16x512xf32> -> vector<16x512xf32>
    %123 = arith.addf %120, %122 : vector<16x512xf32>
    %124 = vector.extract_strided_slice %118 {offsets = [0, 0], sizes = [16, 384], strides = [1, 1]} : vector<16x512xf32> to vector<16x384xf32>
    %125 = arith.negf %124 : vector<16x384xf32>
    %126 = math.exp %125 : vector<16x384xf32>
    %cst_22 = arith.constant 1.000000e+00 : f32
    %127 = vector.broadcast %cst_22 : f32 to vector<16x384xf32>
    %128 = arith.addf %127, %126 : vector<16x384xf32>
    %129 = arith.divf %127, %128 : vector<16x384xf32>
    %130 = vector.extract_strided_slice %118 {offsets = [0, 384], sizes = [16, 128], strides = [1, 1]} : vector<16x512xf32> to vector<16x128xf32>
    %131 = math.tanh %130 : vector<16x128xf32>
    %132 = vector.extract_strided_slice %129 {offsets = [0, 0], sizes = [16, 128], strides = [1, 1]} : vector<16x384xf32> to vector<16x128xf32>
    %133 = vector.extract_strided_slice %129 {offsets = [0, 128], sizes = [16, 128], strides = [1, 1]} : vector<16x384xf32> to vector<16x128xf32>
    %134 = vector.extract_strided_slice %129 {offsets = [0, 256], sizes = [16, 128], strides = [1, 1]} : vector<16x384xf32> to vector<16x128xf32>
    %135 = arith.mulf %133, %94 : vector<16x128xf32>
    %136 = arith.mulf %132, %131 : vector<16x128xf32>
    %137 = arith.addf %135, %136 : vector<16x128xf32>
    %138 = math.tanh %137 : vector<16x128xf32>
    %139 = arith.mulf %134, %138 : vector<16x128xf32>
    %140 = vector.extract_strided_slice %123 {offsets = [0, 0], sizes = [16, 384], strides = [1, 1]} : vector<16x512xf32> to vector<16x384xf32>
    %141 = arith.negf %140 : vector<16x384xf32>
    %142 = math.exp %141 : vector<16x384xf32>
    %cst_23 = arith.constant 1.000000e+00 : f32
    %143 = vector.broadcast %cst_23 : f32 to vector<16x384xf32>
    %144 = arith.addf %143, %142 : vector<16x384xf32>
    %145 = arith.divf %143, %144 : vector<16x384xf32>
    %146 = vector.extract_strided_slice %123 {offsets = [0, 384], sizes = [16, 128], strides = [1, 1]} : vector<16x512xf32> to vector<16x128xf32>
    %147 = math.tanh %146 : vector<16x128xf32>
    %148 = vector.extract_strided_slice %145 {offsets = [0, 0], sizes = [16, 128], strides = [1, 1]} : vector<16x384xf32> to vector<16x128xf32>
    %149 = vector.extract_strided_slice %145 {offsets = [0, 128], sizes = [16, 128], strides = [1, 1]} : vector<16x384xf32> to vector<16x128xf32>
    %150 = vector.extract_strided_slice %145 {offsets = [0, 256], sizes = [16, 128], strides = [1, 1]} : vector<16x384xf32> to vector<16x128xf32>
    %151 = arith.mulf %149, %110 : vector<16x128xf32>
    %152 = arith.mulf %148, %147 : vector<16x128xf32>
    %153 = arith.addf %151, %152 : vector<16x128xf32>
    %154 = math.tanh %153 : vector<16x128xf32>
    %155 = arith.mulf %150, %154 : vector<16x128xf32>
    %156 = arith.truncf %139 : vector<16x128xf32> to vector<16x128xbf16>
    %cst_24 = arith.constant dense<0.000000e+00> : vector<16x1024xf32>
    %157 = tpu.matmul %156, %3, %cst_24 {dimension_numbers = #tpu.dot_dimension_numbers<[1], [0], [0], [1], [0, 0, 1, 1], [], []>} : vector<16x128xbf16>, vector<128x1024xbf16>, vector<16x1024xf32> -> vector<16x1024xf32>
    %158 = vector.extract_strided_slice %157 {offsets = [0, 0], sizes = [16, 512], strides = [1, 1]} : vector<16x1024xf32> to vector<16x512xf32>
    %159 = vector.extract_strided_slice %2 {offsets = [64, 0], sizes = [16, 512], strides = [1, 1]} : vector<128x512xf32> to vector<16x512xf32>
    %160 = arith.addf %158, %159 : vector<16x512xf32>
    %161 = arith.addf %160, %7 : vector<16x512xf32>
    %162 = vector.extract_strided_slice %157 {offsets = [0, 512], sizes = [16, 512], strides = [1, 1]} : vector<16x1024xf32> to vector<16x512xf32>
    %163 = arith.addf %162, %10 : vector<16x512xf32>
    %164 = arith.truncf %155 : vector<16x128xf32> to vector<16x128xbf16>
    %cst_25 = arith.constant dense<0.000000e+00> : vector<16x512xf32>
    %165 = tpu.matmul %164, %4, %cst_25 {dimension_numbers = #tpu.dot_dimension_numbers<[1], [0], [0], [1], [0, 0, 1, 1], [], []>} : vector<16x128xbf16>, vector<128x512xbf16>, vector<16x512xf32> -> vector<16x512xf32>
    %166 = arith.addf %163, %165 : vector<16x512xf32>
    %167 = vector.extract_strided_slice %161 {offsets = [0, 0], sizes = [16, 384], strides = [1, 1]} : vector<16x512xf32> to vector<16x384xf32>
    %168 = arith.negf %167 : vector<16x384xf32>
    %169 = math.exp %168 : vector<16x384xf32>
    %cst_26 = arith.constant 1.000000e+00 : f32
    %170 = vector.broadcast %cst_26 : f32 to vector<16x384xf32>
    %171 = arith.addf %170, %169 : vector<16x384xf32>
    %172 = arith.divf %170, %171 : vector<16x384xf32>
    %173 = vector.extract_strided_slice %161 {offsets = [0, 384], sizes = [16, 128], strides = [1, 1]} : vector<16x512xf32> to vector<16x128xf32>
    %174 = math.tanh %173 : vector<16x128xf32>
    %175 = vector.extract_strided_slice %172 {offsets = [0, 0], sizes = [16, 128], strides = [1, 1]} : vector<16x384xf32> to vector<16x128xf32>
    %176 = vector.extract_strided_slice %172 {offsets = [0, 128], sizes = [16, 128], strides = [1, 1]} : vector<16x384xf32> to vector<16x128xf32>
    %177 = vector.extract_strided_slice %172 {offsets = [0, 256], sizes = [16, 128], strides = [1, 1]} : vector<16x384xf32> to vector<16x128xf32>
    %178 = arith.mulf %176, %137 : vector<16x128xf32>
    %179 = arith.mulf %175, %174 : vector<16x128xf32>
    %180 = arith.addf %178, %179 : vector<16x128xf32>
    %181 = math.tanh %180 : vector<16x128xf32>
    %182 = arith.mulf %177, %181 : vector<16x128xf32>
    %183 = vector.extract_strided_slice %166 {offsets = [0, 0], sizes = [16, 384], strides = [1, 1]} : vector<16x512xf32> to vector<16x384xf32>
    %184 = arith.negf %183 : vector<16x384xf32>
    %185 = math.exp %184 : vector<16x384xf32>
    %cst_27 = arith.constant 1.000000e+00 : f32
    %186 = vector.broadcast %cst_27 : f32 to vector<16x384xf32>
    %187 = arith.addf %186, %185 : vector<16x384xf32>
    %188 = arith.divf %186, %187 : vector<16x384xf32>
    %189 = vector.extract_strided_slice %166 {offsets = [0, 384], sizes = [16, 128], strides = [1, 1]} : vector<16x512xf32> to vector<16x128xf32>
    %190 = math.tanh %189 : vector<16x128xf32>
    %191 = vector.extract_strided_slice %188 {offsets = [0, 0], sizes = [16, 128], strides = [1, 1]} : vector<16x384xf32> to vector<16x128xf32>
    %192 = vector.extract_strided_slice %188 {offsets = [0, 128], sizes = [16, 128], strides = [1, 1]} : vector<16x384xf32> to vector<16x128xf32>
    %193 = vector.extract_strided_slice %188 {offsets = [0, 256], sizes = [16, 128], strides = [1, 1]} : vector<16x384xf32> to vector<16x128xf32>
    %194 = arith.mulf %192, %153 : vector<16x128xf32>
    %195 = arith.mulf %191, %190 : vector<16x128xf32>
    %196 = arith.addf %194, %195 : vector<16x128xf32>
    %197 = math.tanh %196 : vector<16x128xf32>
    %198 = arith.mulf %193, %197 : vector<16x128xf32>
    %199 = arith.truncf %182 : vector<16x128xf32> to vector<16x128xbf16>
    %cst_28 = arith.constant dense<0.000000e+00> : vector<16x1024xf32>
    %200 = tpu.matmul %199, %3, %cst_28 {dimension_numbers = #tpu.dot_dimension_numbers<[1], [0], [0], [1], [0, 0, 1, 1], [], []>} : vector<16x128xbf16>, vector<128x1024xbf16>, vector<16x1024xf32> -> vector<16x1024xf32>
    %201 = vector.extract_strided_slice %200 {offsets = [0, 0], sizes = [16, 512], strides = [1, 1]} : vector<16x1024xf32> to vector<16x512xf32>
    %202 = vector.extract_strided_slice %2 {offsets = [80, 0], sizes = [16, 512], strides = [1, 1]} : vector<128x512xf32> to vector<16x512xf32>
    %203 = arith.addf %201, %202 : vector<16x512xf32>
    %204 = arith.addf %203, %7 : vector<16x512xf32>
    %205 = vector.extract_strided_slice %200 {offsets = [0, 512], sizes = [16, 512], strides = [1, 1]} : vector<16x1024xf32> to vector<16x512xf32>
    %206 = arith.addf %205, %10 : vector<16x512xf32>
    %207 = arith.truncf %198 : vector<16x128xf32> to vector<16x128xbf16>
    %cst_29 = arith.constant dense<0.000000e+00> : vector<16x512xf32>
    %208 = tpu.matmul %207, %4, %cst_29 {dimension_numbers = #tpu.dot_dimension_numbers<[1], [0], [0], [1], [0, 0, 1, 1], [], []>} : vector<16x128xbf16>, vector<128x512xbf16>, vector<16x512xf32> -> vector<16x512xf32>
    %209 = arith.addf %206, %208 : vector<16x512xf32>
    %210 = vector.extract_strided_slice %204 {offsets = [0, 0], sizes = [16, 384], strides = [1, 1]} : vector<16x512xf32> to vector<16x384xf32>
    %211 = arith.negf %210 : vector<16x384xf32>
    %212 = math.exp %211 : vector<16x384xf32>
    %cst_30 = arith.constant 1.000000e+00 : f32
    %213 = vector.broadcast %cst_30 : f32 to vector<16x384xf32>
    %214 = arith.addf %213, %212 : vector<16x384xf32>
    %215 = arith.divf %213, %214 : vector<16x384xf32>
    %216 = vector.extract_strided_slice %204 {offsets = [0, 384], sizes = [16, 128], strides = [1, 1]} : vector<16x512xf32> to vector<16x128xf32>
    %217 = math.tanh %216 : vector<16x128xf32>
    %218 = vector.extract_strided_slice %215 {offsets = [0, 0], sizes = [16, 128], strides = [1, 1]} : vector<16x384xf32> to vector<16x128xf32>
    %219 = vector.extract_strided_slice %215 {offsets = [0, 128], sizes = [16, 128], strides = [1, 1]} : vector<16x384xf32> to vector<16x128xf32>
    %220 = vector.extract_strided_slice %215 {offsets = [0, 256], sizes = [16, 128], strides = [1, 1]} : vector<16x384xf32> to vector<16x128xf32>
    %221 = arith.mulf %219, %180 : vector<16x128xf32>
    %222 = arith.mulf %218, %217 : vector<16x128xf32>
    %223 = arith.addf %221, %222 : vector<16x128xf32>
    %224 = math.tanh %223 : vector<16x128xf32>
    %225 = arith.mulf %220, %224 : vector<16x128xf32>
    %226 = vector.extract_strided_slice %209 {offsets = [0, 0], sizes = [16, 384], strides = [1, 1]} : vector<16x512xf32> to vector<16x384xf32>
    %227 = arith.negf %226 : vector<16x384xf32>
    %228 = math.exp %227 : vector<16x384xf32>
    %cst_31 = arith.constant 1.000000e+00 : f32
    %229 = vector.broadcast %cst_31 : f32 to vector<16x384xf32>
    %230 = arith.addf %229, %228 : vector<16x384xf32>
    %231 = arith.divf %229, %230 : vector<16x384xf32>
    %232 = vector.extract_strided_slice %209 {offsets = [0, 384], sizes = [16, 128], strides = [1, 1]} : vector<16x512xf32> to vector<16x128xf32>
    %233 = math.tanh %232 : vector<16x128xf32>
    %234 = vector.extract_strided_slice %231 {offsets = [0, 0], sizes = [16, 128], strides = [1, 1]} : vector<16x384xf32> to vector<16x128xf32>
    %235 = vector.extract_strided_slice %231 {offsets = [0, 128], sizes = [16, 128], strides = [1, 1]} : vector<16x384xf32> to vector<16x128xf32>
    %236 = vector.extract_strided_slice %231 {offsets = [0, 256], sizes = [16, 128], strides = [1, 1]} : vector<16x384xf32> to vector<16x128xf32>
    %237 = arith.mulf %235, %196 : vector<16x128xf32>
    %238 = arith.mulf %234, %233 : vector<16x128xf32>
    %239 = arith.addf %237, %238 : vector<16x128xf32>
    %240 = math.tanh %239 : vector<16x128xf32>
    %241 = arith.mulf %236, %240 : vector<16x128xf32>
    %242 = arith.truncf %225 : vector<16x128xf32> to vector<16x128xbf16>
    %cst_32 = arith.constant dense<0.000000e+00> : vector<16x1024xf32>
    %243 = tpu.matmul %242, %3, %cst_32 {dimension_numbers = #tpu.dot_dimension_numbers<[1], [0], [0], [1], [0, 0, 1, 1], [], []>} : vector<16x128xbf16>, vector<128x1024xbf16>, vector<16x1024xf32> -> vector<16x1024xf32>
    %244 = vector.extract_strided_slice %243 {offsets = [0, 0], sizes = [16, 512], strides = [1, 1]} : vector<16x1024xf32> to vector<16x512xf32>
    %245 = vector.extract_strided_slice %2 {offsets = [96, 0], sizes = [16, 512], strides = [1, 1]} : vector<128x512xf32> to vector<16x512xf32>
    %246 = arith.addf %244, %245 : vector<16x512xf32>
    %247 = arith.addf %246, %7 : vector<16x512xf32>
    %248 = vector.extract_strided_slice %243 {offsets = [0, 512], sizes = [16, 512], strides = [1, 1]} : vector<16x1024xf32> to vector<16x512xf32>
    %249 = arith.addf %248, %10 : vector<16x512xf32>
    %250 = arith.truncf %241 : vector<16x128xf32> to vector<16x128xbf16>
    %cst_33 = arith.constant dense<0.000000e+00> : vector<16x512xf32>
    %251 = tpu.matmul %250, %4, %cst_33 {dimension_numbers = #tpu.dot_dimension_numbers<[1], [0], [0], [1], [0, 0, 1, 1], [], []>} : vector<16x128xbf16>, vector<128x512xbf16>, vector<16x512xf32> -> vector<16x512xf32>
    %252 = arith.addf %249, %251 : vector<16x512xf32>
    %253 = vector.extract_strided_slice %247 {offsets = [0, 0], sizes = [16, 384], strides = [1, 1]} : vector<16x512xf32> to vector<16x384xf32>
    %254 = arith.negf %253 : vector<16x384xf32>
    %255 = math.exp %254 : vector<16x384xf32>
    %cst_34 = arith.constant 1.000000e+00 : f32
    %256 = vector.broadcast %cst_34 : f32 to vector<16x384xf32>
    %257 = arith.addf %256, %255 : vector<16x384xf32>
    %258 = arith.divf %256, %257 : vector<16x384xf32>
    %259 = vector.extract_strided_slice %247 {offsets = [0, 384], sizes = [16, 128], strides = [1, 1]} : vector<16x512xf32> to vector<16x128xf32>
    %260 = math.tanh %259 : vector<16x128xf32>
    %261 = vector.extract_strided_slice %258 {offsets = [0, 0], sizes = [16, 128], strides = [1, 1]} : vector<16x384xf32> to vector<16x128xf32>
    %262 = vector.extract_strided_slice %258 {offsets = [0, 128], sizes = [16, 128], strides = [1, 1]} : vector<16x384xf32> to vector<16x128xf32>
    %263 = vector.extract_strided_slice %258 {offsets = [0, 256], sizes = [16, 128], strides = [1, 1]} : vector<16x384xf32> to vector<16x128xf32>
    %264 = arith.mulf %262, %223 : vector<16x128xf32>
    %265 = arith.mulf %261, %260 : vector<16x128xf32>
    %266 = arith.addf %264, %265 : vector<16x128xf32>
    %267 = math.tanh %266 : vector<16x128xf32>
    %268 = arith.mulf %263, %267 : vector<16x128xf32>
    %269 = vector.extract_strided_slice %252 {offsets = [0, 0], sizes = [16, 384], strides = [1, 1]} : vector<16x512xf32> to vector<16x384xf32>
    %270 = arith.negf %269 : vector<16x384xf32>
    %271 = math.exp %270 : vector<16x384xf32>
    %cst_35 = arith.constant 1.000000e+00 : f32
    %272 = vector.broadcast %cst_35 : f32 to vector<16x384xf32>
    %273 = arith.addf %272, %271 : vector<16x384xf32>
    %274 = arith.divf %272, %273 : vector<16x384xf32>
    %275 = vector.extract_strided_slice %252 {offsets = [0, 384], sizes = [16, 128], strides = [1, 1]} : vector<16x512xf32> to vector<16x128xf32>
    %276 = math.tanh %275 : vector<16x128xf32>
    %277 = vector.extract_strided_slice %274 {offsets = [0, 0], sizes = [16, 128], strides = [1, 1]} : vector<16x384xf32> to vector<16x128xf32>
    %278 = vector.extract_strided_slice %274 {offsets = [0, 128], sizes = [16, 128], strides = [1, 1]} : vector<16x384xf32> to vector<16x128xf32>
    %279 = vector.extract_strided_slice %274 {offsets = [0, 256], sizes = [16, 128], strides = [1, 1]} : vector<16x384xf32> to vector<16x128xf32>
    %280 = arith.mulf %278, %239 : vector<16x128xf32>
    %281 = arith.mulf %277, %276 : vector<16x128xf32>
    %282 = arith.addf %280, %281 : vector<16x128xf32>
    %283 = math.tanh %282 : vector<16x128xf32>
    %284 = arith.mulf %279, %283 : vector<16x128xf32>
    %285 = arith.truncf %268 : vector<16x128xf32> to vector<16x128xbf16>
    %cst_36 = arith.constant dense<0.000000e+00> : vector<16x1024xf32>
    %286 = tpu.matmul %285, %3, %cst_36 {dimension_numbers = #tpu.dot_dimension_numbers<[1], [0], [0], [1], [0, 0, 1, 1], [], []>} : vector<16x128xbf16>, vector<128x1024xbf16>, vector<16x1024xf32> -> vector<16x1024xf32>
    %287 = vector.extract_strided_slice %286 {offsets = [0, 0], sizes = [16, 512], strides = [1, 1]} : vector<16x1024xf32> to vector<16x512xf32>
    %288 = vector.extract_strided_slice %2 {offsets = [112, 0], sizes = [16, 512], strides = [1, 1]} : vector<128x512xf32> to vector<16x512xf32>
    %289 = arith.addf %287, %288 : vector<16x512xf32>
    %290 = arith.addf %289, %7 : vector<16x512xf32>
    %291 = vector.extract_strided_slice %286 {offsets = [0, 512], sizes = [16, 512], strides = [1, 1]} : vector<16x1024xf32> to vector<16x512xf32>
    %292 = arith.addf %291, %10 : vector<16x512xf32>
    %293 = arith.truncf %284 : vector<16x128xf32> to vector<16x128xbf16>
    %cst_37 = arith.constant dense<0.000000e+00> : vector<16x512xf32>
    %294 = tpu.matmul %293, %4, %cst_37 {dimension_numbers = #tpu.dot_dimension_numbers<[1], [0], [0], [1], [0, 0, 1, 1], [], []>} : vector<16x128xbf16>, vector<128x512xbf16>, vector<16x512xf32> -> vector<16x512xf32>
    %295 = arith.addf %292, %294 : vector<16x512xf32>
    %296 = vector.extract_strided_slice %290 {offsets = [0, 0], sizes = [16, 384], strides = [1, 1]} : vector<16x512xf32> to vector<16x384xf32>
    %297 = arith.negf %296 : vector<16x384xf32>
    %298 = math.exp %297 : vector<16x384xf32>
    %cst_38 = arith.constant 1.000000e+00 : f32
    %299 = vector.broadcast %cst_38 : f32 to vector<16x384xf32>
    %300 = arith.addf %299, %298 : vector<16x384xf32>
    %301 = arith.divf %299, %300 : vector<16x384xf32>
    %302 = vector.extract_strided_slice %290 {offsets = [0, 384], sizes = [16, 128], strides = [1, 1]} : vector<16x512xf32> to vector<16x128xf32>
    %303 = math.tanh %302 : vector<16x128xf32>
    %304 = vector.extract_strided_slice %301 {offsets = [0, 0], sizes = [16, 128], strides = [1, 1]} : vector<16x384xf32> to vector<16x128xf32>
    %305 = vector.extract_strided_slice %301 {offsets = [0, 128], sizes = [16, 128], strides = [1, 1]} : vector<16x384xf32> to vector<16x128xf32>
    %306 = vector.extract_strided_slice %301 {offsets = [0, 256], sizes = [16, 128], strides = [1, 1]} : vector<16x384xf32> to vector<16x128xf32>
    %307 = arith.mulf %305, %266 : vector<16x128xf32>
    %308 = arith.mulf %304, %303 : vector<16x128xf32>
    %309 = arith.addf %307, %308 : vector<16x128xf32>
    %310 = math.tanh %309 : vector<16x128xf32>
    %311 = arith.mulf %306, %310 : vector<16x128xf32>
    %312 = vector.extract_strided_slice %295 {offsets = [0, 0], sizes = [16, 384], strides = [1, 1]} : vector<16x512xf32> to vector<16x384xf32>
    %313 = arith.negf %312 : vector<16x384xf32>
    %314 = math.exp %313 : vector<16x384xf32>
    %cst_39 = arith.constant 1.000000e+00 : f32
    %315 = vector.broadcast %cst_39 : f32 to vector<16x384xf32>
    %316 = arith.addf %315, %314 : vector<16x384xf32>
    %317 = arith.divf %315, %316 : vector<16x384xf32>
    %318 = vector.extract_strided_slice %295 {offsets = [0, 384], sizes = [16, 128], strides = [1, 1]} : vector<16x512xf32> to vector<16x128xf32>
    %319 = math.tanh %318 : vector<16x128xf32>
    %320 = vector.extract_strided_slice %317 {offsets = [0, 0], sizes = [16, 128], strides = [1, 1]} : vector<16x384xf32> to vector<16x128xf32>
    %321 = vector.extract_strided_slice %317 {offsets = [0, 128], sizes = [16, 128], strides = [1, 1]} : vector<16x384xf32> to vector<16x128xf32>
    %322 = vector.extract_strided_slice %317 {offsets = [0, 256], sizes = [16, 128], strides = [1, 1]} : vector<16x384xf32> to vector<16x128xf32>
    %323 = arith.mulf %321, %282 : vector<16x128xf32>
    %324 = arith.mulf %320, %319 : vector<16x128xf32>
    %325 = arith.addf %323, %324 : vector<16x128xf32>
    %326 = math.tanh %325 : vector<16x128xf32>
    %327 = arith.mulf %322, %326 : vector<16x128xf32>
    %328 = arith.truncf %311 : vector<16x128xf32> to vector<16x128xbf16>
    %329 = vector.extract_strided_slice %3 {offsets = [0, 512], sizes = [128, 512], strides = [1, 1]} : vector<128x1024xbf16> to vector<128x512xbf16>
    %cst_40 = arith.constant dense<0.000000e+00> : vector<16x512xf32>
    %330 = tpu.matmul %328, %329, %cst_40 {dimension_numbers = #tpu.dot_dimension_numbers<[1], [0], [0], [1], [0, 0, 1, 1], [], []>} : vector<16x128xbf16>, vector<128x512xbf16>, vector<16x512xf32> -> vector<16x512xf32>
    %331 = arith.addf %330, %10 : vector<16x512xf32>
    %332 = arith.truncf %327 : vector<16x128xf32> to vector<16x128xbf16>
    %cst_41 = arith.constant dense<0.000000e+00> : vector<16x512xf32>
    %333 = tpu.matmul %332, %4, %cst_41 {dimension_numbers = #tpu.dot_dimension_numbers<[1], [0], [0], [1], [0, 0, 1, 1], [], []>} : vector<16x128xbf16>, vector<128x512xbf16>, vector<16x512xf32> -> vector<16x512xf32>
    %334 = arith.addf %331, %333 : vector<16x512xf32>
    %335 = vector.extract_strided_slice %334 {offsets = [0, 0], sizes = [16, 384], strides = [1, 1]} : vector<16x512xf32> to vector<16x384xf32>
    %336 = arith.negf %335 : vector<16x384xf32>
    %337 = math.exp %336 : vector<16x384xf32>
    %cst_42 = arith.constant 1.000000e+00 : f32
    %338 = vector.broadcast %cst_42 : f32 to vector<16x384xf32>
    %339 = arith.addf %338, %337 : vector<16x384xf32>
    %340 = arith.divf %338, %339 : vector<16x384xf32>
    %341 = vector.extract_strided_slice %334 {offsets = [0, 384], sizes = [16, 128], strides = [1, 1]} : vector<16x512xf32> to vector<16x128xf32>
    %342 = math.tanh %341 : vector<16x128xf32>
    %343 = vector.extract_strided_slice %340 {offsets = [0, 0], sizes = [16, 128], strides = [1, 1]} : vector<16x384xf32> to vector<16x128xf32>
    %344 = vector.extract_strided_slice %340 {offsets = [0, 128], sizes = [16, 128], strides = [1, 1]} : vector<16x384xf32> to vector<16x128xf32>
    %345 = vector.extract_strided_slice %340 {offsets = [0, 256], sizes = [16, 128], strides = [1, 1]} : vector<16x384xf32> to vector<16x128xf32>
    %346 = arith.mulf %344, %325 : vector<16x128xf32>
    %347 = arith.mulf %343, %342 : vector<16x128xf32>
    %348 = arith.addf %346, %347 : vector<16x128xf32>
    %349 = math.tanh %348 : vector<16x128xf32>
    %350 = arith.mulf %345, %349 : vector<16x128xf32>
    %351 = arith.truncf %350 : vector<16x128xf32> to vector<16x128xbf16>
    %c0_43 = arith.constant 0 : index
    %c0_44 = arith.constant 0 : index
    %352 = vector.load %arg6[%c0_43, %c0_44] : memref<128x512xbf16, #tpu.memory_space<vmem>>, vector<128x512xbf16>
    %cst_45 = arith.constant dense<0.000000e+00> : vector<16x512xf32>
    %353 = tpu.matmul %351, %352, %cst_45 {dimension_numbers = #tpu.dot_dimension_numbers<[1], [0], [0], [1], [0, 0, 1, 1], [], []>} : vector<16x128xbf16>, vector<128x512xbf16>, vector<16x512xf32> -> vector<16x512xf32>
    %c0_46 = arith.constant 0 : index
    %c0_47 = arith.constant 0 : index
    %354 = vector.load %arg7[%c0_46, %c0_47] : memref<1x512xf32, #tpu.memory_space<vmem>>, vector<1x512xf32>
    %355 = vector.broadcast %354 : vector<1x512xf32> to vector<16x512xf32>
    %356 = arith.addf %353, %355 : vector<16x512xf32>
    %357 = vector.extract_strided_slice %356 {offsets = [0, 0], sizes = [16, 384], strides = [1, 1]} : vector<16x512xf32> to vector<16x384xf32>
    %358 = arith.negf %357 : vector<16x384xf32>
    %359 = math.exp %358 : vector<16x384xf32>
    %cst_48 = arith.constant 1.000000e+00 : f32
    %360 = vector.broadcast %cst_48 : f32 to vector<16x384xf32>
    %361 = arith.addf %360, %359 : vector<16x384xf32>
    %362 = arith.divf %360, %361 : vector<16x384xf32>
    %363 = vector.extract_strided_slice %356 {offsets = [0, 384], sizes = [16, 128], strides = [1, 1]} : vector<16x512xf32> to vector<16x128xf32>
    %364 = math.tanh %363 : vector<16x128xf32>
    %365 = vector.extract_strided_slice %362 {offsets = [0, 0], sizes = [16, 128], strides = [1, 1]} : vector<16x384xf32> to vector<16x128xf32>
    %366 = vector.extract_strided_slice %362 {offsets = [0, 128], sizes = [16, 128], strides = [1, 1]} : vector<16x384xf32> to vector<16x128xf32>
    %367 = vector.extract_strided_slice %362 {offsets = [0, 256], sizes = [16, 128], strides = [1, 1]} : vector<16x384xf32> to vector<16x128xf32>
    %368 = arith.mulf %366, %11 : vector<16x128xf32>
    %369 = arith.mulf %365, %364 : vector<16x128xf32>
    %370 = arith.addf %368, %369 : vector<16x128xf32>
    %371 = math.tanh %370 : vector<16x128xf32>
    %372 = arith.mulf %367, %371 : vector<16x128xf32>
    %373 = arith.truncf %372 : vector<16x128xf32> to vector<16x128xbf16>
    %c0_49 = arith.constant 0 : index
    %c0_50 = arith.constant 0 : index
    %374 = vector.load %arg8[%c0_49, %c0_50] : memref<128x512xbf16, #tpu.memory_space<vmem>>, vector<128x512xbf16>
    %cst_51 = arith.constant dense<0.000000e+00> : vector<16x512xf32>
    %375 = tpu.matmul %373, %374, %cst_51 {dimension_numbers = #tpu.dot_dimension_numbers<[1], [0], [0], [1], [0, 0, 1, 1], [], []>} : vector<16x128xbf16>, vector<128x512xbf16>, vector<16x512xf32> -> vector<16x512xf32>
    %c0_52 = arith.constant 0 : index
    %c0_53 = arith.constant 0 : index
    %376 = vector.load %arg9[%c0_52, %c0_53] : memref<1x512xf32, #tpu.memory_space<vmem>>, vector<1x512xf32>
    %377 = vector.broadcast %376 : vector<1x512xf32> to vector<16x512xf32>
    %378 = arith.addf %375, %377 : vector<16x512xf32>
    %379 = vector.extract_strided_slice %378 {offsets = [0, 0], sizes = [16, 384], strides = [1, 1]} : vector<16x512xf32> to vector<16x384xf32>
    %380 = arith.negf %379 : vector<16x384xf32>
    %381 = math.exp %380 : vector<16x384xf32>
    %cst_54 = arith.constant 1.000000e+00 : f32
    %382 = vector.broadcast %cst_54 : f32 to vector<16x384xf32>
    %383 = arith.addf %382, %381 : vector<16x384xf32>
    %384 = arith.divf %382, %383 : vector<16x384xf32>
    %385 = vector.extract_strided_slice %378 {offsets = [0, 384], sizes = [16, 128], strides = [1, 1]} : vector<16x512xf32> to vector<16x128xf32>
    %386 = math.tanh %385 : vector<16x128xf32>
    %387 = vector.extract_strided_slice %384 {offsets = [0, 0], sizes = [16, 128], strides = [1, 1]} : vector<16x384xf32> to vector<16x128xf32>
    %388 = vector.extract_strided_slice %384 {offsets = [0, 128], sizes = [16, 128], strides = [1, 1]} : vector<16x384xf32> to vector<16x128xf32>
    %389 = vector.extract_strided_slice %384 {offsets = [0, 256], sizes = [16, 128], strides = [1, 1]} : vector<16x384xf32> to vector<16x128xf32>
    %390 = arith.mulf %388, %11 : vector<16x128xf32>
    %391 = arith.mulf %387, %386 : vector<16x128xf32>
    %392 = arith.addf %390, %391 : vector<16x128xf32>
    %393 = math.tanh %392 : vector<16x128xf32>
    %394 = arith.mulf %389, %393 : vector<16x128xf32>
    %395 = arith.truncf %394 : vector<16x128xf32> to vector<16x128xbf16>
    %c0_55 = arith.constant 0 : index
    %c0_56 = arith.constant 0 : index
    %396 = vector.load %arg10[%c0_55, %c0_56] : memref<128x768xbf16, #tpu.memory_space<vmem>>, vector<128x768xbf16>
    %cst_57 = arith.constant dense<0.000000e+00> : vector<16x768xf32>
    %397 = tpu.matmul %395, %396, %cst_57 {dimension_numbers = #tpu.dot_dimension_numbers<[1], [0], [0], [1], [0, 0, 1, 1], [], []>} : vector<16x128xbf16>, vector<128x768xbf16>, vector<16x768xf32> -> vector<16x768xf32>
    %c0_58 = arith.constant 0 : index
    %c0_59 = arith.constant 0 : index
    %398 = vector.load %arg11[%c0_58, %c0_59] : memref<1x768xf32, #tpu.memory_space<vmem>>, vector<1x768xf32>
    %399 = vector.broadcast %398 : vector<1x768xf32> to vector<16x768xf32>
    %400 = arith.addf %397, %399 : vector<16x768xf32>
    %401 = tpu.iota {dimensions = array<i32: 1>} : vector<16x128xi32>
    %c5_i32 = arith.constant 5 : i32
    %402 = vector.broadcast %c5_i32 : i32 to vector<16x128xi32>
    %403 = arith.cmpi slt, %401, %402 : vector<16x128xi32>
    %404 = vector.extract_strided_slice %400 {offsets = [0, 0], sizes = [16, 128], strides = [1, 1]} : vector<16x768xf32> to vector<16x128xf32>
    %cst_60 = arith.constant -1.000000e+30 : f32
    %405 = vector.broadcast %cst_60 : f32 to vector<16x128xf32>
    %406 = arith.select %403, %404, %405 : vector<16x128xi1>, vector<16x128xf32>
    %cst_61 = arith.constant dense<0xFF800000> : vector<16xf32>
    %407 = vector.multi_reduction <maximumf>, %406, %cst_61 [1] : vector<16x128xf32> to vector<16xf32>
    %408 = vector.shape_cast %407 : vector<16xf32> to vector<16x1xf32>
    %409 = vector.broadcast %408 : vector<16x1xf32> to vector<16x128xf32>
    %410 = arith.subf %404, %409 : vector<16x128xf32>
    %411 = math.exp %410 : vector<16x128xf32>
    %cst_62 = arith.constant 0.000000e+00 : f32
    %412 = vector.broadcast %cst_62 : f32 to vector<16x128xf32>
    %413 = arith.select %403, %411, %412 : vector<16x128xi1>, vector<16x128xf32>
    %cst_63 = arith.constant dense<0.000000e+00> : vector<16xf32>
    %414 = vector.multi_reduction <add>, %413, %cst_63 [1] : vector<16x128xf32> to vector<16xf32>
    %415 = vector.shape_cast %414 : vector<16xf32> to vector<16x1xf32>
    %416 = math.log %415 : vector<16x1xf32>
    %417 = vector.broadcast %416 : vector<16x1xf32> to vector<16x128xf32>
    %418 = arith.subf %410, %417 : vector<16x128xf32>
    %419 = vector.extract_strided_slice %400 {offsets = [0, 128], sizes = [16, 128], strides = [1, 1]} : vector<16x768xf32> to vector<16x128xf32>
    %cst_64 = arith.constant -1.000000e+30 : f32
    %420 = vector.broadcast %cst_64 : f32 to vector<16x128xf32>
    %421 = arith.select %403, %419, %420 : vector<16x128xi1>, vector<16x128xf32>
    %cst_65 = arith.constant dense<0xFF800000> : vector<16xf32>
    %422 = vector.multi_reduction <maximumf>, %421, %cst_65 [1] : vector<16x128xf32> to vector<16xf32>
    %423 = vector.shape_cast %422 : vector<16xf32> to vector<16x1xf32>
    %424 = vector.broadcast %423 : vector<16x1xf32> to vector<16x128xf32>
    %425 = arith.subf %419, %424 : vector<16x128xf32>
    %426 = math.exp %425 : vector<16x128xf32>
    %cst_66 = arith.constant 0.000000e+00 : f32
    %427 = vector.broadcast %cst_66 : f32 to vector<16x128xf32>
    %428 = arith.select %403, %426, %427 : vector<16x128xi1>, vector<16x128xf32>
    %cst_67 = arith.constant dense<0.000000e+00> : vector<16xf32>
    %429 = vector.multi_reduction <add>, %428, %cst_67 [1] : vector<16x128xf32> to vector<16xf32>
    %430 = vector.shape_cast %429 : vector<16xf32> to vector<16x1xf32>
    %431 = math.log %430 : vector<16x1xf32>
    %432 = vector.broadcast %431 : vector<16x1xf32> to vector<16x128xf32>
    %433 = arith.subf %425, %432 : vector<16x128xf32>
    %434 = vector.extract_strided_slice %400 {offsets = [0, 256], sizes = [16, 128], strides = [1, 1]} : vector<16x768xf32> to vector<16x128xf32>
    %cst_68 = arith.constant -1.000000e+30 : f32
    %435 = vector.broadcast %cst_68 : f32 to vector<16x128xf32>
    %436 = arith.select %403, %434, %435 : vector<16x128xi1>, vector<16x128xf32>
    %cst_69 = arith.constant dense<0xFF800000> : vector<16xf32>
    %437 = vector.multi_reduction <maximumf>, %436, %cst_69 [1] : vector<16x128xf32> to vector<16xf32>
    %438 = vector.shape_cast %437 : vector<16xf32> to vector<16x1xf32>
    %439 = vector.broadcast %438 : vector<16x1xf32> to vector<16x128xf32>
    %440 = arith.subf %434, %439 : vector<16x128xf32>
    %441 = math.exp %440 : vector<16x128xf32>
    %cst_70 = arith.constant 0.000000e+00 : f32
    %442 = vector.broadcast %cst_70 : f32 to vector<16x128xf32>
    %443 = arith.select %403, %441, %442 : vector<16x128xi1>, vector<16x128xf32>
    %cst_71 = arith.constant dense<0.000000e+00> : vector<16xf32>
    %444 = vector.multi_reduction <add>, %443, %cst_71 [1] : vector<16x128xf32> to vector<16xf32>
    %445 = vector.shape_cast %444 : vector<16xf32> to vector<16x1xf32>
    %446 = math.log %445 : vector<16x1xf32>
    %447 = vector.broadcast %446 : vector<16x1xf32> to vector<16x128xf32>
    %448 = arith.subf %440, %447 : vector<16x128xf32>
    %449 = vector.extract_strided_slice %400 {offsets = [0, 384], sizes = [16, 128], strides = [1, 1]} : vector<16x768xf32> to vector<16x128xf32>
    %cst_72 = arith.constant -1.000000e+30 : f32
    %450 = vector.broadcast %cst_72 : f32 to vector<16x128xf32>
    %451 = arith.select %403, %449, %450 : vector<16x128xi1>, vector<16x128xf32>
    %cst_73 = arith.constant dense<0xFF800000> : vector<16xf32>
    %452 = vector.multi_reduction <maximumf>, %451, %cst_73 [1] : vector<16x128xf32> to vector<16xf32>
    %453 = vector.shape_cast %452 : vector<16xf32> to vector<16x1xf32>
    %454 = vector.broadcast %453 : vector<16x1xf32> to vector<16x128xf32>
    %455 = arith.subf %449, %454 : vector<16x128xf32>
    %456 = math.exp %455 : vector<16x128xf32>
    %cst_74 = arith.constant 0.000000e+00 : f32
    %457 = vector.broadcast %cst_74 : f32 to vector<16x128xf32>
    %458 = arith.select %403, %456, %457 : vector<16x128xi1>, vector<16x128xf32>
    %cst_75 = arith.constant dense<0.000000e+00> : vector<16xf32>
    %459 = vector.multi_reduction <add>, %458, %cst_75 [1] : vector<16x128xf32> to vector<16xf32>
    %460 = vector.shape_cast %459 : vector<16xf32> to vector<16x1xf32>
    %461 = math.log %460 : vector<16x1xf32>
    %462 = vector.broadcast %461 : vector<16x1xf32> to vector<16x128xf32>
    %463 = arith.subf %455, %462 : vector<16x128xf32>
    %464 = vector.extract_strided_slice %400 {offsets = [0, 512], sizes = [16, 128], strides = [1, 1]} : vector<16x768xf32> to vector<16x128xf32>
    %cst_76 = arith.constant -1.000000e+30 : f32
    %465 = vector.broadcast %cst_76 : f32 to vector<16x128xf32>
    %466 = arith.select %403, %464, %465 : vector<16x128xi1>, vector<16x128xf32>
    %cst_77 = arith.constant dense<0xFF800000> : vector<16xf32>
    %467 = vector.multi_reduction <maximumf>, %466, %cst_77 [1] : vector<16x128xf32> to vector<16xf32>
    %468 = vector.shape_cast %467 : vector<16xf32> to vector<16x1xf32>
    %469 = vector.broadcast %468 : vector<16x1xf32> to vector<16x128xf32>
    %470 = arith.subf %464, %469 : vector<16x128xf32>
    %471 = math.exp %470 : vector<16x128xf32>
    %cst_78 = arith.constant 0.000000e+00 : f32
    %472 = vector.broadcast %cst_78 : f32 to vector<16x128xf32>
    %473 = arith.select %403, %471, %472 : vector<16x128xi1>, vector<16x128xf32>
    %cst_79 = arith.constant dense<0.000000e+00> : vector<16xf32>
    %474 = vector.multi_reduction <add>, %473, %cst_79 [1] : vector<16x128xf32> to vector<16xf32>
    %475 = vector.shape_cast %474 : vector<16xf32> to vector<16x1xf32>
    %476 = math.log %475 : vector<16x1xf32>
    %477 = vector.broadcast %476 : vector<16x1xf32> to vector<16x128xf32>
    %478 = arith.subf %470, %477 : vector<16x128xf32>
    %479 = vector.extract_strided_slice %400 {offsets = [0, 640], sizes = [16, 128], strides = [1, 1]} : vector<16x768xf32> to vector<16x128xf32>
    %cst_80 = arith.constant -1.000000e+30 : f32
    %480 = vector.broadcast %cst_80 : f32 to vector<16x128xf32>
    %481 = arith.select %403, %479, %480 : vector<16x128xi1>, vector<16x128xf32>
    %cst_81 = arith.constant dense<0xFF800000> : vector<16xf32>
    %482 = vector.multi_reduction <maximumf>, %481, %cst_81 [1] : vector<16x128xf32> to vector<16xf32>
    %483 = vector.shape_cast %482 : vector<16xf32> to vector<16x1xf32>
    %484 = vector.broadcast %483 : vector<16x1xf32> to vector<16x128xf32>
    %485 = arith.subf %479, %484 : vector<16x128xf32>
    %486 = math.exp %485 : vector<16x128xf32>
    %cst_82 = arith.constant 0.000000e+00 : f32
    %487 = vector.broadcast %cst_82 : f32 to vector<16x128xf32>
    %488 = arith.select %403, %486, %487 : vector<16x128xi1>, vector<16x128xf32>
    %cst_83 = arith.constant dense<0.000000e+00> : vector<16xf32>
    %489 = vector.multi_reduction <add>, %488, %cst_83 [1] : vector<16x128xf32> to vector<16xf32>
    %490 = vector.shape_cast %489 : vector<16xf32> to vector<16x1xf32>
    %491 = math.log %490 : vector<16x1xf32>
    %492 = vector.broadcast %491 : vector<16x1xf32> to vector<16x128xf32>
    %493 = arith.subf %485, %492 : vector<16x128xf32>
    %494 = tpu.concatenate %418, %433, %448, %463, %478, %493 in 1 : vector<16x128xf32>, vector<16x128xf32>, vector<16x128xf32>, vector<16x128xf32>, vector<16x128xf32>, vector<16x128xf32> -> vector<16x768xf32>
    %c0_84 = arith.constant 0 : index
    %c0_85 = arith.constant 0 : index
    %495 = vector.load %arg12[%c0_84, %c0_85] : memref<16x768xf32, #tpu.memory_space<vmem>>, vector<16x768xf32>
    tpu.vector_store %arg12[%c0_84, %c0_85], %494 {strides = array<i32>} : memref<16x768xf32, #tpu.memory_space<vmem>>, vector<16x768xf32>,
    return
  }
}

</mosaic_0001>

<bundles_post_ra>
// kernel: tpu_custom_call.1
= control target key start
LH: loop header
LB: loop body
LE: loop exit
PB: predicated region body
PF: predicated region fallthrough
CT: control target
= control target key end

     0   :  { %17 = vsyncpa [#allocation3], 0  ;;  %s11886_s0 = inlined_call_operand.hbm [shape: bf16[128,128], index: 0, kind: input, shape index: {}]   ;;  %s11887_s1 = inlined_call_operand.hbm [shape: bf16[128,512], index: 1, kind: input, shape index: {}]   ;;  %s11888_s2 = inlined_call_operand.hbm [shape: bf16[128,1024], index: 2, kind: input, shape index: {}]   ;;  %s11889_s3 = inlined_call_operand.hbm [shape: bf16[128,512], index: 3, kind: input, shape index: {}]   ;;  %s11890_s4 = inlined_call_operand.hbm [shape: f32[1,512], index: 4, kind: input, shape index: {}]   ;;  %s11891_s5 = inlined_call_operand.vmem [shape: f32[1,512], index: 5, kind: input, shape index: {}]   ;;  %s11892_s6 = inlined_call_operand.hbm [shape: bf16[128,512], index: 6, kind: input, shape index: {}]   ;;  %s11893_s7 = inlined_call_operand.hbm [shape: f32[1,512], index: 7, kind: input, shape index: {}]   ;;  %s11894_s8 = inlined_call_operand.hbm [shape: bf16[128,512], index: 8, kind: input, shape index: {}]   ;;  %s11895_s9 = inlined_call_operand.hbm [shape: f32[1,512], index: 9, kind: input, shape index: {}]   ;;  %s11896_s10 = inlined_call_operand.hbm [shape: bf16[128,768], index: 10, kind: input, shape index: {}]   ;;  %s11897_s11 = inlined_call_operand.vmem [shape: f32[1,768], index: 11, kind: input, shape index: {}]   ;;  %s11898_s12 = inlined_call_operand.hbm [shape: f32[16,768], index: 12, kind: output, shape index: {}]  }
   0x1   :  { %18 = vsyncpa [#allocation6], 0 }
   0x2   :  { %19 = vsyncpa [#allocation9], 0 }
   0x3   :  { %20 = vsyncpa [#allocation12], 0 }
   0x4   :  { %21 = vsyncpa [#allocation15], 0 }
   0x5   :  { %22 = vsyncpa [#allocation18], 0  ;;  %s41_s23 = sshll.u32 %s11887_s1, 4  ;;  %s42_s23 = int_to_ptr.hbm [resolvable:$true] %s41_s23 }
   0x6   :  { %23 = vsyncpa [#allocation4], 0  ;;  %s8346_s24 = smov [#allocation5]   ;;  %s67_s28 = sshll.u32 %s11889_s3, 4  ;;  %s68_s28 = int_to_ptr.hbm [resolvable:$true] %s67_s28 }
   0x7   :  { %s43_s25 = sshll.u32 %s8346_s24, 4  ;;  %s8347_s29 = smov 256   ;;  %s44_s25 = int_to_ptr.vmem [resolvable:$true] %s43_s25 }
   0x8   :  { %s8348_s30 = smov 16   ;;  %s8349_s13 = smov [#allocation8]  }
   0x9   :  { %49 = dma.hbm_to_vmem [thread:$0]  %s42_s23, 4096, %s44_s25, [#allocation6], %s8347_s29, %s8347_s29, %s8348_s30  }
   0xa   :  { %s69_s14 = sshll.u32 %s8349_s13, 4  ;;  %s93_s17 = sshll.u32 %s11892_s6, 4  ;;  %s70_s14 = int_to_ptr.vmem [resolvable:$true] %s69_s14  ;;  %s94_s17 = int_to_ptr.hbm [resolvable:$true] %s93_s17 }
   0xb   :  { %75 = dma.hbm_to_vmem [thread:$0]  %s68_s28, 4096, %s70_s14, [#allocation9], %s8347_s29, %s8347_s29, %s8348_s30  }
   0xc   :  { %s117_s19 = sshll.u32 %s11894_s8, 4  ;;  %s8350_s20 = smov [#allocation11]   ;;  %s118_s19 = int_to_ptr.hbm [resolvable:$true] %s117_s19 }
   0xd   :  { %s95_s21 = sshll.u32 %s8350_s20, 4  ;;  %s8351_s3 = smov [#allocation14]   ;;  %s96_s21 = int_to_ptr.vmem [resolvable:$true] %s95_s21 }
   0xe   :  { %101 = dma.hbm_to_vmem [thread:$0]  %s94_s17, 4096, %s96_s21, [#allocation12], %s8347_s29, %s8347_s29, %s8348_s30  }
   0xf   :  { %s119_s22 = sshll.u32 %s8351_s3, 4  ;;  %s28_s25 = sshll.u32 %s11886_s0, 4  ;;  %s120_s22 = int_to_ptr.vmem [resolvable:$true] %s119_s22  ;;  %s29_s25 = int_to_ptr.hbm [resolvable:$true] %s28_s25 }
  0x10   :  { %125 = dma.hbm_to_vmem [thread:$0]  %s118_s19, 4096, %s120_s22, [#allocation15], %s8347_s29, %s8347_s29, %s8348_s30  }
  0x11   :  { %s8352_s6 = smov [#allocation2]   ;;  %s54_s8 = sshll.u32 %s11888_s2, 4  ;;  %s55_s8 = int_to_ptr.hbm [resolvable:$true] %s54_s8 }
  0x12   :  { %s30_s26 = sshll.u32 %s8352_s6, 4  ;;  %s8353_s13 = smov 64   ;;  %s31_s26 = int_to_ptr.vmem [resolvable:$true] %s30_s26 }
  0x13   :  { %s8354_s14 = smov 4   ;;  %s8355_s15 = smov [#allocation7]  }
  0x14   :  { %36 = dma.hbm_to_vmem [thread:$0]  %s29_s25, 1024, %s31_s26, [#allocation3], %s8353_s13, %s8353_s13, %s8354_s14  }
  0x15   :  { %s56_s16 = sshll.u32 %s8355_s15, 4  ;;  %s8356_s17 = smov 512   ;;  %s57_s16 = int_to_ptr.vmem [resolvable:$true] %s56_s16 }
  0x16   :  { %s8357_s1 = smov 32   ;;  %s81_s29 = sshll.u32 %s11890_s4, 4  ;;  %s82_s29 = int_to_ptr.hbm [resolvable:$true] %s81_s29 }
  0x17   :  { %62 = dma.hbm_to_vmem [thread:$0]  %s55_s8, 8192, %s57_s16, [#allocation6], %s8356_s17, %s8356_s17, %s8357_s1  }
  0x18   :  { %s8358_s30 = smov [#allocation10]   ;;  %s107_s21 = sshll.u32 %s11893_s7, 4  ;;  %s108_s21 = int_to_ptr.hbm [resolvable:$true] %s107_s21 }
  0x19   :  { %s83_s19 = sshll.u32 %s8358_s30, 4  ;;  %s8359_s3 = smov [#allocation13]   ;;  %s84_s19 = int_to_ptr.vmem [resolvable:$true] %s83_s19 }
  0x1a   :  { %86 = dma.hbm_to_vmem [thread:$0]  %s82_s29, 64, %s84_s19, [#allocation9]  }
  0x1b   :  { %s109_s22 = sshll.u32 %s8359_s3, 4  ;;  %s131_s25 = sshll.u32 %s11895_s9, 4  ;;  %s110_s22 = int_to_ptr.vmem [resolvable:$true] %s109_s22  ;;  %s132_s25 = int_to_ptr.hbm [resolvable:$true] %s131_s25 }
  0x1c   :  { %112 = dma.hbm_to_vmem [thread:$0]  %s108_s21, 64, %s110_s22, [#allocation12]  }
  0x1d   :  { %s141_s26 = sshll.u32 %s11896_s10, 4  ;;  %s8360_s27 = smov [#allocation16]   ;;  %s142_s26 = int_to_ptr.hbm [resolvable:$true] %s141_s26 }
  0x1e   :  { %s133_s28 = sshll.u32 %s8360_s27, 4  ;;  %s8361_s7 = smov [#allocation17]   ;;  %s134_s28 = int_to_ptr.vmem [resolvable:$true] %s133_s28 }
  0x1f   :  { %136 = dma.hbm_to_vmem [thread:$0]  %s132_s25, 64, %s134_s28, [#allocation15]  }
  0x20   :  { %s143_s8 = sshll.u32 %s8361_s7, 4  ;;  %s8362_s13 = smov 384   ;;  %s144_s8 = int_to_ptr.vmem [resolvable:$true] %s143_s8 }
  0x21   :  { %s8363_s14 = smov 24  }
  0x22   :  { %149 = dma.hbm_to_vmem [thread:$0]  %s142_s26, 6144, %s144_s8, [#allocation18], %s8362_s13, %s8362_s13, %s8363_s14  }
  0x23   :  { %8332 = dma.done.wait [#allocation3], 1024  }
  0x24   :  { %8333 = vsyncadd [#allocation3], 4294966272 }
  0x25   :  { %8334 = dma.done.wait [#allocation6], 12288  }
  0x26   :  { %8335 = vsyncadd [#allocation6], 4294955008 }
  0x27   :  { %8336 = dma.done.wait [#allocation9], 4160  }
  0x28   :  { %8337 = vsyncadd [#allocation9], 4294963136 }
  0x29   :  { %8338 = dma.done.wait [#allocation12], 4160  }
  0x2a   :  { %8339 = vsyncadd [#allocation12], 4294963136 }
  0x2b   :  { %8340 = dma.done.wait [#allocation15], 4160  }
  0x2c   :  { %8341 = vsyncadd [#allocation15], 4294963136 }
  0x2d   :  { %8342 = dma.done.wait [#allocation18], 6144  }
  0x2e   :  { %8343 = vsyncadd [#allocation18], 4294961152  ;;  %v6221_v0 = vld [vmem:[#allocation5 + $0xe0] sm:$0xf]  ;;  %v7213_v1 = vld [vmem:[#allocation5 + $0xec] sm:$0xf0] }
  0x2f   :  { %v7211_v2 = vld [vmem:[#allocation5 + $0xe4] sm:$0xf]  ;;  %v6222_v3 = vor.u32 %v7213_v1, %v6221_v0  ;;  %v6223_v4 = vld [vmem:[#allocation5 + $0xf0] sm:$0xf0]  ;;  %v6229_v5 = vld [vmem:[#allocation5 + $0xe8] sm:$0xf] }
  0x30   :  { %v7214_v6 = vld [vmem:[#allocation5 + $0xf4] sm:$0xf0]  ;;  %v6226_v7 = vor.u32 %v7211_v2, %v6223_v4  ;;  %v6205_v9 = vld [vmem:[#allocation5 + $0xc0] sm:$0xf]  ;;  %v7209_v10 = vld [vmem:[#allocation5 + $0xcc] sm:$0xf0] }
  0x31   :  { %v6230_v8 = vor.u32 %v7214_v6, %v6229_v5  ;;  %v7207_v11 = vld [vmem:[#allocation5 + $0xc4] sm:$0xf]  ;;  %448 = vmatpush.bf16.msra.mxu0 %v6222_v3  ;;  %v6206_v12 = vor.u32 %v7209_v10, %v6205_v9  ;;  %v6207_v13 = vld [vmem:[#allocation5 + $0xd0] sm:$0xf0]  ;;  %v6213_v14 = vld [vmem:[#allocation5 + $0xc8] sm:$0xf] }
  0x32   :  { %v7210_v15 = vld [vmem:[#allocation5 + $0xd4] sm:$0xf0]  ;;  %497 = vmatpush.bf16.msra.mxu1 %v6226_v7  ;;  %v6210_v16 = vor.u32 %v7207_v11, %v6207_v13  ;;  %v7212_v18 = vld [vmem:[#allocation5 + $0xec] sm:$0xf]  ;;  %v6231_v19 = vld [vmem:[#allocation5 + $0xf8] sm:$0xf0] }
  0x33   :  { %546 = vmatpush.bf16.msra.mxu2 %v6230_v8  ;;  %v6214_v17 = vor.u32 %v7210_v15, %v6213_v14  ;;  %v6189_v20 = vld [vmem:[#allocation5 + $0xa0] sm:$0xf]  ;;  %v6234_v21 = vor.u32 %v7212_v18, %v6231_v19  ;;  %v7205_v22 = vld [vmem:[#allocation5 + $0xac] sm:$0xf0]  ;;  %v7203_v23 = vld [vmem:[#allocation5 + $0xa4] sm:$0xf] }
  0x34   :  { %v6191_v24 = vld [vmem:[#allocation5 + $0xb0] sm:$0xf0]  ;;  %v6197_v25 = vld [vmem:[#allocation5 + $0xa8] sm:$0xf]  ;;  %v7206_v26 = vld [vmem:[#allocation5 + $0xb4] sm:$0xf0]  ;;  %v6190_v28 = vor.u32 %v7205_v22, %v6189_v20 }
  0x35   :  { %v7208_v27 = vld [vmem:[#allocation5 + $0xcc] sm:$0xf]  ;;  %449 = vmatpush.bf16.msra.mxu0 %v6206_v12  ;;  %595 = vmatpush.bf16.msra.mxu3 %v6234_v21  ;;  %v6215_v29 = vld [vmem:[#allocation5 + $0xd8] sm:$0xf0]  ;;  %v6173_v30 = vld [vmem:[#allocation5 + $0x80] sm:$0xf]  ;;  %v6194_v32 = vor.u32 %v7203_v23, %v6191_v24  ;;  %v6198_v33 = vor.u32 %v7206_v26, %v6197_v25 }
  0x36   :  { %v7201_v31 = vld [vmem:[#allocation5 + $0x8c] sm:$0xf0]  ;;  %498 = vmatpush.bf16.msra.mxu1 %v6210_v16  ;;  %v6218_v34 = vor.u32 %v7208_v27, %v6215_v29  ;;  %v7199_v35 = vld [vmem:[#allocation5 + $0x84] sm:$0xf]  ;;  %v6175_v36 = vld [vmem:[#allocation5 + $0x90] sm:$0xf0] }
  0x37   :  { %547 = vmatpush.bf16.msra.mxu2 %v6214_v17  ;;  %v6181_v37 = vld [vmem:[#allocation5 + $0x88] sm:$0xf]  ;;  %v7202_v38 = vld [vmem:[#allocation5 + $0x94] sm:$0xf0]  ;;  %v7204_v39 = vld [vmem:[#allocation5 + $0xac] sm:$0xf]  ;;  %v6174_v41 = vor.u32 %v7201_v31, %v6173_v30  ;;  %v6178_v45 = vor.u32 %v7199_v35, %v6175_v36 }
  0x38   :  { %v6199_v40 = vld [vmem:[#allocation5 + $0xb8] sm:$0xf0]  ;;  %v6157_v43 = vld [vmem:[#allocation5 + $0x60] sm:$0xf]  ;;  %v7197_v44 = vld [vmem:[#allocation5 + $0x6c] sm:$0xf0]  ;;  %v6182_v46 = vor.u32 %v7202_v38, %v6181_v37 }
  0x39   :  { %450 = vmatpush.bf16.msra.mxu0 %v6190_v28  ;;  %596 = vmatpush.bf16.msra.mxu3 %v6218_v34  ;;  %v6202_v42 = vor.u32 %v7204_v39, %v6199_v40  ;;  %v7195_v47 = vld [vmem:[#allocation5 + $0x64] sm:$0xf]  ;;  %v7200_v48 = vld [vmem:[#allocation5 + $0x8c] sm:$0xf]  ;;  %v6183_v49 = vld [vmem:[#allocation5 + $0x98] sm:$0xf0]  ;;  %v6158_v53 = vor.u32 %v7197_v44, %v6157_v43 }
  0x3a   :  { %499 = vmatpush.bf16.msra.mxu1 %v6194_v32  ;;  %v6159_v50 = vld [vmem:[#allocation5 + $0x70] sm:$0xf0]  ;;  %v6165_v51 = vld [vmem:[#allocation5 + $0x68] sm:$0xf]  ;;  %v7198_v52 = vld [vmem:[#allocation5 + $0x74] sm:$0xf0]  ;;  %v6186_v54 = vor.u32 %v7200_v48, %v6183_v49 }
  0x3b   :  { %548 = vmatpush.bf16.msra.mxu2 %v6198_v33  ;;  %v6141_v55 = vld [vmem:[#allocation5 + $0x40] sm:$0xf]  ;;  %v7193_v56 = vld [vmem:[#allocation5 + $0x4c] sm:$0xf0]  ;;  %v6162_v57 = vor.u32 %v7195_v47, %v6159_v50  ;;  %v6166_v58 = vor.u32 %v7198_v52, %v6165_v51  ;;  %v7191_v59 = vld [vmem:[#allocation5 + $0x44] sm:$0xf] }
  0x3c   :  { %v7196_v60 = vld [vmem:[#allocation5 + $0x6c] sm:$0xf]  ;;  %v6167_v61 = vld [vmem:[#allocation5 + $0x78] sm:$0xf0]  ;;  %v6143_v62 = vld [vmem:[#allocation5 + $0x50] sm:$0xf0]  ;;  %v6142_v1 = vor.u32 %v7193_v56, %v6141_v55 }
  0x3d   :  { %451 = vmatpush.bf16.msra.mxu0 %v6174_v41  ;;  %597 = vmatpush.bf16.msra.mxu3 %v6202_v42  ;;  %v6149_v63 = vld [vmem:[#allocation5 + $0x48] sm:$0xf]  ;;  %v7194_v0 = vld [vmem:[#allocation5 + $0x54] sm:$0xf0]  ;;  %v6170_v2 = vor.u32 %v7196_v60, %v6167_v61  ;;  %v6125_v3 = vld [vmem:[#allocation5 + $0x20] sm:$0xf]  ;;  %v6146_v5 = vor.u32 %v7191_v59, %v6143_v62 }
  0x3e   :  { %500 = vmatpush.bf16.msra.mxu1 %v6178_v45  ;;  %v7189_v4 = vld [vmem:[#allocation5 + $0x2c] sm:$0xf0]  ;;  %v6150_v6 = vor.u32 %v7194_v0, %v6149_v63  ;;  %v7187_v7 = vld [vmem:[#allocation5 + $0x24] sm:$0xf]  ;;  %v7192_v8 = vld [vmem:[#allocation5 + $0x4c] sm:$0xf] }
  0x3f   :  { %549 = vmatpush.bf16.msra.mxu2 %v6182_v46  ;;  %v6151_v9 = vld [vmem:[#allocation5 + $0x58] sm:$0xf0]  ;;  %v6127_v10 = vld [vmem:[#allocation5 + $0x30] sm:$0xf0]  ;;  %v6133_v11 = vld [vmem:[#allocation5 + $0x28] sm:$0xf]  ;;  %v6126_v13 = vor.u32 %v7189_v4, %v6125_v3 }
  0x40   :  { %v7190_v12 = vld [vmem:[#allocation5 + $0x34] sm:$0xf0]  ;;  %v6154_v14 = vor.u32 %v7192_v8, %v6151_v9  ;;  %v6109_v15 = vld [vmem:[#allocation5] sm:$0xf]  ;;  %v7185_v16 = vld [vmem:[#allocation5 + $0xc] sm:$0xf0]  ;;  %v6130_v18 = vor.u32 %v7187_v7, %v6127_v10 }
  0x41   :  { %452 = vmatpush.bf16.msra.mxu0 %v6158_v53  ;;  %598 = vmatpush.bf16.msra.mxu3 %v6186_v54  ;;  %v7183_v17 = vld [vmem:[#allocation5 + $0x4] sm:$0xf]  ;;  %v6134_v19 = vor.u32 %v7190_v12, %v6133_v11  ;;  %v6111_v20 = vld [vmem:[#allocation5 + $0x10] sm:$0xf0]  ;;  %v7188_v21 = vld [vmem:[#allocation5 + $0x2c] sm:$0xf]  ;;  %v6110_v29 = vor.u32 %v7185_v16, %v6109_v15 }
  0x42   :  { %501 = vmatpush.bf16.msra.mxu1 %v6162_v57  ;;  %v6135_v22 = vld [vmem:[#allocation5 + $0x38] sm:$0xf0]  ;;  %v6117_v23 = vld [vmem:[#allocation5 + $0x8] sm:$0xf]  ;;  %v7186_v24 = vld [vmem:[#allocation5 + $0x14] sm:$0xf0]  ;;  %v6114_v33 = vor.u32 %v7183_v17, %v6111_v20 }
  0x43   :  { %550 = vmatpush.bf16.msra.mxu2 %v6166_v58  ;;  %v6467_v25 = vld [vmem:[#allocation7 + $0x1c0] sm:$0xf]  ;;  %v7271_v27 = vld [vmem:[#allocation7 + $0x1c4] sm:$0xf]  ;;  %v6138_v30 = vor.u32 %v7188_v21, %v6135_v22  ;;  %v6475_v31 = vld [vmem:[#allocation7 + $0x1c8] sm:$0xf]  ;;  %v6118_v34 = vor.u32 %v7186_v24, %v6117_v23 }
  0x44   :  { %v7275_v26 = vld [vmem:[#allocation7 + $0x1dc] sm:$0xf0]  ;;  %v6469_v28 = vld [vmem:[#allocation7 + $0x1e0] sm:$0xf0]  ;;  %v7276_v32 = vld [vmem:[#allocation7 + $0x1e4] sm:$0xf0] }
  0x45   :  { %453 = vmatpush.bf16.msra.mxu0 %v6142_v1  ;;  %599 = vmatpush.bf16.msra.mxu3 %v6170_v2  ;;  %v7175_v35 = vld [vmem:[#allocation2] sm:$0xff]  ;;  %v7184_v36 = vld [vmem:[#allocation5 + $0xc] sm:$0xf]  ;;  %v6119_v37 = vld [vmem:[#allocation5 + $0x18] sm:$0xf0]  ;;  %v8462_v38 = vor.u32 %v7275_v26, %v6467_v25  ;;  %v8464_v39 = vor.u32 %v7271_v27, %v6469_v28  ;;  %v8466_v42 = vor.u32 %v7276_v32, %v6475_v31  ;;  %s6057_s0 = sshll.u32 %s11898_s12, 4  ;;  %s6058_s0 = int_to_ptr.hbm [resolvable:$true] %s6057_s0 }
  0x46   :  { %502 = vmatpush.bf16.msra.mxu1 %v6146_v5  ;;  %v7272_v40 = vld [vmem:[#allocation7 + $0x1cc] sm:$0xf]  ;;  %v6435_v43 = vld [vmem:[#allocation7 + $0x180] sm:$0xf]  ;;  %v7263_v45 = vld [vmem:[#allocation7 + $0x184] sm:$0xf]  ;;  %v6122_v49 = vor.u32 %v7184_v36, %v6119_v37 }
  0x47   :  { %551 = vmatpush.bf16.msra.mxu2 %v6150_v6  ;;  %12125 = vst [vmem:[#allocation27_spill] sm:$0xff] %v8462_v38  ;;  %v6477_v41 = vld [vmem:[#allocation7 + $0x1e8] sm:$0xf0]  ;;  %v7267_v44 = vld [vmem:[#allocation7 + $0x19c] sm:$0xf0]  ;;  %v7177_v15 = vld [vmem:[#allocation2 + $0x10] sm:$0xff] }
  0x48   :  { %12126 = vst [vmem:[#allocation28_spill] sm:$0xff] %v8464_v39  ;;  %v6437_v46 = vld [vmem:[#allocation7 + $0x1a0] sm:$0xf0]  ;;  %v6443_v47 = vld [vmem:[#allocation7 + $0x188] sm:$0xf]  ;;  %v8470_v50 = vor.u32 %v7272_v40, %v6477_v41  ;;  %v8472_v51 = vor.u32 %v7267_v44, %v6435_v43  ;;  %v7178_v28 = vld [vmem:[#allocation2 + $0x18] sm:$0xff] }
  0x49   :  { %454 = vmatpush.bf16.msra.mxu0 %v6126_v13  ;;  %600 = vmatpush.bf16.msra.mxu3 %v6154_v14  ;;  %12127 = vst [vmem:[#allocation29_spill] sm:$0xff] %v8466_v42  ;;  %v7268_v48 = vld [vmem:[#allocation7 + $0x1a4] sm:$0xf0]  ;;  %v8475_v52 = vor.u32 %v7263_v45, %v6437_v46  ;;  %v7264_v54 = vld [vmem:[#allocation7 + $0x18c] sm:$0xf]  ;;  %v7181_v31 = vld [vmem:[#allocation2 + $0x30] sm:$0xff] }
  0x4a   :  { %503 = vmatpush.bf16.msra.mxu1 %v6130_v18  ;;  %12128 = vst [vmem:[#allocation30_spill] sm:$0xff] %v8470_v50  ;;  %v8477_v53 = vor.u32 %v7268_v48, %v6443_v47  ;;  %v6445_v55 = vld [vmem:[#allocation7 + $0x1a8] sm:$0xf0]  ;;  %v6403_v57 = vld [vmem:[#allocation7 + $0x140] sm:$0xf]  ;;  %s8365_s18 = smov 768  }
  0x4b   :  { %552 = vmatpush.bf16.msra.mxu2 %v6134_v19  ;;  %12129 = vst [vmem:[#allocation31_spill] sm:$0xff] %v8472_v51  ;;  %v8481_v56 = vor.u32 %v7264_v54, %v6445_v55  ;;  %v7259_v58 = vld [vmem:[#allocation7 + $0x15c] sm:$0xf0]  ;;  %v7255_v59 = vld [vmem:[#allocation7 + $0x144] sm:$0xf]  ;;  %v7176_v2 = vld [vmem:[#allocation2 + $0x8] sm:$0xff] }
  0x4c   :  { %12130 = vst [vmem:[#allocation32_spill] sm:$0xff] %v8475_v52  ;;  %v8485_v60 = vor.u32 %v7259_v58, %v6403_v57  ;;  %v6405_v61 = vld [vmem:[#allocation7 + $0x160] sm:$0xf0]  ;;  %v6411_v62 = vld [vmem:[#allocation7 + $0x148] sm:$0xf]  ;;  %s8366_s29 = smov 48  }
  0x4d   :  { %455 = vmatpush.bf16.msra.mxu0 %v6110_v29  ;;  %601 = vmatpush.bf16.msra.mxu3 %v6138_v30  ;;  %12131 = vst [vmem:[#allocation33_spill] sm:$0xff] %v8477_v53  ;;  %v7260_v63 = vld [vmem:[#allocation7 + $0x164] sm:$0xf0]  ;;  %v8488_v0 = vor.u32 %v7255_v59, %v6405_v61  ;;  %v7256_v3 = vld [vmem:[#allocation7 + $0x14c] sm:$0xf]  ;;  %v7179_v29 = vld [vmem:[#allocation2 + $0x20] sm:$0xff] }
  0x4e   :  { %504 = vmatpush.bf16.msra.mxu1 %v6114_v33  ;;  %12132 = vst [vmem:[#allocation34_spill] sm:$0xff] %v8481_v56  ;;  %v8490_v1 = vor.u32 %v7260_v63, %v6411_v62  ;;  %v6413_v4 = vld [vmem:[#allocation7 + $0x168] sm:$0xf0]  ;;  %v6371_v6 = vld [vmem:[#allocation7 + $0x100] sm:$0xf] }
  0x4f   :  { %553 = vmatpush.bf16.msra.mxu2 %v6118_v34  ;;  %12133 = vst [vmem:[#allocation35_spill] sm:$0xff] %v8485_v60  ;;  %v8495_v5 = vor.u32 %v7256_v3, %v6413_v4  ;;  %v7251_v7 = vld [vmem:[#allocation7 + $0x11c] sm:$0xf0]  ;;  %v7247_v8 = vld [vmem:[#allocation7 + $0x104] sm:$0xf]  ;;  %v7180_v30 = vld [vmem:[#allocation2 + $0x28] sm:$0xff] }
  0x50   :  { %456 = vmatmul.bf16.vlgmr.msra.gmra.mxu0 %v7175_v35  ;;  %12134 = vst [vmem:[#allocation36_spill] sm:$0xff] %v8488_v0  ;;  %v8498_v9 = vor.u32 %v7251_v7, %v6371_v6  ;;  %v6373_v10 = vld [vmem:[#allocation7 + $0x120] sm:$0xf0]  ;;  %v6379_v11 = vld [vmem:[#allocation7 + $0x108] sm:$0xf]  ;;  %v7182_v4 = vld [vmem:[#allocation2 + $0x38] sm:$0xff] }
  0x51   :  { %1215 = vmatpush.bf16.msrb.mxu0 %v8462_v38  ;;  %505 = vmatmul.bf16.vlgmr.msra.gmra.mxu1 %v7175_v35  ;;  %12135 = vst [vmem:[#allocation37_spill] sm:$0xff] %v8490_v1  ;;  %v7252_v12 = vld [vmem:[#allocation7 + $0x124] sm:$0xf0]  ;;  %v8500_v13 = vor.u32 %v7247_v8, %v6373_v10  ;;  %v7248_v16 = vld [vmem:[#allocation7 + $0x10c] sm:$0xf] }
  0x52   :  { %1229 = vmatpush.bf16.msrb.mxu1 %v8464_v39  ;;  %554 = vmatmul.bf16.vlgmr.msra.gmra.mxu2 %v7175_v35  ;;  %12136 = vst [vmem:[#allocation38_spill] sm:$0xff] %v8495_v5  ;;  %v8502_v14 = vor.u32 %v7252_v12, %v6379_v11  ;;  %v6381_v17 = vld [vmem:[#allocation7 + $0x128] sm:$0xf0]  ;;  %v6339_v19 = vld [vmem:[#allocation7 + $0xc0] sm:$0xf] }
  0x53   :  { %1243 = vmatpush.bf16.msrb.mxu2 %v8466_v42  ;;  %602 = vmatpush.bf16.msra.mxu3 %v6122_v49  ;;  %12137 = vst [vmem:[#allocation39_spill] sm:$0xff] %v8498_v9  ;;  %v8507_v18 = vor.u32 %v7248_v16, %v6381_v17  ;;  %v7243_v20 = vld [vmem:[#allocation7 + $0xdc] sm:$0xf0]  ;;  %v7239_v21 = vld [vmem:[#allocation7 + $0xc4] sm:$0xf] }
  0x54   :  { %12138 = vst [vmem:[#allocation40_spill] sm:$0xff] %v8500_v13  ;;  %v8510_v22 = vor.u32 %v7243_v20, %v6339_v19  ;;  %v6341_v23 = vld [vmem:[#allocation7 + $0xe0] sm:$0xf0]  ;;  %v6347_v24 = vld [vmem:[#allocation7 + $0xc8] sm:$0xf] }
  0x55   :  { %1216 = vmatpush.bf16.msrb.mxu0 %v8472_v51  ;;  %12139 = vst [vmem:[#allocation41_spill] sm:$0xff] %v8502_v14  ;;  %v7244_v25 = vld [vmem:[#allocation7 + $0xe4] sm:$0xf0]  ;;  %v8512_v26 = vor.u32 %v7239_v21, %v6341_v23  ;;  %v7240_v32 = vld [vmem:[#allocation7 + $0xcc] sm:$0xf] }
  0x56   :  { %1230 = vmatpush.bf16.msrb.mxu1 %v8475_v52  ;;  %603 = vmatmul.bf16.vlgmr.msra.gmra.mxu3 %v7175_v35  ;;  %12140 = vst [vmem:[#allocation42_spill] sm:$0xff] %v8507_v18  ;;  %v8514_v27 = vor.u32 %v7244_v25, %v6347_v24  ;;  %v6349_v33 = vld [vmem:[#allocation7 + $0xe8] sm:$0xf0]  ;;  %v8521_v35 = vld [vmem:[#allocation10] sm:$0xf] }
  0x57   :  { %1257 = vmatpush.bf16.msrb.mxu3 %v8470_v50  ;;  %1244 = vmatpush.bf16.msrb.mxu2 %v8477_v53  ;;  %12141 = vst [vmem:[#allocation43_spill] sm:$0xff] %v8510_v22  ;;  %v8519_v34 = vor.u32 %v7240_v32, %v6349_v33  ;;  %v6307_v36 = vld [vmem:[#allocation7 + $0x80] sm:$0xf]  ;;  %v7231_v40 = vld [vmem:[#allocation7 + $0x84] sm:$0xf]  ;;  %v8525_v41 = vperm.slane %v8521_v35, 0 }
  0x58   :  { %12142 = vst [vmem:[#allocation44_spill] sm:$0xff] %v8512_v26  ;;  %v7235_v37 = vld [vmem:[#allocation7 + $0x9c] sm:$0xf0]  ;;  %v6309_v44 = vld [vmem:[#allocation7 + $0xa0] sm:$0xf0]  ;;  %v8530_v45 = vperm.slane %v8521_v35, 1 }
  0x59   :  { %1217 = vmatpush.bf16.msrb.mxu0 %v8485_v60  ;;  %12143 = vst [vmem:[#allocation45_spill] sm:$0xff] %v8514_v27  ;;  %v8527_v43 = vor.u32 %v7235_v37, %v6307_v36  ;;  %v8532_v46 = vor.u32 %v7231_v40, %v6309_v44  ;;  %v6315_v47 = vld [vmem:[#allocation7 + $0x88] sm:$0xf]  ;;  %v8542_v62 = vperm.slane %v8521_v35, 2  ;;  %v7232_v63 = vld [vmem:[#allocation7 + $0x8c] sm:$0xf] }
  0x5a   :  { %1231 = vmatpush.bf16.msrb.mxu1 %v8488_v0  ;;  %12144 = vst [vmem:[#allocation46_spill] sm:$0xff] %v8519_v34  ;;  %v7236_v48 = vld [vmem:[#allocation7 + $0xa4] sm:$0xf0]  ;;  %v6275_v12 = vld [vmem:[#allocation7 + $0x40] sm:$0xf] }
  0x5b   :  { %1258 = vmatpush.bf16.msrb.mxu3 %v8481_v56  ;;  %1245 = vmatpush.bf16.msrb.mxu2 %v8490_v1  ;;  %12145 = vst [vmem:[#allocation47_spill] sm:$0xff] %v8525_v41  ;;  %v8535_v49 = vor.u32 %v7236_v48, %v6315_v47  ;;  %v7223_v16 = vld [vmem:[#allocation7 + $0x44] sm:$0xf]  ;;  %v6283_v23 = vld [vmem:[#allocation7 + $0x48] sm:$0xf] }
  0x5c   :  { %12146 = vst [vmem:[#allocation48_spill] sm:$0xff] %v8527_v43  ;;  %v6277_v21 = vld [vmem:[#allocation7 + $0x60] sm:$0xf0]  ;;  %v6285_v36 = vld [vmem:[#allocation7 + $0x68] sm:$0xf0] }
  0x5d   :  { %1218 = vmatpush.bf16.msrb.mxu0 %v8498_v9  ;;  %12147 = vst [vmem:[#allocation49_spill] sm:$0xff] %v8530_v45  ;;  %v6243_v47 = vld [vmem:[#allocation7] sm:$0xf] }
  0x5e   :  { %1232 = vmatpush.bf16.msrb.mxu1 %v8500_v13  ;;  %12148 = vst [vmem:[#allocation50_spill] sm:$0xff] %v8532_v46  ;;  %v7219_v48 = vld [vmem:[#allocation7 + $0x1c] sm:$0xf0] }
  0x5f   :  { %1259 = vmatpush.bf16.msrb.mxu3 %v8495_v5  ;;  %1246 = vmatpush.bf16.msrb.mxu2 %v8502_v14  ;;  %12149 = vst [vmem:[#allocation51_spill] sm:$0xff] %v8535_v49 }
  0x60   :  { %461 = vmatmul.bf16.gmra.mxu0 %v7176_v2  ;;  %12150 = vst [vmem:[#allocation52_spill] sm:$0xff] %v8542_v62 }
  0x61   :  { %510 = vmatmul.bf16.gmra.mxu1 %v7176_v2  ;;  %1219 = vmatpush.bf16.msrb.mxu0 %v8510_v22 }
  0x62   :  { %559 = vmatmul.bf16.gmra.mxu2 %v7176_v2  ;;  %1233 = vmatpush.bf16.msrb.mxu1 %v8512_v26 }
  0x63   :  { %1260 = vmatpush.bf16.msrb.mxu3 %v8507_v18  ;;  %1247 = vmatpush.bf16.msrb.mxu2 %v8514_v27 }
  0x65   :  { %1220 = vmatpush.bf16.msrb.mxu0 %v8527_v43 }
  0x66   :  { %608 = vmatmul.bf16.gmra.mxu3 %v7176_v2  ;;  %1234 = vmatpush.bf16.msrb.mxu1 %v8532_v46  ;;  %v6317_v2 = vld [vmem:[#allocation7 + $0xa8] sm:$0xf0] }
  0x67   :  { %1261 = vmatpush.bf16.msrb.mxu3 %v8519_v34  ;;  %1248 = vmatpush.bf16.msrb.mxu2 %v8535_v49  ;;  %v8544_v3 = vor.u32 %v7232_v63, %v6317_v2  ;;  %v6251_v63 = vld [vmem:[#allocation7 + $0x8] sm:$0xf] }
  0x68   :  { %v7220_v2 = vld [vmem:[#allocation7 + $0x24] sm:$0xf0] }
  0x69   :  { %12151 = vst [vmem:[#allocation53_spill] sm:$0xff] %v8544_v3 }
  0x6b   :  { %1262 = vmatpush.bf16.msrb.mxu3 %v8544_v3 }
  0x70   :  { %466 = vmatmul.bf16.gmra.mxu0 %v7177_v15 }
  0x71   :  { %515 = vmatmul.bf16.gmra.mxu1 %v7177_v15 }
  0x72   :  { %564 = vmatmul.bf16.gmra.mxu2 %v7177_v15 }
  0x76   :  { %613 = vmatmul.bf16.gmra.mxu3 %v7177_v15  ;;  %v7227_v15 = vld [vmem:[#allocation7 + $0x5c] sm:$0xf0] }
  0x77   :  { %v8550_v20 = vor.u32 %v7227_v15, %v6275_v12  ;;  %v8576_v12 = vor.u32 %v7220_v2, %v6251_v63 }
  0x79   :  { %12152 = vst [vmem:[#allocation54_spill] sm:$0xff] %v8550_v20  ;;  %1221 = vmatpush.bf16.msrb.mxu0 %v8550_v20 }
  0x7a   :  { %12159 = vst [vmem:[#allocation61_spill] sm:$0xff] %v8576_v12 }
  0x80   :  { %471 = vmatmul.bf16.gmra.mxu0 %v7178_v28 }
  0x81   :  { %520 = vmatmul.bf16.gmra.mxu1 %v7178_v28 }
  0x82   :  { %569 = vmatmul.bf16.gmra.mxu2 %v7178_v28 }
  0x86   :  { %618 = vmatmul.bf16.gmra.mxu3 %v7178_v28  ;;  %v8552_v28 = vor.u32 %v7223_v16, %v6277_v21  ;;  %v6483_v16 = vld [vmem:[#allocation7 + $0x1d0] sm:$0xf] }
  0x88   :  { %12153 = vst [vmem:[#allocation55_spill] sm:$0xff] %v8552_v28  ;;  %1235 = vmatpush.bf16.msrb.mxu1 %v8552_v28  ;;  %v7261_v28 = vld [vmem:[#allocation7 + $0x16c] sm:$0xf0] }
  0x90   :  { %476 = vmatmul.bf16.gmra.mxu0 %v7179_v29 }
  0x91   :  { %525 = vmatmul.bf16.gmra.mxu1 %v7179_v29 }
  0x92   :  { %574 = vmatmul.bf16.gmra.mxu2 %v7179_v29 }
  0x96   :  { %623 = vmatmul.bf16.gmra.mxu3 %v7179_v29  ;;  %v7228_v29 = vld [vmem:[#allocation7 + $0x64] sm:$0xf0] }
  0x97   :  { %v8560_v40 = vor.u32 %v7228_v29, %v6283_v23  ;;  %v7273_v23 = vld [vmem:[#allocation7 + $0x1d4] sm:$0xf] }
  0x99   :  { %12154 = vst [vmem:[#allocation56_spill] sm:$0xff] %v8560_v40  ;;  %1249 = vmatpush.bf16.msrb.mxu2 %v8560_v40  ;;  %v6461_v40 = vld [vmem:[#allocation7 + $0x1b8] sm:$0xf0] }
  0x9d   :  { %1250 = vmatpush.bf16.msrb.mxu2 %v8576_v12  ;;  %v7266_v12 = vld [vmem:[#allocation7 + $0x19c] sm:$0xf] }
  0xa0   :  { %481 = vmatmul.bf16.gmra.mxu0 %v7180_v30 }
  0xa1   :  { %530 = vmatmul.bf16.gmra.mxu1 %v7180_v30 }
  0xa2   :  { %579 = vmatmul.bf16.gmra.mxu2 %v7180_v30 }
  0xa6   :  { %628 = vmatmul.bf16.gmra.mxu3 %v7180_v30  ;;  %v7224_v30 = vld [vmem:[#allocation7 + $0x4c] sm:$0xf] }
  0xa7   :  { %v8562_v44 = vor.u32 %v7224_v30, %v6285_v36 }
  0xa9   :  { %12155 = vst [vmem:[#allocation57_spill] sm:$0xff] %v8562_v44  ;;  %1263 = vmatpush.bf16.msrb.mxu3 %v8562_v44 }
  0xb0   :  { %486 = vmatmul.bf16.gmra.mxu0 %v7181_v31 }
  0xb1   :  { %535 = vmatmul.bf16.gmra.mxu1 %v7181_v31 }
  0xb2   :  { %584 = vmatmul.bf16.gmra.mxu2 %v7181_v31 }
  0xb6   :  { %633 = vmatmul.bf16.gmra.mxu3 %v7181_v31 }
  0xc0   :  { %491 = vmatmul.bf16.gmra.mxu0 %v7182_v4 }
  0xc1   :  { %540 = vmatmul.bf16.gmra.mxu1 %v7182_v4 }
  0xc2   :  { %589 = vmatmul.bf16.gmra.mxu2 %v7182_v4 }
  0xc6   :  { %638 = vmatmul.bf16.gmra.mxu3 %v7182_v4  ;;  %v8572_v4 = vor.u32 %v7219_v48, %v6243_v47 }
  0xc8   :  { %12157 = vst [vmem:[#allocation59_spill] sm:$0xff] %v8572_v4  ;;  %1222 = vmatpush.bf16.msrb.mxu0 %v8572_v4 }
  0xcd   :  { %v457_v54 = vpop.f32.mrf.mxu0 }
  0xce   :  { %v760_v55 = vadd.f32 %v8525_v41, %v457_v54  ;;  %v506_v57 = vpop.f32.mrf.mxu1 }
  0xcf   :  { %v761_v58 = vadd.f32 %v8530_v45, %v506_v57  ;;  %v7215_v57 = vld [vmem:[#allocation7 + $0x4] sm:$0xf] }
  0xd0   :  { %v6235_v59 = vmul.f32 -1.442695, %v760_v55 }
  0xd1   :  { %v6236_v61 = vmul.f32 -1.442695, %v761_v58  ;;  %v6245_v58 = vld [vmem:[#allocation7 + $0x20] sm:$0xf0] }
  0xd2   :  { %7444 = vpow2.f32 %v6235_v59  ;;  %v8569_v59 = vperm.slane %v8521_v35, 3 }
  0xd3   :  { %7446 = vpow2.f32 %v6236_v61 }
  0xd4   :  { %12156 = vst [vmem:[#allocation58_spill] sm:$0xff] %v8569_v59 }
  0xd5   :  { %v555_v6 = vpop.f32.mrf.mxu2  ;;  %v459_v8 = vpop.f32.mrf.mxu0 }
  0xd6   :  { %v762_v7 = vadd.f32 %v8542_v62, %v555_v6  ;;  %v764_v10 = vadd.f32 %v8525_v41, %v459_v8  ;;  %v508_v11 = vpop.f32.mrf.mxu1  ;;  %v7216_v6 = vld [vmem:[#allocation7 + $0xc] sm:$0xf]  ;;  %v8693_v41 = vor.u32 %v7266_v12, %v6461_v40  ;;  %v6395_v12 = vld [vmem:[#allocation7 + $0x118] sm:$0xf] }
  0xd7   :  { %v765_v19 = vadd.f32 %v8530_v45, %v508_v11  ;;  %v8574_v11 = vor.u32 %v7215_v57, %v6245_v58 }
  0xd8   :  { %v6237_v17 = vmul.f32 -1.442695, %v762_v7  ;;  %v7445_v24 = vpop.eup %7444  ;;  %v6238_v25 = vmul.f32 -1.442695, %v764_v10  ;;  %v6253_v7 = vld [vmem:[#allocation7 + $0x28] sm:$0xf0] }
  0xd9   :  { %v7447_v31 = vpop.eup %7446  ;;  %v8554_v32 = vadd.f32 1.0, %v7445_v24  ;;  %v6239_v33 = vmul.f32 -1.442695, %v765_v19  ;;  %v604_v54 = vpop.f32.mrf.mxu3  ;;  %12158 = vst [vmem:[#allocation60_spill] sm:$0xff] %v8574_v11  ;;  %v8578_v15 = vor.u32 %v7216_v6, %v6253_v7  ;;  %v6485_v24 = vld [vmem:[#allocation7 + $0x1f0] sm:$0xf0]  ;;  %1236 = vmatpush.bf16.msrb.mxu1 %v8574_v11 }
  0xda   :  { %7448 = vpow2.f32 %v6237_v17  ;;  %v8557_v37 = vadd.f32 1.0, %v7447_v31  ;;  %v7277_v17 = vld [vmem:[#allocation7 + $0x1ec] sm:$0xf0]  ;;  %v763_v30 = vadd.f32 %v8569_v59, %v604_v54  ;;  %v8590_v31 = vor.u32 %v7273_v23, %v6485_v24  ;;  %12177 = vst [vmem:[#allocation71_spill] sm:$0xff] %v8693_v41 }
  0xdb   :  { %7450 = vpow2.f32 %v6238_v25  ;;  %12160 = vst [vmem:[#allocation62_spill] sm:$0xff] %v8578_v15  ;;  %v8583_v21 = vor.u32 %v7277_v17, %v6483_v16  ;;  %1264 = vmatpush.bf16.msrb.mxu3 %v8578_v15  ;;  %v801_v54 = vand.u32 2147483647, %v8554_v32  ;;  %vm797_vm0 = vweird.f32 %v8554_v32 }
  0xdc   :  { %7452 = vrcp.f32 %v8554_v32  ;;  %12162 = vst [vmem:[#allocation64_spill] sm:$0xff] %v8590_v31  ;;  %v818_v57 = vand.u32 2147483648, %v8557_v37  ;;  %v816_v2 = vand.u32 2147483647, %v8557_v37  ;;  %vm812_vm2 = vweird.f32 %v8557_v37 }
  0xdd   :  { %7454 = vrcp.f32 %v8557_v37  ;;  %v557_v55 = vpop.f32.mrf.mxu2  ;;  %12161 = vst [vmem:[#allocation63_spill] sm:$0xff] %v8583_v21  ;;  %1271 = vmatpush.bf16.msra.mxu0 %v8583_v21  ;;  %1285 = vmatpush.bf16.msra.mxu1 %v8590_v31  ;;  %vm8608_vm3 = vcmp.eq.f32.partialorder %v801_v54, 8.507059e+37  ;;  %v7265_v31 = vld [vmem:[#allocation7 + $0x194] sm:$0xf] }
  0xde   :  { %7456 = vpow2.f32 %v6239_v33  ;;  %v766_v61 = vadd.f32 %v8542_v62, %v557_v55  ;;  %vm8622_vm6 = vcmp.eq.f32.partialorder %v816_v2, 8.507059e+37  ;;  %v6453_v21 = vld [vmem:[#allocation7 + $0x1b0] sm:$0xf0] }
  0xe0   :  { %v7449_v8 = vpop.eup %7448  ;;  %v6240_v10 = vmul.f32 -1.442695, %v766_v61  ;;  %v803_v61 = vand.u32 2147483648, %v8554_v32 }
  0xe1   :  { %v7451_v35 = vpop.eup %7450  ;;  %v8580_v19 = vadd.f32 1.0, %v7449_v8  ;;  %v606_v7 = vpop.f32.mrf.mxu3 }
  0xe2   :  { %v7453_v25 = vpop.eup %7452  ;;  %v8585_v29 = vadd.f32 1.0, %v7451_v35  ;;  %7458 = vpow2.f32 %v6240_v10  ;;  %v819_v35 = vor.u32 1.1754944e-38, %v818_v57  ;;  %v804_v24 = vor.u32 1.1754944e-38, %v803_v61 }
  0xe3   :  { %v7455_v33 = vpop.eup %7454  ;;  %v793_v36 = vmul.f32 %v7453_v25, %v8554_v32  ;;  %7460 = vrcp.f32 %v8580_v19  ;;  %vm798_vm1 = vweird.f32 %v7453_v25  ;;  %v767_v54 = vadd.f32 %v8569_v59, %v606_v7  ;;  %v6491_v7 = vld [vmem:[#allocation7 + $0x1d8] sm:$0xf]  ;;  %v6493_v59 = vld [vmem:[#allocation7 + $0x1f8] sm:$0xf0]  ;;  %v7269_v32 = vld [vmem:[#allocation7 + $0x1ac] sm:$0xf0] }
  0xe4   :  { %v7457_v47 = vpop.eup %7456  ;;  %v808_v48 = vmul.f32 %v7455_v33, %v8557_v37  ;;  %7462 = vrcp.f32 %v8585_v29  ;;  %vm813_vm4 = vweird.f32 %v7455_v33  ;;  %vm8618_vm5 = vmor %vm797_vm0, %vm798_vm1  ;;  %vm842_vm8 = vweird.f32 %v8585_v29 }
  0xe5   :  { %v794_v55 = vsub.f32 1.0, %v793_v36  ;;  %v8601_v58 = vadd.f32 1.0, %v7457_v47  ;;  %7464 = vtanh.f32 %v763_v30  ;;  %vm814_vm7 = vmor %vm812_vm2, %vm813_vm4  ;;  %vm827_vm2 = vweird.f32 %v8580_v19 }
  0xe6   :  { %v809_v63 = vsub.f32 1.0, %v808_v48  ;;  %v7270_v48 = vld [vmem:[#allocation7 + $0x1b4] sm:$0xf0] }
  0xe7   :  { %7466 = vrcp.f32 %v8601_v58  ;;  %v795_v6 = vmul.f32 %v7453_v25, %v794_v55  ;;  %v846_v55 = vand.u32 2147483647, %v8585_v29  ;;  %vm857_vm9 = vweird.f32 %v8601_v58 }
  0xe8   :  { %v7459_v8 = vpop.eup %7458  ;;  %v810_v10 = vmul.f32 %v7455_v33, %v809_v63 }
  0xe9   :  { %v8612_v17 = vpop.eup %7460  ;;  %v796_v23 = vadd.f32 %v7453_v25, %v795_v6  ;;  %v8614_v30 = vadd.f32 1.0, %v7459_v8  ;;  %v7278_v8 = vld [vmem:[#allocation7 + $0x1f4] sm:$0xf0]  ;;  %vm8649_vm10 = vcmp.eq.f32.partialorder %v846_v55, 8.507059e+37  ;;  %v861_v55 = vand.u32 2147483647, %v8601_v58 }
  0xea   :  { %v8616_v36 = vpop.eup %7462  ;;  %v811_v47 = vadd.f32 %v7455_v33, %v810_v10  ;;  %v823_v57 = vmul.f32 %v8612_v17, %v8580_v19  ;;  %v7274_v10 = vld [vmem:[#allocation7 + $0x1dc] sm:$0xf]  ;;  %v8660_v44 = vor.u32 %v7278_v8, %v6491_v7  ;;  %v6421_v7 = vld [vmem:[#allocation7 + $0x170] sm:$0xf0]  ;;  %vm828_vm0 = vweird.f32 %v8612_v17 }
  0xeb   :  { %v838_v61 = vmul.f32 %v8616_v36, %v8585_v29  ;;  %v800_v63 = vsel %vm8618_vm5, %v7453_v25, %v796_v23  ;;  %7468 = vrcp.f32 %v8614_v30  ;;  %v7465_v2 = vpop.eup %7464  ;;  %v6451_v23 = vld [vmem:[#allocation7 + $0x190] sm:$0xf]  ;;  %vm843_vm11 = vweird.f32 %v8616_v36 }
  0xec   :  { %v815_v6 = vsel %vm814_vm7, %v7455_v33, %v811_v47  ;;  %v805_v25 = vsel %vm8608_vm3, %v804_v24, %v800_v63  ;;  %v863_v47 = vand.u32 2147483648, %v8601_v58  ;;  %v824_v16 = vsub.f32 1.0, %v823_v57  ;;  %12171 = vst [vmem:[#allocation65_spill] sm:$0xff] %v8660_v44  ;;  %vm844_vm12 = vmor %vm842_vm8, %vm843_vm11  ;;  %1299 = vmatpush.bf16.msra.mxu2 %v8660_v44 }
  0xed   :  { %v8639_v62 = vpop.eup %7466  ;;  %v839_v45 = vsub.f32 1.0, %v838_v61  ;;  %v820_v37 = vsel %vm8622_vm6, %v819_v35, %v815_v6  ;;  %v848_v61 = vand.u32 2147483648, %v8585_v29  ;;  %7470 = vtanh.f32 %v767_v54  ;;  %v6459_v35 = vld [vmem:[#allocation7 + $0x198] sm:$0xf]  ;;  %v6419_v54 = vld [vmem:[#allocation7 + $0x150] sm:$0xf]  ;;  %vm8740_vm3 = vmor %vm827_vm2, %vm828_vm0 }
  0xee   :  { %v853_v33 = vmul.f32 %v8639_v62, %v8601_v58  ;;  %v884_v6 = vmul.f32 0.0, %v820_v37  ;;  %v886_v15 = vmul.f32 %v7465_v2, %v805_v25  ;;  %v8662_v57 = vor.u32 %v7274_v10, %v6493_v59  ;;  %v7257_v59 = vld [vmem:[#allocation7 + $0x154] sm:$0xf] }
  0xef   :  { %v840_v24 = vmul.f32 %v8616_v36, %v839_v45  ;;  %v8664_v45 = vor.u32 %v7269_v32, %v6451_v23  ;;  %v849_v25 = vor.u32 1.1754944e-38, %v848_v61  ;;  %vm858_vm13 = vweird.f32 %v8639_v62  ;;  %v6427_v32 = vld [vmem:[#allocation7 + $0x158] sm:$0xf] }
  0xf0   :  { %v854_v63 = vsub.f32 1.0, %v853_v33  ;;  %12172 = vst [vmem:[#allocation66_spill] sm:$0xff] %v8662_v57  ;;  %v825_v8 = vmul.f32 %v8612_v17, %v824_v16  ;;  %v864_v10 = vor.u32 1.1754944e-38, %v863_v47  ;;  %1313 = vmatpush.bf16.msra.mxu3 %v8662_v57  ;;  %v8678_v23 = vor.u32 %v7265_v31, %v6453_v21  ;;  %v7258_v47 = vld [vmem:[#allocation7 + $0x15c] sm:$0xf]  ;;  %vm859_vm14 = vmor %vm857_vm9, %vm858_vm13 }
  0xf1   :  { %v8657_v11 = vpop.eup %7468  ;;  %v841_v4 = vadd.f32 %v8616_v36, %v840_v24  ;;  %12173 = vst [vmem:[#allocation67_spill] sm:$0xff] %v8664_v45  ;;  %v7262_v24 = vld [vmem:[#allocation7 + $0x174] sm:$0xf0]  ;;  %1272 = vmatpush.bf16.msra.mxu0 %v8664_v45  ;;  %v8684_v16 = vor.u32 %v7270_v48, %v6459_v35  ;;  %v8686_v44 = vadd.f32 %v886_v15, %v884_v6  ;;  %v6387_v35 = vld [vmem:[#allocation7 + $0x110] sm:$0xf]  ;;  %vm862_vm15 = vcmp.eq.f32.partialorder %v861_v55, 8.507059e+37 }
  0xf2   :  { %v855_v33 = vmul.f32 %v8639_v62, %v854_v63  ;;  %v868_v2 = vmul.f32 %v8657_v11, %v8614_v30  ;;  %12174 = vst [vmem:[#allocation68_spill] sm:$0xff] %v8678_v23  ;;  %1286 = vmatpush.bf16.msra.mxu1 %v8678_v23  ;;  %v8695_v21 = vor.u32 %v7261_v28, %v6419_v54  ;;  %v7253_v48 = vld [vmem:[#allocation7 + $0x12c] sm:$0xf0]  ;;  %v831_v58 = vand.u32 2147483647, %v8580_v19 }
  0xf3   :  { %v845_v37 = vsel %vm844_vm12, %v8616_v36, %v841_v4  ;;  %12175 = vst [vmem:[#allocation69_spill] sm:$0xff] %v8684_v16  ;;  %v6429_v4 = vld [vmem:[#allocation7 + $0x178] sm:$0xf0]  ;;  %v7471_v36 = vpop.eup %7470  ;;  %v8697_v31 = vor.u32 %v7257_v59, %v6421_v7  ;;  %1300 = vmatpush.bf16.msra.mxu2 %v8684_v16  ;;  %v8704_v28 = vor.u32 %v7262_v24, %v6427_v32  ;;  %v7254_v54 = vld [vmem:[#allocation7 + $0x134] sm:$0xf0]  ;;  %7472 = vtanh.f32 %v8686_v44 }
  0xf4   :  { %v869_v29 = vsub.f32 1.0, %v868_v2  ;;  %v850_v61 = vsel %vm8649_vm10, %v849_v25, %v845_v37  ;;  %v856_v63 = vadd.f32 %v8639_v62, %v855_v33  ;;  %12176 = vst [vmem:[#allocation70_spill] sm:$0xff] %v8686_v44  ;;  %v7249_v2 = vld [vmem:[#allocation7 + $0x114] sm:$0xf]  ;;  %1314 = vmatpush.bf16.msra.mxu3 %v8693_v41  ;;  %v8706_v40 = vor.u32 %v7258_v47, %v6429_v4  ;;  %v7250_v55 = vld [vmem:[#allocation7 + $0x11c] sm:$0xf] }
  0xf5   :  { %12178 = vst [vmem:[#allocation72_spill] sm:$0xff] %v8695_v21  ;;  %v887_v6 = vmul.f32 %v7471_v36, %v850_v61  ;;  %v6389_v25 = vld [vmem:[#allocation7 + $0x130] sm:$0xf0]  ;;  %1273 = vmatpush.bf16.msra.mxu0 %v8695_v21  ;;  %v6397_v7 = vld [vmem:[#allocation7 + $0x138] sm:$0xf0]  ;;  %v826_v61 = vadd.f32 %v8612_v17, %v825_v8  ;;  %vm873_vm1 = vweird.f32 %v8657_v11  ;;  %v8729_v8 = vor.u32 %v7254_v54, %v6395_v12 }
  0xf6   :  { %12179 = vst [vmem:[#allocation73_spill] sm:$0xff] %v8697_v31  ;;  %v870_v33 = vmul.f32 %v8657_v11, %v869_v29  ;;  %v860_v15 = vsel %vm859_vm14, %v8639_v62, %v856_v63  ;;  %v8709_v62 = vor.u32 %v7253_v48, %v6387_v35  ;;  %1287 = vmatpush.bf16.msra.mxu1 %v8697_v31  ;;  %v6355_v32 = vld [vmem:[#allocation7 + $0xd0] sm:$0xf]  ;;  %v878_v63 = vand.u32 2147483648, %v8614_v30  ;;  %v7241_v4 = vld [vmem:[#allocation7 + $0xd4] sm:$0xf]  ;;  %v8721_v35 = vpop.f32.mrf.mxu0  ;;  %v8723_v48 = vpop.f32.mrf.mxu1 }
  0xf7   :  { %v865_v37 = vsel %vm862_vm15, %v864_v10, %v860_v15  ;;  %12180 = vst [vmem:[#allocation74_spill] sm:$0xff] %v8704_v28  ;;  %v833_v10 = vand.u32 2147483648, %v8580_v19  ;;  %v8714_v29 = vor.u32 %v7249_v2, %v6389_v25  ;;  %v7245_v24 = vld [vmem:[#allocation7 + $0xec] sm:$0xf0]  ;;  %v6357_v36 = vld [vmem:[#allocation7 + $0xf0] sm:$0xf0]  ;;  %1301 = vmatpush.bf16.msra.mxu2 %v8704_v28  ;;  %v8731_v2 = vor.u32 %v7250_v55, %v6397_v7 }
  0xf8   :  { %12181 = vst [vmem:[#allocation75_spill] sm:$0xff] %v8706_v40  ;;  %v885_v59 = vmul.f32 0.0, %v865_v37  ;;  %v871_v15 = vadd.f32 %v8657_v11, %v870_v33  ;;  %1315 = vmatpush.bf16.msra.mxu3 %v8706_v40  ;;  %v8736_v25 = vor.u32 %v7245_v24, %v6355_v32  ;;  %v7246_v33 = vld [vmem:[#allocation7 + $0xf4] sm:$0xf0]  ;;  %v7242_v37 = vld [vmem:[#allocation7 + $0xdc] sm:$0xf]  ;;  %vm872_vm4 = vweird.f32 %v8614_v30 }
  0xf9   :  { %12182 = vst [vmem:[#allocation76_spill] sm:$0xff] %v8709_v62  ;;  %1274 = vmatpush.bf16.msra.mxu0 %v8709_v62  ;;  %v876_v12 = vand.u32 2147483647, %v8614_v30  ;;  %v8747_v19 = vor.u32 %v7241_v4, %v6357_v36  ;;  %v6323_v54 = vld [vmem:[#allocation7 + $0x90] sm:$0xf]  ;;  %v830_v7 = vsel %vm8740_vm3, %v8612_v17, %v826_v61  ;;  %vm8754_vm5 = vmor %vm872_vm4, %vm873_vm1  ;;  %v7473_v17 = vpop.eup %7472  ;;  %v834_v61 = vor.u32 1.1754944e-38, %v833_v10 }
  0xfa   :  { %12183 = vst [vmem:[#allocation77_spill] sm:$0xff] %v8714_v29  ;;  %v8719_v47 = vadd.f32 %v887_v6, %v885_v59  ;;  %v6363_v6 = vld [vmem:[#allocation7 + $0xd8] sm:$0xf]  ;;  %v6365_v59 = vld [vmem:[#allocation7 + $0xf8] sm:$0xf0]  ;;  %1288 = vmatpush.bf16.msra.mxu1 %v8714_v29  ;;  %v875_v30 = vsel %vm8754_vm5, %v8657_v11, %v871_v15  ;;  %v879_v36 = vor.u32 1.1754944e-38, %v878_v63 }
  0xfb   :  { %12185 = vst [vmem:[#allocation79_spill] sm:$0xff] %v8721_v35  ;;  %v7237_v55 = vld [vmem:[#allocation7 + $0xac] sm:$0xf0]  ;;  %v7233_v24 = vld [vmem:[#allocation7 + $0x94] sm:$0xf]  ;;  %1302 = vmatpush.bf16.msra.mxu2 %v8729_v8  ;;  %v8763_v4 = vor.u32 %v7246_v33, %v6363_v6  ;;  %v8765_v44 = vor.u32 %v7242_v37, %v6365_v59  ;;  %vm832_vm6 = vcmp.eq.f32.partialorder %v831_v58, 8.507059e+37  ;;  %v8773_v35 = vpop.f32.mrf.mxu2 }
  0xfc   :  { %12184 = vst [vmem:[#allocation78_spill] sm:$0xff] %v8719_v47  ;;  %7474 = vtanh.f32 %v8719_v47  ;;  %v6325_v47 = vld [vmem:[#allocation7 + $0xb0] sm:$0xf0]  ;;  %1316 = vmatpush.bf16.msra.mxu3 %v8731_v2  ;;  %vm877_vm7 = vcmp.eq.f32.partialorder %v876_v12, 8.507059e+37  ;;  %v6331_v15 = vld [vmem:[#allocation7 + $0x98] sm:$0xf]  ;;  %v835_v33 = vsel %vm832_vm6, %v834_v61, %v830_v7 }
  0xfd   :  { %12186 = vst [vmem:[#allocation80_spill] sm:$0xff] %v8723_v48  ;;  %1275 = vmatpush.bf16.msra.mxu0 %v8736_v25  ;;  %v8768_v48 = vor.u32 %v7237_v55, %v6323_v54  ;;  %v8771_v11 = vor.u32 %v7233_v24, %v6325_v47  ;;  %v7238_v32 = vld [vmem:[#allocation7 + $0xb4] sm:$0xf0]  ;;  %v880_v37 = vsel %vm877_vm7, %v879_v36, %v875_v30  ;;  %v7234_v59 = vld [vmem:[#allocation7 + $0x9c] sm:$0xf]  ;;  %v8787_v36 = vpop.f32.mrf.mxu3 }
  0xfe   :  { %12187 = vst [vmem:[#allocation81_spill] sm:$0xff] %v8729_v8  ;;  %1289 = vmatpush.bf16.msra.mxu1 %v8747_v19  ;;  %v6333_v10 = vld [vmem:[#allocation7 + $0xb8] sm:$0xf0]  ;;  %v6291_v63 = vld [vmem:[#allocation7 + $0x50] sm:$0xf]  ;;  %v8778_v54 = vpop.f32.mrf.mxu0  ;;  %v8780_v55 = vpop.f32.mrf.mxu1  ;;  %v8783_v24 = vor.u32 %v7238_v32, %v6331_v15 }
  0xff   :  { %12188 = vst [vmem:[#allocation82_spill] sm:$0xff] %v8731_v2  ;;  %v892_v2 = vmul.f32 %v7473_v17, %v835_v33  ;;  %1303 = vmatpush.bf16.msra.mxu2 %v8763_v4  ;;  %v7229_v58 = vld [vmem:[#allocation7 + $0x6c] sm:$0xf0]  ;;  %v7225_v12 = vld [vmem:[#allocation7 + $0x54] sm:$0xf]  ;;  %v8785_v30 = vor.u32 %v7234_v59, %v6333_v10 }
 0x100   :  { %12189 = vst [vmem:[#allocation83_spill] sm:$0xff] %v8736_v25  ;;  %1317 = vmatpush.bf16.msra.mxu3 %v8765_v44  ;;  %v6293_v47 = vld [vmem:[#allocation7 + $0x70] sm:$0xf0]  ;;  %v6299_v17 = vld [vmem:[#allocation7 + $0x58] sm:$0xf] }
 0x101   :  { %12192 = vst [vmem:[#allocation84_spill] sm:$0xff] %v8747_v19  ;;  %1276 = vmatpush.bf16.msra.mxu0 %v8768_v48  ;;  %v7230_v61 = vld [vmem:[#allocation7 + $0x74] sm:$0xf0]  ;;  %v8791_v33 = vor.u32 %v7225_v12, %v6293_v47  ;;  %v7218_v12 = vld [vmem:[#allocation7 + $0x1c] sm:$0xf] }
 0x102   :  { %12195 = vst [vmem:[#allocation85_spill] sm:$0xff] %v8763_v4  ;;  %v7475_v6 = vpop.eup %7474  ;;  %1290 = vmatpush.bf16.msra.mxu1 %v8771_v11  ;;  %v8795_v15 = vor.u32 %v7230_v61, %v6299_v17  ;;  %v6267_v59 = vld [vmem:[#allocation7 + $0x18] sm:$0xf]  ;;  %v6269_v47 = vld [vmem:[#allocation7 + $0x38] sm:$0xf0] }
 0x103   :  { %12196 = vst [vmem:[#allocation86_spill] sm:$0xff] %v8765_v44  ;;  %v893_v25 = vmul.f32 %v7475_v6, %v880_v37  ;;  %v8789_v6 = vor.u32 %v7229_v58, %v6291_v63  ;;  %v7226_v37 = vld [vmem:[#allocation7 + $0x5c] sm:$0xf]  ;;  %1304 = vmatpush.bf16.msra.mxu2 %v8783_v24  ;;  %v7222_v58 = vld [vmem:[#allocation7 + $0x34] sm:$0xf0]  ;;  %v8811_v17 = vor.u32 %v7218_v12, %v6269_v47 }
 0x104   :  { %12197 = vst [vmem:[#allocation87_spill] sm:$0xff] %v8768_v48  ;;  %1318 = vmatpush.bf16.msra.mxu3 %v8785_v30 }
 0x105   :  { %12198 = vst [vmem:[#allocation88_spill] sm:$0xff] %v8771_v11  ;;  %v894_v7 = vpack.c.bf16 %v893_v25, %v892_v2  ;;  %v7221_v2 = vld [vmem:[#allocation7 + $0x2c] sm:$0xf0]  ;;  %v7217_v25 = vld [vmem:[#allocation7 + $0x14] sm:$0xf]  ;;  %1277 = vmatpush.bf16.msra.mxu0 %v8789_v6  ;;  %v8819_v61 = vpop.f32.mrf.mxu3 }
 0x106   :  { %12199 = vst [vmem:[#allocation89_spill] sm:$0xff] %v8773_v35  ;;  %v6301_v35 = vld [vmem:[#allocation7 + $0x78] sm:$0xf0]  ;;  %1291 = vmatpush.bf16.msra.mxu1 %v8791_v33 }
 0x107   :  { %12200 = vst [vmem:[#allocation90_spill] sm:$0xff] %v8778_v54  ;;  %v6259_v54 = vld [vmem:[#allocation7 + $0x10] sm:$0xf]  ;;  %1223 = vmatmul.bf16.vlgmr.msrb.gmra.mxu0 %v894_v7  ;;  %1237 = vmatmul.bf16.vlgmr.msrb.gmra.mxu1 %v894_v7  ;;  %v8797_v32 = vor.u32 %v7226_v37, %v6301_v35  ;;  %v8809_v35 = vor.u32 %v7222_v58, %v6267_v59 }
 0x108   :  { %12201 = vst [vmem:[#allocation91_spill] sm:$0xff] %v8780_v55  ;;  %v6261_v55 = vld [vmem:[#allocation7 + $0x30] sm:$0xf0]  ;;  %1251 = vmatmul.bf16.vlgmr.msrb.gmra.mxu2 %v894_v7  ;;  %1265 = vmatmul.bf16.vlgmr.msrb.gmra.mxu3 %v894_v7  ;;  %v8801_v10 = vor.u32 %v7221_v2, %v6259_v54  ;;  %v8815_v54 = vpop.f32.mrf.mxu0 }
 0x109   :  { %12202 = vst [vmem:[#allocation92_spill] sm:$0xff] %v8783_v24  ;;  %v8803_v63 = vor.u32 %v7217_v25, %v6261_v55  ;;  %1305 = vmatpush.bf16.msra.mxu2 %v8795_v15  ;;  %1319 = vmatpush.bf16.msra.mxu3 %v8797_v32  ;;  %v8817_v55 = vpop.f32.mrf.mxu1 }
 0x10a   :  { %12203 = vst [vmem:[#allocation93_spill] sm:$0xff] %v8785_v30  ;;  %1278 = vmatpush.bf16.msra.mxu0 %v8801_v10 }
 0x10b   :  { %12204 = vst [vmem:[#allocation94_spill] sm:$0xff] %v8787_v36  ;;  %v8805_v36 = vpop.f32.mrf.mxu2  ;;  %1292 = vmatpush.bf16.msra.mxu1 %v8803_v63 }
 0x10c   :  { %12205 = vst [vmem:[#allocation95_spill] sm:$0xff] %v8789_v6 }
 0x10d   :  { %12206 = vst [vmem:[#allocation96_spill] sm:$0xff] %v8791_v33  ;;  %1306 = vmatpush.bf16.msra.mxu2 %v8809_v35  ;;  %1320 = vmatpush.bf16.msra.mxu3 %v8811_v17  ;;  %v8837_v59 = vpop.f32.mrf.mxu3 }
 0x10e   :  { %12207 = vst [vmem:[#allocation97_spill] sm:$0xff] %v8795_v15  ;;  %1604 = vmatpush.bf16.msrb.mxu0 %v8462_v38 }
 0x10f   :  { %12208 = vst [vmem:[#allocation98_spill] sm:$0xff] %v8797_v32  ;;  %1618 = vmatpush.bf16.msrb.mxu1 %v8464_v39 }
 0x110   :  { %12209 = vst [vmem:[#allocation99_spill] sm:$0xff] %v8801_v10  ;;  %v8833_v2 = vpop.f32.mrf.mxu0 }
 0x111   :  { %12210 = vst [vmem:[#allocation100_spill] sm:$0xff] %v8803_v63  ;;  %1632 = vmatpush.bf16.msrb.mxu2 %v8466_v42  ;;  %1646 = vmatpush.bf16.msrb.mxu3 %v8470_v50  ;;  %v8835_v25 = vpop.f32.mrf.mxu1 }
 0x112   :  { %12211 = vst [vmem:[#allocation101_spill] sm:$0xff] %v8809_v35  ;;  %1605 = vmatpush.bf16.msrb.mxu0 %v8472_v51 }
 0x113   :  { %12212 = vst [vmem:[#allocation102_spill] sm:$0xff] %v8811_v17  ;;  %1619 = vmatpush.bf16.msrb.mxu1 %v8475_v52  ;;  %v8829_v37 = vpop.f32.mrf.mxu2 }
 0x114   :  { %12213 = vst [vmem:[#allocation103_spill] sm:$0xff] %v8815_v54  ;;  %v12232_v54 = vld [vmem:[#allocation61_spill] sm:$0xff] }
 0x115   :  { %12214 = vst [vmem:[#allocation104_spill] sm:$0xff] %v8817_v55  ;;  %1633 = vmatpush.bf16.msrb.mxu2 %v8477_v53  ;;  %1647 = vmatpush.bf16.msrb.mxu3 %v8481_v56  ;;  %v8857_v47 = vpop.f32.mrf.mxu3  ;;  %v12231_v55 = vld [vmem:[#allocation60_spill] sm:$0xff] }
 0x116   :  { %12215 = vst [vmem:[#allocation105_spill] sm:$0xff] %v8829_v37  ;;  %1606 = vmatpush.bf16.msrb.mxu0 %v8485_v60  ;;  %v12230_v37 = vld [vmem:[#allocation59_spill] sm:$0xff] }
 0x117   :  { %1279 = vmatmul.bf16.vlgmr.msra.gmra.mxu0 %v894_v7  ;;  %1293 = vmatmul.bf16.vlgmr.msra.gmra.mxu1 %v894_v7  ;;  %12216 = vst [vmem:[#allocation106_spill] sm:$0xff] %v8833_v2 }
 0x118   :  { %1307 = vmatmul.bf16.vlgmr.msra.gmra.mxu2 %v894_v7  ;;  %1321 = vmatmul.bf16.vlgmr.msra.gmra.mxu3 %v894_v7  ;;  %12217 = vst [vmem:[#allocation107_spill] sm:$0xff] %v8835_v25  ;;  %v8851_v58 = vpop.f32.mrf.mxu0 }
 0x119   :  { %12218 = vst [vmem:[#allocation108_spill] sm:$0xff] %v8837_v59  ;;  %1620 = vmatpush.bf16.msrb.mxu1 %v8488_v0  ;;  %1634 = vmatpush.bf16.msrb.mxu2 %v8490_v1  ;;  %v8853_v12 = vpop.f32.mrf.mxu1 }
 0x11a   :  { %1648 = vmatpush.bf16.msrb.mxu3 %v8495_v5  ;;  %1607 = vmatpush.bf16.msrb.mxu0 %v8498_v9  ;;  %12220 = vst [vmem:[#allocation110_spill] sm:$0xff] %v8851_v58  ;;  %v12224_v58 = vld [vmem:[#allocation55_spill] sm:$0xff] }
 0x11b   :  { %v8847_v7 = vpop.f32.mrf.mxu2  ;;  %12221 = vst [vmem:[#allocation111_spill] sm:$0xff] %v8853_v12  ;;  %v12225_v12 = vld [vmem:[#allocation56_spill] sm:$0xff] }
 0x11c   :  { %12219 = vst [vmem:[#allocation109_spill] sm:$0xff] %v8847_v7  ;;  %v12226_v7 = vld [vmem:[#allocation57_spill] sm:$0xff] }
 0x11d   :  { %1621 = vmatpush.bf16.msrb.mxu1 %v8500_v13  ;;  %1635 = vmatpush.bf16.msrb.mxu2 %v8502_v14  ;;  %12222 = vst [vmem:[#allocation112_spill] sm:$0xff] %v8857_v47  ;;  %v8873_v2 = vpop.f32.mrf.mxu3 }
 0x11e   :  { %1649 = vmatpush.bf16.msrb.mxu3 %v8507_v18  ;;  %1608 = vmatpush.bf16.msrb.mxu0 %v8510_v22  ;;  %12229 = vst [vmem:[#allocation116_spill] sm:$0xff] %v8873_v2 }
 0x120   :  { %v8869_v25 = vpop.f32.mrf.mxu0 }
 0x121   :  { %1622 = vmatpush.bf16.msrb.mxu1 %v8512_v26  ;;  %1636 = vmatpush.bf16.msrb.mxu2 %v8514_v27  ;;  %12227 = vst [vmem:[#allocation114_spill] sm:$0xff] %v8869_v25  ;;  %v8871_v47 = vpop.f32.mrf.mxu1 }
 0x122   :  { %1650 = vmatpush.bf16.msrb.mxu3 %v8519_v34  ;;  %1609 = vmatpush.bf16.msrb.mxu0 %v8527_v43  ;;  %12228 = vst [vmem:[#allocation115_spill] sm:$0xff] %v8871_v47 }
 0x123   :  { %v8863_v59 = vpop.f32.mrf.mxu2 }
 0x124   :  { %12223 = vst [vmem:[#allocation113_spill] sm:$0xff] %v8863_v59  ;;  %v12233_v59 = vld [vmem:[#allocation62_spill] sm:$0xff] }
 0x125   :  { %1623 = vmatpush.bf16.msrb.mxu1 %v8532_v46  ;;  %1637 = vmatpush.bf16.msrb.mxu2 %v8535_v49 }
 0x126   :  { %1651 = vmatpush.bf16.msrb.mxu3 %v8544_v3  ;;  %1610 = vmatpush.bf16.msrb.mxu0 %v8550_v20  ;;  %v12234_v20 = vld [vmem:[#allocation63_spill] sm:$0xff] }
 0x128   :  { %v8889_v2 = vpop.f32.mrf.mxu0 }
 0x129   :  { %1624 = vmatpush.bf16.msrb.mxu1 %v12224_v58  ;;  %1638 = vmatpush.bf16.msrb.mxu2 %v12225_v12  ;;  %v12235_v58 = vld [vmem:[#allocation64_spill] sm:$0xff]  ;;  %v12236_v12 = vld [vmem:[#allocation65_spill] sm:$0xff]  ;;  %12238 = vst [vmem:[#allocation118_spill] sm:$0xff] %v8889_v2  ;;  %v8891_v47 = vpop.f32.mrf.mxu1 }
 0x12a   :  { %1652 = vmatpush.bf16.msrb.mxu3 %v12226_v7  ;;  %1611 = vmatpush.bf16.msrb.mxu0 %v12230_v37  ;;  %12239 = vst [vmem:[#allocation119_spill] sm:$0xff] %v8891_v47  ;;  %v12243_v47 = vld [vmem:[#allocation83_spill] sm:$0xff] }
 0x12b   :  { %v8883_v25 = vpop.f32.mrf.mxu2 }
 0x12c   :  { %12237 = vst [vmem:[#allocation117_spill] sm:$0xff] %v8883_v25  ;;  %v12241_v25 = vld [vmem:[#allocation82_spill] sm:$0xff] }
 0x12d   :  { %1625 = vmatpush.bf16.msrb.mxu1 %v12231_v55  ;;  %1639 = vmatpush.bf16.msrb.mxu2 %v12232_v54  ;;  %v7295_v55 = vld [vmem:[#allocation8 + $0x84] sm:$0xf] }
 0x12e   :  { %1653 = vmatpush.bf16.msrb.mxu3 %v12233_v59  ;;  %1660 = vmatpush.bf16.msra.mxu0 %v12234_v20  ;;  %v8893_v59 = vpop.f32.mrf.mxu3 }
 0x12f   :  { %12240 = vst [vmem:[#allocation120_spill] sm:$0xff] %v8893_v59 }
 0x130   :  { %v8907_v59 = vpop.f32.mrf.mxu0 }
 0x131   :  { %1674 = vmatpush.bf16.msra.mxu1 %v12235_v58  ;;  %1688 = vmatpush.bf16.msra.mxu2 %v12236_v12  ;;  %12244 = vst [vmem:[#allocation122_spill] sm:$0xff] %v8907_v59 }
 0x132   :  { %1702 = vmatpush.bf16.msra.mxu3 %v8662_v57  ;;  %1661 = vmatpush.bf16.msra.mxu0 %v8664_v45 }
 0x133   :  { %v8903_v2 = vpop.f32.mrf.mxu2 }
 0x134   :  { %12242 = vst [vmem:[#allocation121_spill] sm:$0xff] %v8903_v2 }
 0x135   :  { %1675 = vmatpush.bf16.msra.mxu1 %v8678_v23  ;;  %1689 = vmatpush.bf16.msra.mxu2 %v8684_v16 }
 0x136   :  { %1703 = vmatpush.bf16.msra.mxu3 %v8693_v41  ;;  %1662 = vmatpush.bf16.msra.mxu0 %v8695_v21 }
 0x139   :  { %1676 = vmatpush.bf16.msra.mxu1 %v8697_v31  ;;  %1690 = vmatpush.bf16.msra.mxu2 %v8704_v28  ;;  %v8909_v31 = vpop.f32.mrf.mxu1 }
 0x13a   :  { %1704 = vmatpush.bf16.msra.mxu3 %v8706_v40  ;;  %1663 = vmatpush.bf16.msra.mxu0 %v8709_v62  ;;  %12245 = vst [vmem:[#allocation123_spill] sm:$0xff] %v8909_v31  ;;  %v8913_v62 = vpop.f32.mrf.mxu3  ;;  %v8925_v31 = vpop.f32.mrf.mxu0 }
 0x13b   :  { %12246 = vst [vmem:[#allocation124_spill] sm:$0xff] %v8913_v62  ;;  %v8919_v2 = vpop.f32.mrf.mxu2 }
 0x13c   :  { %12247 = vst [vmem:[#allocation125_spill] sm:$0xff] %v8919_v2 }
 0x13d   :  { %1677 = vmatpush.bf16.msra.mxu1 %v8714_v29  ;;  %1691 = vmatpush.bf16.msra.mxu2 %v8729_v8  ;;  %12248 = vst [vmem:[#allocation126_spill] sm:$0xff] %v8925_v31 }
 0x13e   :  { %1705 = vmatpush.bf16.msra.mxu3 %v12241_v25  ;;  %1664 = vmatpush.bf16.msra.mxu0 %v12243_v47 }
 0x141   :  { %1678 = vmatpush.bf16.msra.mxu1 %v8747_v19  ;;  %1692 = vmatpush.bf16.msra.mxu2 %v8763_v4  ;;  %v8927_v62 = vpop.f32.mrf.mxu1  ;;  %v12278_v19 = vld [vmem:[#allocation90_spill] sm:$0xff] }
 0x142   :  { %1706 = vmatpush.bf16.msra.mxu3 %v8765_v44  ;;  %1665 = vmatpush.bf16.msra.mxu0 %v8768_v48  ;;  %12249 = vst [vmem:[#allocation127_spill] sm:$0xff] %v8927_v62  ;;  %v8929_v59 = vpop.f32.mrf.mxu3 }
 0x143   :  { %12250 = vst [vmem:[#allocation128_spill] sm:$0xff] %v8929_v59  ;;  %v8935_v2 = vpop.f32.mrf.mxu2 }
 0x144   :  { %12251 = vst [vmem:[#allocation129_spill] sm:$0xff] %v8935_v2 }
 0x145   :  { %1679 = vmatpush.bf16.msra.mxu1 %v8771_v11  ;;  %1693 = vmatpush.bf16.msra.mxu2 %v8783_v24  ;;  %v12276_v11 = vld [vmem:[#allocation49_spill] sm:$0xff] }
 0x146   :  { %1707 = vmatpush.bf16.msra.mxu3 %v8785_v30  ;;  %1666 = vmatpush.bf16.msra.mxu0 %v8789_v6  ;;  %v12272_v6 = vld [vmem:[#allocation79_spill] sm:$0xff]  ;;  %v12273_v30 = vld [vmem:[#allocation80_spill] sm:$0xff] }
 0x149   :  { %1680 = vmatpush.bf16.msra.mxu1 %v8791_v33  ;;  %1694 = vmatpush.bf16.msra.mxu2 %v8795_v15  ;;  %v8937_v33 = vpop.f32.mrf.mxu0  ;;  %v8939_v15 = vpop.f32.mrf.mxu1 }
 0x14a   :  { %1708 = vmatpush.bf16.msra.mxu3 %v8797_v32  ;;  %1667 = vmatpush.bf16.msra.mxu0 %v8801_v10  ;;  %12252 = vst [vmem:[#allocation130_spill] sm:$0xff] %v8937_v33  ;;  %v8941_v32 = vpop.f32.mrf.mxu3 }
 0x14b   :  { %12253 = vst [vmem:[#allocation131_spill] sm:$0xff] %v8939_v15  ;;  %v8943_v31 = vpop.f32.mrf.mxu2 }
 0x14c   :  { %12254 = vst [vmem:[#allocation132_spill] sm:$0xff] %v8941_v32 }
 0x14d   :  { %1681 = vmatpush.bf16.msra.mxu1 %v8803_v63  ;;  %1695 = vmatpush.bf16.msra.mxu2 %v8809_v35  ;;  %12255 = vst [vmem:[#allocation133_spill] sm:$0xff] %v8943_v31 }
 0x14e   :  { %1709 = vmatpush.bf16.msra.mxu3 %v8811_v17 }
 0x151   :  { %v8945_v62 = vpop.f32.mrf.mxu0  ;;  %v8947_v59 = vpop.f32.mrf.mxu1 }
 0x152   :  { %12256 = vst [vmem:[#allocation134_spill] sm:$0xff] %v8945_v62  ;;  %v8949_v10 = vpop.f32.mrf.mxu3 }
 0x153   :  { %12257 = vst [vmem:[#allocation135_spill] sm:$0xff] %v8947_v59  ;;  %v8951_v63 = vpop.f32.mrf.mxu2 }
 0x154   :  { %12258 = vst [vmem:[#allocation136_spill] sm:$0xff] %v8949_v10 }
 0x155   :  { %12259 = vst [vmem:[#allocation137_spill] sm:$0xff] %v8951_v63 }
 0x159   :  { %v8953_v35 = vpop.f32.mrf.mxu0  ;;  %v8955_v17 = vpop.f32.mrf.mxu1 }
 0x15a   :  { %12260 = vst [vmem:[#allocation138_spill] sm:$0xff] %v8953_v35  ;;  %v8957_v2 = vpop.f32.mrf.mxu3 }
 0x15b   :  { %12261 = vst [vmem:[#allocation139_spill] sm:$0xff] %v8955_v17  ;;  %v8959_v33 = vpop.f32.mrf.mxu2 }
 0x15c   :  { %12262 = vst [vmem:[#allocation140_spill] sm:$0xff] %v8957_v2 }
 0x15d   :  { %12263 = vst [vmem:[#allocation141_spill] sm:$0xff] %v8959_v33 }
 0x161   :  { %v8961_v15 = vpop.f32.mrf.mxu0  ;;  %v8963_v32 = vpop.f32.mrf.mxu1 }
 0x162   :  { %12264 = vst [vmem:[#allocation142_spill] sm:$0xff] %v8961_v15  ;;  %v8965_v31 = vpop.f32.mrf.mxu3 }
 0x163   :  { %12265 = vst [vmem:[#allocation143_spill] sm:$0xff] %v8963_v32  ;;  %v8967_v62 = vpop.f32.mrf.mxu2  ;;  %v12275_v32 = vld [vmem:[#allocation47_spill] sm:$0xff] }
 0x164   :  { %12266 = vst [vmem:[#allocation144_spill] sm:$0xff] %v8965_v31 }
 0x165   :  { %12267 = vst [vmem:[#allocation145_spill] sm:$0xff] %v8967_v62 }
 0x169   :  { %v8969_v59 = vpop.f32.mrf.mxu0  ;;  %v8971_v10 = vpop.f32.mrf.mxu1 }
 0x16a   :  { %12268 = vst [vmem:[#allocation146_spill] sm:$0xff] %v8969_v59  ;;  %v8973_v63 = vpop.f32.mrf.mxu3 }
 0x16b   :  { %12269 = vst [vmem:[#allocation147_spill] sm:$0xff] %v8971_v10  ;;  %v8975_v35 = vpop.f32.mrf.mxu2 }
 0x16c   :  { %12270 = vst [vmem:[#allocation148_spill] sm:$0xff] %v8973_v63  ;;  %v12277_v63 = vld [vmem:[#allocation89_spill] sm:$0xff] }
 0x16d   :  { %12271 = vst [vmem:[#allocation149_spill] sm:$0xff] %v8975_v35 }
 0x172   :  { %v8979_v24 = vpop.f32.mrf.mxu3 }
 0x173   :  { %12274 = vst [vmem:[#allocation79_spill] sm:$0xff] %v8979_v24 }
 0x184   :  { %v1224_v17 = vpop.f32.mrf.mxu0  ;;  %v1238_v2 = vpop.f32.mrf.mxu1 }
 0x185   :  { %v1327_v33 = vadd.f32 %v1224_v17, %v12272_v6  ;;  %v1328_v15 = vadd.f32 %v1238_v2, %v12273_v30  ;;  %v12279_v6 = vld [vmem:[#allocation91_spill] sm:$0xff]  ;;  %v12280_v30 = vld [vmem:[#allocation52_spill] sm:$0xff] }
 0x187   :  { %v1335_v31 = vadd.f32 %v1327_v33, %v12275_v32  ;;  %v1336_v62 = vadd.f32 %v1328_v15, %v12276_v11 }
 0x189   :  { %v6497_v48 = vmul.f32 -1.442695, %v1335_v31  ;;  %v6498_v59 = vmul.f32 -1.442695, %v1336_v62 }
 0x18b   :  { %7476 = vpow2.f32 %v6497_v48  ;;  %v1252_v10 = vpop.f32.mrf.mxu2  ;;  %v1266_v62 = vpop.f32.mrf.mxu3 }
 0x18c   :  { %7478 = vpow2.f32 %v6498_v59  ;;  %v1329_v44 = vadd.f32 %v1252_v10, %v12277_v63  ;;  %v1226_v35 = vpop.f32.mrf.mxu0  ;;  %v1240_v4 = vpop.f32.mrf.mxu1 }
 0x18d   :  { %v1331_v47 = vadd.f32 %v1226_v35, %v12278_v19  ;;  %v1332_v17 = vadd.f32 %v1240_v4, %v12279_v6  ;;  %v8992_v19 = vld [vmem:[%s11891_s5] sm:$0xf] }
 0x18e   :  { %v1337_v2 = vadd.f32 %v1329_v44, %v12280_v30  ;;  %v12281_v44 = vld [vmem:[#allocation94_spill] sm:$0xff]  ;;  %v9017_v23 = vperm.slane %v8992_v19, 2 }
 0x18f   :  { %v1339_v24 = vadd.f32 %v1331_v47, %v12275_v32  ;;  %v1340_v33 = vadd.f32 %v1332_v17, %v12276_v11  ;;  %v1330_v35 = vadd.f32 %v1266_v62, %v12281_v44  ;;  %v12283_v11 = vld [vmem:[#allocation58_spill] sm:$0xff]  ;;  %v9007_v44 = vperm.slane %v8992_v19, 1 }
 0x190   :  { %v6499_v15 = vmul.f32 -1.442695, %v1337_v2  ;;  %12285 = vst [vmem:[#allocation90_spill] sm:$0xff] %v9017_v23 }
 0x191   :  { %v7477_v31 = vpop.eup %7476  ;;  %v6500_v48 = vmul.f32 -1.442695, %v1339_v24  ;;  %v6501_v10 = vmul.f32 -1.442695, %v1340_v33  ;;  %v8997_v24 = vperm.slane %v8992_v19, 0  ;;  %12284 = vst [vmem:[#allocation89_spill] sm:$0xff] %v9007_v44 }
 0x192   :  { %v7479_v25 = vpop.eup %7478  ;;  %v1369_v59 = vadd.f32 1.0, %v7477_v31  ;;  %7480 = vpow2.f32 %v6499_v15 }
 0x193   :  { %v1370_v63 = vadd.f32 1.0, %v7479_v25  ;;  %7482 = vpow2.f32 %v6500_v48  ;;  %v1254_v8 = vpop.f32.mrf.mxu2  ;;  %12282 = vst [vmem:[#allocation80_spill] sm:$0xff] %v8997_v24 }
 0x194   :  { %7484 = vrcp.f32 %v1369_v59  ;;  %v1333_v4 = vadd.f32 %v1254_v8, %v8805_v36  ;;  %v1280_v6 = vpop.f32.mrf.mxu0  ;;  %v1338_v8 = vadd.f32 %v1330_v35, %v12283_v11  ;;  %v1268_v36 = vpop.f32.mrf.mxu3  ;;  %vm1380_vm11 = vweird.f32 %v1369_v59 }
 0x195   :  { %7486 = vrcp.f32 %v1370_v63  ;;  %v1343_v62 = vadd.f32 %v1280_v6, %v8997_v24  ;;  %v1294_v40 = vpop.f32.mrf.mxu1  ;;  %v1399_v28 = vand.u32 2147483647, %v1370_v63  ;;  %v1334_v6 = vadd.f32 %v1268_v36, %v8819_v61 }
 0x196   :  { %7488 = vpow2.f32 %v6501_v10  ;;  %v1341_v25 = vadd.f32 %v1333_v4, %v12280_v30  ;;  %v1386_v30 = vand.u32 2147483648, %v1369_v59  ;;  %vm1395_vm10 = vweird.f32 %v1370_v63 }
 0x197   :  { %v6503_v41 = vmul.f32 -1.442695, %v1343_v62  ;;  %vm1400_vm15 = vcmp.eq.f32.partialorder %v1399_v28, 8.507059e+37 }
 0x198   :  { %v7481_v47 = vpop.eup %7480  ;;  %v6502_v31 = vmul.f32 -1.442695, %v1341_v25  ;;  %v1387_v36 = vor.u32 1.1754944e-38, %v1386_v30 }
 0x199   :  { %v7483_v17 = vpop.eup %7482  ;;  %v9000_v2 = vadd.f32 1.0, %v7481_v47  ;;  %v1384_v47 = vand.u32 2147483647, %v1369_v59 }
 0x19a   :  { %v7485_v33 = vpop.eup %7484  ;;  %v9002_v15 = vadd.f32 1.0, %v7483_v17  ;;  %v1401_v17 = vand.u32 2147483648, %v1370_v63 }
 0x19b   :  { %v7487_v48 = vpop.eup %7486  ;;  %v1376_v10 = vmul.f32 %v7485_v33, %v1369_v59  ;;  %7490 = vrcp.f32 %v9000_v2  ;;  %vm1381_vm8 = vweird.f32 %v7485_v33  ;;  %vm9025_vm13 = vcmp.eq.f32.partialorder %v1384_v47, 8.507059e+37  ;;  %v1308_v62 = vpop.f32.mrf.mxu2 }
 0x19c   :  { %v7489_v32 = vpop.eup %7488  ;;  %v1391_v4 = vmul.f32 %v7487_v48, %v1370_v63  ;;  %7492 = vrcp.f32 %v9002_v15  ;;  %vm1396_vm9 = vweird.f32 %v7487_v48  ;;  %vm9021_vm12 = vmor %vm1380_vm11, %vm1381_vm8  ;;  %v1342_v63 = vadd.f32 %v1334_v6, %v12283_v11  ;;  %v1282_v12 = vpop.f32.mrf.mxu0 }
 0x19d   :  { %v1377_v29 = vsub.f32 1.0, %v1376_v10  ;;  %v9011_v25 = vadd.f32 1.0, %v7489_v32  ;;  %7494 = vpow2.f32 %v6502_v31  ;;  %v1344_v10 = vadd.f32 %v1294_v40, %v9007_v44  ;;  %vm9030_vm14 = vmor %vm1395_vm10, %vm1396_vm9 }
 0x19e   :  { %v1392_v35 = vsub.f32 1.0, %v1391_v4  ;;  %v1402_v31 = vor.u32 1.1754944e-38, %v1401_v17  ;;  %vm1425_vm0 = vweird.f32 %v9002_v15  ;;  %v1345_v28 = vadd.f32 %v1308_v62, %v9017_v23 }
 0x19f   :  { %v1378_v21 = vmul.f32 %v7485_v33, %v1377_v29  ;;  %7496 = vrcp.f32 %v9011_v25  ;;  %v6504_v30 = vmul.f32 -1.442695, %v1344_v10  ;;  %v1446_v29 = vand.u32 2147483648, %v9011_v25 }
 0x1a0   :  { %v1393_v16 = vmul.f32 %v7487_v48, %v1392_v35  ;;  %7498 = vtanh.f32 %v1338_v8  ;;  %v1429_v10 = vand.u32 2147483647, %v9002_v15  ;;  %v1431_v61 = vand.u32 2147483648, %v9002_v15 }
 0x1a1   :  { %v1379_v32 = vadd.f32 %v7485_v33, %v1378_v21  ;;  %v9019_v4 = vpop.eup %7490  ;;  %7500 = vpow2.f32 %v6503_v41  ;;  %vm1440_vm2 = vweird.f32 %v9011_v25  ;;  %v1447_v54 = vor.u32 1.1754944e-38, %v1446_v29  ;;  %v1296_v29 = vpop.f32.mrf.mxu1 }
 0x1a2   :  { %v1394_v40 = vadd.f32 %v7487_v48, %v1393_v16  ;;  %v7493_v35 = vpop.eup %7492  ;;  %v1406_v41 = vmul.f32 %v9019_v4, %v9000_v2  ;;  %vm9056_vm4 = vcmp.eq.f32.partialorder %v1429_v10, 8.507059e+37  ;;  %vm1411_vm8 = vweird.f32 %v9019_v4 }
 0x1a3   :  { %v1383_v59 = vsel %vm9021_vm12, %v7485_v33, %v1379_v32  ;;  %v7495_v8 = vpop.eup %7494  ;;  %v1421_v16 = vmul.f32 %v7493_v35, %v9002_v15  ;;  %vm1426_vm1 = vweird.f32 %v7493_v35  ;;  %vm1410_vm9 = vweird.f32 %v9000_v2 }
 0x1a4   :  { %v1398_v47 = vsel %vm9030_vm14, %v7487_v48, %v1394_v40  ;;  %v1388_v45 = vsel %vm9025_vm13, %v1387_v36, %v1383_v59  ;;  %v9044_v33 = vadd.f32 1.0, %v7495_v8  ;;  %v1444_v36 = vand.u32 2147483647, %v9011_v25  ;;  %v12292_v8 = vld [vmem:[#allocation70_spill] sm:$0xff]  ;;  %vm9065_vm5 = vmor %vm1425_vm0, %vm1426_vm1 }
 0x1a5   :  { %v7497_v17 = vpop.eup %7496  ;;  %v1403_v6 = vsel %vm1400_vm15, %v1402_v31, %v1398_v47  ;;  %v1422_v48 = vsub.f32 1.0, %v1421_v16  ;;  %v6505_v47 = vmul.f32 -1.442695, %v1345_v28  ;;  %v1407_v16 = vsub.f32 1.0, %v1406_v41  ;;  %vm9115_vm11 = vmor %vm1410_vm9, %vm1411_vm8 }
 0x1a6   :  { %v1436_v32 = vmul.f32 %v7497_v17, %v9011_v25  ;;  %v7499_v40 = vpop.eup %7498  ;;  %7502 = vrcp.f32 %v9044_v33  ;;  %v1467_v11 = vmul.f32 %v1403_v6, %v12292_v8  ;;  %vm1441_vm3 = vweird.f32 %v7497_v17 }
 0x1a7   :  { %v1469_v21 = vmul.f32 %v7499_v40, %v1388_v45  ;;  %7504 = vtanh.f32 %v1342_v63  ;;  %v7501_v62 = vpop.eup %7500  ;;  %v1423_v31 = vmul.f32 %v7493_v35, %v1422_v48  ;;  %vm9069_vm6 = vcmp.eq.f32.partialorder %v1444_v36, 8.507059e+37  ;;  %vm1442_vm7 = vmor %vm1440_vm2, %vm1441_vm3 }
 0x1a8   :  { %v1437_v59 = vsub.f32 1.0, %v1436_v32  ;;  %7506 = vpow2.f32 %v6504_v30  ;;  %v9060_v45 = vadd.f32 1.0, %v7501_v62  ;;  %v1432_v30 = vor.u32 1.1754944e-38, %v1431_v61  ;;  %v12300_v62 = vld [vmem:[#allocation78_spill] sm:$0xff] }
 0x1a9   :  { %v1424_v58 = vadd.f32 %v7493_v35, %v1423_v31  ;;  %7508 = vpow2.f32 %v6505_v47  ;;  %v9075_v48 = vadd.f32 %v1469_v21, %v1467_v11  ;;  %v1408_v40 = vmul.f32 %v9019_v4, %v1407_v16 }
 0x1aa   :  { %v1438_v57 = vmul.f32 %v7497_v17, %v1437_v59  ;;  %7510 = vrcp.f32 %v9060_v45  ;;  %v1414_v25 = vand.u32 2147483647, %v9000_v2  ;;  %v1348_v21 = vadd.f32 %v1296_v29, %v9007_v44  ;;  %v7303_v44 = vld [vmem:[#allocation8 + $0xc4] sm:$0xf] }
 0x1ab   :  { %12299 = vst [vmem:[#allocation91_spill] sm:$0xff] %v9075_v48  ;;  %v1428_v15 = vsel %vm9065_vm5, %v7493_v35, %v1424_v58  ;;  %7512 = vtanh.f32 %v9075_v48  ;;  %v1459_v20 = vand.u32 2147483647, %v9044_v33  ;;  %vm1455_vm13 = vweird.f32 %v9044_v33 }
 0x1ac   :  { %v1439_v28 = vadd.f32 %v7497_v17, %v1438_v57  ;;  %v9073_v6 = vpop.eup %7502  ;;  %v1347_v57 = vadd.f32 %v1282_v12, %v8997_v24  ;;  %v1433_v11 = vsel %vm9056_vm4, %v1432_v30, %v1428_v15  ;;  %v1416_v12 = vand.u32 2147483648, %v9000_v2  ;;  %v1322_v30 = vpop.f32.mrf.mxu3  ;;  %v7310_v2 = vld [vmem:[#allocation8 + $0xf4] sm:$0xf0]  ;;  %v6609_v24 = vld [vmem:[#allocation8 + $0xd0] sm:$0xf0] }
 0x1ad   :  { %v7505_v32 = vpop.eup %7504  ;;  %v1451_v10 = vmul.f32 %v9073_v6, %v9044_v33  ;;  %vm1456_vm10 = vweird.f32 %v9073_v6  ;;  %v6507_v41 = vmul.f32 -1.442695, %v1348_v21  ;;  %v1461_v15 = vand.u32 2147483648, %v9044_v33 }
 0x1ae   :  { %v1443_v61 = vsel %vm1442_vm7, %v7497_v17, %v1439_v28  ;;  %v7507_v36 = vpop.eup %7506  ;;  %v1470_v35 = vmul.f32 %v7505_v32, %v1433_v11  ;;  %v6506_v17 = vmul.f32 -1.442695, %v1347_v57  ;;  %v1310_v32 = vpop.f32.mrf.mxu2  ;;  %vm9119_vm12 = vcmp.eq.f32.partialorder %v1414_v25, 8.507059e+37  ;;  %vm9130_vm14 = vmor %vm1455_vm13, %vm1456_vm10 }
 0x1af   :  { %v1448_v58 = vsel %vm9069_vm6, %v1447_v54, %v1443_v61  ;;  %v1452_v59 = vsub.f32 1.0, %v1451_v10  ;;  %v9094_v31 = vadd.f32 1.0, %v7507_v36  ;;  %v7509_v47 = vpop.eup %7508  ;;  %v1409_v54 = vadd.f32 %v9019_v4, %v1408_v40 }
 0x1b0   :  { %v1468_v8 = vmul.f32 %v1448_v58, %v12300_v62  ;;  %v9104_v28 = vpop.eup %7510  ;;  %v1417_v10 = vor.u32 1.1754944e-38, %v1416_v12  ;;  %v9125_v11 = vperm.slane %v8992_v19, 3  ;;  %vm9134_vm15 = vcmp.eq.f32.partialorder %v1459_v20, 8.507059e+37  ;;  %v6623_v20 = vld [vmem:[#allocation8 + $0xe0] sm:$0xf] }
 0x1b1   :  { %v1453_v16 = vmul.f32 %v9073_v6, %v1452_v59  ;;  %7514 = vrcp.f32 %v9094_v31  ;;  %v1502_v57 = vmul.f32 %v9104_v28, %v9060_v45  ;;  %v1413_v61 = vsel %vm9115_vm11, %v9019_v4, %v1409_v54  ;;  %v7513_v21 = vpop.eup %7512 }
 0x1b2   :  { %v9101_v63 = vadd.f32 %v1470_v35, %v1468_v8  ;;  %7516 = vpow2.f32 %v6506_v17  ;;  %12306 = vst [vmem:[#allocation70_spill] sm:$0xff] %v9125_v11  ;;  %v9138_v35 = vadd.f32 1.0, %v7509_v47  ;;  %v1510_v33 = vand.u32 2147483647, %v9060_v45  ;;  %v7309_v17 = vld [vmem:[#allocation8 + $0xec] sm:$0xf0] }
 0x1b3   :  { %v1454_v29 = vadd.f32 %v9073_v6, %v1453_v16  ;;  %v1503_v25 = vsub.f32 1.0, %v1502_v57  ;;  %v1349_v4 = vadd.f32 %v1310_v32, %v9017_v23  ;;  %v1462_v59 = vor.u32 1.1754944e-38, %v1461_v15  ;;  %v6625_v57 = vld [vmem:[#allocation8 + $0xf0] sm:$0xf0] }
 0x1b4   :  { %12301 = vst [vmem:[#allocation94_spill] sm:$0xff] %v9101_v63  ;;  %7518 = vtanh.f32 %v9101_v63  ;;  %v1512_v8 = vand.u32 2147483648, %v9060_v45  ;;  %v1418_v54 = vsel %vm9119_vm12, %v1417_v10, %v1413_v61  ;;  %v1346_v16 = vadd.f32 %v1322_v30, %v9125_v11  ;;  %v7308_v30 = vld [vmem:[#allocation8 + $0xec] sm:$0xf] }
 0x1b5   :  { %v1458_v19 = vsel %vm9130_vm14, %v9073_v6, %v1454_v29  ;;  %7520 = vpow2.f32 %v6507_v41  ;;  %v1504_v62 = vmul.f32 %v9104_v28, %v1503_v25  ;;  %v6508_v41 = vmul.f32 -1.442695, %v1349_v4  ;;  %v7307_v29 = vld [vmem:[#allocation8 + $0xe4] sm:$0xf]  ;;  %v6631_v25 = vld [vmem:[#allocation8 + $0xe8] sm:$0xf] }
 0x1b6   :  { %v1475_v15 = vmul.f32 %v7513_v21, %v1418_v54  ;;  %v1463_v40 = vsel %vm9134_vm15, %v1462_v59, %v1458_v19  ;;  %7522 = vrcp.f32 %v9138_v35  ;;  %v1527_v63 = vand.u32 2147483648, %v9094_v31  ;;  %v6633_v4 = vld [vmem:[#allocation8 + $0xf8] sm:$0xf0]  ;;  %v1324_v21 = vpop.f32.mrf.mxu3 }
 0x1b7   :  { %v9145_v12 = vpop.eup %7514  ;;  %7524 = vpow2.f32 %v6508_v41  ;;  %v1505_v23 = vadd.f32 %v9104_v28, %v1504_v62  ;;  %vm1507_vm0 = vweird.f32 %v9104_v28  ;;  %v1525_v58 = vand.u32 2147483647, %v9094_v31  ;;  %v6607_v41 = vld [vmem:[#allocation8 + $0xc0] sm:$0xf] }
 0x1b8   :  { %v7517_v47 = vpop.eup %7516  ;;  %v1517_v6 = vmul.f32 %v9145_v12, %v9094_v31  ;;  %v9167_v54 = vor.u32 %v7309_v17, %v6623_v20  ;;  %vm1506_vm1 = vweird.f32 %v9060_v45  ;;  %v9176_v48 = vor.u32 %v7308_v30, %v6633_v4  ;;  %v6591_v30 = vld [vmem:[#allocation8 + $0xa0] sm:$0xf]  ;;  %v7301_v4 = vld [vmem:[#allocation8 + $0xac] sm:$0xf0] }
 0x1b9   :  { %v9157_v36 = vadd.f32 1.0, %v7517_v47  ;;  %vm9182_vm2 = vmor %vm1506_vm1, %vm1507_vm0  ;;  %vm9186_vm3 = vcmp.eq.f32.partialorder %v1510_v33, 8.507059e+37  ;;  %v1513_v45 = vor.u32 1.1754944e-38, %v1512_v8  ;;  %v6615_v33 = vld [vmem:[#allocation8 + $0xc8] sm:$0xf]  ;;  %vm1522_vm4 = vweird.f32 %v9145_v12 }
 0x1ba   :  { %v7519_v32 = vpop.eup %7518  ;;  %v1518_v61 = vsub.f32 1.0, %v1517_v6  ;;  %12311 = vst [vmem:[#allocation78_spill] sm:$0xff] %v9167_v54  ;;  %v9169_v6 = vor.u32 %v7307_v29, %v6625_v57  ;;  %v1350_v29 = vadd.f32 %v1324_v21, %v9125_v11  ;;  %v7306_v8 = vld [vmem:[#allocation8 + $0xd4] sm:$0xf0]  ;;  %v7299_v21 = vld [vmem:[#allocation8 + $0xa4] sm:$0xf]  ;;  %vm1521_vm6 = vweird.f32 %v9094_v31 }
 0x1bb   :  { %v1476_v10 = vmul.f32 %v7519_v32, %v1463_v40  ;;  %7526 = vrcp.f32 %v9157_v36  ;;  %v7521_v19 = vpop.eup %7520  ;;  %v7305_v32 = vld [vmem:[#allocation8 + $0xcc] sm:$0xf0]  ;;  %v9174_v40 = vor.u32 %v7310_v2, %v6631_v25  ;;  %12314 = vst [vmem:[#allocation152_spill] sm:$0xff] %v9176_v48  ;;  %v7304_v25 = vld [vmem:[#allocation8 + $0xcc] sm:$0xf]  ;;  %vm9211_vm5 = vcmp.eq.f32.partialorder %v1525_v58, 8.507059e+37  ;;  %vm9230_vm7 = vmor %vm1521_vm6, %vm1522_vm4 }
 0x1bc   :  { %v1519_v47 = vmul.f32 %v9145_v12, %v1518_v61  ;;  %12312 = vst [vmem:[#allocation150_spill] sm:$0xff] %v9169_v6  ;;  %v9172_v62 = vadd.f32 1.0, %v7521_v19  ;;  %v9193_v57 = vpop.eup %7522  ;;  %v6617_v2 = vld [vmem:[#allocation8 + $0xd8] sm:$0xf0]  ;;  %v7302_v58 = vld [vmem:[#allocation8 + $0xb4] sm:$0xf0]  ;;  %v9242_v17 = vor.u32 %v7306_v8, %v6615_v33  ;;  %vm1551_vm8 = vweird.f32 %v9157_v36 }
 0x1bd   :  { %v9164_v59 = vpack.c.bf16 %v1476_v10, %v1475_v15  ;;  %12313 = vst [vmem:[#allocation151_spill] sm:$0xff] %v9174_v40  ;;  %v9178_v15 = vor.u32 1.1754944e-38, %v1527_v63  ;;  %v1509_v63 = vsel %vm9182_vm2, %v9104_v28, %v1505_v23  ;;  %v7525_v10 = vpop.eup %7524  ;;  %v9205_v23 = vor.u32 %v7305_v32, %v6607_v41  ;;  %v6593_v41 = vld [vmem:[#allocation8 + $0xb0] sm:$0xf0]  ;;  %v6599_v32 = vld [vmem:[#allocation8 + $0xa8] sm:$0xf] }
 0x1be   :  { %7528 = vrcp.f32 %v9172_v62  ;;  %v1520_v61 = vadd.f32 %v9145_v12, %v1519_v47  ;;  %v9207_v28 = vor.u32 %v7303_v44, %v6609_v24  ;;  %v9215_v47 = vadd.f32 1.0, %v7525_v10  ;;  %v6601_v10 = vld [vmem:[#allocation8 + $0xb8] sm:$0xf0]  ;;  %12325 = vst [vmem:[#allocation155_spill] sm:$0xff] %v9242_v17 }
 0x1bf   :  { %1612 = vmatmul.bf16.vlgmr.msrb.gmra.mxu0 %v9164_v59  ;;  %1626 = vmatmul.bf16.vlgmr.msrb.gmra.mxu1 %v9164_v59  ;;  %12319 = vst [vmem:[#allocation153_spill] sm:$0xff] %v9205_v23  ;;  %7530 = vtanh.f32 %v1346_v16  ;;  %v9222_v24 = vmul.f32 %v9193_v57, %v9138_v35  ;;  %v7300_v16 = vld [vmem:[#allocation8 + $0xac] sm:$0xf]  ;;  %v1555_v31 = vand.u32 2147483647, %v9157_v36  ;;  %v1572_v7 = vand.u32 2147483648, %v9172_v62 }
 0x1c0   :  { %1640 = vmatmul.bf16.vlgmr.msrb.gmra.mxu2 %v9164_v59  ;;  %1654 = vmatmul.bf16.vlgmr.msrb.gmra.mxu3 %v9164_v59  ;;  %12320 = vst [vmem:[#allocation154_spill] sm:$0xff] %v9207_v28  ;;  %7532 = vtanh.f32 %v1350_v29  ;;  %v1524_v29 = vsel %vm9230_vm7, %v9145_v12, %v1520_v61  ;;  %v9250_v3 = vor.u32 %v7301_v4, %v6591_v30  ;;  %v6577_v12 = vld [vmem:[#allocation8 + $0x90] sm:$0xf0]  ;;  %v6583_v61 = vld [vmem:[#allocation8 + $0x88] sm:$0xf]  ;;  %vm1566_vm13 = vweird.f32 %v9172_v62 }
 0x1c1   :  { %1901 = vmatpush.bf16.msrb.mxu0 %v9167_v54  ;;  %1915 = vmatpush.bf16.msrb.mxu1 %v9169_v6  ;;  %v9209_v19 = vpop.eup %7526  ;;  %7534 = vrcp.f32 %v9215_v47  ;;  %v1557_v6 = vand.u32 2147483648, %v9157_v36  ;;  %v6575_v54 = vld [vmem:[#allocation8 + $0x80] sm:$0xf]  ;;  %v7296_v30 = vld [vmem:[#allocation8 + $0x8c] sm:$0xf]  ;;  %vm9265_vm10 = vcmp.eq.f32.partialorder %v1555_v31, 8.507059e+37  ;;  %vm1537_vm0 = vweird.f32 %v9193_v57 }
 0x1c2   :  { %1929 = vmatpush.bf16.msrb.mxu2 %v9174_v40  ;;  %1943 = vmatpush.bf16.msrb.mxu3 %v9176_v48  ;;  %v1547_v44 = vmul.f32 %v9209_v19, %v9157_v36  ;;  %v1514_v40 = vsel %vm9186_vm3, %v1513_v45, %v1509_v63  ;;  %v9244_v45 = vor.u32 %v7304_v25, %v6617_v2  ;;  %v7297_v63 = vld [vmem:[#allocation8 + $0x8c] sm:$0xf0]  ;;  %vm1552_vm9 = vweird.f32 %v9209_v19  ;;  %v7298_v2 = vld [vmem:[#allocation8 + $0x94] sm:$0xf0]  ;;  %v6585_v4 = vld [vmem:[#allocation8 + $0x98] sm:$0xf0] }
 0x1c3   :  { %12327 = vst [vmem:[#allocation157_spill] sm:$0xff] %v9250_v3  ;;  %v9252_v48 = vor.u32 %v7299_v21, %v6593_v41  ;;  %v9260_v25 = vor.u32 %v7302_v58, %v6599_v32  ;;  %v1529_v41 = vsel %vm9211_vm5, %v9178_v15, %v1524_v29  ;;  %v9274_v58 = vor.u32 %v7297_v63, %v6575_v54  ;;  %v6559_v15 = vld [vmem:[#allocation8 + $0x60] sm:$0xf]  ;;  %vm9284_vm11 = vmor %vm1551_vm8, %vm1552_vm9  ;;  %v7293_v54 = vld [vmem:[#allocation8 + $0x6c] sm:$0xf0] }
 0x1c4   :  { %v1548_v11 = vsub.f32 1.0, %v1547_v44  ;;  %12326 = vst [vmem:[#allocation156_spill] sm:$0xff] %v9244_v45  ;;  %v9246_v37 = vpop.eup %7528  ;;  %v9291_v31 = vor.u32 %v7296_v30, %v6585_v4  ;;  %v7292_v4 = vld [vmem:[#allocation8 + $0x6c] sm:$0xf]  ;;  %v7289_v44 = vld [vmem:[#allocation8 + $0x4c] sm:$0xf0]  ;;  %vm1536_vm2 = vweird.f32 %v9138_v35  ;;  %vm1581_vm4 = vweird.f32 %v9215_v47 }
 0x1c5   :  { %1902 = vmatpush.bf16.msrb.mxu0 %v9205_v23  ;;  %1916 = vmatpush.bf16.msrb.mxu1 %v9207_v28  ;;  %12328 = vst [vmem:[#allocation158_spill] sm:$0xff] %v9252_v48  ;;  %v1562_v33 = vmul.f32 %v9246_v37, %v9172_v62  ;;  %v7531_v21 = vpop.eup %7530  ;;  %v9269_v28 = vor.u32 %v7300_v16, %v6601_v10  ;;  %v1570_v16 = vand.u32 2147483647, %v9172_v62  ;;  %vm1567_vm12 = vweird.f32 %v9246_v37  ;;  %vm9366_vm3 = vmor %vm1536_vm2, %vm1537_vm0 }
 0x1c6   :  { %v1549_v8 = vmul.f32 %v9209_v19, %v1548_v11  ;;  %1930 = vmatpush.bf16.msrb.mxu2 %v9242_v17  ;;  %1944 = vmatpush.bf16.msrb.mxu3 %v9244_v45  ;;  %v1558_v11 = vor.u32 1.1754944e-38, %v1557_v6  ;;  %v7533_v17 = vpop.eup %7532  ;;  %v9276_v45 = vor.u32 %v7295_v55, %v6577_v12  ;;  %v9289_v10 = vor.u32 %v7298_v2, %v6583_v61  ;;  %v7291_v55 = vld [vmem:[#allocation8 + $0x64] sm:$0xf]  ;;  %v6561_v12 = vld [vmem:[#allocation8 + $0x70] sm:$0xf0]  ;;  %vm9311_vm14 = vmor %vm1566_vm13, %vm1567_vm12 }
 0x1c7   :  { %v1563_v23 = vsub.f32 1.0, %v1562_v33  ;;  %v9278_v20 = vpop.eup %7534  ;;  %v6567_v61 = vld [vmem:[#allocation8 + $0x68] sm:$0xf]  ;;  %v7294_v33 = vld [vmem:[#allocation8 + $0x74] sm:$0xf0]  ;;  %v1593_v2 = vmul.f32 0.0, %v1529_v41 }
 0x1c8   :  { %v1550_v32 = vadd.f32 %v9209_v19, %v1549_v8  ;;  %v1577_v63 = vmul.f32 %v9278_v20, %v9215_v47  ;;  %v1533_v8 = vsub.f32 1.0, %v9222_v24  ;;  %vm9315_vm15 = vcmp.eq.f32.partialorder %v1570_v16, 8.507059e+37  ;;  %v6543_v41 = vld [vmem:[#allocation8 + $0x40] sm:$0xf]  ;;  %v7283_v24 = vld [vmem:[#allocation8 + $0x24] sm:$0xf] }
 0x1c9   :  { %1903 = vmatpush.bf16.msrb.mxu0 %v9250_v3  ;;  %1917 = vmatpush.bf16.msrb.mxu1 %v9252_v48  ;;  %v1564_v29 = vmul.f32 %v9246_v37, %v1563_v23  ;;  %v1595_v23 = vmul.f32 %v7531_v21, %v1514_v40  ;;  %v6569_v48 = vld [vmem:[#allocation8 + $0x78] sm:$0xf0]  ;;  %v9319_v21 = vor.u32 %v7293_v54, %v6559_v15  ;;  %v6545_v15 = vld [vmem:[#allocation8 + $0x50] sm:$0xf0]  ;;  %v6551_v54 = vld [vmem:[#allocation8 + $0x48] sm:$0xf]  ;;  %vm1582_vm1 = vweird.f32 %v9278_v20 }
 0x1ca   :  { %v1554_v36 = vsel %vm9284_vm11, %v9209_v19, %v1550_v32  ;;  %1931 = vmatpush.bf16.msrb.mxu2 %v9260_v25  ;;  %1945 = vmatpush.bf16.msrb.mxu3 %v9269_v28  ;;  %v1573_v19 = vor.u32 1.1754944e-38, %v1572_v7  ;;  %v1578_v32 = vsub.f32 1.0, %v1577_v63  ;;  %v9321_v7 = vor.u32 %v7291_v55, %v6561_v12  ;;  %v7287_v63 = vld [vmem:[#allocation8 + $0x44] sm:$0xf]  ;;  %v6529_v40 = vld [vmem:[#allocation8 + $0x30] sm:$0xf0]  ;;  %vm9375_vm5 = vmor %vm1581_vm4, %vm1582_vm1 }
 0x1cb   :  { %v1559_v30 = vsel %vm9265_vm10, %v1558_v11, %v1554_v36  ;;  %v1565_v6 = vadd.f32 %v9246_v37, %v1564_v29  ;;  %v9323_v62 = vor.u32 %v7294_v33, %v6567_v61  ;;  %v9330_v16 = vor.u32 %v7292_v4, %v6569_v48  ;;  %v6553_v61 = vld [vmem:[#allocation8 + $0x58] sm:$0xf0] }
 0x1cc   :  { %12337 = vst [vmem:[#allocation159_spill] sm:$0xff] %v9321_v7  ;;  %v1596_v29 = vmul.f32 %v7533_v17, %v1559_v30  ;;  %v9332_v55 = vadd.f32 %v1595_v23, %v1593_v2  ;;  %v1579_v36 = vmul.f32 %v9278_v20, %v1578_v32  ;;  %v7288_v17 = vld [vmem:[#allocation8 + $0x4c] sm:$0xf]  ;;  %v1534_v48 = vmul.f32 %v9193_v57, %v1533_v8  ;;  %v6527_v8 = vld [vmem:[#allocation8 + $0x20] sm:$0xf] }
 0x1cd   :  { %1904 = vmatpush.bf16.msrb.mxu0 %v9274_v58  ;;  %1918 = vmatpush.bf16.msrb.mxu1 %v9276_v45  ;;  %12338 = vst [vmem:[#allocation160_spill] sm:$0xff] %v9323_v62  ;;  %v1569_v11 = vsel %vm9311_vm14, %v9246_v37, %v1565_v6  ;;  %v7290_v37 = vld [vmem:[#allocation8 + $0x54] sm:$0xf0]  ;;  %v1540_v33 = vand.u32 2147483647, %v9138_v35  ;;  %v1542_v2 = vand.u32 2147483648, %v9138_v35  ;;  %v9347_v23 = vor.u32 %v7289_v44, %v6543_v41 }
 0x1ce   :  { %1932 = vmatpush.bf16.msrb.mxu2 %v9289_v10  ;;  %1946 = vmatpush.bf16.msrb.mxu3 %v9291_v31  ;;  %12339 = vst [vmem:[#allocation161_spill] sm:$0xff] %v9330_v16  ;;  %v1574_v12 = vsel %vm9315_vm15, %v1573_v19, %v1569_v11  ;;  %v9349_v4 = vor.u32 %v7287_v63, %v6545_v15  ;;  %v7285_v19 = vld [vmem:[#allocation8 + $0x2c] sm:$0xf0]  ;;  %v6535_v41 = vld [vmem:[#allocation8 + $0x28] sm:$0xf]  ;;  %7536 = vtanh.f32 %v9332_v55  ;;  %v12363_v35 = vld [vmem:[#allocation60_spill] sm:$0xff] }
 0x1cf   :  { %1668 = vmatmul.bf16.vlgmr.msra.gmra.mxu0 %v9164_v59  ;;  %1682 = vmatmul.bf16.vlgmr.msra.gmra.mxu1 %v9164_v59  ;;  %v1594_v30 = vmul.f32 0.0, %v1574_v12  ;;  %12340 = vst [vmem:[#allocation162_spill] sm:$0xff] %v9347_v23  ;;  %v9358_v6 = vor.u32 %v7288_v17, %v6553_v61  ;;  %v1580_v44 = vadd.f32 %v9278_v20, %v1579_v36  ;;  %v7286_v11 = vld [vmem:[#allocation8 + $0x34] sm:$0xf0]  ;;  %v6537_v63 = vld [vmem:[#allocation8 + $0x38] sm:$0xf0] }
 0x1d0   :  { %1696 = vmatmul.bf16.vlgmr.msra.gmra.mxu2 %v9164_v59  ;;  %1710 = vmatmul.bf16.vlgmr.msra.gmra.mxu3 %v9164_v59  ;;  %12341 = vst [vmem:[#allocation163_spill] sm:$0xff] %v9349_v4  ;;  %v9356_v59 = vor.u32 %v7290_v37, %v6551_v54  ;;  %v1535_v15 = vadd.f32 %v9193_v57, %v1534_v48  ;;  %v1587_v12 = vand.u32 2147483648, %v9215_v47  ;;  %v1585_v36 = vand.u32 2147483647, %v9215_v47  ;;  %v6511_v61 = vld [vmem:[#allocation8] sm:$0xf] }
 0x1d1   :  { %1905 = vmatpush.bf16.msrb.mxu0 %v9319_v21  ;;  %1919 = vmatpush.bf16.msrb.mxu1 %v9321_v7  ;;  %v9352_v32 = vadd.f32 %v1596_v29, %v1594_v30  ;;  %12344 = vst [vmem:[#allocation166_spill] sm:$0xff] %v9358_v6  ;;  %v7284_v29 = vld [vmem:[#allocation8 + $0x2c] sm:$0xf]  ;;  %v9382_v37 = vor.u32 %v7285_v19, %v6527_v8  ;;  %v7281_v48 = vld [vmem:[#allocation8 + $0xc] sm:$0xf0]  ;;  %vm1541_vm7 = vcmp.eq.f32.partialorder %v1540_v33, 8.507059e+37 }
 0x1d2   :  { %1933 = vmatpush.bf16.msrb.mxu2 %v9323_v62  ;;  %1947 = vmatpush.bf16.msrb.mxu3 %v9330_v16  ;;  %12343 = vst [vmem:[#allocation165_spill] sm:$0xff] %v9356_v59  ;;  %v9384_v17 = vor.u32 %v7283_v24, %v6529_v40  ;;  %v9388_v30 = vor.u32 %v7286_v11, %v6535_v41  ;;  %v7279_v62 = vld [vmem:[#allocation8 + $0x4] sm:$0xf]  ;;  %v6513_v47 = vld [vmem:[#allocation8 + $0x10] sm:$0xf0]  ;;  %v1588_v19 = vor.u32 1.1754944e-38, %v1587_v12 }
 0x1d3   :  { %12342 = vst [vmem:[#allocation164_spill] sm:$0xff] %v9352_v32  ;;  %7538 = vtanh.f32 %v9352_v32  ;;  %v9390_v16 = vor.u32 %v7284_v29, %v6537_v63  ;;  %v6519_v32 = vld [vmem:[#allocation8 + $0x8] sm:$0xf]  ;;  %v7280_v7 = vld [vmem:[#allocation8 + $0xc] sm:$0xf]  ;;  %v1584_v8 = vsel %vm9375_vm5, %v9278_v20, %v1580_v44  ;;  %v1539_v24 = vsel %vm9366_vm3, %v9193_v57, %v1535_v15 }
 0x1d4   :  { %12349 = vst [vmem:[#allocation167_spill] sm:$0xff] %v9382_v37  ;;  %v7537_v40 = vpop.eup %7536  ;;  %v1543_v41 = vor.u32 1.1754944e-38, %v1542_v2  ;;  %v9400_v11 = vor.u32 %v7281_v48, %v6511_v61  ;;  %v9402_v29 = vor.u32 %v7279_v62, %v6513_v47  ;;  %vm1586_vm6 = vcmp.eq.f32.partialorder %v1585_v36, 8.507059e+37  ;;  %v12358_v33 = vld [vmem:[#allocation54_spill] sm:$0xff]  ;;  %v12362_v12 = vld [vmem:[#allocation59_spill] sm:$0xff]  ;;  %v12365_v61 = vld [vmem:[#allocation64_spill] sm:$0xff] }
 0x1d5   :  { %1906 = vmatpush.bf16.msrb.mxu0 %v9347_v23  ;;  %1920 = vmatpush.bf16.msrb.mxu1 %v9349_v4  ;;  %12350 = vst [vmem:[#allocation168_spill] sm:$0xff] %v9384_v17  ;;  %v7282_v23 = vld [vmem:[#allocation8 + $0x14] sm:$0xf0]  ;;  %v6521_v4 = vld [vmem:[#allocation8 + $0x18] sm:$0xf0]  ;;  %v1589_v2 = vsel %vm1586_vm6, %v1588_v19, %v1584_v8  ;;  %v12364_v36 = vld [vmem:[#allocation63_spill] sm:$0xff] }
 0x1d6   :  { %1934 = vmatpush.bf16.msrb.mxu2 %v9356_v59  ;;  %1948 = vmatpush.bf16.msrb.mxu3 %v9358_v6  ;;  %12351 = vst [vmem:[#allocation169_spill] sm:$0xff] %v9388_v30  ;;  %v9406_v20 = vor.u32 %v7282_v23, %v6519_v32  ;;  %v9408_v57 = vor.u32 %v7280_v7, %v6521_v4  ;;  %v12357_v7 = vld [vmem:[#allocation53_spill] sm:$0xff]  ;;  %v12359_v23 = vld [vmem:[#allocation55_spill] sm:$0xff]  ;;  %v12360_v4 = vld [vmem:[#allocation56_spill] sm:$0xff] }
 0x1d7   :  { %12352 = vst [vmem:[#allocation170_spill] sm:$0xff] %v9390_v16  ;;  %v1544_v44 = vsel %vm1541_vm7, %v1543_v41, %v1539_v24  ;;  %v12361_v32 = vld [vmem:[#allocation57_spill] sm:$0xff]  ;;  %v12367_v47 = vld [vmem:[#allocation62_spill] sm:$0xff]  ;;  %v12370_v24 = vld [vmem:[#allocation67_spill] sm:$0xff] }
 0x1d8   :  { %12353 = vst [vmem:[#allocation171_spill] sm:$0xff] %v9400_v11  ;;  %v1601_v54 = vmul.f32 %v7537_v40, %v1544_v44  ;;  %v12366_v48 = vld [vmem:[#allocation61_spill] sm:$0xff]  ;;  %v12369_v19 = vld [vmem:[#allocation66_spill] sm:$0xff]  ;;  %v12371_v40 = vld [vmem:[#allocation68_spill] sm:$0xff] }
 0x1d9   :  { %1907 = vmatpush.bf16.msrb.mxu0 %v9382_v37  ;;  %1921 = vmatpush.bf16.msrb.mxu1 %v9384_v17  ;;  %12354 = vst [vmem:[#allocation172_spill] sm:$0xff] %v9402_v29  ;;  %v7539_v63 = vpop.eup %7538  ;;  %v12368_v8 = vld [vmem:[#allocation65_spill] sm:$0xff] }
 0x1da   :  { %1935 = vmatpush.bf16.msrb.mxu2 %v9388_v30  ;;  %1949 = vmatpush.bf16.msrb.mxu3 %v9390_v16  ;;  %12355 = vst [vmem:[#allocation173_spill] sm:$0xff] %v9406_v20  ;;  %v1602_v15 = vmul.f32 %v7539_v63, %v1589_v2  ;;  %v12372_v41 = vld [vmem:[#allocation69_spill] sm:$0xff]  ;;  %v12373_v63 = vld [vmem:[#allocation71_spill] sm:$0xff]  ;;  %v12374_v2 = vld [vmem:[#allocation72_spill] sm:$0xff] }
 0x1db   :  { %12356 = vst [vmem:[#allocation174_spill] sm:$0xff] %v9408_v57  ;;  %v12375_v44 = vld [vmem:[#allocation73_spill] sm:$0xff] }
 0x1dc   :  { %v1740_v62 = vpack.c.bf16 %v1602_v15, %v1601_v54  ;;  %v12376_v15 = vld [vmem:[#allocation74_spill] sm:$0xff]  ;;  %v12377_v54 = vld [vmem:[#allocation75_spill] sm:$0xff] }
 0x1dd   :  { %1908 = vmatpush.bf16.msrb.mxu0 %v9400_v11  ;;  %1922 = vmatpush.bf16.msrb.mxu1 %v9402_v29 }
 0x1de   :  { %1936 = vmatpush.bf16.msrb.mxu2 %v9406_v20  ;;  %1950 = vmatpush.bf16.msrb.mxu3 %v9408_v57 }
 0x1e0   :  { %1909 = vmatmul.bf16.vlgmr.msrb.gmra.mxu0 %v1740_v62  ;;  %1923 = vmatmul.bf16.vlgmr.msrb.gmra.mxu1 %v1740_v62 }
 0x1e1   :  { %2218 = vmatpush.bf16.msra.mxu0 %v8462_v38  ;;  %2232 = vmatpush.bf16.msra.mxu1 %v8464_v39 }
 0x1e2   :  { %1937 = vmatmul.bf16.vlgmr.msrb.gmra.mxu2 %v1740_v62  ;;  %1951 = vmatmul.bf16.vlgmr.msrb.gmra.mxu3 %v1740_v62  ;;  %v12378_v62 = vld [vmem:[#allocation76_spill] sm:$0xff] }
 0x1e3   :  { %2246 = vmatpush.bf16.msra.mxu2 %v8466_v42  ;;  %2260 = vmatpush.bf16.msra.mxu3 %v8470_v50 }
 0x1e5   :  { %2219 = vmatpush.bf16.msra.mxu0 %v8472_v51  ;;  %2233 = vmatpush.bf16.msra.mxu1 %v8475_v52 }
 0x1e7   :  { %2247 = vmatpush.bf16.msra.mxu2 %v8477_v53  ;;  %2261 = vmatpush.bf16.msra.mxu3 %v8481_v56 }
 0x1e9   :  { %2220 = vmatpush.bf16.msra.mxu0 %v8485_v60  ;;  %2234 = vmatpush.bf16.msra.mxu1 %v8488_v0 }
 0x1eb   :  { %2248 = vmatpush.bf16.msra.mxu2 %v8490_v1  ;;  %2262 = vmatpush.bf16.msra.mxu3 %v8495_v5 }
 0x1ed   :  { %2221 = vmatpush.bf16.msra.mxu0 %v8498_v9  ;;  %2235 = vmatpush.bf16.msra.mxu1 %v8500_v13  ;;  %v12415_v9 = vld [vmem:[#allocation89_spill] sm:$0xff] }
 0x1ef   :  { %2249 = vmatpush.bf16.msra.mxu2 %v8502_v14  ;;  %2263 = vmatpush.bf16.msra.mxu3 %v8507_v18 }
 0x1f1   :  { %2222 = vmatpush.bf16.msra.mxu0 %v8510_v22  ;;  %2236 = vmatpush.bf16.msra.mxu1 %v8512_v26  ;;  %v12409_v26 = vld [vmem:[#allocation112_spill] sm:$0xff] }
 0x1f3   :  { %2250 = vmatpush.bf16.msra.mxu2 %v8514_v27  ;;  %2264 = vmatpush.bf16.msra.mxu3 %v8519_v34 }
 0x1f5   :  { %2223 = vmatpush.bf16.msra.mxu0 %v8527_v43  ;;  %2237 = vmatpush.bf16.msra.mxu1 %v8532_v46 }
 0x1f7   :  { %2251 = vmatpush.bf16.msra.mxu2 %v8535_v49  ;;  %2265 = vmatpush.bf16.msra.mxu3 %v12357_v7 }
 0x1f9   :  { %2224 = vmatpush.bf16.msra.mxu0 %v12358_v33  ;;  %2238 = vmatpush.bf16.msra.mxu1 %v12359_v23  ;;  %v12404_v33 = vld [vmem:[#allocation107_spill] sm:$0xff] }
 0x1fb   :  { %2252 = vmatpush.bf16.msra.mxu2 %v12360_v4  ;;  %2266 = vmatpush.bf16.msra.mxu3 %v12361_v32  ;;  %v12403_v4 = vld [vmem:[#allocation106_spill] sm:$0xff] }
 0x1fd   :  { %2225 = vmatpush.bf16.msra.mxu0 %v12362_v12  ;;  %2239 = vmatpush.bf16.msra.mxu1 %v12363_v35 }
 0x1ff   :  { %2253 = vmatpush.bf16.msra.mxu2 %v12366_v48  ;;  %2267 = vmatpush.bf16.msra.mxu3 %v12367_v47  ;;  %v12400_v47 = vld [vmem:[#allocation47_spill] sm:$0xff]  ;;  %v12401_v48 = vld [vmem:[#allocation49_spill] sm:$0xff] }
 0x201   :  { %2274 = vmatpush.bf16.msrb.mxu0 %v12364_v36  ;;  %2288 = vmatpush.bf16.msrb.mxu1 %v12365_v61  ;;  %v12398_v61 = vld [vmem:[#allocation103_spill] sm:$0xff]  ;;  %v12399_v36 = vld [vmem:[#allocation104_spill] sm:$0xff] }
 0x203   :  { %2302 = vmatpush.bf16.msrb.mxu2 %v12368_v8  ;;  %2316 = vmatpush.bf16.msrb.mxu3 %v12369_v19  ;;  %v12379_v8 = vld [vmem:[#allocation77_spill] sm:$0xff] }
 0x204   :  { %v12380_v19 = vld [vmem:[#allocation81_spill] sm:$0xff] }
 0x205   :  { %2275 = vmatpush.bf16.msrb.mxu0 %v12370_v24  ;;  %2289 = vmatpush.bf16.msrb.mxu1 %v12371_v40  ;;  %v12381_v24 = vld [vmem:[#allocation82_spill] sm:$0xff]  ;;  %v12382_v40 = vld [vmem:[#allocation83_spill] sm:$0xff] }
 0x207   :  { %2303 = vmatpush.bf16.msrb.mxu2 %v12372_v41  ;;  %2317 = vmatpush.bf16.msrb.mxu3 %v12373_v63  ;;  %v12383_v41 = vld [vmem:[#allocation84_spill] sm:$0xff]  ;;  %v12384_v63 = vld [vmem:[#allocation85_spill] sm:$0xff] }
 0x209   :  { %2276 = vmatpush.bf16.msrb.mxu0 %v12374_v2  ;;  %2290 = vmatpush.bf16.msrb.mxu1 %v12375_v44  ;;  %v12385_v2 = vld [vmem:[#allocation86_spill] sm:$0xff]  ;;  %v12386_v44 = vld [vmem:[#allocation87_spill] sm:$0xff] }
 0x20b   :  { %2304 = vmatpush.bf16.msrb.mxu2 %v12376_v15  ;;  %2318 = vmatpush.bf16.msrb.mxu3 %v12377_v54  ;;  %v12387_v15 = vld [vmem:[#allocation88_spill] sm:$0xff] }
 0x20c   :  { %v12388_v54 = vld [vmem:[#allocation92_spill] sm:$0xff] }
 0x20d   :  { %2277 = vmatpush.bf16.msrb.mxu0 %v12378_v62  ;;  %2291 = vmatpush.bf16.msrb.mxu1 %v12379_v8  ;;  %v12389_v62 = vld [vmem:[#allocation93_spill] sm:$0xff]  ;;  %v12390_v8 = vld [vmem:[#allocation95_spill] sm:$0xff] }
 0x20f   :  { %2305 = vmatpush.bf16.msrb.mxu2 %v12380_v19  ;;  %2319 = vmatpush.bf16.msrb.mxu3 %v12381_v24  ;;  %v12391_v19 = vld [vmem:[#allocation96_spill] sm:$0xff]  ;;  %v12392_v24 = vld [vmem:[#allocation97_spill] sm:$0xff] }
 0x211   :  { %2278 = vmatpush.bf16.msrb.mxu0 %v12382_v40  ;;  %2292 = vmatpush.bf16.msrb.mxu1 %v12383_v41  ;;  %v12393_v40 = vld [vmem:[#allocation98_spill] sm:$0xff]  ;;  %v12394_v41 = vld [vmem:[#allocation99_spill] sm:$0xff] }
 0x213   :  { %2306 = vmatpush.bf16.msrb.mxu2 %v12384_v63  ;;  %2320 = vmatpush.bf16.msrb.mxu3 %v12385_v2  ;;  %v12395_v63 = vld [vmem:[#allocation100_spill] sm:$0xff]  ;;  %v12396_v2 = vld [vmem:[#allocation101_spill] sm:$0xff] }
 0x215   :  { %2279 = vmatpush.bf16.msrb.mxu0 %v12386_v44  ;;  %2293 = vmatpush.bf16.msrb.mxu1 %v12387_v15  ;;  %v12397_v44 = vld [vmem:[#allocation102_spill] sm:$0xff] }
 0x217   :  { %2307 = vmatpush.bf16.msrb.mxu2 %v12388_v54  ;;  %2321 = vmatpush.bf16.msrb.mxu3 %v12389_v62 }
 0x219   :  { %2280 = vmatpush.bf16.msrb.mxu0 %v12390_v8  ;;  %2294 = vmatpush.bf16.msrb.mxu1 %v12391_v19 }
 0x21b   :  { %2308 = vmatpush.bf16.msrb.mxu2 %v12392_v24  ;;  %2322 = vmatpush.bf16.msrb.mxu3 %v12393_v40 }
 0x21d   :  { %2281 = vmatpush.bf16.msrb.mxu0 %v12394_v41  ;;  %2295 = vmatpush.bf16.msrb.mxu1 %v12395_v63  ;;  %v12402_v63 = vld [vmem:[#allocation105_spill] sm:$0xff] }
 0x21f   :  { %2309 = vmatpush.bf16.msrb.mxu2 %v12396_v2  ;;  %2323 = vmatpush.bf16.msrb.mxu3 %v12397_v44 }
 0x23c   :  { %v1613_v15 = vpop.f32.mrf.mxu0  ;;  %v1627_v54 = vpop.f32.mrf.mxu1 }
 0x23d   :  { %v1716_v62 = vadd.f32 %v1613_v15, %v12398_v61  ;;  %v1717_v8 = vadd.f32 %v1627_v54, %v12399_v36  ;;  %v12405_v15 = vld [vmem:[#allocation52_spill] sm:$0xff] }
 0x23f   :  { %v1724_v19 = vadd.f32 %v1716_v62, %v12400_v47  ;;  %v1725_v24 = vadd.f32 %v1717_v8, %v12401_v48 }
 0x241   :  { %v6637_v35 = vmul.f32 -1.442695, %v1724_v19  ;;  %v6638_v40 = vmul.f32 -1.442695, %v1725_v24 }
 0x243   :  { %7540 = vpow2.f32 %v6637_v35  ;;  %v1641_v41 = vpop.f32.mrf.mxu2  ;;  %v1655_v12 = vpop.f32.mrf.mxu3 }
 0x244   :  { %7542 = vpow2.f32 %v6638_v40  ;;  %v1718_v2 = vadd.f32 %v1641_v41, %v12402_v63  ;;  %v1615_v32 = vpop.f32.mrf.mxu0  ;;  %v1629_v44 = vpop.f32.mrf.mxu1 }
 0x245   :  { %v1720_v23 = vadd.f32 %v1615_v32, %v12403_v4  ;;  %v1721_v61 = vadd.f32 %v1629_v44, %v12404_v33 }
 0x246   :  { %v1726_v36 = vadd.f32 %v1718_v2, %v12405_v15  ;;  %v12406_v2 = vld [vmem:[#allocation109_spill] sm:$0xff] }
 0x247   :  { %v1728_v54 = vadd.f32 %v1720_v23, %v12400_v47  ;;  %v1729_v8 = vadd.f32 %v1721_v61, %v12401_v48  ;;  %v12407_v61 = vld [vmem:[#allocation108_spill] sm:$0xff] }
 0x248   :  { %v6639_v19 = vmul.f32 -1.442695, %v1726_v36  ;;  %v1719_v36 = vadd.f32 %v1655_v12, %v12407_v61 }
 0x249   :  { %v7541_v24 = vpop.eup %7540  ;;  %v6640_v35 = vmul.f32 -1.442695, %v1728_v54  ;;  %v6641_v40 = vmul.f32 -1.442695, %v1729_v8 }
 0x24a   :  { %v7543_v62 = vpop.eup %7542  ;;  %v1983_v7 = vadd.f32 1.0, %v7541_v24  ;;  %7544 = vpow2.f32 %v6639_v19 }
 0x24b   :  { %v1984_v41 = vadd.f32 1.0, %v7543_v62  ;;  %7546 = vpow2.f32 %v6640_v35  ;;  %v1643_v63 = vpop.f32.mrf.mxu2  ;;  %v1657_v4 = vpop.f32.mrf.mxu3 }
 0x24c   :  { %7548 = vrcp.f32 %v1983_v7  ;;  %v1669_v33 = vpop.f32.mrf.mxu0  ;;  %v1683_v32 = vpop.f32.mrf.mxu1  ;;  %v1722_v23 = vadd.f32 %v1643_v63, %v12406_v2  ;;  %v1998_v61 = vand.u32 2147483647, %v1983_v7  ;;  %v2000_v43 = vand.u32 2147483648, %v1983_v7 }
 0x24d   :  { %7550 = vrcp.f32 %v1984_v41  ;;  %vm1994_vm10 = vweird.f32 %v1983_v7  ;;  %vm2009_vm11 = vweird.f32 %v1984_v41  ;;  %v1733_v5 = vadd.f32 %v1683_v32, %v12415_v9 }
 0x24e   :  { %7552 = vpow2.f32 %v6641_v40  ;;  %v1730_v54 = vadd.f32 %v1722_v23, %v12405_v15  ;;  %v12408_v40 = vld [vmem:[#allocation58_spill] sm:$0xff]  ;;  %v2015_v15 = vand.u32 2147483648, %v1984_v41  ;;  %vm9516_vm13 = vcmp.eq.f32.partialorder %v1998_v61, 8.507059e+37 }
 0x24f   :  { %v1727_v63 = vadd.f32 %v1719_v36, %v12408_v40  ;;  %v2013_v36 = vand.u32 2147483647, %v1984_v41 }
 0x250   :  { %v7545_v44 = vpop.eup %7544  ;;  %v6642_v35 = vmul.f32 -1.442695, %v1730_v54  ;;  %v2016_v13 = vor.u32 1.1754944e-38, %v2015_v15 }
 0x251   :  { %v7547_v48 = vpop.eup %7546  ;;  %v9491_v24 = vadd.f32 1.0, %v7545_v44  ;;  %vm2014_vm15 = vcmp.eq.f32.partialorder %v2013_v36, 8.507059e+37 }
 0x252   :  { %v7549_v8 = vpop.eup %7548  ;;  %v9493_v19 = vadd.f32 1.0, %v7547_v48 }
 0x253   :  { %v7551_v62 = vpop.eup %7550  ;;  %v1990_v47 = vmul.f32 %v7549_v8, %v1983_v7  ;;  %7554 = vrcp.f32 %v9491_v24  ;;  %v9497_v2 = vpop.f32.mrf.mxu2  ;;  %vm1995_vm8 = vweird.f32 %v7549_v8  ;;  %vm2024_vm5 = vweird.f32 %v9491_v24 }
 0x254   :  { %v7553_v49 = vpop.eup %7552  ;;  %v2005_v46 = vmul.f32 %v7551_v62, %v1984_v41  ;;  %7556 = vrcp.f32 %v9493_v19  ;;  %v9502_v44 = vpop.f32.mrf.mxu0  ;;  %vm2010_vm9 = vweird.f32 %v7551_v62  ;;  %vm9512_vm12 = vmor %vm1994_vm10, %vm1995_vm8  ;;  %vm2039_vm0 = vweird.f32 %v9493_v19 }
 0x255   :  { %v1991_v12 = vsub.f32 1.0, %v1990_v47  ;;  %v9500_v23 = vadd.f32 1.0, %v7553_v49  ;;  %v9504_v48 = vpop.f32.mrf.mxu1  ;;  %7558 = vpow2.f32 %v6642_v35  ;;  %v9506_v34 = vpop.f32.mrf.mxu3  ;;  %v1723_v49 = vadd.f32 %v1657_v4, %v12409_v26  ;;  %vm2011_vm14 = vmor %vm2009_vm11, %vm2010_vm9 }
 0x256   :  { %v2006_v54 = vsub.f32 1.0, %v2005_v46  ;;  %v2043_v35 = vand.u32 2147483647, %v9493_v19 }
 0x257   :  { %v1992_v27 = vmul.f32 %v7549_v8, %v1991_v12  ;;  %7560 = vrcp.f32 %v9500_v23  ;;  %v2001_v12 = vor.u32 1.1754944e-38, %v2000_v43  ;;  %v1731_v61 = vadd.f32 %v1723_v49, %v12408_v40 }
 0x258   :  { %v2007_v47 = vmul.f32 %v7551_v62, %v2006_v54  ;;  %7562 = vtanh.f32 %v1727_v63  ;;  %v2058_v0 = vand.u32 2147483647, %v9500_v23  ;;  %vm2054_vm2 = vweird.f32 %v9500_v23 }
 0x259   :  { %v1993_v22 = vadd.f32 %v7549_v8, %v1992_v27  ;;  %v9510_v18 = vpop.eup %7554  ;;  %v12414_v27 = vld [vmem:[#allocation80_spill] sm:$0xff]  ;;  %vm9546_vm4 = vcmp.eq.f32.partialorder %v2043_v35, 8.507059e+37 }
 0x25a   :  { %v2008_v14 = vadd.f32 %v7551_v62, %v2007_v47  ;;  %v7557_v54 = vpop.eup %7556  ;;  %v1732_v7 = vadd.f32 %v1669_v33, %v12414_v27  ;;  %v2020_v15 = vmul.f32 %v9510_v18, %v9491_v24  ;;  %v2060_v47 = vand.u32 2147483648, %v9500_v23 }
 0x25b   :  { %v1997_v26 = vsel %vm9512_vm12, %v7549_v8, %v1993_v22  ;;  %v7559_v41 = vpop.eup %7558  ;;  %v2035_v63 = vmul.f32 %v7557_v54, %v9493_v19  ;;  %v9526_v1 = vpop.f32.mrf.mxu2  ;;  %vm2040_vm1 = vweird.f32 %v7557_v54  ;;  %vm2059_vm8 = vcmp.eq.f32.partialorder %v2058_v0, 8.507059e+37 }
 0x25c   :  { %v2012_v4 = vsel %vm2011_vm14, %v7551_v62, %v2008_v14  ;;  %v2002_v22 = vsel %vm9516_vm13, %v2001_v12, %v1997_v26  ;;  %v9532_v36 = vadd.f32 1.0, %v7559_v41  ;;  %v12416_v12 = vld [vmem:[#allocation91_spill] sm:$0xff]  ;;  %v2021_v14 = vsub.f32 1.0, %v2020_v15  ;;  %vm2041_vm6 = vmor %vm2039_vm0, %vm2040_vm1 }
 0x25d   :  { %v7561_v43 = vpop.eup %7560  ;;  %v2017_v8 = vsel %vm2014_vm15, %v2016_v13, %v2012_v4  ;;  %v2036_v33 = vsub.f32 1.0, %v2035_v63  ;;  %v1910_v32 = vpop.f32.mrf.mxu0  ;;  %v2045_v13 = vand.u32 2147483648, %v9493_v19  ;;  %v2061_v56 = vor.u32 1.1754944e-38, %v2060_v47 }
 0x25e   :  { %v2050_v62 = vmul.f32 %v7561_v43, %v9500_v23  ;;  %v1924_v49 = vpop.f32.mrf.mxu1  ;;  %v7563_v46 = vpop.eup %7562  ;;  %7564 = vrcp.f32 %v9532_v36  ;;  %v2081_v26 = vmul.f32 %v2017_v8, %v12416_v12  ;;  %vm2055_vm3 = vweird.f32 %v7561_v43  ;;  %v12419_v8 = vld [vmem:[#allocation90_spill] sm:$0xff] }
 0x25f   :  { %v2083_v41 = vmul.f32 %v7563_v46, %v2002_v22  ;;  %7566 = vtanh.f32 %v1731_v61  ;;  %v9542_v63 = vpop.f32.mrf.mxu3  ;;  %v2037_v40 = vmul.f32 %v7557_v54, %v2036_v33  ;;  %v2046_v22 = vor.u32 1.1754944e-38, %v2045_v13  ;;  %vm2056_vm7 = vmor %vm2054_vm2, %vm2055_vm3 }
 0x260   :  { %v2051_v4 = vsub.f32 1.0, %v2050_v62  ;;  %v1734_v61 = vadd.f32 %v9497_v2, %v12419_v8  ;;  %v1957_v62 = vadd.f32 %v1910_v32, %v1732_v7  ;;  %v1958_v46 = vadd.f32 %v1924_v49, %v1733_v5  ;;  %v12420_v49 = vld [vmem:[#allocation94_spill] sm:$0xff] }
 0x261   :  { %v2038_v53 = vadd.f32 %v7557_v54, %v2037_v40  ;;  %v9553_v15 = vadd.f32 %v2083_v41, %v2081_v26  ;;  %v2022_v40 = vmul.f32 %v9510_v18, %v2021_v14  ;;  %v1736_v2 = vadd.f32 %v9502_v44, %v12414_v27 }
 0x262   :  { %v2052_v60 = vmul.f32 %v7561_v43, %v2051_v4  ;;  %v1737_v7 = vadd.f32 %v9504_v48, %v12415_v9  ;;  %v6643_v0 = vmul.f32 -1.442695, %v1957_v62  ;;  %vm2025_vm9 = vweird.f32 %v9510_v18 }
 0x263   :  { %v2042_v35 = vsel %vm2041_vm6, %v7557_v54, %v2038_v53  ;;  %v6644_v54 = vmul.f32 -1.442695, %v1958_v46  ;;  %7568 = vtanh.f32 %v9553_v15  ;;  %vm9587_vm11 = vmor %vm2024_vm5, %vm2025_vm9  ;;  %vm2069_vm12 = vweird.f32 %v9532_v36 }
 0x264   :  { %v2053_v33 = vadd.f32 %v7561_v43, %v2052_v60  ;;  %v9557_v47 = vpop.eup %7564  ;;  %v2047_v60 = vsel %vm9546_vm4, %v2046_v22, %v2042_v35  ;;  %7570 = vpow2.f32 %v6643_v0  ;;  %v2075_v35 = vand.u32 2147483648, %v9532_v36 }
 0x265   :  { %v1938_v13 = vpop.f32.mrf.mxu2  ;;  %v7567_v12 = vpop.eup %7566  ;;  %v2065_v19 = vmul.f32 %v9557_v47, %v9532_v36  ;;  %7572 = vpow2.f32 %v6644_v54  ;;  %vm2070_vm10 = vweird.f32 %v9557_v47 }
 0x266   :  { %v2057_v5 = vsel %vm2056_vm7, %v7561_v43, %v2053_v33  ;;  %v1912_v14 = vpop.f32.mrf.mxu0  ;;  %v1926_v23 = vpop.f32.mrf.mxu1  ;;  %v2084_v53 = vmul.f32 %v7567_v12, %v2047_v60  ;;  %v1959_v41 = vadd.f32 %v1938_v13, %v1734_v61  ;;  %v2023_v33 = vadd.f32 %v9510_v18, %v2022_v40  ;;  %vm9594_vm13 = vmor %vm2069_vm12, %vm2070_vm10 }
 0x267   :  { %v2062_v32 = vsel %vm2059_vm8, %v2061_v56, %v2057_v5  ;;  %v2066_v44 = vsub.f32 1.0, %v2065_v19  ;;  %v1961_v52 = vadd.f32 %v1912_v14, %v1736_v2  ;;  %v1962_v43 = vadd.f32 %v1926_v23, %v1737_v7  ;;  %v1952_v22 = vpop.f32.mrf.mxu3  ;;  %v12427_v5 = vld [vmem:[#allocation78_spill] sm:$0xff] }
 0x268   :  { %v2082_v26 = vmul.f32 %v2062_v32, %v12420_v49  ;;  %v6645_v56 = vmul.f32 -1.442695, %v1959_v41  ;;  %v1738_v2 = vadd.f32 %v9526_v1, %v12419_v8  ;;  %v2028_v40 = vand.u32 2147483647, %v9491_v24 }
 0x269   :  { %v2067_v4 = vmul.f32 %v9557_v47, %v2066_v44  ;;  %v6646_v62 = vmul.f32 -1.442695, %v1961_v52  ;;  %v6647_v46 = vmul.f32 -1.442695, %v1962_v43  ;;  %v2073_v12 = vand.u32 2147483647, %v9532_v36  ;;  %v7569_v60 = vpop.eup %7568 }
 0x26a   :  { %v9574_v48 = vadd.f32 %v2084_v53, %v2082_v26  ;;  %v7571_v7 = vpop.eup %7570  ;;  %v2027_v14 = vsel %vm9587_vm11, %v9510_v18, %v2023_v33  ;;  %v12425_v32 = vand.u32 2147483648, %v9491_v24  ;;  %v2076_v0 = vor.u32 1.1754944e-38, %v2075_v35 }
 0x26b   :  { %v2068_v61 = vadd.f32 %v9557_v47, %v2067_v4  ;;  %v7573_v36 = vpop.eup %7572  ;;  %v9606_v54 = vadd.f32 1.0, %v7571_v7  ;;  %vm2029_vm14 = vcmp.eq.f32.partialorder %v2028_v40, 8.507059e+37  ;;  %vm2074_vm15 = vcmp.eq.f32.partialorder %v2073_v12, 8.507059e+37  ;;  %v12426_v4 = vld [vmem:[#allocation70_spill] sm:$0xff] }
 0x26c   :  { %7574 = vtanh.f32 %v9574_v48  ;;  %v2031_v53 = vor.u32 1.1754944e-38, %v12425_v32  ;;  %v9608_v44 = vadd.f32 1.0, %v7573_v36  ;;  %v1739_v35 = vadd.f32 %v9542_v63, %v12426_v4 }
 0x26d   :  { %7576 = vpow2.f32 %v6645_v56  ;;  %v1940_v19 = vpop.f32.mrf.mxu2  ;;  %v2072_v23 = vsel %vm9594_vm13, %v9557_v47, %v2068_v61  ;;  %v1735_v56 = vadd.f32 %v9506_v34, %v12426_v4  ;;  %vm2120_vm1 = vweird.f32 %v9606_v54 }
 0x26e   :  { %7578 = vpow2.f32 %v6646_v62  ;;  %v1963_v1 = vadd.f32 %v1940_v19, %v1738_v2  ;;  %v2032_v41 = vsel %vm2029_vm14, %v2031_v53, %v2027_v14  ;;  %v2077_v18 = vsel %vm2074_vm15, %v2076_v0, %v2072_v23  ;;  %v12429_v14 = vld [vmem:[#allocation151_spill] sm:$0xff]  ;;  %v12430_v23 = vld [vmem:[#allocation152_spill] sm:$0xff] }
 0x26f   :  { %7580 = vpow2.f32 %v6647_v46  ;;  %v2089_v47 = vmul.f32 %v7569_v60, %v2032_v41  ;;  %v1954_v62 = vpop.f32.mrf.mxu3  ;;  %v1960_v13 = vadd.f32 %v1952_v22, %v1735_v56  ;;  %v2124_v22 = vand.u32 2147483647, %v9606_v54 }
 0x270   :  { %v6648_v49 = vmul.f32 -1.442695, %v1963_v1  ;;  %7582 = vrcp.f32 %v9606_v54  ;;  %v1964_v12 = vadd.f32 %v1954_v62, %v1739_v35  ;;  %v2126_v60 = vand.u32 2147483648, %v9606_v54  ;;  %v12428_v1 = vld [vmem:[#allocation150_spill] sm:$0xff]  ;;  %v12435_v35 = vld [vmem:[#allocation155_spill] sm:$0xff] }
 0x271   :  { %7584 = vrcp.f32 %v9608_v44  ;;  %v2141_v53 = vand.u32 2147483648, %v9608_v44  ;;  %v2139_v0 = vand.u32 2147483647, %v9608_v44  ;;  %vm2135_vm0 = vweird.f32 %v9608_v44 }
 0x272   :  { %v7575_v26 = vpop.eup %7574  ;;  %7586 = vpow2.f32 %v6648_v49  ;;  %vm9647_vm3 = vcmp.eq.f32.partialorder %v2124_v22, 8.507059e+37 }
 0x273   :  { %v7577_v52 = vpop.eup %7576  ;;  %v2090_v43 = vmul.f32 %v7575_v26, %v2077_v18  ;;  %vm9660_vm5 = vcmp.eq.f32.partialorder %v2139_v0, 8.507059e+37 }
 0x274   :  { %v7579_v24 = vpop.eup %7578  ;;  %v9614_v33 = vadd.f32 1.0, %v7577_v52 }
 0x275   :  { %v7581_v46 = vpop.eup %7580  ;;  %v9616_v61 = vpack.c.bf16 %v2090_v43, %v2089_v47  ;;  %v9620_v2 = vadd.f32 1.0, %v7579_v24  ;;  %v2127_v47 = vor.u32 1.1754944e-38, %v2126_v60  ;;  %v12433_v43 = vld [vmem:[#allocation153_spill] sm:$0xff]  ;;  %v12434_v24 = vld [vmem:[#allocation154_spill] sm:$0xff] }
 0x276   :  { %v9623_v40 = vadd.f32 1.0, %v7581_v46  ;;  %v7583_v34 = vpop.eup %7582 }
 0x277   :  { %7588 = vrcp.f32 %v9620_v2  ;;  %2226 = vmatmul.bf16.vlgmr.msra.gmra.mxu0 %v9616_v61  ;;  %2240 = vmatmul.bf16.vlgmr.msra.gmra.mxu1 %v9616_v61  ;;  %v7585_v63 = vpop.eup %7584  ;;  %v2116_v19 = vmul.f32 %v7583_v34, %v9606_v54  ;;  %vm2121_vm2 = vweird.f32 %v7583_v34  ;;  %vm2165_vm6 = vweird.f32 %v9620_v2 }
 0x278   :  { %7590 = vrcp.f32 %v9614_v33  ;;  %2254 = vmatmul.bf16.vlgmr.msra.gmra.mxu2 %v9616_v61  ;;  %2268 = vmatmul.bf16.vlgmr.msra.gmra.mxu3 %v9616_v61  ;;  %v2131_v7 = vmul.f32 %v7585_v63, %v9608_v44  ;;  %v7587_v36 = vpop.eup %7586  ;;  %vm2136_vm4 = vweird.f32 %v7585_v63  ;;  %vm2122_vm7 = vmor %vm2120_vm1, %vm2121_vm2  ;;  %v2171_v54 = vand.u32 2147483648, %v9620_v2 }
 0x279   :  { %7592 = vrcp.f32 %v9623_v40  ;;  %2355 = vmatpush.bf16.msra.mxu0 %v12427_v5  ;;  %2369 = vmatpush.bf16.msra.mxu1 %v12428_v1  ;;  %v2117_v32 = vsub.f32 1.0, %v2116_v19  ;;  %v9643_v26 = vadd.f32 1.0, %v7587_v36  ;;  %v2142_v19 = vor.u32 1.1754944e-38, %v2141_v53  ;;  %vm2137_vm8 = vmor %vm2135_vm0, %vm2136_vm4 }
 0x27a   :  { %7594 = vtanh.f32 %v1960_v13  ;;  %2383 = vmatpush.bf16.msra.mxu2 %v12429_v14  ;;  %2397 = vmatpush.bf16.msra.mxu3 %v12430_v23  ;;  %v2132_v49 = vsub.f32 1.0, %v2131_v7  ;;  %v12436_v13 = vld [vmem:[#allocation156_spill] sm:$0xff]  ;;  %vm2180_vm12 = vweird.f32 %v9623_v40  ;;  %vm2150_vm2 = vweird.f32 %v9614_v33 }
 0x27b   :  { %7596 = vtanh.f32 %v1964_v12  ;;  %v2118_v18 = vmul.f32 %v7583_v34, %v2117_v32  ;;  %vm2195_vm4 = vweird.f32 %v9643_v26 }
 0x27c   :  { %v2133_v62 = vmul.f32 %v7585_v63, %v2132_v49  ;;  %7598 = vrcp.f32 %v9643_v26 }
 0x27d   :  { %v9645_v41 = vpop.eup %7588  ;;  %2356 = vmatpush.bf16.msra.mxu0 %v12433_v43  ;;  %2370 = vmatpush.bf16.msra.mxu1 %v12434_v24  ;;  %v2119_v22 = vadd.f32 %v7583_v34, %v2118_v18  ;;  %v12439_v18 = vld [vmem:[#allocation158_spill] sm:$0xff] }
 0x27e   :  { %v9653_v56 = vpop.eup %7590  ;;  %v2161_v46 = vmul.f32 %v9645_v41, %v9620_v2  ;;  %2384 = vmatpush.bf16.msra.mxu2 %v12435_v35  ;;  %2398 = vmatpush.bf16.msra.mxu3 %v12436_v13  ;;  %v2134_v36 = vadd.f32 %v7585_v63, %v2133_v62  ;;  %v2169_v13 = vand.u32 2147483647, %v9620_v2  ;;  %vm2166_vm9 = vweird.f32 %v9645_v41 }
 0x27f   :  { %v7593_v12 = vpop.eup %7592  ;;  %v2146_v53 = vmul.f32 %v9653_v56, %v9614_v33  ;;  %v2123_v0 = vsel %vm2122_vm7, %v7583_v34, %v2119_v22  ;;  %v2186_v22 = vand.u32 2147483648, %v9623_v40  ;;  %vm2167_vm11 = vmor %vm2165_vm6, %vm2166_vm9  ;;  %vm2151_vm0 = vweird.f32 %v9653_v56 }
 0x280   :  { %v7595_v7 = vpop.eup %7594  ;;  %v2162_v32 = vsub.f32 1.0, %v2161_v46  ;;  %v2176_v49 = vmul.f32 %v7593_v12, %v9623_v40  ;;  %v2128_v62 = vsel %vm9647_vm3, %v2127_v47, %v2123_v0  ;;  %v2138_v46 = vsel %vm2137_vm8, %v7585_v63, %v2134_v36  ;;  %vm9733_vm3 = vmor %vm2150_vm2, %vm2151_vm0 }
 0x281   :  { %v7597_v35 = vpop.eup %7596  ;;  %2357 = vmatpush.bf16.msra.mxu0 %v9250_v3  ;;  %2371 = vmatpush.bf16.msra.mxu1 %v12439_v18  ;;  %v2143_v34 = vsel %vm9660_vm5, %v2142_v19, %v2138_v46  ;;  %vm2181_vm10 = vweird.f32 %v7593_v12  ;;  %v2184_v3 = vand.u32 2147483647, %v9623_v40  ;;  %v2209_v63 = vmul.f32 %v7595_v7, %v2128_v62  ;;  %v12440_v62 = vld [vmem:[#allocation159_spill] sm:$0xff]  ;;  %v12441_v46 = vld [vmem:[#allocation164_spill] sm:$0xff] }
 0x282   :  { %v2177_v24 = vsub.f32 1.0, %v2176_v49  ;;  %v2163_v44 = vmul.f32 %v9645_v41, %v2162_v32  ;;  %2385 = vmatpush.bf16.msra.mxu2 %v9260_v25  ;;  %2399 = vmatpush.bf16.msra.mxu3 %v9269_v28  ;;  %v9688_v18 = vpop.eup %7598  ;;  %v2207_v52 = vmul.f32 %v2143_v34, %v9332_v55  ;;  %v2147_v32 = vsub.f32 1.0, %v2146_v53  ;;  %vm2182_vm14 = vmor %vm2180_vm12, %vm2181_vm10  ;;  %v12442_v34 = vld [vmem:[#allocation160_spill] sm:$0xff] }
 0x283   :  { %v2191_v49 = vmul.f32 %v9688_v18, %v9643_v26  ;;  %v2172_v19 = vor.u32 1.1754944e-38, %v2171_v54  ;;  %vm2170_vm13 = vcmp.eq.f32.partialorder %v2169_v13, 8.507059e+37  ;;  %v2187_v60 = vor.u32 1.1754944e-38, %v2186_v22  ;;  %v12444_v22 = vld [vmem:[#allocation162_spill] sm:$0xff] }
 0x284   :  { %v2178_v47 = vmul.f32 %v7593_v12, %v2177_v24  ;;  %v2164_v36 = vadd.f32 %v9645_v41, %v2163_v44  ;;  %v9707_v53 = vadd.f32 %v2209_v63, %v2207_v52  ;;  %vm2185_vm15 = vcmp.eq.f32.partialorder %v2184_v3, 8.507059e+37  ;;  %v12445_v52 = vld [vmem:[#allocation163_spill] sm:$0xff] }
 0x285   :  { %2358 = vmatpush.bf16.msra.mxu0 %v9274_v58  ;;  %2372 = vmatpush.bf16.msra.mxu1 %v9276_v45  ;;  %v2192_v2 = vsub.f32 1.0, %v2191_v49  ;;  %v2148_v13 = vmul.f32 %v9653_v56, %v2147_v32  ;;  %vm2196_vm1 = vweird.f32 %v9688_v18  ;;  %v2156_v63 = vand.u32 2147483648, %v9614_v33 }
 0x286   :  { %v2168_v55 = vsel %vm2167_vm11, %v9645_v41, %v2164_v36  ;;  %v2179_v24 = vadd.f32 %v7593_v12, %v2178_v47  ;;  %2386 = vmatpush.bf16.msra.mxu2 %v9289_v10  ;;  %2400 = vmatpush.bf16.msra.mxu3 %v9291_v31  ;;  %7600 = vtanh.f32 %v9707_v53  ;;  %v2201_v47 = vand.u32 2147483648, %v9643_v26  ;;  %vm2197_vm5 = vmor %vm2195_vm4, %vm2196_vm1  ;;  %v12458_v36 = vld [vmem:[#allocation42_spill] sm:$0xff] }
 0x287   :  { %v2173_v7 = vsel %vm2170_vm13, %v2172_v19, %v2168_v55  ;;  %2282 = vmatmul.bf16.vlgmr.msrb.gmra.mxu0 %v9616_v61  ;;  %2296 = vmatmul.bf16.vlgmr.msrb.gmra.mxu1 %v9616_v61  ;;  %v2193_v0 = vmul.f32 %v9688_v18, %v2192_v2  ;;  %v2154_v32 = vand.u32 2147483647, %v9614_v33  ;;  %v2199_v49 = vand.u32 2147483647, %v9643_v26 }
 0x288   :  { %v2183_v40 = vsel %vm2182_vm14, %v7593_v12, %v2179_v24  ;;  %v2210_v41 = vmul.f32 %v7597_v35, %v2173_v7  ;;  %2310 = vmatmul.bf16.vlgmr.msrb.gmra.mxu2 %v9616_v61  ;;  %2324 = vmatmul.bf16.vlgmr.msrb.gmra.mxu3 %v9616_v61  ;;  %v12443_v12 = vld [vmem:[#allocation161_spill] sm:$0xff]  ;;  %v2149_v61 = vadd.f32 %v9653_v56, %v2148_v13  ;;  %v2202_v2 = vor.u32 1.1754944e-38, %v2201_v47 }
 0x289   :  { %v2188_v54 = vsel %vm2185_vm15, %v2187_v60, %v2183_v40  ;;  %2359 = vmatpush.bf16.msra.mxu0 %v9319_v21  ;;  %2373 = vmatpush.bf16.msra.mxu1 %v12440_v62  ;;  %v2194_v35 = vadd.f32 %v9688_v18, %v2193_v0  ;;  %v2157_v60 = vor.u32 1.1754944e-38, %v2156_v63  ;;  %vm2155_vm6 = vcmp.eq.f32.partialorder %v2154_v32, 8.507059e+37  ;;  %v12449_v13 = vld [vmem:[#allocation33_spill] sm:$0xff]  ;;  %v12450_v0 = vld [vmem:[#allocation34_spill] sm:$0xff]  ;;  %v12456_v63 = vld [vmem:[#allocation40_spill] sm:$0xff] }
 0x28a   :  { %v2208_v44 = vmul.f32 %v2188_v54, %v12441_v46  ;;  %2387 = vmatpush.bf16.msra.mxu2 %v12442_v34  ;;  %2401 = vmatpush.bf16.msra.mxu3 %v12443_v12  ;;  %v2153_v19 = vsel %vm9733_vm3, %v9653_v56, %v2149_v61  ;;  %vm2200_vm7 = vcmp.eq.f32.partialorder %v2199_v49, 8.507059e+37  ;;  %v12451_v54 = vld [vmem:[#allocation35_spill] sm:$0xff]  ;;  %v12452_v46 = vld [vmem:[#allocation36_spill] sm:$0xff]  ;;  %v12454_v61 = vld [vmem:[#allocation38_spill] sm:$0xff] }
 0x28b   :  { %v2198_v55 = vsel %vm2197_vm5, %v9688_v18, %v2194_v35  ;;  %v2158_v26 = vsel %vm2155_vm6, %v2157_v60, %v2153_v19  ;;  %v12455_v35 = vld [vmem:[#allocation39_spill] sm:$0xff]  ;;  %v12457_v47 = vld [vmem:[#allocation41_spill] sm:$0xff]  ;;  %v12460_v49 = vld [vmem:[#allocation44_spill] sm:$0xff] }
 0x28c   :  { %v9720_v3 = vadd.f32 %v2210_v41, %v2208_v44  ;;  %v7601_v24 = vpop.eup %7600  ;;  %v2203_v7 = vsel %vm2200_vm7, %v2202_v2, %v2198_v55  ;;  %v12448_v41 = vld [vmem:[#allocation32_spill] sm:$0xff]  ;;  %v12453_v44 = vld [vmem:[#allocation37_spill] sm:$0xff]  ;;  %v12459_v32 = vld [vmem:[#allocation43_spill] sm:$0xff] }
 0x28d   :  { %2360 = vmatpush.bf16.msra.mxu0 %v12444_v22  ;;  %2374 = vmatpush.bf16.msra.mxu1 %v12445_v52  ;;  %v2215_v40 = vmul.f32 %v7601_v24, %v2158_v26  ;;  %v12461_v19 = vld [vmem:[#allocation45_spill] sm:$0xff]  ;;  %v12462_v55 = vld [vmem:[#allocation46_spill] sm:$0xff]  ;;  %v12463_v24 = vld [vmem:[#allocation48_spill] sm:$0xff] }
 0x28e   :  { %7602 = vtanh.f32 %v9720_v3  ;;  %2388 = vmatpush.bf16.msra.mxu2 %v9356_v59  ;;  %2402 = vmatpush.bf16.msra.mxu3 %v9358_v6  ;;  %v12464_v60 = vld [vmem:[#allocation50_spill] sm:$0xff]  ;;  %v12465_v2 = vld [vmem:[#allocation51_spill] sm:$0xff] }
 0x28f   :  { %v12467_v26 = vld [vmem:[#allocation54_spill] sm:$0xff] }
 0x291   :  { %2361 = vmatpush.bf16.msra.mxu0 %v9382_v37  ;;  %2375 = vmatpush.bf16.msra.mxu1 %v9384_v17 }
 0x292   :  { %2389 = vmatpush.bf16.msra.mxu2 %v9388_v30  ;;  %2403 = vmatpush.bf16.msra.mxu3 %v9390_v16 }
 0x294   :  { %v7603_v33 = vpop.eup %7602 }
 0x295   :  { %2362 = vmatpush.bf16.msra.mxu0 %v9400_v11  ;;  %2376 = vmatpush.bf16.msra.mxu1 %v9402_v29  ;;  %v2216_v56 = vmul.f32 %v7603_v33, %v2203_v7  ;;  %v12466_v33 = vld [vmem:[#allocation53_spill] sm:$0xff]  ;;  %v12468_v7 = vld [vmem:[#allocation55_spill] sm:$0xff] }
 0x296   :  { %2390 = vmatpush.bf16.msra.mxu2 %v9406_v20  ;;  %2404 = vmatpush.bf16.msra.mxu3 %v9408_v57 }
 0x297   :  { %v2354_v18 = vpack.c.bf16 %v2216_v56, %v2215_v40  ;;  %v12469_v40 = vld [vmem:[#allocation56_spill] sm:$0xff]  ;;  %v12470_v56 = vld [vmem:[#allocation57_spill] sm:$0xff] }
 0x299   :  { %2672 = vmatpush.bf16.msrb.mxu0 %v8462_v38  ;;  %2686 = vmatpush.bf16.msrb.mxu1 %v8464_v39  ;;  %v12518_v38 = vld [vmem:[#allocation120_spill] sm:$0xff] }
 0x29a   :  { %2700 = vmatpush.bf16.msrb.mxu2 %v8466_v42  ;;  %2714 = vmatpush.bf16.msrb.mxu3 %v8470_v50 }
 0x29b   :  { %2363 = vmatmul.bf16.vlgmr.msra.gmra.mxu0 %v2354_v18  ;;  %2377 = vmatmul.bf16.vlgmr.msra.gmra.mxu1 %v2354_v18 }
 0x29c   :  { %2391 = vmatmul.bf16.vlgmr.msra.gmra.mxu2 %v2354_v18  ;;  %2405 = vmatmul.bf16.vlgmr.msra.gmra.mxu3 %v2354_v18  ;;  %v12471_v18 = vld [vmem:[#allocation59_spill] sm:$0xff] }
 0x29d   :  { %2673 = vmatpush.bf16.msrb.mxu0 %v8472_v51  ;;  %2687 = vmatpush.bf16.msrb.mxu1 %v12448_v41 }
 0x29e   :  { %2701 = vmatpush.bf16.msrb.mxu2 %v12449_v13  ;;  %2715 = vmatpush.bf16.msrb.mxu3 %v12450_v0 }
 0x2a1   :  { %2674 = vmatpush.bf16.msrb.mxu0 %v12451_v54  ;;  %2688 = vmatpush.bf16.msrb.mxu1 %v12452_v46  ;;  %v12513_v54 = vld [vmem:[#allocation115_spill] sm:$0xff] }
 0x2a2   :  { %2702 = vmatpush.bf16.msrb.mxu2 %v12453_v44  ;;  %2716 = vmatpush.bf16.msrb.mxu3 %v12454_v61  ;;  %v12512_v44 = vld [vmem:[#allocation114_spill] sm:$0xff] }
 0x2a5   :  { %2675 = vmatpush.bf16.msrb.mxu0 %v12455_v35  ;;  %2689 = vmatpush.bf16.msrb.mxu1 %v12456_v63 }
 0x2a6   :  { %2703 = vmatpush.bf16.msrb.mxu2 %v12457_v47  ;;  %2717 = vmatpush.bf16.msrb.mxu3 %v12458_v36  ;;  %v12509_v36 = vld [vmem:[#allocation47_spill] sm:$0xff]  ;;  %v12510_v47 = vld [vmem:[#allocation49_spill] sm:$0xff] }
 0x2a9   :  { %2676 = vmatpush.bf16.msrb.mxu0 %v12459_v32  ;;  %2690 = vmatpush.bf16.msrb.mxu1 %v12460_v49  ;;  %v12507_v49 = vld [vmem:[#allocation110_spill] sm:$0xff]  ;;  %v12508_v32 = vld [vmem:[#allocation111_spill] sm:$0xff] }
 0x2aa   :  { %2704 = vmatpush.bf16.msrb.mxu2 %v12461_v19  ;;  %2718 = vmatpush.bf16.msrb.mxu3 %v12462_v55  ;;  %v12472_v19 = vld [vmem:[#allocation60_spill] sm:$0xff]  ;;  %v12473_v55 = vld [vmem:[#allocation61_spill] sm:$0xff] }
 0x2ad   :  { %2677 = vmatpush.bf16.msrb.mxu0 %v12463_v24  ;;  %2691 = vmatpush.bf16.msrb.mxu1 %v12464_v60  ;;  %v12474_v24 = vld [vmem:[#allocation62_spill] sm:$0xff]  ;;  %v12475_v60 = vld [vmem:[#allocation63_spill] sm:$0xff] }
 0x2ae   :  { %2705 = vmatpush.bf16.msrb.mxu2 %v12465_v2  ;;  %2719 = vmatpush.bf16.msrb.mxu3 %v12466_v33  ;;  %v12476_v2 = vld [vmem:[#allocation64_spill] sm:$0xff]  ;;  %v12477_v33 = vld [vmem:[#allocation65_spill] sm:$0xff] }
 0x2b1   :  { %2678 = vmatpush.bf16.msrb.mxu0 %v12467_v26  ;;  %2692 = vmatpush.bf16.msrb.mxu1 %v12468_v7  ;;  %v12478_v26 = vld [vmem:[#allocation66_spill] sm:$0xff]  ;;  %v12479_v7 = vld [vmem:[#allocation67_spill] sm:$0xff] }
 0x2b2   :  { %2706 = vmatpush.bf16.msrb.mxu2 %v12469_v40  ;;  %2720 = vmatpush.bf16.msrb.mxu3 %v12470_v56  ;;  %v12480_v40 = vld [vmem:[#allocation68_spill] sm:$0xff]  ;;  %v12481_v56 = vld [vmem:[#allocation69_spill] sm:$0xff] }
 0x2b5   :  { %2679 = vmatpush.bf16.msrb.mxu0 %v12471_v18  ;;  %2693 = vmatpush.bf16.msrb.mxu1 %v12472_v19  ;;  %v12482_v18 = vld [vmem:[#allocation71_spill] sm:$0xff]  ;;  %v12483_v19 = vld [vmem:[#allocation72_spill] sm:$0xff] }
 0x2b6   :  { %2707 = vmatpush.bf16.msrb.mxu2 %v12473_v55  ;;  %2721 = vmatpush.bf16.msrb.mxu3 %v12474_v24  ;;  %v12484_v55 = vld [vmem:[#allocation73_spill] sm:$0xff]  ;;  %v12485_v24 = vld [vmem:[#allocation74_spill] sm:$0xff] }
 0x2b9   :  { %2728 = vmatpush.bf16.msra.mxu0 %v12475_v60  ;;  %2742 = vmatpush.bf16.msra.mxu1 %v12476_v2  ;;  %v12486_v60 = vld [vmem:[#allocation75_spill] sm:$0xff]  ;;  %v12487_v2 = vld [vmem:[#allocation76_spill] sm:$0xff] }
 0x2ba   :  { %2756 = vmatpush.bf16.msra.mxu2 %v12477_v33  ;;  %2770 = vmatpush.bf16.msra.mxu3 %v12478_v26  ;;  %v12488_v33 = vld [vmem:[#allocation77_spill] sm:$0xff] }
 0x2bb   :  { %v12489_v26 = vld [vmem:[#allocation81_spill] sm:$0xff] }
 0x2bd   :  { %2729 = vmatpush.bf16.msra.mxu0 %v12479_v7  ;;  %2743 = vmatpush.bf16.msra.mxu1 %v12480_v40  ;;  %v12490_v7 = vld [vmem:[#allocation82_spill] sm:$0xff]  ;;  %v12491_v40 = vld [vmem:[#allocation83_spill] sm:$0xff] }
 0x2be   :  { %2757 = vmatpush.bf16.msra.mxu2 %v12481_v56  ;;  %2771 = vmatpush.bf16.msra.mxu3 %v12482_v18  ;;  %v12492_v56 = vld [vmem:[#allocation84_spill] sm:$0xff]  ;;  %v12493_v18 = vld [vmem:[#allocation85_spill] sm:$0xff] }
 0x2c1   :  { %2730 = vmatpush.bf16.msra.mxu0 %v12483_v19  ;;  %2744 = vmatpush.bf16.msra.mxu1 %v12484_v55  ;;  %v12494_v19 = vld [vmem:[#allocation86_spill] sm:$0xff]  ;;  %v12495_v55 = vld [vmem:[#allocation87_spill] sm:$0xff] }
 0x2c2   :  { %2758 = vmatpush.bf16.msra.mxu2 %v12485_v24  ;;  %2772 = vmatpush.bf16.msra.mxu3 %v12486_v60  ;;  %v12496_v24 = vld [vmem:[#allocation88_spill] sm:$0xff] }
 0x2c3   :  { %v12497_v60 = vld [vmem:[#allocation92_spill] sm:$0xff] }
 0x2c5   :  { %2731 = vmatpush.bf16.msra.mxu0 %v12487_v2  ;;  %2745 = vmatpush.bf16.msra.mxu1 %v12488_v33  ;;  %v12498_v2 = vld [vmem:[#allocation93_spill] sm:$0xff]  ;;  %v12499_v33 = vld [vmem:[#allocation95_spill] sm:$0xff] }
 0x2c6   :  { %2759 = vmatpush.bf16.msra.mxu2 %v12489_v26  ;;  %2773 = vmatpush.bf16.msra.mxu3 %v12490_v7  ;;  %v12500_v26 = vld [vmem:[#allocation96_spill] sm:$0xff]  ;;  %v12501_v7 = vld [vmem:[#allocation97_spill] sm:$0xff] }
 0x2c9   :  { %2732 = vmatpush.bf16.msra.mxu0 %v12491_v40  ;;  %2746 = vmatpush.bf16.msra.mxu1 %v12492_v56  ;;  %v12502_v40 = vld [vmem:[#allocation98_spill] sm:$0xff]  ;;  %v12503_v56 = vld [vmem:[#allocation99_spill] sm:$0xff] }
 0x2ca   :  { %2760 = vmatpush.bf16.msra.mxu2 %v12493_v18  ;;  %2774 = vmatpush.bf16.msra.mxu3 %v12494_v19  ;;  %v12504_v18 = vld [vmem:[#allocation100_spill] sm:$0xff]  ;;  %v12505_v19 = vld [vmem:[#allocation101_spill] sm:$0xff] }
 0x2cd   :  { %2733 = vmatpush.bf16.msra.mxu0 %v12495_v55  ;;  %2747 = vmatpush.bf16.msra.mxu1 %v12496_v24  ;;  %v12506_v55 = vld [vmem:[#allocation102_spill] sm:$0xff] }
 0x2ce   :  { %2761 = vmatpush.bf16.msra.mxu2 %v12497_v60  ;;  %2775 = vmatpush.bf16.msra.mxu3 %v12498_v2 }
 0x2d1   :  { %2734 = vmatpush.bf16.msra.mxu0 %v12499_v33  ;;  %2748 = vmatpush.bf16.msra.mxu1 %v12500_v26 }
 0x2d2   :  { %2762 = vmatpush.bf16.msra.mxu2 %v12501_v7  ;;  %2776 = vmatpush.bf16.msra.mxu3 %v12502_v40 }
 0x2d5   :  { %2735 = vmatpush.bf16.msra.mxu0 %v12503_v56  ;;  %2749 = vmatpush.bf16.msra.mxu1 %v12504_v18  ;;  %v12511_v18 = vld [vmem:[#allocation113_spill] sm:$0xff] }
 0x2d6   :  { %2763 = vmatpush.bf16.msra.mxu2 %v12505_v19  ;;  %2777 = vmatpush.bf16.msra.mxu3 %v12506_v55 }
 0x2f4   :  { %v2227_v24 = vpop.f32.mrf.mxu0  ;;  %v2241_v60 = vpop.f32.mrf.mxu1 }
 0x2f5   :  { %v2330_v2 = vadd.f32 %v2227_v24, %v12507_v49  ;;  %v2331_v33 = vadd.f32 %v2241_v60, %v12508_v32  ;;  %v12514_v24 = vld [vmem:[#allocation52_spill] sm:$0xff] }
 0x2f7   :  { %v2338_v26 = vadd.f32 %v2330_v2, %v12509_v36  ;;  %v2339_v7 = vadd.f32 %v2331_v33, %v12510_v47 }
 0x2f9   :  { %v6649_v63 = vmul.f32 -1.442695, %v2338_v26  ;;  %v6650_v40 = vmul.f32 -1.442695, %v2339_v7 }
 0x2fb   :  { %7604 = vpow2.f32 %v6649_v63  ;;  %v2255_v56 = vpop.f32.mrf.mxu2  ;;  %v2269_v35 = vpop.f32.mrf.mxu3 }
 0x2fc   :  { %7606 = vpow2.f32 %v6650_v40  ;;  %v2332_v19 = vadd.f32 %v2255_v56, %v12511_v18  ;;  %v2229_v61 = vpop.f32.mrf.mxu0  ;;  %v2243_v55 = vpop.f32.mrf.mxu1 }
 0x2fd   :  { %v2334_v46 = vadd.f32 %v2229_v61, %v12512_v44  ;;  %v2335_v49 = vadd.f32 %v2243_v55, %v12513_v54  ;;  %v12515_v61 = vld [vmem:[#allocation117_spill] sm:$0xff]  ;;  %v12516_v55 = vld [vmem:[#allocation116_spill] sm:$0xff] }
 0x2fe   :  { %v2340_v32 = vadd.f32 %v2332_v19, %v12514_v24 }
 0x2ff   :  { %v2342_v60 = vadd.f32 %v2334_v46, %v12509_v36  ;;  %v2343_v2 = vadd.f32 %v2335_v49, %v12510_v47  ;;  %v2333_v49 = vadd.f32 %v2269_v35, %v12516_v55 }
 0x300   :  { %v6651_v33 = vmul.f32 -1.442695, %v2340_v32 }
 0x301   :  { %v7605_v26 = vpop.eup %7604  ;;  %v6652_v63 = vmul.f32 -1.442695, %v2342_v60  ;;  %v6653_v40 = vmul.f32 -1.442695, %v2343_v2 }
 0x302   :  { %v7607_v7 = vpop.eup %7606  ;;  %v2437_v0 = vadd.f32 1.0, %v7605_v26  ;;  %7608 = vpow2.f32 %v6651_v33 }
 0x303   :  { %v2438_v56 = vadd.f32 1.0, %v7607_v7  ;;  %7610 = vpow2.f32 %v6652_v63  ;;  %v2257_v18 = vpop.f32.mrf.mxu2  ;;  %v2271_v13 = vpop.f32.mrf.mxu3 }
 0x304   :  { %7612 = vrcp.f32 %v2437_v0  ;;  %v2283_v44 = vpop.f32.mrf.mxu0  ;;  %v2297_v54 = vpop.f32.mrf.mxu1  ;;  %v2336_v46 = vadd.f32 %v2257_v18, %v12515_v61  ;;  %v12517_v18 = vld [vmem:[#allocation58_spill] sm:$0xff]  ;;  %v2452_v55 = vand.u32 2147483647, %v2437_v0  ;;  %v2454_v51 = vand.u32 2147483648, %v2437_v0 }
 0x305   :  { %7614 = vrcp.f32 %v2438_v56  ;;  %v2341_v61 = vadd.f32 %v2333_v49, %v12517_v18  ;;  %v2467_v39 = vand.u32 2147483647, %v2438_v56  ;;  %vm2448_vm10 = vweird.f32 %v2437_v0 }
 0x306   :  { %7616 = vpow2.f32 %v6653_v40  ;;  %v2344_v32 = vadd.f32 %v2336_v46, %v12514_v24  ;;  %v2469_v24 = vand.u32 2147483648, %v2438_v56  ;;  %vm2463_vm11 = vweird.f32 %v2438_v56 }
 0x307   :  { %vm9854_vm13 = vcmp.eq.f32.partialorder %v2452_v55, 8.507059e+37  ;;  %vm2468_vm15 = vcmp.eq.f32.partialorder %v2467_v39, 8.507059e+37 }
 0x308   :  { %v7609_v19 = vpop.eup %7608  ;;  %v6654_v63 = vmul.f32 -1.442695, %v2344_v32  ;;  %v2470_v29 = vor.u32 1.1754944e-38, %v2469_v24 }
 0x309   :  { %v7611_v60 = vpop.eup %7610  ;;  %v9829_v26 = vadd.f32 1.0, %v7609_v19 }
 0x30a   :  { %v7613_v2 = vpop.eup %7612  ;;  %v9831_v33 = vadd.f32 1.0, %v7611_v60 }
 0x30b   :  { %v7615_v7 = vpop.eup %7614  ;;  %v2444_v47 = vmul.f32 %v7613_v2, %v2437_v0  ;;  %v9833_v36 = vpop.f32.mrf.mxu2  ;;  %7618 = vrcp.f32 %v9829_v26  ;;  %vm2449_vm8 = vweird.f32 %v7613_v2  ;;  %vm2478_vm5 = vweird.f32 %v9829_v26 }
 0x30c   :  { %v7617_v41 = vpop.eup %7616  ;;  %v2459_v40 = vmul.f32 %v7615_v7, %v2438_v56  ;;  %v9837_v35 = vpop.f32.mrf.mxu0  ;;  %7620 = vrcp.f32 %v9831_v33  ;;  %vm2464_vm9 = vweird.f32 %v7615_v7  ;;  %vm9850_vm12 = vmor %vm2448_vm10, %vm2449_vm8  ;;  %vm2493_vm0 = vweird.f32 %v9831_v33 }
 0x30d   :  { %v9839_v46 = vpop.f32.mrf.mxu1  ;;  %v2445_v19 = vsub.f32 1.0, %v2444_v47  ;;  %v9842_v60 = vadd.f32 1.0, %v7617_v41  ;;  %7622 = vpow2.f32 %v6654_v63  ;;  %v9844_v50 = vpop.f32.mrf.mxu3  ;;  %v2337_v47 = vadd.f32 %v2271_v13, %v12518_v38  ;;  %vm2465_vm14 = vmor %vm2463_vm11, %vm2464_vm9 }
 0x30e   :  { %v2460_v32 = vsub.f32 1.0, %v2459_v40  ;;  %v2497_v63 = vand.u32 2147483647, %v9831_v33 }
 0x30f   :  { %v2446_v42 = vmul.f32 %v7613_v2, %v2445_v19  ;;  %7624 = vrcp.f32 %v9842_v60  ;;  %v2455_v19 = vor.u32 1.1754944e-38, %v2454_v51  ;;  %v2345_v55 = vadd.f32 %v2337_v47, %v12517_v18 }
 0x310   :  { %v2461_v49 = vmul.f32 %v7615_v7, %v2460_v32  ;;  %7626 = vtanh.f32 %v2341_v61  ;;  %v2347_v51 = vadd.f32 %v2297_v54, %v12415_v9  ;;  %v2512_v11 = vand.u32 2147483647, %v9842_v60 }
 0x311   :  { %v2447_v57 = vadd.f32 %v7613_v2, %v2446_v42  ;;  %v9848_v41 = vpop.eup %7618  ;;  %v2346_v42 = vadd.f32 %v2283_v44, %v12414_v27  ;;  %vm2508_vm2 = vweird.f32 %v9842_v60  ;;  %vm9884_vm4 = vcmp.eq.f32.partialorder %v2497_v63, 8.507059e+37 }
 0x312   :  { %v2462_v20 = vadd.f32 %v7615_v7, %v2461_v49  ;;  %v7621_v32 = vpop.eup %7620  ;;  %v2474_v24 = vmul.f32 %v9848_v41, %v9829_v26  ;;  %vm2513_vm8 = vcmp.eq.f32.partialorder %v2512_v11, 8.507059e+37  ;;  %vm2479_vm9 = vweird.f32 %v9848_v41 }
 0x313   :  { %v2451_v38 = vsel %vm9850_vm12, %v7613_v2, %v2447_v57  ;;  %v9861_v13 = vpop.f32.mrf.mxu2  ;;  %v7623_v0 = vpop.eup %7622  ;;  %v2489_v61 = vmul.f32 %v7621_v32, %v9831_v33  ;;  %vm2494_vm1 = vweird.f32 %v7621_v32  ;;  %vm9925_vm11 = vmor %vm2478_vm5, %vm2479_vm9 }
 0x314   :  { %v2466_v56 = vsel %vm2465_vm14, %v7615_v7, %v2462_v20  ;;  %v2456_v57 = vsel %vm9854_vm13, %v2455_v19, %v2451_v38  ;;  %v9870_v2 = vadd.f32 1.0, %v7623_v0  ;;  %v2514_v7 = vand.u32 2147483648, %v9842_v60  ;;  %vm2495_vm6 = vmor %vm2493_vm0, %vm2494_vm1 }
 0x315   :  { %v7625_v49 = vpop.eup %7624  ;;  %v2471_v39 = vsel %vm2468_vm15, %v2470_v29, %v2466_v56  ;;  %v2490_v40 = vsub.f32 1.0, %v2489_v61  ;;  %v2499_v29 = vand.u32 2147483648, %v9831_v33  ;;  %v9880_v56 = vpop.f32.mrf.mxu3  ;;  %v2475_v61 = vsub.f32 1.0, %v2474_v24 }
 0x316   :  { %v2504_v20 = vmul.f32 %v7625_v49, %v9842_v60  ;;  %v7627_v54 = vpop.eup %7626  ;;  %7628 = vrcp.f32 %v9870_v2  ;;  %v2535_v19 = vmul.f32 %v2471_v39, %v9553_v15  ;;  %vm2509_vm3 = vweird.f32 %v7625_v49 }
 0x317   :  { %v2537_v38 = vmul.f32 %v7627_v54, %v2456_v57  ;;  %7630 = vtanh.f32 %v2345_v55  ;;  %v2491_v44 = vmul.f32 %v7621_v32, %v2490_v40  ;;  %v2515_v30 = vor.u32 1.1754944e-38, %v2514_v7  ;;  %vm2510_vm7 = vmor %vm2508_vm2, %vm2509_vm3 }
 0x318   :  { %v2364_v47 = vpop.f32.mrf.mxu0  ;;  %v2378_v18 = vpop.f32.mrf.mxu1  ;;  %v2505_v0 = vsub.f32 1.0, %v2504_v20  ;;  %v2500_v15 = vor.u32 1.1754944e-38, %v2499_v29  ;;  %v2348_v55 = vadd.f32 %v9833_v36, %v12419_v8  ;;  %v2350_v36 = vadd.f32 %v9837_v35, %v12414_v27 }
 0x319   :  { %v2492_v17 = vadd.f32 %v7621_v32, %v2491_v44  ;;  %v9891_v24 = vadd.f32 %v2537_v38, %v2535_v19  ;;  %v2411_v39 = vadd.f32 %v2364_v47, %v2346_v42  ;;  %v2412_v40 = vadd.f32 %v2378_v18, %v2347_v51 }
 0x31a   :  { %v2506_v16 = vmul.f32 %v7625_v49, %v2505_v0  ;;  %v2476_v44 = vmul.f32 %v9848_v41, %v2475_v61  ;;  %v2351_v42 = vadd.f32 %v9839_v46, %v12415_v9  ;;  %vm2523_vm12 = vweird.f32 %v9870_v2 }
 0x31b   :  { %v2496_v7 = vsel %vm2495_vm6, %v7621_v32, %v2492_v17  ;;  %v6655_v11 = vmul.f32 -1.442695, %v2411_v39  ;;  %v6656_v32 = vmul.f32 -1.442695, %v2412_v40  ;;  %7632 = vtanh.f32 %v9891_v24 }
 0x31c   :  { %v2507_v57 = vadd.f32 %v7625_v49, %v2506_v16  ;;  %v9895_v20 = vpop.eup %7628  ;;  %v2501_v16 = vsel %vm9884_vm4, %v2500_v15, %v2496_v7  ;;  %v2477_v61 = vadd.f32 %v9848_v41, %v2476_v44  ;;  %v2352_v39 = vadd.f32 %v9861_v13, %v12419_v8 }
 0x31d   :  { %v7631_v63 = vpop.eup %7630  ;;  %v2519_v33 = vmul.f32 %v9895_v20, %v9870_v2  ;;  %7634 = vpow2.f32 %v6655_v11  ;;  %vm2524_vm10 = vweird.f32 %v9895_v20  ;;  %v2482_v44 = vand.u32 2147483647, %v9829_v26 }
 0x31e   :  { %v2511_v18 = vsel %vm2510_vm7, %v7625_v49, %v2507_v57  ;;  %v2538_v17 = vmul.f32 %v7631_v63, %v2501_v16  ;;  %7636 = vpow2.f32 %v6656_v32  ;;  %v2527_v7 = vand.u32 2147483647, %v9870_v2  ;;  %vm9932_vm13 = vmor %vm2523_vm12, %vm2524_vm10 }
 0x31f   :  { %v2392_v54 = vpop.f32.mrf.mxu2  ;;  %v2516_v47 = vsel %vm2513_vm8, %v2515_v30, %v2511_v18  ;;  %v2520_v35 = vsub.f32 1.0, %v2519_v33  ;;  %v2406_v0 = vpop.f32.mrf.mxu3  ;;  %v2481_v16 = vsel %vm9925_vm11, %v9848_v41, %v2477_v61  ;;  %vm2483_vm14 = vcmp.eq.f32.partialorder %v2482_v44, 8.507059e+37 }
 0x320   :  { %v2366_v51 = vpop.f32.mrf.mxu0  ;;  %v2380_v60 = vpop.f32.mrf.mxu1  ;;  %v2536_v29 = vmul.f32 %v2516_v47, %v9574_v48  ;;  %v2413_v19 = vadd.f32 %v2392_v54, %v2348_v55  ;;  %v2529_v55 = vand.u32 2147483648, %v9870_v2  ;;  %vm2528_vm15 = vcmp.eq.f32.partialorder %v2527_v7, 8.507059e+37 }
 0x321   :  { %v2415_v37 = vadd.f32 %v2366_v51, %v2350_v36  ;;  %v2416_v49 = vadd.f32 %v2380_v60, %v2351_v42  ;;  %v2521_v38 = vmul.f32 %v9895_v20, %v2520_v35  ;;  %v7633_v54 = vpop.eup %7632  ;;  %v12529_v42 = vand.u32 2147483648, %v9829_v26 }
 0x322   :  { %v9912_v46 = vadd.f32 %v2538_v17, %v2536_v29  ;;  %v6657_v30 = vmul.f32 -1.442695, %v2413_v19  ;;  %v2530_v60 = vor.u32 1.1754944e-38, %v2529_v55 }
 0x323   :  { %v6658_v15 = vmul.f32 -1.442695, %v2415_v37  ;;  %v6659_v57 = vmul.f32 -1.442695, %v2416_v49  ;;  %v2522_v48 = vadd.f32 %v9895_v20, %v2521_v38  ;;  %v7635_v33 = vpop.eup %7634  ;;  %v2485_v51 = vor.u32 1.1754944e-38, %v12529_v42 }
 0x324   :  { %7638 = vtanh.f32 %v9912_v46  ;;  %v7637_v2 = vpop.eup %7636  ;;  %v9944_v47 = vadd.f32 1.0, %v7635_v33  ;;  %v2349_v37 = vadd.f32 %v9844_v50, %v12426_v4 }
 0x325   :  { %7640 = vpow2.f32 %v6657_v30  ;;  %v2526_v18 = vsel %vm9932_vm13, %v9895_v20, %v2522_v48  ;;  %v9946_v17 = vadd.f32 1.0, %v7637_v2  ;;  %v2486_v35 = vsel %vm2483_vm14, %v2485_v51, %v2481_v16 }
 0x326   :  { %7642 = vpow2.f32 %v6658_v15  ;;  %v2531_v41 = vsel %vm2528_vm15, %v2530_v60, %v2526_v18  ;;  %v2543_v20 = vmul.f32 %v7633_v54, %v2486_v35  ;;  %v2353_v15 = vadd.f32 %v9880_v56, %v12426_v4  ;;  %v12532_v60 = vld [vmem:[#allocation154_spill] sm:$0xff] }
 0x327   :  { %v2394_v36 = vpop.f32.mrf.mxu2  ;;  %7644 = vpow2.f32 %v6659_v57  ;;  %v2408_v38 = vpop.f32.mrf.mxu3  ;;  %v2414_v48 = vadd.f32 %v2406_v0, %v2349_v37  ;;  %v2578_v0 = vand.u32 2147483647, %v9944_v47  ;;  %v2580_v44 = vand.u32 2147483648, %v9944_v47 }
 0x328   :  { %v2417_v13 = vadd.f32 %v2394_v36, %v2352_v39  ;;  %7646 = vrcp.f32 %v9944_v47  ;;  %v2418_v39 = vadd.f32 %v2408_v38, %v2353_v15  ;;  %v2595_v63 = vand.u32 2147483648, %v9946_v17 }
 0x329   :  { %7648 = vrcp.f32 %v9946_v17  ;;  %vm2589_vm0 = vweird.f32 %v9946_v17  ;;  %vm2574_vm1 = vweird.f32 %v9944_v47  ;;  %vm9985_vm3 = vcmp.eq.f32.partialorder %v2578_v0, 8.507059e+37 }
 0x32a   :  { %v6660_v11 = vmul.f32 -1.442695, %v2417_v13  ;;  %v7639_v32 = vpop.eup %7638  ;;  %v2593_v13 = vand.u32 2147483647, %v9946_v17  ;;  %v2581_v51 = vor.u32 1.1754944e-38, %v2580_v44 }
 0x32b   :  { %v7641_v29 = vpop.eup %7640  ;;  %v2544_v19 = vmul.f32 %v7639_v32, %v2531_v41  ;;  %v12533_v41 = vld [vmem:[#allocation155_spill] sm:$0xff] }
 0x32c   :  { %v7643_v26 = vpop.eup %7642  ;;  %v9952_v49 = vadd.f32 1.0, %v7641_v29  ;;  %7650 = vpow2.f32 %v6660_v11  ;;  %v12534_v29 = vld [vmem:[#allocation156_spill] sm:$0xff]  ;;  %vm9998_vm5 = vcmp.eq.f32.partialorder %v2593_v13, 8.507059e+37 }
 0x32d   :  { %v7645_v30 = vpop.eup %7644  ;;  %v9954_v61 = vpack.c.bf16 %v2544_v19, %v2543_v20  ;;  %v9958_v57 = vadd.f32 1.0, %v7643_v26  ;;  %v2596_v19 = vor.u32 1.1754944e-38, %v2595_v63 }
 0x32e   :  { %v9961_v55 = vadd.f32 1.0, %v7645_v30  ;;  %v7647_v50 = vpop.eup %7646 }
 0x32f   :  { %7652 = vrcp.f32 %v9958_v57  ;;  %2680 = vmatmul.bf16.vlgmr.msrb.gmra.mxu0 %v9954_v61  ;;  %2694 = vmatmul.bf16.vlgmr.msrb.gmra.mxu1 %v9954_v61  ;;  %v7649_v56 = vpop.eup %7648  ;;  %v2570_v40 = vmul.f32 %v7647_v50, %v9944_v47  ;;  %vm2575_vm2 = vweird.f32 %v7647_v50  ;;  %vm2619_vm6 = vweird.f32 %v9958_v57 }
 0x330   :  { %7654 = vrcp.f32 %v9952_v49  ;;  %2708 = vmatmul.bf16.vlgmr.msrb.gmra.mxu2 %v9954_v61  ;;  %2722 = vmatmul.bf16.vlgmr.msrb.gmra.mxu3 %v9954_v61  ;;  %v2585_v7 = vmul.f32 %v7649_v56, %v9946_v17  ;;  %vm2590_vm4 = vweird.f32 %v7649_v56  ;;  %vm2576_vm7 = vmor %vm2574_vm1, %vm2575_vm2  ;;  %v2625_v47 = vand.u32 2147483648, %v9958_v57 }
 0x331   :  { %7656 = vrcp.f32 %v9961_v55  ;;  %2809 = vmatpush.bf16.msrb.mxu0 %v12427_v5  ;;  %2823 = vmatpush.bf16.msrb.mxu1 %v12428_v1  ;;  %v2571_v54 = vsub.f32 1.0, %v2570_v40  ;;  %vm2591_vm8 = vmor %vm2589_vm0, %vm2590_vm4  ;;  %vm2634_vm12 = vweird.f32 %v9961_v55  ;;  %vm2604_vm2 = vweird.f32 %v9952_v49 }
 0x332   :  { %7658 = vtanh.f32 %v2414_v48  ;;  %2837 = vmatpush.bf16.msrb.mxu2 %v12429_v14  ;;  %2851 = vmatpush.bf16.msrb.mxu3 %v12430_v23  ;;  %v7651_v36 = vpop.eup %7650  ;;  %v2586_v33 = vsub.f32 1.0, %v2585_v7  ;;  %v12537_v7 = vld [vmem:[#allocation157_spill] sm:$0xff] }
 0x333   :  { %7660 = vtanh.f32 %v2418_v39  ;;  %v9981_v16 = vadd.f32 1.0, %v7651_v36  ;;  %v2572_v2 = vmul.f32 %v7647_v50, %v2571_v54  ;;  %v2623_v39 = vand.u32 2147483647, %v9958_v57  ;;  %v12538_v36 = vld [vmem:[#allocation158_spill] sm:$0xff] }
 0x334   :  { %v2587_v32 = vmul.f32 %v7649_v56, %v2586_v33  ;;  %v2640_v33 = vand.u32 2147483648, %v9961_v55 }
 0x335   :  { %v9983_v18 = vpop.eup %7652  ;;  %2810 = vmatpush.bf16.msrb.mxu0 %v12433_v43  ;;  %2824 = vmatpush.bf16.msrb.mxu1 %v12532_v60  ;;  %7662 = vrcp.f32 %v9981_v16  ;;  %v2573_v26 = vadd.f32 %v7647_v50, %v2572_v2  ;;  %v2638_v2 = vand.u32 2147483647, %v9961_v55  ;;  %vm2624_vm13 = vcmp.eq.f32.partialorder %v2623_v39, 8.507059e+37 }
 0x336   :  { %v9991_v11 = vpop.eup %7654  ;;  %v2615_v35 = vmul.f32 %v9983_v18, %v9958_v57  ;;  %2838 = vmatpush.bf16.msrb.mxu2 %v12533_v41  ;;  %2852 = vmatpush.bf16.msrb.mxu3 %v12534_v29  ;;  %v2588_v30 = vadd.f32 %v7649_v56, %v2587_v32  ;;  %vm2620_vm9 = vweird.f32 %v9983_v18  ;;  %vm2649_vm4 = vweird.f32 %v9981_v16 }
 0x337   :  { %v7657_v20 = vpop.eup %7656  ;;  %v2600_v0 = vmul.f32 %v9991_v11, %v9952_v49  ;;  %v2577_v44 = vsel %vm2576_vm7, %v7647_v50, %v2573_v26  ;;  %vm2621_vm11 = vmor %vm2619_vm6, %vm2620_vm9  ;;  %vm2639_vm15 = vcmp.eq.f32.partialorder %v2638_v2, 8.507059e+37  ;;  %vm2605_vm0 = vweird.f32 %v9991_v11 }
 0x338   :  { %v7659_v38 = vpop.eup %7658  ;;  %v2616_v15 = vsub.f32 1.0, %v2615_v35  ;;  %v2630_v48 = vmul.f32 %v7657_v20, %v9961_v55  ;;  %v2582_v54 = vsel %vm9985_vm3, %v2581_v51, %v2577_v44  ;;  %v2592_v63 = vsel %vm2591_vm8, %v7649_v56, %v2588_v30  ;;  %vm10071_vm3 = vmor %vm2604_vm2, %vm2605_vm0 }
 0x339   :  { %v7661_v40 = vpop.eup %7660  ;;  %2811 = vmatpush.bf16.msrb.mxu0 %v12537_v7  ;;  %2825 = vmatpush.bf16.msrb.mxu1 %v12538_v36  ;;  %v2597_v50 = vsel %vm9998_vm5, %v2596_v19, %v2592_v63  ;;  %vm2635_vm10 = vweird.f32 %v7657_v20  ;;  %v2663_v56 = vmul.f32 %v7659_v38, %v2582_v54  ;;  %v2601_v26 = vsub.f32 1.0, %v2600_v0  ;;  %v12559_v63 = vld [vmem:[#allocation37_spill] sm:$0xff] }
 0x33a   :  { %v2631_v13 = vsub.f32 1.0, %v2630_v48  ;;  %v2617_v17 = vmul.f32 %v9983_v18, %v2616_v15  ;;  %2839 = vmatpush.bf16.msrb.mxu2 %v9260_v25  ;;  %2853 = vmatpush.bf16.msrb.mxu3 %v9269_v28  ;;  %v2661_v42 = vmul.f32 %v2597_v50, %v9707_v53  ;;  %v2626_v19 = vor.u32 1.1754944e-38, %v2625_v47  ;;  %vm2636_vm14 = vmor %vm2634_vm12, %vm2635_vm10  ;;  %v12541_v50 = vld [vmem:[#allocation167_spill] sm:$0xff] }
 0x33b   :  { %v10026_v32 = vpop.eup %7662  ;;  %v2641_v38 = vor.u32 1.1754944e-38, %v2640_v33  ;;  %v2602_v39 = vmul.f32 %v9991_v11, %v2601_v26  ;;  %v2655_v54 = vand.u32 2147483648, %v9981_v16  ;;  %v12542_v33 = vld [vmem:[#allocation168_spill] sm:$0xff]  ;;  %v12543_v26 = vld [vmem:[#allocation169_spill] sm:$0xff] }
 0x33c   :  { %v2632_v51 = vmul.f32 %v7657_v20, %v2631_v13  ;;  %v2618_v35 = vadd.f32 %v9983_v18, %v2617_v17  ;;  %v2645_v30 = vmul.f32 %v10026_v32, %v9981_v16  ;;  %v10045_v48 = vadd.f32 %v2663_v56, %v2661_v42 }
 0x33d   :  { %2812 = vmatpush.bf16.msrb.mxu0 %v9274_v58  ;;  %2826 = vmatpush.bf16.msrb.mxu1 %v9276_v45  ;;  %vm2650_vm1 = vweird.f32 %v10026_v32  ;;  %v2608_v13 = vand.u32 2147483647, %v9952_v49  ;;  %v2653_v17 = vand.u32 2147483647, %v9981_v16 }
 0x33e   :  { %v2622_v53 = vsel %vm2621_vm11, %v9983_v18, %v2618_v35  ;;  %v2633_v37 = vadd.f32 %v7657_v20, %v2632_v51  ;;  %2840 = vmatpush.bf16.msrb.mxu2 %v9289_v10  ;;  %2854 = vmatpush.bf16.msrb.mxu3 %v9291_v31  ;;  %v2646_v57 = vsub.f32 1.0, %v2645_v30  ;;  %7664 = vtanh.f32 %v10045_v48  ;;  %vm2651_vm5 = vmor %vm2649_vm4, %vm2650_vm1 }
 0x33f   :  { %v2627_v15 = vsel %vm2624_vm13, %v2626_v19, %v2622_v53  ;;  %2736 = vmatmul.bf16.vlgmr.msra.gmra.mxu0 %v9954_v61  ;;  %2750 = vmatmul.bf16.vlgmr.msra.gmra.mxu1 %v9954_v61  ;;  %v2656_v35 = vor.u32 1.1754944e-38, %v2655_v54  ;;  %vm2609_vm6 = vcmp.eq.f32.partialorder %v2608_v13, 8.507059e+37  ;;  %vm2654_vm7 = vcmp.eq.f32.partialorder %v2653_v17, 8.507059e+37  ;;  %v12545_v53 = vld [vmem:[#allocation171_spill] sm:$0xff]  ;;  %v12558_v54 = vld [vmem:[#allocation36_spill] sm:$0xff]  ;;  %v12560_v13 = vld [vmem:[#allocation38_spill] sm:$0xff] }
 0x340   :  { %v2637_v55 = vsel %vm2636_vm14, %v7657_v20, %v2633_v37  ;;  %v2664_v18 = vmul.f32 %v7661_v40, %v2627_v15  ;;  %2764 = vmatmul.bf16.vlgmr.msra.gmra.mxu2 %v9954_v61  ;;  %2778 = vmatmul.bf16.vlgmr.msra.gmra.mxu3 %v9954_v61  ;;  %v2647_v0 = vmul.f32 %v10026_v32, %v2646_v57  ;;  %v12546_v37 = vld [vmem:[#allocation172_spill] sm:$0xff]  ;;  %v12547_v57 = vld [vmem:[#allocation173_spill] sm:$0xff]  ;;  %v12561_v17 = vld [vmem:[#allocation39_spill] sm:$0xff] }
 0x341   :  { %v2642_v44 = vsel %vm2639_vm15, %v2641_v38, %v2637_v55  ;;  %2813 = vmatpush.bf16.msrb.mxu0 %v9319_v21  ;;  %2827 = vmatpush.bf16.msrb.mxu1 %v12440_v62  ;;  %v2603_v20 = vadd.f32 %v9991_v11, %v2602_v39  ;;  %v12549_v55 = vld [vmem:[#allocation27_spill] sm:$0xff]  ;;  %v12551_v39 = vld [vmem:[#allocation29_spill] sm:$0xff] }
 0x342   :  { %v2662_v47 = vmul.f32 %v2642_v44, %v9720_v3  ;;  %2841 = vmatpush.bf16.msrb.mxu2 %v12442_v34  ;;  %2855 = vmatpush.bf16.msrb.mxu3 %v12443_v12  ;;  %v2648_v40 = vadd.f32 %v10026_v32, %v2647_v0  ;;  %v2610_v3 = vand.u32 2147483648, %v9952_v49  ;;  %v12544_v49 = vld [vmem:[#allocation170_spill] sm:$0xff]  ;;  %v12553_v44 = vld [vmem:[#allocation31_spill] sm:$0xff] }
 0x343   :  { %v2607_v2 = vsel %vm10071_vm3, %v9991_v11, %v2603_v20  ;;  %v12552_v0 = vld [vmem:[#allocation30_spill] sm:$0xff]  ;;  %v12555_v20 = vld [vmem:[#allocation33_spill] sm:$0xff] }
 0x344   :  { %v10058_v61 = vadd.f32 %v2664_v18, %v2662_v47  ;;  %v2652_v42 = vsel %vm2651_vm5, %v10026_v32, %v2648_v40  ;;  %v7665_v56 = vpop.eup %7664  ;;  %v2611_v51 = vor.u32 1.1754944e-38, %v2610_v3  ;;  %v12548_v32 = vld [vmem:[#allocation174_spill] sm:$0xff]  ;;  %v12550_v18 = vld [vmem:[#allocation28_spill] sm:$0xff]  ;;  %v12557_v3 = vld [vmem:[#allocation35_spill] sm:$0xff] }
 0x345   :  { %2814 = vmatpush.bf16.msrb.mxu0 %v12444_v22  ;;  %2828 = vmatpush.bf16.msrb.mxu1 %v12445_v52  ;;  %v2657_v19 = vsel %vm2654_vm7, %v2656_v35, %v2652_v42  ;;  %v12554_v47 = vld [vmem:[#allocation32_spill] sm:$0xff]  ;;  %v12556_v40 = vld [vmem:[#allocation34_spill] sm:$0xff]  ;;  %v12563_v42 = vld [vmem:[#allocation41_spill] sm:$0xff] }
 0x346   :  { %7666 = vtanh.f32 %v10058_v61  ;;  %2842 = vmatpush.bf16.msrb.mxu2 %v9356_v59  ;;  %2856 = vmatpush.bf16.msrb.mxu3 %v9358_v6  ;;  %v2612_v30 = vsel %vm2609_vm6, %v2611_v51, %v2607_v2  ;;  %v12562_v2 = vld [vmem:[#allocation40_spill] sm:$0xff]  ;;  %v12565_v51 = vld [vmem:[#allocation43_spill] sm:$0xff] }
 0x347   :  { %v2669_v38 = vmul.f32 %v7665_v56, %v2612_v30  ;;  %v12564_v56 = vld [vmem:[#allocation42_spill] sm:$0xff]  ;;  %v12566_v35 = vld [vmem:[#allocation44_spill] sm:$0xff] }
 0x348   :  { %v12568_v30 = vld [vmem:[#allocation46_spill] sm:$0xff] }
 0x349   :  { %2815 = vmatpush.bf16.msrb.mxu0 %v12541_v50  ;;  %2829 = vmatpush.bf16.msrb.mxu1 %v12542_v33 }
 0x34a   :  { %2843 = vmatpush.bf16.msrb.mxu2 %v12543_v26  ;;  %2857 = vmatpush.bf16.msrb.mxu3 %v12544_v49  ;;  %v12624_v49 = vld [vmem:[#allocation128_spill] sm:$0xff] }
 0x34c   :  { %v7667_v16 = vpop.eup %7666 }
 0x34d   :  { %2816 = vmatpush.bf16.msrb.mxu0 %v12545_v53  ;;  %2830 = vmatpush.bf16.msrb.mxu1 %v12546_v37  ;;  %v2670_v11 = vmul.f32 %v7667_v16, %v2657_v19  ;;  %v12567_v16 = vld [vmem:[#allocation45_spill] sm:$0xff]  ;;  %v12569_v19 = vld [vmem:[#allocation48_spill] sm:$0xff] }
 0x34e   :  { %2844 = vmatpush.bf16.msrb.mxu2 %v12547_v57  ;;  %2858 = vmatpush.bf16.msrb.mxu3 %v12548_v32 }
 0x34f   :  { %v2808_v15 = vpack.c.bf16 %v2670_v11, %v2669_v38  ;;  %v12570_v38 = vld [vmem:[#allocation50_spill] sm:$0xff]  ;;  %v12571_v11 = vld [vmem:[#allocation51_spill] sm:$0xff] }
 0x351   :  { %3126 = vmatpush.bf16.msra.mxu0 %v12549_v55  ;;  %3140 = vmatpush.bf16.msra.mxu1 %v12550_v18 }
 0x352   :  { %3154 = vmatpush.bf16.msra.mxu2 %v12551_v39  ;;  %3168 = vmatpush.bf16.msra.mxu3 %v12552_v0  ;;  %v12619_v0 = vld [vmem:[#allocation123_spill] sm:$0xff] }
 0x353   :  { %2817 = vmatmul.bf16.vlgmr.msrb.gmra.mxu0 %v2808_v15  ;;  %2831 = vmatmul.bf16.vlgmr.msrb.gmra.mxu1 %v2808_v15 }
 0x354   :  { %2845 = vmatmul.bf16.vlgmr.msrb.gmra.mxu2 %v2808_v15  ;;  %2859 = vmatmul.bf16.vlgmr.msrb.gmra.mxu3 %v2808_v15  ;;  %v12572_v15 = vld [vmem:[#allocation53_spill] sm:$0xff] }
 0x355   :  { %3127 = vmatpush.bf16.msra.mxu0 %v12553_v44  ;;  %3141 = vmatpush.bf16.msra.mxu1 %v12554_v47  ;;  %v12618_v47 = vld [vmem:[#allocation122_spill] sm:$0xff] }
 0x356   :  { %3155 = vmatpush.bf16.msra.mxu2 %v12555_v20  ;;  %3169 = vmatpush.bf16.msra.mxu3 %v12556_v40 }
 0x359   :  { %3128 = vmatpush.bf16.msra.mxu0 %v12557_v3  ;;  %3142 = vmatpush.bf16.msra.mxu1 %v12558_v54  ;;  %v12616_v54 = vld [vmem:[#allocation49_spill] sm:$0xff] }
 0x35a   :  { %3156 = vmatpush.bf16.msra.mxu2 %v12559_v63  ;;  %3170 = vmatpush.bf16.msra.mxu3 %v12560_v13  ;;  %v12614_v13 = vld [vmem:[#allocation119_spill] sm:$0xff] }
 0x35b   :  { %v12615_v63 = vld [vmem:[#allocation47_spill] sm:$0xff] }
 0x35d   :  { %3129 = vmatpush.bf16.msra.mxu0 %v12561_v17  ;;  %3143 = vmatpush.bf16.msra.mxu1 %v12562_v2  ;;  %v12573_v2 = vld [vmem:[#allocation54_spill] sm:$0xff] }
 0x35e   :  { %3157 = vmatpush.bf16.msra.mxu2 %v12563_v42  ;;  %3171 = vmatpush.bf16.msra.mxu3 %v12564_v56  ;;  %v12574_v42 = vld [vmem:[#allocation55_spill] sm:$0xff]  ;;  %v12575_v56 = vld [vmem:[#allocation56_spill] sm:$0xff]  ;;  %v12613_v17 = vld [vmem:[#allocation118_spill] sm:$0xff] }
 0x361   :  { %3130 = vmatpush.bf16.msra.mxu0 %v12565_v51  ;;  %3144 = vmatpush.bf16.msra.mxu1 %v12566_v35  ;;  %v12576_v51 = vld [vmem:[#allocation57_spill] sm:$0xff]  ;;  %v12577_v35 = vld [vmem:[#allocation59_spill] sm:$0xff] }
 0x362   :  { %3158 = vmatpush.bf16.msra.mxu2 %v12567_v16  ;;  %3172 = vmatpush.bf16.msra.mxu3 %v12568_v30  ;;  %v12578_v16 = vld [vmem:[#allocation60_spill] sm:$0xff]  ;;  %v12579_v30 = vld [vmem:[#allocation61_spill] sm:$0xff] }
 0x365   :  { %3131 = vmatpush.bf16.msra.mxu0 %v12569_v19  ;;  %3145 = vmatpush.bf16.msra.mxu1 %v12570_v38  ;;  %v12580_v19 = vld [vmem:[#allocation62_spill] sm:$0xff]  ;;  %v12581_v38 = vld [vmem:[#allocation63_spill] sm:$0xff] }
 0x366   :  { %3159 = vmatpush.bf16.msra.mxu2 %v12571_v11  ;;  %3173 = vmatpush.bf16.msra.mxu3 %v12572_v15  ;;  %v12582_v11 = vld [vmem:[#allocation64_spill] sm:$0xff]  ;;  %v12583_v15 = vld [vmem:[#allocation65_spill] sm:$0xff] }
 0x369   :  { %3132 = vmatpush.bf16.msra.mxu0 %v12573_v2  ;;  %3146 = vmatpush.bf16.msra.mxu1 %v12574_v42  ;;  %v12584_v2 = vld [vmem:[#allocation66_spill] sm:$0xff]  ;;  %v12585_v42 = vld [vmem:[#allocation67_spill] sm:$0xff] }
 0x36a   :  { %3160 = vmatpush.bf16.msra.mxu2 %v12575_v56  ;;  %3174 = vmatpush.bf16.msra.mxu3 %v12576_v51  ;;  %v12586_v56 = vld [vmem:[#allocation68_spill] sm:$0xff]  ;;  %v12587_v51 = vld [vmem:[#allocation69_spill] sm:$0xff] }
 0x36d   :  { %3133 = vmatpush.bf16.msra.mxu0 %v12577_v35  ;;  %3147 = vmatpush.bf16.msra.mxu1 %v12578_v16  ;;  %v12588_v35 = vld [vmem:[#allocation71_spill] sm:$0xff]  ;;  %v12589_v16 = vld [vmem:[#allocation72_spill] sm:$0xff] }
 0x36e   :  { %3161 = vmatpush.bf16.msra.mxu2 %v12579_v30  ;;  %3175 = vmatpush.bf16.msra.mxu3 %v12580_v19  ;;  %v12590_v30 = vld [vmem:[#allocation73_spill] sm:$0xff]  ;;  %v12591_v19 = vld [vmem:[#allocation74_spill] sm:$0xff] }
 0x371   :  { %3182 = vmatpush.bf16.msrb.mxu0 %v12581_v38  ;;  %3196 = vmatpush.bf16.msrb.mxu1 %v12582_v11  ;;  %v12592_v38 = vld [vmem:[#allocation75_spill] sm:$0xff]  ;;  %v12593_v11 = vld [vmem:[#allocation76_spill] sm:$0xff] }
 0x372   :  { %3210 = vmatpush.bf16.msrb.mxu2 %v12583_v15  ;;  %3224 = vmatpush.bf16.msrb.mxu3 %v12584_v2  ;;  %v12594_v15 = vld [vmem:[#allocation77_spill] sm:$0xff] }
 0x373   :  { %v12595_v2 = vld [vmem:[#allocation81_spill] sm:$0xff] }
 0x375   :  { %3183 = vmatpush.bf16.msrb.mxu0 %v12585_v42  ;;  %3197 = vmatpush.bf16.msrb.mxu1 %v12586_v56  ;;  %v12596_v42 = vld [vmem:[#allocation82_spill] sm:$0xff]  ;;  %v12597_v56 = vld [vmem:[#allocation83_spill] sm:$0xff] }
 0x376   :  { %3211 = vmatpush.bf16.msrb.mxu2 %v12587_v51  ;;  %3225 = vmatpush.bf16.msrb.mxu3 %v12588_v35  ;;  %v12598_v51 = vld [vmem:[#allocation84_spill] sm:$0xff]  ;;  %v12599_v35 = vld [vmem:[#allocation85_spill] sm:$0xff] }
 0x379   :  { %3184 = vmatpush.bf16.msrb.mxu0 %v12589_v16  ;;  %3198 = vmatpush.bf16.msrb.mxu1 %v12590_v30  ;;  %v12600_v16 = vld [vmem:[#allocation86_spill] sm:$0xff]  ;;  %v12601_v30 = vld [vmem:[#allocation87_spill] sm:$0xff] }
 0x37a   :  { %3212 = vmatpush.bf16.msrb.mxu2 %v12591_v19  ;;  %3226 = vmatpush.bf16.msrb.mxu3 %v12592_v38  ;;  %v12602_v19 = vld [vmem:[#allocation88_spill] sm:$0xff] }
 0x37b   :  { %v12603_v38 = vld [vmem:[#allocation92_spill] sm:$0xff] }
 0x37d   :  { %3185 = vmatpush.bf16.msrb.mxu0 %v12593_v11  ;;  %3199 = vmatpush.bf16.msrb.mxu1 %v12594_v15  ;;  %v12604_v11 = vld [vmem:[#allocation93_spill] sm:$0xff]  ;;  %v12605_v15 = vld [vmem:[#allocation95_spill] sm:$0xff] }
 0x37e   :  { %3213 = vmatpush.bf16.msrb.mxu2 %v12595_v2  ;;  %3227 = vmatpush.bf16.msrb.mxu3 %v12596_v42  ;;  %v12606_v2 = vld [vmem:[#allocation96_spill] sm:$0xff]  ;;  %v12607_v42 = vld [vmem:[#allocation97_spill] sm:$0xff] }
 0x381   :  { %3186 = vmatpush.bf16.msrb.mxu0 %v12597_v56  ;;  %3200 = vmatpush.bf16.msrb.mxu1 %v12598_v51  ;;  %v12608_v56 = vld [vmem:[#allocation98_spill] sm:$0xff]  ;;  %v12609_v51 = vld [vmem:[#allocation99_spill] sm:$0xff] }
 0x382   :  { %3214 = vmatpush.bf16.msrb.mxu2 %v12599_v35  ;;  %3228 = vmatpush.bf16.msrb.mxu3 %v12600_v16  ;;  %v12610_v35 = vld [vmem:[#allocation100_spill] sm:$0xff]  ;;  %v12611_v16 = vld [vmem:[#allocation101_spill] sm:$0xff] }
 0x385   :  { %3187 = vmatpush.bf16.msrb.mxu0 %v12601_v30  ;;  %3201 = vmatpush.bf16.msrb.mxu1 %v12602_v19  ;;  %v12612_v30 = vld [vmem:[#allocation102_spill] sm:$0xff] }
 0x386   :  { %3215 = vmatpush.bf16.msrb.mxu2 %v12603_v38  ;;  %3229 = vmatpush.bf16.msrb.mxu3 %v12604_v11 }
 0x389   :  { %3188 = vmatpush.bf16.msrb.mxu0 %v12605_v15  ;;  %3202 = vmatpush.bf16.msrb.mxu1 %v12606_v2 }
 0x38a   :  { %3216 = vmatpush.bf16.msrb.mxu2 %v12607_v42  ;;  %3230 = vmatpush.bf16.msrb.mxu3 %v12608_v56 }
 0x38d   :  { %3189 = vmatpush.bf16.msrb.mxu0 %v12609_v51  ;;  %3203 = vmatpush.bf16.msrb.mxu1 %v12610_v35  ;;  %v12617_v35 = vld [vmem:[#allocation121_spill] sm:$0xff] }
 0x38e   :  { %3217 = vmatpush.bf16.msrb.mxu2 %v12611_v16  ;;  %3231 = vmatpush.bf16.msrb.mxu3 %v12612_v30 }
 0x3ac   :  { %v2681_v19 = vpop.f32.mrf.mxu0  ;;  %v2695_v38 = vpop.f32.mrf.mxu1 }
 0x3ad   :  { %v2784_v11 = vadd.f32 %v2681_v19, %v12613_v17  ;;  %v2785_v15 = vadd.f32 %v2695_v38, %v12614_v13  ;;  %v12620_v19 = vld [vmem:[#allocation52_spill] sm:$0xff] }
 0x3af   :  { %v2792_v2 = vadd.f32 %v2784_v11, %v12615_v63  ;;  %v2793_v42 = vadd.f32 %v2785_v15, %v12616_v54 }
 0x3b1   :  { %v6661_v3 = vmul.f32 -1.442695, %v2792_v2  ;;  %v6662_v56 = vmul.f32 -1.442695, %v2793_v42 }
 0x3b3   :  { %7668 = vpow2.f32 %v6661_v3  ;;  %v2709_v51 = vpop.f32.mrf.mxu2  ;;  %v2723_v40 = vpop.f32.mrf.mxu3 }
 0x3b4   :  { %7670 = vpow2.f32 %v6662_v56  ;;  %v2786_v16 = vadd.f32 %v2709_v51, %v12617_v35  ;;  %v2683_v20 = vpop.f32.mrf.mxu0  ;;  %v2697_v30 = vpop.f32.mrf.mxu1 }
 0x3b5   :  { %v2788_v44 = vadd.f32 %v2683_v20, %v12618_v47  ;;  %v2789_v17 = vadd.f32 %v2697_v30, %v12619_v0  ;;  %v12621_v20 = vld [vmem:[#allocation125_spill] sm:$0xff]  ;;  %v12622_v30 = vld [vmem:[#allocation124_spill] sm:$0xff] }
 0x3b6   :  { %v2794_v13 = vadd.f32 %v2786_v16, %v12620_v19 }
 0x3b7   :  { %v2796_v38 = vadd.f32 %v2788_v44, %v12615_v63  ;;  %v2797_v11 = vadd.f32 %v2789_v17, %v12616_v54  ;;  %v2787_v17 = vadd.f32 %v2723_v40, %v12622_v30 }
 0x3b8   :  { %v6663_v2 = vmul.f32 -1.442695, %v2794_v13 }
 0x3b9   :  { %v7669_v42 = vpop.eup %7668  ;;  %v6664_v3 = vmul.f32 -1.442695, %v2796_v38  ;;  %v6665_v56 = vmul.f32 -1.442695, %v2797_v11 }
 0x3ba   :  { %v7671_v15 = vpop.eup %7670  ;;  %v2891_v39 = vadd.f32 1.0, %v7669_v42  ;;  %7672 = vpow2.f32 %v6663_v2 }
 0x3bb   :  { %v2892_v51 = vadd.f32 1.0, %v7671_v15  ;;  %7674 = vpow2.f32 %v6664_v3  ;;  %v2711_v35 = vpop.f32.mrf.mxu2  ;;  %v2725_v18 = vpop.f32.mrf.mxu3 }
 0x3bc   :  { %7676 = vrcp.f32 %v2891_v39  ;;  %v2737_v47 = vpop.f32.mrf.mxu0  ;;  %v2751_v0 = vpop.f32.mrf.mxu1  ;;  %v2790_v44 = vadd.f32 %v2711_v35, %v12621_v20  ;;  %v12623_v35 = vld [vmem:[#allocation58_spill] sm:$0xff]  ;;  %v2906_v30 = vand.u32 2147483647, %v2891_v39  ;;  %v2908_v32 = vand.u32 2147483648, %v2891_v39 }
 0x3bd   :  { %7678 = vrcp.f32 %v2892_v51  ;;  %v2795_v20 = vadd.f32 %v2787_v17, %v12623_v35  ;;  %v2921_v53 = vand.u32 2147483647, %v2892_v51  ;;  %vm2902_vm10 = vweird.f32 %v2891_v39 }
 0x3be   :  { %7680 = vpow2.f32 %v6665_v56  ;;  %v2798_v13 = vadd.f32 %v2790_v44, %v12620_v19  ;;  %v2923_v19 = vand.u32 2147483648, %v2892_v51  ;;  %vm2917_vm11 = vweird.f32 %v2892_v51 }
 0x3bf   :  { %vm10192_vm13 = vcmp.eq.f32.partialorder %v2906_v30, 8.507059e+37  ;;  %vm2922_vm15 = vcmp.eq.f32.partialorder %v2921_v53, 8.507059e+37 }
 0x3c0   :  { %v7673_v16 = vpop.eup %7672  ;;  %v6666_v3 = vmul.f32 -1.442695, %v2798_v13  ;;  %v2924_v50 = vor.u32 1.1754944e-38, %v2923_v19 }
 0x3c1   :  { %v7675_v38 = vpop.eup %7674  ;;  %v10167_v42 = vadd.f32 1.0, %v7673_v16 }
 0x3c2   :  { %v7677_v11 = vpop.eup %7676  ;;  %v10169_v2 = vadd.f32 1.0, %v7675_v38 }
 0x3c3   :  { %v7679_v15 = vpop.eup %7678  ;;  %v2898_v54 = vmul.f32 %v7677_v11, %v2891_v39  ;;  %v10171_v63 = vpop.f32.mrf.mxu2  ;;  %7682 = vrcp.f32 %v10167_v42  ;;  %vm2903_vm8 = vweird.f32 %v7677_v11  ;;  %vm2932_vm5 = vweird.f32 %v10167_v42 }
 0x3c4   :  { %v7681_v55 = vpop.eup %7680  ;;  %v2913_v56 = vmul.f32 %v7679_v15, %v2892_v51  ;;  %v10175_v40 = vpop.f32.mrf.mxu0  ;;  %7684 = vrcp.f32 %v10169_v2  ;;  %vm2918_vm9 = vweird.f32 %v7679_v15  ;;  %vm10188_vm12 = vmor %vm2902_vm10, %vm2903_vm8  ;;  %vm2947_vm0 = vweird.f32 %v10169_v2 }
 0x3c5   :  { %v10177_v44 = vpop.f32.mrf.mxu1  ;;  %v2899_v16 = vsub.f32 1.0, %v2898_v54  ;;  %v10180_v38 = vadd.f32 1.0, %v7681_v55  ;;  %7686 = vpow2.f32 %v6666_v3  ;;  %v10182_v57 = vpop.f32.mrf.mxu3  ;;  %v2791_v54 = vadd.f32 %v2725_v18, %v12624_v49  ;;  %vm2919_vm14 = vmor %vm2917_vm11, %vm2918_vm9 }
 0x3c6   :  { %v2914_v13 = vsub.f32 1.0, %v2913_v56  ;;  %v2951_v3 = vand.u32 2147483647, %v10169_v2 }
 0x3c7   :  { %v2900_v37 = vmul.f32 %v7677_v11, %v2899_v16  ;;  %7688 = vrcp.f32 %v10180_v38  ;;  %v2909_v16 = vor.u32 1.1754944e-38, %v2908_v32  ;;  %v2799_v30 = vadd.f32 %v2791_v54, %v12623_v35 }
 0x3c8   :  { %v2915_v17 = vmul.f32 %v7679_v15, %v2914_v13  ;;  %7690 = vtanh.f32 %v2795_v20  ;;  %v2801_v32 = vadd.f32 %v2751_v0, %v12415_v9  ;;  %v2966_v6 = vand.u32 2147483647, %v10180_v38 }
 0x3c9   :  { %v2901_v26 = vadd.f32 %v7677_v11, %v2900_v37  ;;  %v10186_v55 = vpop.eup %7682  ;;  %v2800_v37 = vadd.f32 %v2737_v47, %v12414_v27  ;;  %vm2962_vm2 = vweird.f32 %v10180_v38  ;;  %vm10222_vm4 = vcmp.eq.f32.partialorder %v2951_v3, 8.507059e+37 }
 0x3ca   :  { %v2916_v33 = vadd.f32 %v7679_v15, %v2915_v17  ;;  %v7685_v13 = vpop.eup %7684  ;;  %v2928_v19 = vmul.f32 %v10186_v55, %v10167_v42  ;;  %vm2967_vm8 = vcmp.eq.f32.partialorder %v2966_v6, 8.507059e+37  ;;  %vm2933_vm9 = vweird.f32 %v10186_v55 }
 0x3cb   :  { %v2905_v49 = vsel %vm10188_vm12, %v7677_v11, %v2901_v26  ;;  %v10199_v18 = vpop.f32.mrf.mxu2  ;;  %v7687_v39 = vpop.eup %7686  ;;  %v2943_v20 = vmul.f32 %v7685_v13, %v10169_v2  ;;  %vm2948_vm1 = vweird.f32 %v7685_v13  ;;  %vm10263_vm11 = vmor %vm2932_vm5, %vm2933_vm9 }
 0x3cc   :  { %v2920_v51 = vsel %vm2919_vm14, %v7679_v15, %v2916_v33  ;;  %v2910_v26 = vsel %vm10192_vm13, %v2909_v16, %v2905_v49  ;;  %v10208_v11 = vadd.f32 1.0, %v7687_v39  ;;  %v2968_v15 = vand.u32 2147483648, %v10180_v38  ;;  %vm2949_vm6 = vmor %vm2947_vm0, %vm2948_vm1 }
 0x3cd   :  { %v7689_v17 = vpop.eup %7688  ;;  %v2925_v53 = vsel %vm2922_vm15, %v2924_v50, %v2920_v51  ;;  %v2944_v56 = vsub.f32 1.0, %v2943_v20  ;;  %v2953_v50 = vand.u32 2147483648, %v10169_v2  ;;  %v10218_v51 = vpop.f32.mrf.mxu3  ;;  %v2929_v20 = vsub.f32 1.0, %v2928_v19 }
 0x3ce   :  { %v2958_v33 = vmul.f32 %v7689_v17, %v10180_v38  ;;  %v7691_v0 = vpop.eup %7690  ;;  %7692 = vrcp.f32 %v10208_v11  ;;  %v2989_v16 = vmul.f32 %v2925_v53, %v9891_v24  ;;  %vm2963_vm3 = vweird.f32 %v7689_v17 }
 0x3cf   :  { %v2991_v49 = vmul.f32 %v7691_v0, %v2910_v26  ;;  %7694 = vtanh.f32 %v2799_v30  ;;  %v2945_v47 = vmul.f32 %v7685_v13, %v2944_v56  ;;  %v2969_v52 = vor.u32 1.1754944e-38, %v2968_v15  ;;  %vm2964_vm7 = vmor %vm2962_vm2, %vm2963_vm3 }
 0x3d0   :  { %v2818_v54 = vpop.f32.mrf.mxu0  ;;  %v2832_v35 = vpop.f32.mrf.mxu1  ;;  %v2959_v39 = vsub.f32 1.0, %v2958_v33  ;;  %v2954_v24 = vor.u32 1.1754944e-38, %v2953_v50  ;;  %v2802_v30 = vadd.f32 %v10171_v63, %v12419_v8  ;;  %v2804_v63 = vadd.f32 %v10175_v40, %v12414_v27 }
 0x3d1   :  { %v2946_v22 = vadd.f32 %v7685_v13, %v2945_v47  ;;  %v10229_v19 = vadd.f32 %v2991_v49, %v2989_v16  ;;  %v2865_v53 = vadd.f32 %v2818_v54, %v2800_v37  ;;  %v2866_v56 = vadd.f32 %v2832_v35, %v2801_v32 }
 0x3d2   :  { %v2960_v59 = vmul.f32 %v7689_v17, %v2959_v39  ;;  %v2930_v47 = vmul.f32 %v10186_v55, %v2929_v20  ;;  %v2805_v37 = vadd.f32 %v10177_v44, %v12415_v9  ;;  %vm2977_vm12 = vweird.f32 %v10208_v11 }
 0x3d3   :  { %v2950_v15 = vsel %vm2949_vm6, %v7685_v13, %v2946_v22  ;;  %v6667_v6 = vmul.f32 -1.442695, %v2865_v53  ;;  %v6668_v13 = vmul.f32 -1.442695, %v2866_v56  ;;  %7696 = vtanh.f32 %v10229_v19 }
 0x3d4   :  { %v2961_v26 = vadd.f32 %v7689_v17, %v2960_v59  ;;  %v10233_v33 = vpop.eup %7692  ;;  %v2955_v59 = vsel %vm10222_vm4, %v2954_v24, %v2950_v15  ;;  %v2931_v20 = vadd.f32 %v10186_v55, %v2930_v47  ;;  %v2806_v53 = vadd.f32 %v10199_v18, %v12419_v8 }
 0x3d5   :  { %v7695_v3 = vpop.eup %7694  ;;  %v2973_v2 = vmul.f32 %v10233_v33, %v10208_v11  ;;  %7698 = vpow2.f32 %v6667_v6  ;;  %vm2978_vm10 = vweird.f32 %v10233_v33  ;;  %v2936_v47 = vand.u32 2147483647, %v10167_v42 }
 0x3d6   :  { %v2965_v35 = vsel %vm2964_vm7, %v7689_v17, %v2961_v26  ;;  %v2992_v22 = vmul.f32 %v7695_v3, %v2955_v59  ;;  %7700 = vpow2.f32 %v6668_v13  ;;  %v2981_v15 = vand.u32 2147483647, %v10208_v11  ;;  %vm10270_vm13 = vmor %vm2977_vm12, %vm2978_vm10 }
 0x3d7   :  { %v2846_v0 = vpop.f32.mrf.mxu2  ;;  %v2970_v54 = vsel %vm2967_vm8, %v2969_v52, %v2965_v35  ;;  %v2974_v40 = vsub.f32 1.0, %v2973_v2  ;;  %v2860_v39 = vpop.f32.mrf.mxu3  ;;  %v2935_v59 = vsel %vm10263_vm11, %v10186_v55, %v2931_v20  ;;  %vm2937_vm14 = vcmp.eq.f32.partialorder %v2936_v47, 8.507059e+37 }
 0x3d8   :  { %v2820_v32 = vpop.f32.mrf.mxu0  ;;  %v2834_v38 = vpop.f32.mrf.mxu1  ;;  %v2990_v50 = vmul.f32 %v2970_v54, %v9912_v46  ;;  %v2867_v16 = vadd.f32 %v2846_v0, %v2802_v30  ;;  %v2983_v30 = vand.u32 2147483648, %v10208_v11  ;;  %vm2982_vm15 = vcmp.eq.f32.partialorder %v2981_v15, 8.507059e+37 }
 0x3d9   :  { %v2869_v12 = vadd.f32 %v2820_v32, %v2804_v63  ;;  %v2870_v17 = vadd.f32 %v2834_v38, %v2805_v37  ;;  %v2975_v49 = vmul.f32 %v10233_v33, %v2974_v40  ;;  %v7697_v0 = vpop.eup %7696  ;;  %v12635_v37 = vand.u32 2147483648, %v10167_v42 }
 0x3da   :  { %v10250_v44 = vadd.f32 %v2992_v22, %v2990_v50  ;;  %v6669_v52 = vmul.f32 -1.442695, %v2867_v16  ;;  %v2984_v38 = vor.u32 1.1754944e-38, %v2983_v30 }
 0x3db   :  { %v6670_v24 = vmul.f32 -1.442695, %v2869_v12  ;;  %v6671_v26 = vmul.f32 -1.442695, %v2870_v17  ;;  %v2976_v46 = vadd.f32 %v10233_v33, %v2975_v49  ;;  %v7699_v2 = vpop.eup %7698  ;;  %v2939_v32 = vor.u32 1.1754944e-38, %v12635_v37 }
 0x3dc   :  { %7702 = vtanh.f32 %v10250_v44  ;;  %v7701_v11 = vpop.eup %7700  ;;  %v10282_v54 = vadd.f32 1.0, %v7699_v2  ;;  %v2803_v12 = vadd.f32 %v10182_v57, %v12426_v4 }
 0x3dd   :  { %7704 = vpow2.f32 %v6669_v52  ;;  %v2980_v35 = vsel %vm10270_vm13, %v10233_v33, %v2976_v46  ;;  %v10284_v22 = vadd.f32 1.0, %v7701_v11  ;;  %v2940_v40 = vsel %vm2937_vm14, %v2939_v32, %v2935_v59 }
 0x3de   :  { %7706 = vpow2.f32 %v6670_v24  ;;  %v2985_v55 = vsel %vm2982_vm15, %v2984_v38, %v2980_v35  ;;  %v2997_v33 = vmul.f32 %v7697_v0, %v2940_v40  ;;  %v2807_v24 = vadd.f32 %v10218_v51, %v12426_v4 }
 0x3df   :  { %v2848_v63 = vpop.f32.mrf.mxu2  ;;  %7708 = vpow2.f32 %v6671_v26  ;;  %v2862_v49 = vpop.f32.mrf.mxu3  ;;  %v2868_v46 = vadd.f32 %v2860_v39, %v2803_v12  ;;  %v3032_v39 = vand.u32 2147483647, %v10282_v54  ;;  %v3034_v47 = vand.u32 2147483648, %v10282_v54 }
 0x3e0   :  { %v2871_v18 = vadd.f32 %v2848_v63, %v2806_v53  ;;  %7710 = vrcp.f32 %v10282_v54  ;;  %v2872_v53 = vadd.f32 %v2862_v49, %v2807_v24  ;;  %v3049_v3 = vand.u32 2147483648, %v10284_v22 }
 0x3e1   :  { %7712 = vrcp.f32 %v10284_v22  ;;  %vm3043_vm0 = vweird.f32 %v10284_v22  ;;  %vm3028_vm1 = vweird.f32 %v10282_v54  ;;  %vm10323_vm3 = vcmp.eq.f32.partialorder %v3032_v39, 8.507059e+37 }
 0x3e2   :  { %v6672_v6 = vmul.f32 -1.442695, %v2871_v18  ;;  %v7703_v13 = vpop.eup %7702  ;;  %v3047_v18 = vand.u32 2147483647, %v10284_v22  ;;  %v3035_v32 = vor.u32 1.1754944e-38, %v3034_v47 }
 0x3e3   :  { %v7705_v50 = vpop.eup %7704  ;;  %v2998_v16 = vmul.f32 %v7703_v13, %v2985_v55  ;;  %v3050_v55 = vor.u32 1.1754944e-38, %v3049_v3 }
 0x3e4   :  { %v7707_v42 = vpop.eup %7706  ;;  %v10290_v17 = vadd.f32 1.0, %v7705_v50  ;;  %7714 = vpow2.f32 %v6672_v6  ;;  %vm10336_vm5 = vcmp.eq.f32.partialorder %v3047_v18, 8.507059e+37 }
 0x3e5   :  { %v7709_v52 = vpop.eup %7708  ;;  %v10292_v20 = vpack.c.bf16 %v2998_v16, %v2997_v33  ;;  %v10296_v26 = vadd.f32 1.0, %v7707_v42 }
 0x3e6   :  { %v10299_v30 = vadd.f32 1.0, %v7709_v52  ;;  %v7711_v57 = vpop.eup %7710 }
 0x3e7   :  { %7716 = vrcp.f32 %v10296_v26  ;;  %3134 = vmatmul.bf16.vlgmr.msra.gmra.mxu0 %v10292_v20  ;;  %3148 = vmatmul.bf16.vlgmr.msra.gmra.mxu1 %v10292_v20  ;;  %v7713_v51 = vpop.eup %7712  ;;  %v3024_v56 = vmul.f32 %v7711_v57, %v10282_v54  ;;  %vm3029_vm2 = vweird.f32 %v7711_v57  ;;  %vm3073_vm6 = vweird.f32 %v10296_v26 }
 0x3e8   :  { %7718 = vrcp.f32 %v10290_v17  ;;  %3162 = vmatmul.bf16.vlgmr.msra.gmra.mxu2 %v10292_v20  ;;  %3176 = vmatmul.bf16.vlgmr.msra.gmra.mxu3 %v10292_v20  ;;  %v3039_v15 = vmul.f32 %v7713_v51, %v10284_v22  ;;  %vm3044_vm4 = vweird.f32 %v7713_v51  ;;  %vm3030_vm7 = vmor %vm3028_vm1, %vm3029_vm2  ;;  %v3077_v52 = vand.u32 2147483647, %v10296_v26 }
 0x3e9   :  { %7720 = vrcp.f32 %v10299_v30  ;;  %3263 = vmatpush.bf16.msra.mxu0 %v12427_v5  ;;  %3277 = vmatpush.bf16.msra.mxu1 %v12428_v1  ;;  %v3025_v0 = vsub.f32 1.0, %v3024_v56  ;;  %vm3045_vm8 = vmor %vm3043_vm0, %vm3044_vm4  ;;  %v3079_v54 = vand.u32 2147483648, %v10296_v26  ;;  %vm3088_vm12 = vweird.f32 %v10299_v30 }
 0x3ea   :  { %7722 = vtanh.f32 %v2868_v46  ;;  %3291 = vmatpush.bf16.msra.mxu2 %v12429_v14  ;;  %3305 = vmatpush.bf16.msra.mxu3 %v12430_v23  ;;  %v7715_v63 = vpop.eup %7714  ;;  %v3040_v2 = vsub.f32 1.0, %v3039_v15  ;;  %v3094_v15 = vand.u32 2147483648, %v10299_v30  ;;  %vm3078_vm13 = vcmp.eq.f32.partialorder %v3077_v52, 8.507059e+37 }
 0x3eb   :  { %7724 = vtanh.f32 %v2872_v53  ;;  %v10319_v59 = vadd.f32 1.0, %v7715_v63  ;;  %v3026_v11 = vmul.f32 %v7711_v57, %v3025_v0  ;;  %v3092_v63 = vand.u32 2147483647, %v10299_v30 }
 0x3ec   :  { %v3041_v6 = vmul.f32 %v7713_v51, %v3040_v2  ;;  %vm3058_vm2 = vweird.f32 %v10290_v17 }
 0x3ed   :  { %v10321_v35 = vpop.eup %7716  ;;  %3264 = vmatpush.bf16.msra.mxu0 %v12433_v43  ;;  %3278 = vmatpush.bf16.msra.mxu1 %v12532_v60  ;;  %7726 = vrcp.f32 %v10319_v59  ;;  %v3027_v50 = vadd.f32 %v7711_v57, %v3026_v11  ;;  %vm3093_vm15 = vcmp.eq.f32.partialorder %v3092_v63, 8.507059e+37  ;;  %vm3103_vm4 = vweird.f32 %v10319_v59 }
 0x3ee   :  { %v10329_v38 = vpop.eup %7718  ;;  %v3069_v13 = vmul.f32 %v10321_v35, %v10296_v26  ;;  %3292 = vmatpush.bf16.msra.mxu2 %v12533_v41  ;;  %3306 = vmatpush.bf16.msra.mxu3 %v12534_v29  ;;  %v3042_v42 = vadd.f32 %v7713_v51, %v3041_v6  ;;  %vm3074_vm9 = vweird.f32 %v10321_v35 }
 0x3ef   :  { %v7721_v40 = vpop.eup %7720  ;;  %v3054_v46 = vmul.f32 %v10329_v38, %v10290_v17  ;;  %v3031_v53 = vsel %vm3030_vm7, %v7711_v57, %v3027_v50  ;;  %vm3075_vm11 = vmor %vm3073_vm6, %vm3074_vm9  ;;  %vm3059_vm0 = vweird.f32 %v10329_v38 }
 0x3f0   :  { %v7723_v16 = vpop.eup %7722  ;;  %v3070_v12 = vsub.f32 1.0, %v3069_v13  ;;  %v3084_v49 = vmul.f32 %v7721_v40, %v10299_v30  ;;  %v3036_v56 = vsel %vm10323_vm3, %v3035_v32, %v3031_v53  ;;  %v3046_v39 = vsel %vm3045_vm8, %v7713_v51, %v3042_v42  ;;  %vm10409_vm3 = vmor %vm3058_vm2, %vm3059_vm0 }
 0x3f1   :  { %v7725_v24 = vpop.eup %7724  ;;  %3265 = vmatpush.bf16.msra.mxu0 %v12537_v7  ;;  %3279 = vmatpush.bf16.msra.mxu1 %v12538_v36  ;;  %v3051_v57 = vsel %vm10336_vm5, %v3050_v55, %v3046_v39  ;;  %vm3089_vm10 = vweird.f32 %v7721_v40  ;;  %v3117_v51 = vmul.f32 %v7723_v16, %v3036_v56  ;;  %v3055_v11 = vsub.f32 1.0, %v3054_v46  ;;  %v12642_v46 = vld [vmem:[#allocation163_spill] sm:$0xff]  ;;  %v12644_v56 = vld [vmem:[#allocation166_spill] sm:$0xff]  ;;  %v12665_v39 = vld [vmem:[#allocation37_spill] sm:$0xff] }
 0x3f2   :  { %v3085_v47 = vsub.f32 1.0, %v3084_v49  ;;  %v3071_v22 = vmul.f32 %v10321_v35, %v3070_v12  ;;  %3293 = vmatpush.bf16.msra.mxu2 %v9260_v25  ;;  %3307 = vmatpush.bf16.msra.mxu3 %v9269_v28  ;;  %v3115_v3 = vmul.f32 %v3051_v57, %v10045_v48  ;;  %v3080_v32 = vor.u32 1.1754944e-38, %v3079_v54  ;;  %vm3090_vm14 = vmor %vm3088_vm12, %vm3089_vm10  ;;  %v12643_v54 = vld [vmem:[#allocation165_spill] sm:$0xff]  ;;  %v12647_v57 = vld [vmem:[#allocation167_spill] sm:$0xff] }
 0x3f3   :  { %v10364_v0 = vpop.eup %7726  ;;  %v3095_v13 = vor.u32 1.1754944e-38, %v3094_v15  ;;  %v3056_v33 = vmul.f32 %v10329_v38, %v3055_v11  ;;  %v3109_v53 = vand.u32 2147483648, %v10319_v59  ;;  %v12648_v15 = vld [vmem:[#allocation168_spill] sm:$0xff]  ;;  %v12649_v11 = vld [vmem:[#allocation169_spill] sm:$0xff] }
 0x3f4   :  { %v3086_v18 = vmul.f32 %v7721_v40, %v3085_v47  ;;  %v3072_v2 = vadd.f32 %v10321_v35, %v3071_v22  ;;  %v3099_v37 = vmul.f32 %v10364_v0, %v10319_v59  ;;  %v10383_v50 = vadd.f32 %v3117_v51, %v3115_v3 }
 0x3f5   :  { %3266 = vmatpush.bf16.msra.mxu0 %v9274_v58  ;;  %3280 = vmatpush.bf16.msra.mxu1 %v9276_v45  ;;  %v3057_v49 = vadd.f32 %v10329_v38, %v3056_v33  ;;  %vm3104_vm1 = vweird.f32 %v10364_v0  ;;  %v3062_v47 = vand.u32 2147483647, %v10290_v17  ;;  %v3107_v22 = vand.u32 2147483647, %v10319_v59  ;;  %v12657_v33 = vld [vmem:[#allocation29_spill] sm:$0xff] }
 0x3f6   :  { %v3076_v48 = vsel %vm3075_vm11, %v10321_v35, %v3072_v2  ;;  %v3087_v6 = vadd.f32 %v7721_v40, %v3086_v18  ;;  %3294 = vmatpush.bf16.msra.mxu2 %v9289_v10  ;;  %3308 = vmatpush.bf16.msra.mxu3 %v9291_v31  ;;  %v3100_v26 = vsub.f32 1.0, %v3099_v37  ;;  %7728 = vtanh.f32 %v10383_v50  ;;  %vm3105_vm5 = vmor %vm3103_vm4, %vm3104_vm1 }
 0x3f7   :  { %v3081_v55 = vsel %vm3078_vm13, %v3080_v32, %v3076_v48  ;;  %3190 = vmatmul.bf16.vlgmr.msrb.gmra.mxu0 %v10292_v20  ;;  %3204 = vmatmul.bf16.vlgmr.msrb.gmra.mxu1 %v10292_v20  ;;  %v3061_v63 = vsel %vm10409_vm3, %v10329_v38, %v3057_v49  ;;  %v3110_v2 = vor.u32 1.1754944e-38, %v3109_v53  ;;  %vm3063_vm6 = vcmp.eq.f32.partialorder %v3062_v47, 8.507059e+37  ;;  %v12651_v48 = vld [vmem:[#allocation171_spill] sm:$0xff]  ;;  %v12661_v49 = vld [vmem:[#allocation33_spill] sm:$0xff]  ;;  %v12664_v53 = vld [vmem:[#allocation36_spill] sm:$0xff] }
 0x3f8   :  { %v3091_v30 = vsel %vm3090_vm14, %v7721_v40, %v3087_v6  ;;  %v3118_v35 = vmul.f32 %v7725_v24, %v3081_v55  ;;  %3218 = vmatmul.bf16.vlgmr.msrb.gmra.mxu2 %v10292_v20  ;;  %3232 = vmatmul.bf16.vlgmr.msrb.gmra.mxu3 %v10292_v20  ;;  %v3101_v16 = vmul.f32 %v10364_v0, %v3100_v26  ;;  %v12640_v40 = vld [vmem:[#allocation161_spill] sm:$0xff]  ;;  %v12641_v24 = vld [vmem:[#allocation162_spill] sm:$0xff]  ;;  %vm3108_vm7 = vcmp.eq.f32.partialorder %v3107_v22, 8.507059e+37  ;;  %v12652_v6 = vld [vmem:[#allocation172_spill] sm:$0xff] }
 0x3f9   :  { %v3096_v42 = vsel %vm3093_vm15, %v3095_v13, %v3091_v30  ;;  %3267 = vmatpush.bf16.msra.mxu0 %v9319_v21  ;;  %3281 = vmatpush.bf16.msra.mxu1 %v12440_v62  ;;  %v12653_v26 = vld [vmem:[#allocation173_spill] sm:$0xff]  ;;  %v12655_v30 = vld [vmem:[#allocation27_spill] sm:$0xff]  ;;  %v12666_v47 = vld [vmem:[#allocation38_spill] sm:$0xff] }
 0x3fa   :  { %v3116_v12 = vmul.f32 %v3096_v42, %v10058_v61  ;;  %3295 = vmatpush.bf16.msra.mxu2 %v12442_v34  ;;  %3309 = vmatpush.bf16.msra.mxu3 %v12640_v40  ;;  %v3102_v52 = vadd.f32 %v10364_v0, %v3101_v16  ;;  %v3064_v61 = vand.u32 2147483648, %v10290_v17  ;;  %v12650_v17 = vld [vmem:[#allocation170_spill] sm:$0xff]  ;;  %v12659_v42 = vld [vmem:[#allocation31_spill] sm:$0xff] }
 0x3fb   :  { %v12658_v16 = vld [vmem:[#allocation30_spill] sm:$0xff]  ;;  %v12667_v22 = vld [vmem:[#allocation39_spill] sm:$0xff] }
 0x3fc   :  { %v10396_v20 = vadd.f32 %v3118_v35, %v3116_v12  ;;  %v3106_v3 = vsel %vm3105_vm5, %v10364_v0, %v3102_v52  ;;  %v7729_v51 = vpop.eup %7728  ;;  %v3065_v18 = vor.u32 1.1754944e-38, %v3064_v61  ;;  %v12654_v0 = vld [vmem:[#allocation174_spill] sm:$0xff]  ;;  %v12656_v35 = vld [vmem:[#allocation28_spill] sm:$0xff]  ;;  %v12663_v61 = vld [vmem:[#allocation35_spill] sm:$0xff] }
 0x3fd   :  { %3268 = vmatpush.bf16.msra.mxu0 %v12641_v24  ;;  %3282 = vmatpush.bf16.msra.mxu1 %v12642_v46  ;;  %v3111_v32 = vsel %vm3108_vm7, %v3110_v2, %v3106_v3  ;;  %v12660_v12 = vld [vmem:[#allocation32_spill] sm:$0xff]  ;;  %v12662_v52 = vld [vmem:[#allocation34_spill] sm:$0xff]  ;;  %v12669_v3 = vld [vmem:[#allocation41_spill] sm:$0xff] }
 0x3fe   :  { %7730 = vtanh.f32 %v10396_v20  ;;  %3296 = vmatpush.bf16.msra.mxu2 %v12643_v54  ;;  %3310 = vmatpush.bf16.msra.mxu3 %v12644_v56  ;;  %v3066_v37 = vsel %vm3063_vm6, %v3065_v18, %v3061_v63  ;;  %v12668_v63 = vld [vmem:[#allocation40_spill] sm:$0xff]  ;;  %v12671_v18 = vld [vmem:[#allocation43_spill] sm:$0xff] }
 0x3ff   :  { %v3123_v13 = vmul.f32 %v7729_v51, %v3066_v37  ;;  %v12670_v51 = vld [vmem:[#allocation42_spill] sm:$0xff]  ;;  %v12672_v2 = vld [vmem:[#allocation44_spill] sm:$0xff] }
 0x400   :  { %v12674_v37 = vld [vmem:[#allocation46_spill] sm:$0xff] }
 0x401   :  { %3269 = vmatpush.bf16.msra.mxu0 %v12647_v57  ;;  %3283 = vmatpush.bf16.msra.mxu1 %v12648_v15 }
 0x402   :  { %3297 = vmatpush.bf16.msra.mxu2 %v12649_v11  ;;  %3311 = vmatpush.bf16.msra.mxu3 %v12650_v17  ;;  %v12730_v17 = vld [vmem:[#allocation136_spill] sm:$0xff] }
 0x404   :  { %v7731_v59 = vpop.eup %7730 }
 0x405   :  { %3270 = vmatpush.bf16.msra.mxu0 %v12651_v48  ;;  %3284 = vmatpush.bf16.msra.mxu1 %v12652_v6  ;;  %v3124_v38 = vmul.f32 %v7731_v59, %v3111_v32  ;;  %v12673_v59 = vld [vmem:[#allocation45_spill] sm:$0xff]  ;;  %v12675_v32 = vld [vmem:[#allocation48_spill] sm:$0xff] }
 0x406   :  { %3298 = vmatpush.bf16.msra.mxu2 %v12653_v26  ;;  %3312 = vmatpush.bf16.msra.mxu3 %v12654_v0 }
 0x407   :  { %v3262_v55 = vpack.c.bf16 %v3124_v38, %v3123_v13  ;;  %v12676_v13 = vld [vmem:[#allocation50_spill] sm:$0xff]  ;;  %v12677_v38 = vld [vmem:[#allocation51_spill] sm:$0xff] }
 0x409   :  { %3580 = vmatpush.bf16.msrb.mxu0 %v12655_v30  ;;  %3594 = vmatpush.bf16.msrb.mxu1 %v12656_v35 }
 0x40a   :  { %3608 = vmatpush.bf16.msrb.mxu2 %v12657_v33  ;;  %3622 = vmatpush.bf16.msrb.mxu3 %v12658_v16  ;;  %v12725_v16 = vld [vmem:[#allocation131_spill] sm:$0xff] }
 0x40b   :  { %3271 = vmatmul.bf16.vlgmr.msra.gmra.mxu0 %v3262_v55  ;;  %3285 = vmatmul.bf16.vlgmr.msra.gmra.mxu1 %v3262_v55 }
 0x40c   :  { %3299 = vmatmul.bf16.vlgmr.msra.gmra.mxu2 %v3262_v55  ;;  %3313 = vmatmul.bf16.vlgmr.msra.gmra.mxu3 %v3262_v55  ;;  %v12678_v55 = vld [vmem:[#allocation53_spill] sm:$0xff] }
 0x40d   :  { %3581 = vmatpush.bf16.msrb.mxu0 %v12659_v42  ;;  %3595 = vmatpush.bf16.msrb.mxu1 %v12660_v12  ;;  %v12724_v12 = vld [vmem:[#allocation130_spill] sm:$0xff] }
 0x40e   :  { %3609 = vmatpush.bf16.msrb.mxu2 %v12661_v49  ;;  %3623 = vmatpush.bf16.msrb.mxu3 %v12662_v52 }
 0x411   :  { %3582 = vmatpush.bf16.msrb.mxu0 %v12663_v61  ;;  %3596 = vmatpush.bf16.msrb.mxu1 %v12664_v53  ;;  %v12722_v53 = vld [vmem:[#allocation49_spill] sm:$0xff] }
 0x412   :  { %3610 = vmatpush.bf16.msrb.mxu2 %v12665_v39  ;;  %3624 = vmatpush.bf16.msrb.mxu3 %v12666_v47  ;;  %v12720_v47 = vld [vmem:[#allocation127_spill] sm:$0xff] }
 0x413   :  { %v12721_v39 = vld [vmem:[#allocation47_spill] sm:$0xff] }
 0x415   :  { %3583 = vmatpush.bf16.msrb.mxu0 %v12667_v22  ;;  %3597 = vmatpush.bf16.msrb.mxu1 %v12668_v63  ;;  %v12679_v63 = vld [vmem:[#allocation54_spill] sm:$0xff] }
 0x416   :  { %3611 = vmatpush.bf16.msrb.mxu2 %v12669_v3  ;;  %3625 = vmatpush.bf16.msrb.mxu3 %v12670_v51  ;;  %v12680_v3 = vld [vmem:[#allocation55_spill] sm:$0xff]  ;;  %v12681_v51 = vld [vmem:[#allocation56_spill] sm:$0xff]  ;;  %v12719_v22 = vld [vmem:[#allocation126_spill] sm:$0xff] }
 0x419   :  { %3584 = vmatpush.bf16.msrb.mxu0 %v12671_v18  ;;  %3598 = vmatpush.bf16.msrb.mxu1 %v12672_v2  ;;  %v12682_v18 = vld [vmem:[#allocation57_spill] sm:$0xff]  ;;  %v12683_v2 = vld [vmem:[#allocation59_spill] sm:$0xff] }
 0x41a   :  { %3612 = vmatpush.bf16.msrb.mxu2 %v12673_v59  ;;  %3626 = vmatpush.bf16.msrb.mxu3 %v12674_v37  ;;  %v12684_v59 = vld [vmem:[#allocation60_spill] sm:$0xff]  ;;  %v12685_v37 = vld [vmem:[#allocation61_spill] sm:$0xff] }
 0x41d   :  { %3585 = vmatpush.bf16.msrb.mxu0 %v12675_v32  ;;  %3599 = vmatpush.bf16.msrb.mxu1 %v12676_v13  ;;  %v12686_v32 = vld [vmem:[#allocation62_spill] sm:$0xff]  ;;  %v12687_v13 = vld [vmem:[#allocation63_spill] sm:$0xff] }
 0x41e   :  { %3613 = vmatpush.bf16.msrb.mxu2 %v12677_v38  ;;  %3627 = vmatpush.bf16.msrb.mxu3 %v12678_v55  ;;  %v12688_v38 = vld [vmem:[#allocation64_spill] sm:$0xff]  ;;  %v12689_v55 = vld [vmem:[#allocation65_spill] sm:$0xff] }
 0x421   :  { %3586 = vmatpush.bf16.msrb.mxu0 %v12679_v63  ;;  %3600 = vmatpush.bf16.msrb.mxu1 %v12680_v3  ;;  %v12690_v63 = vld [vmem:[#allocation66_spill] sm:$0xff]  ;;  %v12691_v3 = vld [vmem:[#allocation67_spill] sm:$0xff] }
 0x422   :  { %3614 = vmatpush.bf16.msrb.mxu2 %v12681_v51  ;;  %3628 = vmatpush.bf16.msrb.mxu3 %v12682_v18  ;;  %v12692_v51 = vld [vmem:[#allocation68_spill] sm:$0xff]  ;;  %v12693_v18 = vld [vmem:[#allocation69_spill] sm:$0xff] }
 0x425   :  { %3587 = vmatpush.bf16.msrb.mxu0 %v12683_v2  ;;  %3601 = vmatpush.bf16.msrb.mxu1 %v12684_v59  ;;  %v12694_v2 = vld [vmem:[#allocation71_spill] sm:$0xff]  ;;  %v12695_v59 = vld [vmem:[#allocation72_spill] sm:$0xff] }
 0x426   :  { %3615 = vmatpush.bf16.msrb.mxu2 %v12685_v37  ;;  %3629 = vmatpush.bf16.msrb.mxu3 %v12686_v32  ;;  %v12696_v37 = vld [vmem:[#allocation73_spill] sm:$0xff]  ;;  %v12697_v32 = vld [vmem:[#allocation74_spill] sm:$0xff] }
 0x429   :  { %3636 = vmatpush.bf16.msra.mxu0 %v12687_v13  ;;  %3650 = vmatpush.bf16.msra.mxu1 %v12688_v38  ;;  %v12698_v13 = vld [vmem:[#allocation75_spill] sm:$0xff]  ;;  %v12699_v38 = vld [vmem:[#allocation76_spill] sm:$0xff] }
 0x42a   :  { %3664 = vmatpush.bf16.msra.mxu2 %v12689_v55  ;;  %3678 = vmatpush.bf16.msra.mxu3 %v12690_v63  ;;  %v12700_v55 = vld [vmem:[#allocation77_spill] sm:$0xff] }
 0x42b   :  { %v12701_v63 = vld [vmem:[#allocation81_spill] sm:$0xff] }
 0x42d   :  { %3637 = vmatpush.bf16.msra.mxu0 %v12691_v3  ;;  %3651 = vmatpush.bf16.msra.mxu1 %v12692_v51  ;;  %v12702_v3 = vld [vmem:[#allocation82_spill] sm:$0xff]  ;;  %v12703_v51 = vld [vmem:[#allocation83_spill] sm:$0xff] }
 0x42e   :  { %3665 = vmatpush.bf16.msra.mxu2 %v12693_v18  ;;  %3679 = vmatpush.bf16.msra.mxu3 %v12694_v2  ;;  %v12704_v18 = vld [vmem:[#allocation84_spill] sm:$0xff]  ;;  %v12705_v2 = vld [vmem:[#allocation85_spill] sm:$0xff] }
 0x431   :  { %3638 = vmatpush.bf16.msra.mxu0 %v12695_v59  ;;  %3652 = vmatpush.bf16.msra.mxu1 %v12696_v37  ;;  %v12706_v59 = vld [vmem:[#allocation86_spill] sm:$0xff]  ;;  %v12707_v37 = vld [vmem:[#allocation87_spill] sm:$0xff] }
 0x432   :  { %3666 = vmatpush.bf16.msra.mxu2 %v12697_v32  ;;  %3680 = vmatpush.bf16.msra.mxu3 %v12698_v13  ;;  %v12708_v32 = vld [vmem:[#allocation88_spill] sm:$0xff] }
 0x433   :  { %v12709_v13 = vld [vmem:[#allocation92_spill] sm:$0xff] }
 0x435   :  { %3639 = vmatpush.bf16.msra.mxu0 %v12699_v38  ;;  %3653 = vmatpush.bf16.msra.mxu1 %v12700_v55  ;;  %v12710_v38 = vld [vmem:[#allocation93_spill] sm:$0xff]  ;;  %v12711_v55 = vld [vmem:[#allocation95_spill] sm:$0xff] }
 0x436   :  { %3667 = vmatpush.bf16.msra.mxu2 %v12701_v63  ;;  %3681 = vmatpush.bf16.msra.mxu3 %v12702_v3  ;;  %v12712_v63 = vld [vmem:[#allocation96_spill] sm:$0xff]  ;;  %v12713_v3 = vld [vmem:[#allocation97_spill] sm:$0xff] }
 0x439   :  { %3640 = vmatpush.bf16.msra.mxu0 %v12703_v51  ;;  %3654 = vmatpush.bf16.msra.mxu1 %v12704_v18  ;;  %v12714_v51 = vld [vmem:[#allocation98_spill] sm:$0xff]  ;;  %v12715_v18 = vld [vmem:[#allocation99_spill] sm:$0xff] }
 0x43a   :  { %3668 = vmatpush.bf16.msra.mxu2 %v12705_v2  ;;  %3682 = vmatpush.bf16.msra.mxu3 %v12706_v59  ;;  %v12716_v2 = vld [vmem:[#allocation100_spill] sm:$0xff]  ;;  %v12717_v59 = vld [vmem:[#allocation101_spill] sm:$0xff] }
 0x43d   :  { %3641 = vmatpush.bf16.msra.mxu0 %v12707_v37  ;;  %3655 = vmatpush.bf16.msra.mxu1 %v12708_v32  ;;  %v12718_v37 = vld [vmem:[#allocation102_spill] sm:$0xff] }
 0x43e   :  { %3669 = vmatpush.bf16.msra.mxu2 %v12709_v13  ;;  %3683 = vmatpush.bf16.msra.mxu3 %v12710_v38 }
 0x441   :  { %3642 = vmatpush.bf16.msra.mxu0 %v12711_v55  ;;  %3656 = vmatpush.bf16.msra.mxu1 %v12712_v63 }
 0x442   :  { %3670 = vmatpush.bf16.msra.mxu2 %v12713_v3  ;;  %3684 = vmatpush.bf16.msra.mxu3 %v12714_v51 }
 0x445   :  { %3643 = vmatpush.bf16.msra.mxu0 %v12715_v18  ;;  %3657 = vmatpush.bf16.msra.mxu1 %v12716_v2  ;;  %v12723_v2 = vld [vmem:[#allocation129_spill] sm:$0xff] }
 0x446   :  { %3671 = vmatpush.bf16.msra.mxu2 %v12717_v59  ;;  %3685 = vmatpush.bf16.msra.mxu3 %v12718_v37 }
 0x464   :  { %v3135_v32 = vpop.f32.mrf.mxu0  ;;  %v3149_v13 = vpop.f32.mrf.mxu1 }
 0x465   :  { %v3238_v38 = vadd.f32 %v3135_v32, %v12719_v22  ;;  %v3239_v55 = vadd.f32 %v3149_v13, %v12720_v47  ;;  %v12726_v32 = vld [vmem:[#allocation52_spill] sm:$0xff] }
 0x467   :  { %v3246_v63 = vadd.f32 %v3238_v38, %v12721_v39  ;;  %v3247_v3 = vadd.f32 %v3239_v55, %v12722_v53 }
 0x469   :  { %v6673_v61 = vmul.f32 -1.442695, %v3246_v63  ;;  %v6674_v51 = vmul.f32 -1.442695, %v3247_v3 }
 0x46b   :  { %7732 = vpow2.f32 %v6673_v61  ;;  %v3163_v18 = vpop.f32.mrf.mxu2  ;;  %v3177_v52 = vpop.f32.mrf.mxu3 }
 0x46c   :  { %7734 = vpow2.f32 %v6674_v51  ;;  %v3240_v59 = vadd.f32 %v3163_v18, %v12723_v2  ;;  %v3137_v49 = vpop.f32.mrf.mxu0  ;;  %v3151_v37 = vpop.f32.mrf.mxu1 }
 0x46d   :  { %v3242_v42 = vadd.f32 %v3137_v49, %v12724_v12  ;;  %v3243_v22 = vadd.f32 %v3151_v37, %v12725_v16  ;;  %v12727_v49 = vld [vmem:[#allocation133_spill] sm:$0xff]  ;;  %v12728_v37 = vld [vmem:[#allocation132_spill] sm:$0xff] }
 0x46e   :  { %v3248_v47 = vadd.f32 %v3240_v59, %v12726_v32 }
 0x46f   :  { %v3250_v13 = vadd.f32 %v3242_v42, %v12721_v39  ;;  %v3251_v38 = vadd.f32 %v3243_v22, %v12722_v53  ;;  %v3241_v22 = vadd.f32 %v3177_v52, %v12728_v37 }
 0x470   :  { %v6675_v63 = vmul.f32 -1.442695, %v3248_v47 }
 0x471   :  { %v7733_v3 = vpop.eup %7732  ;;  %v6676_v61 = vmul.f32 -1.442695, %v3250_v13  ;;  %v6677_v51 = vmul.f32 -1.442695, %v3251_v38 }
 0x472   :  { %v7735_v55 = vpop.eup %7734  ;;  %v3345_v33 = vadd.f32 1.0, %v7733_v3  ;;  %7736 = vpow2.f32 %v6675_v63 }
 0x473   :  { %v3346_v18 = vadd.f32 1.0, %v7735_v55  ;;  %7738 = vpow2.f32 %v6676_v61  ;;  %v3165_v2 = vpop.f32.mrf.mxu2  ;;  %v3179_v35 = vpop.f32.mrf.mxu3 }
 0x474   :  { %7740 = vrcp.f32 %v3345_v33  ;;  %v3191_v12 = vpop.f32.mrf.mxu0  ;;  %v3205_v16 = vpop.f32.mrf.mxu1  ;;  %v3244_v42 = vadd.f32 %v3165_v2, %v12727_v49  ;;  %v12729_v2 = vld [vmem:[#allocation58_spill] sm:$0xff]  ;;  %v3360_v37 = vand.u32 2147483647, %v3345_v33  ;;  %v3362_v0 = vand.u32 2147483648, %v3345_v33 }
 0x475   :  { %7742 = vrcp.f32 %v3346_v18  ;;  %v3249_v49 = vadd.f32 %v3241_v22, %v12729_v2  ;;  %v3375_v48 = vand.u32 2147483647, %v3346_v18  ;;  %vm3356_vm10 = vweird.f32 %v3345_v33 }
 0x476   :  { %7744 = vpow2.f32 %v6677_v51  ;;  %v3252_v47 = vadd.f32 %v3244_v42, %v12726_v32  ;;  %v3377_v32 = vand.u32 2147483648, %v3346_v18  ;;  %vm3371_vm11 = vweird.f32 %v3346_v18 }
 0x477   :  { %vm10530_vm13 = vcmp.eq.f32.partialorder %v3360_v37, 8.507059e+37  ;;  %vm3376_vm15 = vcmp.eq.f32.partialorder %v3375_v48, 8.507059e+37 }
 0x478   :  { %v7737_v59 = vpop.eup %7736  ;;  %v6678_v61 = vmul.f32 -1.442695, %v3252_v47  ;;  %v3378_v57 = vor.u32 1.1754944e-38, %v3377_v32 }
 0x479   :  { %v7739_v13 = vpop.eup %7738  ;;  %v10505_v3 = vadd.f32 1.0, %v7737_v59 }
 0x47a   :  { %v7741_v38 = vpop.eup %7740  ;;  %v10507_v63 = vadd.f32 1.0, %v7739_v13 }
 0x47b   :  { %v7743_v55 = vpop.eup %7742  ;;  %v3352_v53 = vmul.f32 %v7741_v38, %v3345_v33  ;;  %v10509_v39 = vpop.f32.mrf.mxu2  ;;  %7746 = vrcp.f32 %v10505_v3  ;;  %vm3357_vm8 = vweird.f32 %v7741_v38  ;;  %vm3386_vm5 = vweird.f32 %v10505_v3 }
 0x47c   :  { %v7745_v30 = vpop.eup %7744  ;;  %v3367_v51 = vmul.f32 %v7743_v55, %v3346_v18  ;;  %v10513_v52 = vpop.f32.mrf.mxu0  ;;  %7748 = vrcp.f32 %v10507_v63  ;;  %vm3372_vm9 = vweird.f32 %v7743_v55  ;;  %vm10526_vm12 = vmor %vm3356_vm10, %vm3357_vm8  ;;  %vm3401_vm0 = vweird.f32 %v10507_v63 }
 0x47d   :  { %v10515_v42 = vpop.f32.mrf.mxu1  ;;  %v3353_v59 = vsub.f32 1.0, %v3352_v53  ;;  %v10518_v13 = vadd.f32 1.0, %v7745_v30  ;;  %7750 = vpow2.f32 %v6678_v61  ;;  %v10520_v26 = vpop.f32.mrf.mxu3  ;;  %v3245_v53 = vadd.f32 %v3179_v35, %v12730_v17  ;;  %vm3373_vm14 = vmor %vm3371_vm11, %vm3372_vm9 }
 0x47e   :  { %v3368_v47 = vsub.f32 1.0, %v3367_v51  ;;  %v3405_v61 = vand.u32 2147483647, %v10507_v63 }
 0x47f   :  { %v3354_v6 = vmul.f32 %v7741_v38, %v3353_v59  ;;  %7752 = vrcp.f32 %v10518_v13  ;;  %v3363_v59 = vor.u32 1.1754944e-38, %v3362_v0  ;;  %v3253_v37 = vadd.f32 %v3245_v53, %v12729_v2 }
 0x480   :  { %v3369_v22 = vmul.f32 %v7743_v55, %v3368_v47  ;;  %7754 = vtanh.f32 %v3249_v49  ;;  %v3255_v0 = vadd.f32 %v3205_v16, %v12415_v9  ;;  %v3420_v56 = vand.u32 2147483647, %v10518_v13 }
 0x481   :  { %v3355_v11 = vadd.f32 %v7741_v38, %v3354_v6  ;;  %v10524_v30 = vpop.eup %7746  ;;  %v3254_v6 = vadd.f32 %v3191_v12, %v12414_v27  ;;  %vm3416_vm2 = vweird.f32 %v10518_v13  ;;  %vm10560_vm4 = vcmp.eq.f32.partialorder %v3405_v61, 8.507059e+37 }
 0x482   :  { %v3370_v15 = vadd.f32 %v7743_v55, %v3369_v22  ;;  %v7749_v47 = vpop.eup %7748  ;;  %v3382_v32 = vmul.f32 %v10524_v30, %v10505_v3  ;;  %vm3421_vm8 = vcmp.eq.f32.partialorder %v3420_v56, 8.507059e+37  ;;  %vm3387_vm9 = vweird.f32 %v10524_v30 }
 0x483   :  { %v3359_v17 = vsel %vm10526_vm12, %v7741_v38, %v3355_v11  ;;  %v10537_v35 = vpop.f32.mrf.mxu2  ;;  %v7751_v33 = vpop.eup %7750  ;;  %v3397_v49 = vmul.f32 %v7749_v47, %v10507_v63  ;;  %vm3402_vm1 = vweird.f32 %v7749_v47  ;;  %vm10601_vm11 = vmor %vm3386_vm5, %vm3387_vm9 }
 0x484   :  { %v3374_v18 = vsel %vm3373_vm14, %v7743_v55, %v3370_v15  ;;  %v3364_v11 = vsel %vm10530_vm13, %v3363_v59, %v3359_v17  ;;  %v10546_v38 = vadd.f32 1.0, %v7751_v33  ;;  %v3422_v55 = vand.u32 2147483648, %v10518_v13  ;;  %vm3403_vm6 = vmor %vm3401_vm0, %vm3402_vm1 }
 0x485   :  { %v7753_v22 = vpop.eup %7752  ;;  %v3379_v48 = vsel %vm3376_vm15, %v3378_v57, %v3374_v18  ;;  %v3398_v51 = vsub.f32 1.0, %v3397_v49  ;;  %v3407_v57 = vand.u32 2147483648, %v10507_v63  ;;  %v10556_v18 = vpop.f32.mrf.mxu3  ;;  %v3383_v49 = vsub.f32 1.0, %v3382_v32 }
 0x486   :  { %v3412_v15 = vmul.f32 %v7753_v22, %v10518_v13  ;;  %v7755_v16 = vpop.eup %7754  ;;  %7756 = vrcp.f32 %v10546_v38  ;;  %v3443_v59 = vmul.f32 %v3379_v48, %v10229_v19  ;;  %vm3417_vm3 = vweird.f32 %v7753_v22 }
 0x487   :  { %v3445_v17 = vmul.f32 %v7755_v16, %v3364_v11  ;;  %7758 = vtanh.f32 %v3253_v37  ;;  %v3399_v12 = vmul.f32 %v7749_v47, %v3398_v51  ;;  %v3423_v46 = vor.u32 1.1754944e-38, %v3422_v55  ;;  %vm3418_vm7 = vmor %vm3416_vm2, %vm3417_vm3 }
 0x488   :  { %v3272_v53 = vpop.f32.mrf.mxu0  ;;  %v3286_v2 = vpop.f32.mrf.mxu1  ;;  %v3413_v33 = vsub.f32 1.0, %v3412_v15  ;;  %v3408_v19 = vor.u32 1.1754944e-38, %v3407_v57  ;;  %v3256_v37 = vadd.f32 %v10509_v39, %v12419_v8  ;;  %v3258_v39 = vadd.f32 %v10513_v52, %v12414_v27 }
 0x489   :  { %v3400_v24 = vadd.f32 %v7749_v47, %v3399_v12  ;;  %v10567_v32 = vadd.f32 %v3445_v17, %v3443_v59  ;;  %v3319_v48 = vadd.f32 %v3272_v53, %v3254_v6  ;;  %v3320_v51 = vadd.f32 %v3286_v2, %v3255_v0 }
 0x48a   :  { %v3414_v54 = vmul.f32 %v7753_v22, %v3413_v33  ;;  %v3384_v12 = vmul.f32 %v10524_v30, %v3383_v49  ;;  %v3259_v6 = vadd.f32 %v10515_v42, %v12415_v9  ;;  %vm3431_vm12 = vweird.f32 %v10546_v38 }
 0x48b   :  { %v3404_v55 = vsel %vm3403_vm6, %v7749_v47, %v3400_v24  ;;  %v6679_v56 = vmul.f32 -1.442695, %v3319_v48  ;;  %v6680_v47 = vmul.f32 -1.442695, %v3320_v51  ;;  %7760 = vtanh.f32 %v10567_v32 }
 0x48c   :  { %v3415_v11 = vadd.f32 %v7753_v22, %v3414_v54  ;;  %v10571_v15 = vpop.eup %7756  ;;  %v3409_v54 = vsel %vm10560_vm4, %v3408_v19, %v3404_v55  ;;  %v3385_v49 = vadd.f32 %v10524_v30, %v3384_v12  ;;  %v3260_v48 = vadd.f32 %v10537_v35, %v12419_v8 }
 0x48d   :  { %v7759_v61 = vpop.eup %7758  ;;  %v3427_v63 = vmul.f32 %v10571_v15, %v10546_v38  ;;  %7762 = vpow2.f32 %v6679_v56  ;;  %vm3432_vm10 = vweird.f32 %v10571_v15  ;;  %v3390_v12 = vand.u32 2147483647, %v10505_v3 }
 0x48e   :  { %v3419_v2 = vsel %vm3418_vm7, %v7753_v22, %v3415_v11  ;;  %v3446_v24 = vmul.f32 %v7759_v61, %v3409_v54  ;;  %7764 = vpow2.f32 %v6680_v47  ;;  %v3435_v55 = vand.u32 2147483647, %v10546_v38  ;;  %vm10608_vm13 = vmor %vm3431_vm12, %vm3432_vm10 }
 0x48f   :  { %v3300_v16 = vpop.f32.mrf.mxu2  ;;  %v3424_v53 = vsel %vm3421_vm8, %v3423_v46, %v3419_v2  ;;  %v3428_v52 = vsub.f32 1.0, %v3427_v63  ;;  %v3314_v33 = vpop.f32.mrf.mxu3  ;;  %v3389_v54 = vsel %vm10601_vm11, %v10524_v30, %v3385_v49  ;;  %vm3391_vm14 = vcmp.eq.f32.partialorder %v3390_v12, 8.507059e+37 }
 0x490   :  { %v3274_v0 = vpop.f32.mrf.mxu0  ;;  %v3288_v13 = vpop.f32.mrf.mxu1  ;;  %v3444_v57 = vmul.f32 %v3424_v53, %v10250_v44  ;;  %v3321_v59 = vadd.f32 %v3300_v16, %v3256_v37  ;;  %v3437_v37 = vand.u32 2147483648, %v10546_v38  ;;  %vm3436_vm15 = vcmp.eq.f32.partialorder %v3435_v55, 8.507059e+37 }
 0x491   :  { %v3323_v40 = vadd.f32 %v3274_v0, %v3258_v39  ;;  %v3324_v22 = vadd.f32 %v3288_v13, %v3259_v6  ;;  %v3429_v17 = vmul.f32 %v10571_v15, %v3428_v52  ;;  %v7761_v16 = vpop.eup %7760  ;;  %v12741_v6 = vand.u32 2147483648, %v10505_v3 }
 0x492   :  { %v10588_v42 = vadd.f32 %v3446_v24, %v3444_v57  ;;  %v6681_v46 = vmul.f32 -1.442695, %v3321_v59  ;;  %v3438_v13 = vor.u32 1.1754944e-38, %v3437_v37 }
 0x493   :  { %v6682_v19 = vmul.f32 -1.442695, %v3323_v40  ;;  %v6683_v11 = vmul.f32 -1.442695, %v3324_v22  ;;  %v3430_v44 = vadd.f32 %v10571_v15, %v3429_v17  ;;  %v7763_v63 = vpop.eup %7762  ;;  %v3393_v0 = vor.u32 1.1754944e-38, %v12741_v6 }
 0x494   :  { %7766 = vtanh.f32 %v10588_v42  ;;  %v7765_v38 = vpop.eup %7764  ;;  %v10620_v53 = vadd.f32 1.0, %v7763_v63  ;;  %v3257_v40 = vadd.f32 %v10520_v26, %v12426_v4 }
 0x495   :  { %7768 = vpow2.f32 %v6681_v46  ;;  %v3434_v2 = vsel %vm10608_vm13, %v10571_v15, %v3430_v44  ;;  %v10622_v24 = vadd.f32 1.0, %v7765_v38  ;;  %v3394_v52 = vsel %vm3391_vm14, %v3393_v0, %v3389_v54 }
 0x496   :  { %7770 = vpow2.f32 %v6682_v19  ;;  %v3439_v30 = vsel %vm3436_vm15, %v3438_v13, %v3434_v2  ;;  %v3451_v15 = vmul.f32 %v7761_v16, %v3394_v52  ;;  %v3261_v19 = vadd.f32 %v10556_v18, %v12426_v4 }
 0x497   :  { %v3302_v39 = vpop.f32.mrf.mxu2  ;;  %7772 = vpow2.f32 %v6683_v11  ;;  %v3316_v17 = vpop.f32.mrf.mxu3  ;;  %v3322_v44 = vadd.f32 %v3314_v33, %v3257_v40  ;;  %v3486_v33 = vand.u32 2147483647, %v10620_v53  ;;  %v3488_v12 = vand.u32 2147483648, %v10620_v53 }
 0x498   :  { %v3325_v35 = vadd.f32 %v3302_v39, %v3260_v48  ;;  %7774 = vrcp.f32 %v10620_v53  ;;  %v3326_v48 = vadd.f32 %v3316_v17, %v3261_v19  ;;  %v3503_v61 = vand.u32 2147483648, %v10622_v24 }
 0x499   :  { %7776 = vrcp.f32 %v10622_v24  ;;  %vm3497_vm0 = vweird.f32 %v10622_v24  ;;  %vm3482_vm1 = vweird.f32 %v10620_v53  ;;  %vm10661_vm3 = vcmp.eq.f32.partialorder %v3486_v33, 8.507059e+37 }
 0x49a   :  { %v6684_v56 = vmul.f32 -1.442695, %v3325_v35  ;;  %v7767_v47 = vpop.eup %7766  ;;  %v3501_v35 = vand.u32 2147483647, %v10622_v24  ;;  %v3489_v0 = vor.u32 1.1754944e-38, %v3488_v12 }
 0x49b   :  { %v7769_v57 = vpop.eup %7768  ;;  %v3452_v59 = vmul.f32 %v7767_v47, %v3439_v30  ;;  %v3504_v30 = vor.u32 1.1754944e-38, %v3503_v61 }
 0x49c   :  { %v7771_v3 = vpop.eup %7770  ;;  %v10628_v22 = vadd.f32 1.0, %v7769_v57  ;;  %7778 = vpow2.f32 %v6684_v56  ;;  %vm10674_vm5 = vcmp.eq.f32.partialorder %v3501_v35, 8.507059e+37 }
 0x49d   :  { %v7773_v46 = vpop.eup %7772  ;;  %v10630_v49 = vpack.c.bf16 %v3452_v59, %v3451_v15  ;;  %v10634_v11 = vadd.f32 1.0, %v7771_v3 }
 0x49e   :  { %v10637_v37 = vadd.f32 1.0, %v7773_v46  ;;  %v7775_v26 = vpop.eup %7774 }
 0x49f   :  { %7780 = vrcp.f32 %v10634_v11  ;;  %3588 = vmatmul.bf16.vlgmr.msrb.gmra.mxu0 %v10630_v49  ;;  %3602 = vmatmul.bf16.vlgmr.msrb.gmra.mxu1 %v10630_v49  ;;  %v7777_v18 = vpop.eup %7776  ;;  %v3478_v51 = vmul.f32 %v7775_v26, %v10620_v53  ;;  %vm3483_vm2 = vweird.f32 %v7775_v26  ;;  %vm3527_vm6 = vweird.f32 %v10634_v11 }
 0x4a0   :  { %7782 = vrcp.f32 %v10628_v22  ;;  %3616 = vmatmul.bf16.vlgmr.msrb.gmra.mxu2 %v10630_v49  ;;  %3630 = vmatmul.bf16.vlgmr.msrb.gmra.mxu3 %v10630_v49  ;;  %v3493_v55 = vmul.f32 %v7777_v18, %v10622_v24  ;;  %vm3498_vm4 = vweird.f32 %v7777_v18  ;;  %vm3484_vm7 = vmor %vm3482_vm1, %vm3483_vm2  ;;  %v3531_v46 = vand.u32 2147483647, %v10634_v11 }
 0x4a1   :  { %7784 = vrcp.f32 %v10637_v37  ;;  %3717 = vmatpush.bf16.msrb.mxu0 %v12427_v5  ;;  %3731 = vmatpush.bf16.msrb.mxu1 %v12428_v1  ;;  %v3479_v16 = vsub.f32 1.0, %v3478_v51  ;;  %vm3499_vm8 = vmor %vm3497_vm0, %vm3498_vm4  ;;  %v3533_v53 = vand.u32 2147483648, %v10634_v11  ;;  %vm3542_vm12 = vweird.f32 %v10637_v37 }
 0x4a2   :  { %7786 = vtanh.f32 %v3322_v44  ;;  %3745 = vmatpush.bf16.msrb.mxu2 %v12429_v14  ;;  %3759 = vmatpush.bf16.msrb.mxu3 %v12430_v23  ;;  %v7779_v39 = vpop.eup %7778  ;;  %v3494_v63 = vsub.f32 1.0, %v3493_v55  ;;  %vm3532_vm13 = vcmp.eq.f32.partialorder %v3531_v46, 8.507059e+37  ;;  %vm3512_vm2 = vweird.f32 %v10628_v22 }
 0x4a3   :  { %7788 = vtanh.f32 %v3326_v48  ;;  %v10657_v54 = vadd.f32 1.0, %v7779_v39  ;;  %v3480_v38 = vmul.f32 %v7775_v26, %v3479_v16  ;;  %v3548_v39 = vand.u32 2147483648, %v10637_v37 }
 0x4a4   :  { %v3495_v56 = vmul.f32 %v7777_v18, %v3494_v63  ;;  %v3546_v16 = vand.u32 2147483647, %v10637_v37 }
 0x4a5   :  { %v10659_v2 = vpop.eup %7780  ;;  %3718 = vmatpush.bf16.msrb.mxu0 %v12433_v43  ;;  %3732 = vmatpush.bf16.msrb.mxu1 %v12532_v60  ;;  %7790 = vrcp.f32 %v10657_v54  ;;  %v3481_v57 = vadd.f32 %v7775_v26, %v3480_v38  ;;  %vm3557_vm4 = vweird.f32 %v10657_v54 }
 0x4a6   :  { %v10667_v13 = vpop.eup %7782  ;;  %v3523_v47 = vmul.f32 %v10659_v2, %v10634_v11  ;;  %3746 = vmatpush.bf16.msrb.mxu2 %v12533_v41  ;;  %3760 = vmatpush.bf16.msrb.mxu3 %v12534_v29  ;;  %v3496_v3 = vadd.f32 %v7777_v18, %v3495_v56  ;;  %vm3528_vm9 = vweird.f32 %v10659_v2  ;;  %v3549_v11 = vor.u32 1.1754944e-38, %v3548_v39 }
 0x4a7   :  { %v7785_v52 = vpop.eup %7784  ;;  %v3508_v44 = vmul.f32 %v10667_v13, %v10628_v22  ;;  %v3485_v48 = vsel %vm3484_vm7, %v7775_v26, %v3481_v57  ;;  %vm3529_vm11 = vmor %vm3527_vm6, %vm3528_vm9  ;;  %vm3547_vm15 = vcmp.eq.f32.partialorder %v3546_v16, 8.507059e+37  ;;  %vm3513_vm0 = vweird.f32 %v10667_v13 }
 0x4a8   :  { %v7787_v59 = vpop.eup %7786  ;;  %v3524_v40 = vsub.f32 1.0, %v3523_v47  ;;  %v3538_v17 = vmul.f32 %v7785_v52, %v10637_v37  ;;  %v3490_v51 = vsel %vm10661_vm3, %v3489_v0, %v3485_v48  ;;  %v3500_v33 = vsel %vm3499_vm8, %v7777_v18, %v3496_v3  ;;  %vm10747_vm3 = vmor %vm3512_vm2, %vm3513_vm0 }
 0x4a9   :  { %v7789_v19 = vpop.eup %7788  ;;  %3719 = vmatpush.bf16.msrb.mxu0 %v12537_v7  ;;  %3733 = vmatpush.bf16.msrb.mxu1 %v12538_v36  ;;  %v3505_v26 = vsel %vm10674_vm5, %v3504_v30, %v3500_v33  ;;  %v3571_v55 = vmul.f32 %v7787_v59, %v3490_v51  ;;  %vm3543_vm10 = vweird.f32 %v7785_v52  ;;  %v3509_v38 = vsub.f32 1.0, %v3508_v44  ;;  %v12748_v44 = vld [vmem:[#allocation163_spill] sm:$0xff]  ;;  %v12750_v51 = vld [vmem:[#allocation166_spill] sm:$0xff]  ;;  %v12771_v33 = vld [vmem:[#allocation37_spill] sm:$0xff] }
 0x4aa   :  { %v3539_v12 = vsub.f32 1.0, %v3538_v17  ;;  %v3525_v24 = vmul.f32 %v10659_v2, %v3524_v40  ;;  %3747 = vmatpush.bf16.msrb.mxu2 %v9260_v25  ;;  %3761 = vmatpush.bf16.msrb.mxu3 %v9269_v28  ;;  %v3569_v35 = vmul.f32 %v3505_v26, %v10383_v50  ;;  %v3534_v0 = vor.u32 1.1754944e-38, %v3533_v53  ;;  %vm3544_vm14 = vmor %vm3542_vm12, %vm3543_vm10  ;;  %v12749_v53 = vld [vmem:[#allocation165_spill] sm:$0xff]  ;;  %v12753_v26 = vld [vmem:[#allocation167_spill] sm:$0xff] }
 0x4ab   :  { %v10702_v61 = vpop.eup %7790  ;;  %v3510_v15 = vmul.f32 %v10667_v13, %v3509_v38  ;;  %v3563_v48 = vand.u32 2147483648, %v10657_v54  ;;  %v12755_v38 = vld [vmem:[#allocation169_spill] sm:$0xff] }
 0x4ac   :  { %v3540_v18 = vmul.f32 %v7785_v52, %v3539_v12  ;;  %v3526_v63 = vadd.f32 %v10659_v2, %v3525_v24  ;;  %v3553_v6 = vmul.f32 %v10702_v61, %v10657_v54  ;;  %v10721_v57 = vadd.f32 %v3571_v55, %v3569_v35  ;;  %v12754_v55 = vld [vmem:[#allocation168_spill] sm:$0xff] }
 0x4ad   :  { %3720 = vmatpush.bf16.msrb.mxu0 %v9274_v58  ;;  %3734 = vmatpush.bf16.msrb.mxu1 %v9276_v45  ;;  %v3511_v17 = vadd.f32 %v10667_v13, %v3510_v15  ;;  %vm3558_vm1 = vweird.f32 %v10702_v61  ;;  %v3516_v12 = vand.u32 2147483647, %v10628_v22  ;;  %v3561_v24 = vand.u32 2147483647, %v10657_v54  ;;  %v12763_v15 = vld [vmem:[#allocation29_spill] sm:$0xff] }
 0x4ae   :  { %v3530_v50 = vsel %vm3529_vm11, %v10659_v2, %v3526_v63  ;;  %v3541_v56 = vadd.f32 %v7785_v52, %v3540_v18  ;;  %3748 = vmatpush.bf16.msrb.mxu2 %v9289_v10  ;;  %3762 = vmatpush.bf16.msrb.mxu3 %v9291_v31  ;;  %v3554_v47 = vsub.f32 1.0, %v3553_v6  ;;  %7792 = vtanh.f32 %v10721_v57  ;;  %vm3559_vm5 = vmor %vm3557_vm4, %vm3558_vm1 }
 0x4af   :  { %v3535_v30 = vsel %vm3532_vm13, %v3534_v0, %v3530_v50  ;;  %3644 = vmatmul.bf16.vlgmr.msra.gmra.mxu0 %v10630_v49  ;;  %3658 = vmatmul.bf16.vlgmr.msra.gmra.mxu1 %v10630_v49  ;;  %v3515_v39 = vsel %vm10747_vm3, %v10667_v13, %v3511_v17  ;;  %v3564_v63 = vor.u32 1.1754944e-38, %v3563_v48  ;;  %vm3517_vm6 = vcmp.eq.f32.partialorder %v3516_v12, 8.507059e+37  ;;  %v12757_v50 = vld [vmem:[#allocation171_spill] sm:$0xff]  ;;  %v12767_v17 = vld [vmem:[#allocation33_spill] sm:$0xff]  ;;  %v12770_v48 = vld [vmem:[#allocation36_spill] sm:$0xff] }
 0x4b0   :  { %v3545_v37 = vsel %vm3544_vm14, %v7785_v52, %v3541_v56  ;;  %v3572_v2 = vmul.f32 %v7789_v19, %v3535_v30  ;;  %3672 = vmatmul.bf16.vlgmr.msra.gmra.mxu2 %v10630_v49  ;;  %3686 = vmatmul.bf16.vlgmr.msra.gmra.mxu3 %v10630_v49  ;;  %v3555_v59 = vmul.f32 %v10702_v61, %v3554_v47  ;;  %v12746_v52 = vld [vmem:[#allocation161_spill] sm:$0xff]  ;;  %v12747_v19 = vld [vmem:[#allocation162_spill] sm:$0xff]  ;;  %vm3562_vm7 = vcmp.eq.f32.partialorder %v3561_v24, 8.507059e+37  ;;  %v12758_v56 = vld [vmem:[#allocation172_spill] sm:$0xff] }
 0x4b1   :  { %v3550_v3 = vsel %vm3547_vm15, %v3549_v11, %v3545_v37  ;;  %3721 = vmatpush.bf16.msrb.mxu0 %v9319_v21  ;;  %3735 = vmatpush.bf16.msrb.mxu1 %v12440_v62  ;;  %v12759_v30 = vld [vmem:[#allocation173_spill] sm:$0xff]  ;;  %v12761_v37 = vld [vmem:[#allocation27_spill] sm:$0xff]  ;;  %v12772_v12 = vld [vmem:[#allocation38_spill] sm:$0xff] }
 0x4b2   :  { %v3570_v40 = vmul.f32 %v3550_v3, %v10396_v20  ;;  %3749 = vmatpush.bf16.msrb.mxu2 %v12442_v34  ;;  %3763 = vmatpush.bf16.msrb.mxu3 %v12746_v52  ;;  %v3556_v46 = vadd.f32 %v10702_v61, %v3555_v59  ;;  %v3518_v20 = vand.u32 2147483648, %v10628_v22  ;;  %v12756_v22 = vld [vmem:[#allocation170_spill] sm:$0xff]  ;;  %v12765_v3 = vld [vmem:[#allocation31_spill] sm:$0xff] }
 0x4b3   :  { %v12764_v59 = vld [vmem:[#allocation30_spill] sm:$0xff]  ;;  %v12773_v24 = vld [vmem:[#allocation39_spill] sm:$0xff] }
 0x4b4   :  { %v10734_v49 = vadd.f32 %v3572_v2, %v3570_v40  ;;  %v3560_v16 = vsel %vm3559_vm5, %v10702_v61, %v3556_v46  ;;  %v7793_v35 = vpop.eup %7792  ;;  %v3519_v18 = vor.u32 1.1754944e-38, %v3518_v20  ;;  %v12760_v61 = vld [vmem:[#allocation174_spill] sm:$0xff]  ;;  %v12762_v2 = vld [vmem:[#allocation28_spill] sm:$0xff]  ;;  %v12769_v20 = vld [vmem:[#allocation35_spill] sm:$0xff] }
 0x4b5   :  { %3722 = vmatpush.bf16.msrb.mxu0 %v12747_v19  ;;  %3736 = vmatpush.bf16.msrb.mxu1 %v12748_v44  ;;  %v3565_v0 = vsel %vm3562_vm7, %v3564_v63, %v3560_v16  ;;  %v12766_v40 = vld [vmem:[#allocation32_spill] sm:$0xff]  ;;  %v12768_v46 = vld [vmem:[#allocation34_spill] sm:$0xff]  ;;  %v12775_v16 = vld [vmem:[#allocation41_spill] sm:$0xff] }
 0x4b6   :  { %7794 = vtanh.f32 %v10734_v49  ;;  %3750 = vmatpush.bf16.msrb.mxu2 %v12749_v53  ;;  %3764 = vmatpush.bf16.msrb.mxu3 %v12750_v51  ;;  %v3520_v6 = vsel %vm3517_vm6, %v3519_v18, %v3515_v39  ;;  %v12774_v39 = vld [vmem:[#allocation40_spill] sm:$0xff]  ;;  %v12777_v18 = vld [vmem:[#allocation43_spill] sm:$0xff] }
 0x4b7   :  { %v3577_v47 = vmul.f32 %v7793_v35, %v3520_v6  ;;  %v12776_v35 = vld [vmem:[#allocation42_spill] sm:$0xff]  ;;  %v12778_v63 = vld [vmem:[#allocation44_spill] sm:$0xff] }
 0x4b8   :  { %v12780_v6 = vld [vmem:[#allocation46_spill] sm:$0xff] }
 0x4b9   :  { %3723 = vmatpush.bf16.msrb.mxu0 %v12753_v26  ;;  %3737 = vmatpush.bf16.msrb.mxu1 %v12754_v55 }
 0x4ba   :  { %3751 = vmatpush.bf16.msrb.mxu2 %v12755_v38  ;;  %3765 = vmatpush.bf16.msrb.mxu3 %v12756_v22  ;;  %v12836_v22 = vld [vmem:[#allocation144_spill] sm:$0xff] }
 0x4bc   :  { %v7795_v54 = vpop.eup %7794 }
 0x4bd   :  { %3724 = vmatpush.bf16.msrb.mxu0 %v12757_v50  ;;  %3738 = vmatpush.bf16.msrb.mxu1 %v12758_v56  ;;  %v3578_v13 = vmul.f32 %v7795_v54, %v3565_v0  ;;  %v12779_v54 = vld [vmem:[#allocation45_spill] sm:$0xff]  ;;  %v12781_v0 = vld [vmem:[#allocation48_spill] sm:$0xff] }
 0x4be   :  { %3752 = vmatpush.bf16.msrb.mxu2 %v12759_v30  ;;  %3766 = vmatpush.bf16.msrb.mxu3 %v12760_v61 }
 0x4bf   :  { %v3716_v11 = vpack.c.bf16 %v3578_v13, %v3577_v47  ;;  %v12782_v47 = vld [vmem:[#allocation50_spill] sm:$0xff]  ;;  %v12783_v13 = vld [vmem:[#allocation51_spill] sm:$0xff] }
 0x4c1   :  { %4034 = vmatpush.bf16.msra.mxu0 %v12761_v37  ;;  %4048 = vmatpush.bf16.msra.mxu1 %v12762_v2  ;;  %v12785_v37 = vld [vmem:[#allocation54_spill] sm:$0xff]  ;;  %v12786_v2 = vld [vmem:[#allocation55_spill] sm:$0xff] }
 0x4c2   :  { %4062 = vmatpush.bf16.msra.mxu2 %v12763_v15  ;;  %4076 = vmatpush.bf16.msra.mxu3 %v12764_v59  ;;  %v12787_v15 = vld [vmem:[#allocation56_spill] sm:$0xff]  ;;  %v12788_v59 = vld [vmem:[#allocation57_spill] sm:$0xff] }
 0x4c3   :  { %3725 = vmatmul.bf16.vlgmr.msrb.gmra.mxu0 %v3716_v11  ;;  %3739 = vmatmul.bf16.vlgmr.msrb.gmra.mxu1 %v3716_v11 }
 0x4c4   :  { %3753 = vmatmul.bf16.vlgmr.msrb.gmra.mxu2 %v3716_v11  ;;  %3767 = vmatmul.bf16.vlgmr.msrb.gmra.mxu3 %v3716_v11  ;;  %v12784_v11 = vld [vmem:[#allocation53_spill] sm:$0xff] }
 0x4c5   :  { %4035 = vmatpush.bf16.msra.mxu0 %v12765_v3  ;;  %4049 = vmatpush.bf16.msra.mxu1 %v12766_v40  ;;  %v12789_v3 = vld [vmem:[#allocation59_spill] sm:$0xff]  ;;  %v12790_v40 = vld [vmem:[#allocation60_spill] sm:$0xff] }
 0x4c6   :  { %4063 = vmatpush.bf16.msra.mxu2 %v12767_v17  ;;  %4077 = vmatpush.bf16.msra.mxu3 %v12768_v46  ;;  %v12791_v17 = vld [vmem:[#allocation61_spill] sm:$0xff]  ;;  %v12792_v46 = vld [vmem:[#allocation62_spill] sm:$0xff] }
 0x4c9   :  { %4036 = vmatpush.bf16.msra.mxu0 %v12769_v20  ;;  %4050 = vmatpush.bf16.msra.mxu1 %v12770_v48  ;;  %v12793_v20 = vld [vmem:[#allocation63_spill] sm:$0xff]  ;;  %v12794_v48 = vld [vmem:[#allocation64_spill] sm:$0xff] }
 0x4ca   :  { %4064 = vmatpush.bf16.msra.mxu2 %v12771_v33  ;;  %4078 = vmatpush.bf16.msra.mxu3 %v12772_v12  ;;  %v12795_v33 = vld [vmem:[#allocation65_spill] sm:$0xff]  ;;  %v12796_v12 = vld [vmem:[#allocation66_spill] sm:$0xff] }
 0x4cd   :  { %4037 = vmatpush.bf16.msra.mxu0 %v12773_v24  ;;  %4051 = vmatpush.bf16.msra.mxu1 %v12774_v39  ;;  %v12797_v24 = vld [vmem:[#allocation67_spill] sm:$0xff]  ;;  %v12798_v39 = vld [vmem:[#allocation68_spill] sm:$0xff] }
 0x4ce   :  { %4065 = vmatpush.bf16.msra.mxu2 %v12775_v16  ;;  %4079 = vmatpush.bf16.msra.mxu3 %v12776_v35  ;;  %v12799_v16 = vld [vmem:[#allocation69_spill] sm:$0xff]  ;;  %v12800_v35 = vld [vmem:[#allocation71_spill] sm:$0xff] }
 0x4d1   :  { %4038 = vmatpush.bf16.msra.mxu0 %v12777_v18  ;;  %4052 = vmatpush.bf16.msra.mxu1 %v12778_v63  ;;  %v12801_v18 = vld [vmem:[#allocation72_spill] sm:$0xff]  ;;  %v12802_v63 = vld [vmem:[#allocation73_spill] sm:$0xff] }
 0x4d2   :  { %4066 = vmatpush.bf16.msra.mxu2 %v12779_v54  ;;  %4080 = vmatpush.bf16.msra.mxu3 %v12780_v6  ;;  %v12803_v54 = vld [vmem:[#allocation74_spill] sm:$0xff]  ;;  %v12804_v6 = vld [vmem:[#allocation75_spill] sm:$0xff] }
 0x4d5   :  { %4039 = vmatpush.bf16.msra.mxu0 %v12781_v0  ;;  %4053 = vmatpush.bf16.msra.mxu1 %v12782_v47  ;;  %v12805_v0 = vld [vmem:[#allocation76_spill] sm:$0xff]  ;;  %v12806_v47 = vld [vmem:[#allocation77_spill] sm:$0xff] }
 0x4d6   :  { %4067 = vmatpush.bf16.msra.mxu2 %v12783_v13  ;;  %4081 = vmatpush.bf16.msra.mxu3 %v12784_v11  ;;  %v12807_v13 = vld [vmem:[#allocation81_spill] sm:$0xff]  ;;  %v12808_v11 = vld [vmem:[#allocation82_spill] sm:$0xff] }
 0x4d9   :  { %4040 = vmatpush.bf16.msra.mxu0 %v12785_v37  ;;  %4054 = vmatpush.bf16.msra.mxu1 %v12786_v2  ;;  %v12809_v37 = vld [vmem:[#allocation83_spill] sm:$0xff]  ;;  %v12810_v2 = vld [vmem:[#allocation84_spill] sm:$0xff] }
 0x4da   :  { %4068 = vmatpush.bf16.msra.mxu2 %v12787_v15  ;;  %4082 = vmatpush.bf16.msra.mxu3 %v12788_v59  ;;  %v12811_v15 = vld [vmem:[#allocation85_spill] sm:$0xff]  ;;  %v12812_v59 = vld [vmem:[#allocation86_spill] sm:$0xff] }
 0x4dd   :  { %4041 = vmatpush.bf16.msra.mxu0 %v12789_v3  ;;  %4055 = vmatpush.bf16.msra.mxu1 %v12790_v40  ;;  %v12813_v3 = vld [vmem:[#allocation87_spill] sm:$0xff]  ;;  %v12814_v40 = vld [vmem:[#allocation88_spill] sm:$0xff] }
 0x4de   :  { %4069 = vmatpush.bf16.msra.mxu2 %v12791_v17  ;;  %4083 = vmatpush.bf16.msra.mxu3 %v12792_v46  ;;  %v12815_v17 = vld [vmem:[#allocation92_spill] sm:$0xff]  ;;  %v12816_v46 = vld [vmem:[#allocation93_spill] sm:$0xff] }
 0x4e1   :  { %4090 = vmatpush.bf16.msrb.mxu0 %v12793_v20  ;;  %4104 = vmatpush.bf16.msrb.mxu1 %v12794_v48 }
 0x4e2   :  { %4118 = vmatpush.bf16.msrb.mxu2 %v12795_v33  ;;  %4132 = vmatpush.bf16.msrb.mxu3 %v12796_v12  ;;  %v12831_v12 = vld [vmem:[#allocation139_spill] sm:$0xff] }
 0x4e5   :  { %4091 = vmatpush.bf16.msrb.mxu0 %v12797_v24  ;;  %4105 = vmatpush.bf16.msrb.mxu1 %v12798_v39  ;;  %v12830_v39 = vld [vmem:[#allocation138_spill] sm:$0xff] }
 0x4e6   :  { %4119 = vmatpush.bf16.msrb.mxu2 %v12799_v16  ;;  %4133 = vmatpush.bf16.msrb.mxu3 %v12800_v35 }
 0x4e9   :  { %4092 = vmatpush.bf16.msrb.mxu0 %v12801_v18  ;;  %4106 = vmatpush.bf16.msrb.mxu1 %v12802_v63  ;;  %v12828_v63 = vld [vmem:[#allocation49_spill] sm:$0xff] }
 0x4ea   :  { %4120 = vmatpush.bf16.msrb.mxu2 %v12803_v54  ;;  %4134 = vmatpush.bf16.msrb.mxu3 %v12804_v6  ;;  %v12826_v6 = vld [vmem:[#allocation135_spill] sm:$0xff] }
 0x4eb   :  { %v12827_v54 = vld [vmem:[#allocation47_spill] sm:$0xff] }
 0x4ed   :  { %4093 = vmatpush.bf16.msrb.mxu0 %v12805_v0  ;;  %4107 = vmatpush.bf16.msrb.mxu1 %v12806_v47  ;;  %v12817_v47 = vld [vmem:[#allocation95_spill] sm:$0xff]  ;;  %v12825_v0 = vld [vmem:[#allocation134_spill] sm:$0xff] }
 0x4ee   :  { %4121 = vmatpush.bf16.msrb.mxu2 %v12807_v13  ;;  %4135 = vmatpush.bf16.msrb.mxu3 %v12808_v11  ;;  %v12818_v13 = vld [vmem:[#allocation96_spill] sm:$0xff]  ;;  %v12819_v11 = vld [vmem:[#allocation97_spill] sm:$0xff] }
 0x4f1   :  { %4094 = vmatpush.bf16.msrb.mxu0 %v12809_v37  ;;  %4108 = vmatpush.bf16.msrb.mxu1 %v12810_v2  ;;  %v12820_v37 = vld [vmem:[#allocation98_spill] sm:$0xff]  ;;  %v12821_v2 = vld [vmem:[#allocation99_spill] sm:$0xff] }
 0x4f2   :  { %4122 = vmatpush.bf16.msrb.mxu2 %v12811_v15  ;;  %4136 = vmatpush.bf16.msrb.mxu3 %v12812_v59  ;;  %v12822_v15 = vld [vmem:[#allocation100_spill] sm:$0xff]  ;;  %v12823_v59 = vld [vmem:[#allocation101_spill] sm:$0xff] }
 0x4f5   :  { %4095 = vmatpush.bf16.msrb.mxu0 %v12813_v3  ;;  %4109 = vmatpush.bf16.msrb.mxu1 %v12814_v40  ;;  %v12824_v3 = vld [vmem:[#allocation102_spill] sm:$0xff] }
 0x4f6   :  { %4123 = vmatpush.bf16.msrb.mxu2 %v12815_v17  ;;  %4137 = vmatpush.bf16.msrb.mxu3 %v12816_v46 }
 0x4f9   :  { %4096 = vmatpush.bf16.msrb.mxu0 %v12817_v47  ;;  %4110 = vmatpush.bf16.msrb.mxu1 %v12818_v13 }
 0x4fa   :  { %4124 = vmatpush.bf16.msrb.mxu2 %v12819_v11  ;;  %4138 = vmatpush.bf16.msrb.mxu3 %v12820_v37 }
 0x4fd   :  { %4097 = vmatpush.bf16.msrb.mxu0 %v12821_v2  ;;  %4111 = vmatpush.bf16.msrb.mxu1 %v12822_v15  ;;  %v12829_v15 = vld [vmem:[#allocation137_spill] sm:$0xff] }
 0x4fe   :  { %4125 = vmatpush.bf16.msrb.mxu2 %v12823_v59  ;;  %4139 = vmatpush.bf16.msrb.mxu3 %v12824_v3 }
 0x51c   :  { %v3589_v40 = vpop.f32.mrf.mxu0  ;;  %v3603_v17 = vpop.f32.mrf.mxu1 }
 0x51d   :  { %v3692_v46 = vadd.f32 %v3589_v40, %v12825_v0  ;;  %v3693_v47 = vadd.f32 %v3603_v17, %v12826_v6  ;;  %v12832_v40 = vld [vmem:[#allocation52_spill] sm:$0xff] }
 0x51f   :  { %v3700_v13 = vadd.f32 %v3692_v46, %v12827_v54  ;;  %v3701_v11 = vadd.f32 %v3693_v47, %v12828_v63 }
 0x521   :  { %v6685_v18 = vmul.f32 -1.442695, %v3700_v13  ;;  %v6686_v37 = vmul.f32 -1.442695, %v3701_v11 }
 0x523   :  { %7796 = vpow2.f32 %v6685_v18  ;;  %v3617_v2 = vpop.f32.mrf.mxu2  ;;  %v3631_v35 = vpop.f32.mrf.mxu3 }
 0x524   :  { %7798 = vpow2.f32 %v6686_v37  ;;  %v3694_v59 = vadd.f32 %v3617_v2, %v12829_v15  ;;  %v3591_v16 = vpop.f32.mrf.mxu0  ;;  %v3605_v3 = vpop.f32.mrf.mxu1 }
 0x525   :  { %v3696_v24 = vadd.f32 %v3591_v16, %v12830_v39  ;;  %v3697_v0 = vadd.f32 %v3605_v3, %v12831_v12  ;;  %v12833_v16 = vld [vmem:[#allocation141_spill] sm:$0xff]  ;;  %v12834_v3 = vld [vmem:[#allocation140_spill] sm:$0xff] }
 0x526   :  { %v3702_v6 = vadd.f32 %v3694_v59, %v12832_v40 }
 0x527   :  { %v3704_v17 = vadd.f32 %v3696_v24, %v12827_v54  ;;  %v3705_v47 = vadd.f32 %v3697_v0, %v12828_v63  ;;  %v3695_v0 = vadd.f32 %v3631_v35, %v12834_v3 }
 0x528   :  { %v6687_v13 = vmul.f32 -1.442695, %v3702_v6 }
 0x529   :  { %v7797_v11 = vpop.eup %7796  ;;  %v6688_v18 = vmul.f32 -1.442695, %v3704_v17  ;;  %v6689_v37 = vmul.f32 -1.442695, %v3705_v47 }
 0x52a   :  { %v7799_v46 = vpop.eup %7798  ;;  %v3799_v33 = vadd.f32 1.0, %v7797_v11  ;;  %7800 = vpow2.f32 %v6687_v13 }
 0x52b   :  { %v3800_v2 = vadd.f32 1.0, %v7799_v46  ;;  %7802 = vpow2.f32 %v6688_v18  ;;  %v3619_v15 = vpop.f32.mrf.mxu2  ;;  %v3633_v48 = vpop.f32.mrf.mxu3 }
 0x52c   :  { %7804 = vrcp.f32 %v3799_v33  ;;  %v3645_v39 = vpop.f32.mrf.mxu0  ;;  %v3659_v12 = vpop.f32.mrf.mxu1  ;;  %v3698_v24 = vadd.f32 %v3619_v15, %v12833_v16  ;;  %v12835_v15 = vld [vmem:[#allocation58_spill] sm:$0xff]  ;;  %v3814_v3 = vand.u32 2147483647, %v3799_v33  ;;  %v3816_v61 = vand.u32 2147483648, %v3799_v33 }
 0x52d   :  { %7806 = vrcp.f32 %v3800_v2  ;;  %v3703_v16 = vadd.f32 %v3695_v0, %v12835_v15  ;;  %v3829_v50 = vand.u32 2147483647, %v3800_v2  ;;  %vm3810_vm10 = vweird.f32 %v3799_v33 }
 0x52e   :  { %7808 = vpow2.f32 %v6689_v37  ;;  %v3706_v6 = vadd.f32 %v3698_v24, %v12832_v40  ;;  %v3831_v40 = vand.u32 2147483648, %v3800_v2  ;;  %vm3825_vm11 = vweird.f32 %v3800_v2 }
 0x52f   :  { %vm10868_vm13 = vcmp.eq.f32.partialorder %v3814_v3, 8.507059e+37  ;;  %vm3830_vm15 = vcmp.eq.f32.partialorder %v3829_v50, 8.507059e+37 }
 0x530   :  { %v7801_v59 = vpop.eup %7800  ;;  %v6690_v18 = vmul.f32 -1.442695, %v3706_v6  ;;  %v3832_v26 = vor.u32 1.1754944e-38, %v3831_v40 }
 0x531   :  { %v7803_v17 = vpop.eup %7802  ;;  %v10843_v11 = vadd.f32 1.0, %v7801_v59 }
 0x532   :  { %v7805_v47 = vpop.eup %7804  ;;  %v10845_v13 = vadd.f32 1.0, %v7803_v17 }
 0x533   :  { %v7807_v46 = vpop.eup %7806  ;;  %v3806_v63 = vmul.f32 %v7805_v47, %v3799_v33  ;;  %v10847_v54 = vpop.f32.mrf.mxu2  ;;  %7810 = vrcp.f32 %v10843_v11  ;;  %vm3811_vm8 = vweird.f32 %v7805_v47  ;;  %vm3840_vm5 = vweird.f32 %v10843_v11 }
 0x534   :  { %v7809_v20 = vpop.eup %7808  ;;  %v3821_v37 = vmul.f32 %v7807_v46, %v3800_v2  ;;  %v10851_v35 = vpop.f32.mrf.mxu0  ;;  %7812 = vrcp.f32 %v10845_v13  ;;  %vm3826_vm9 = vweird.f32 %v7807_v46  ;;  %vm10864_vm12 = vmor %vm3810_vm10, %vm3811_vm8  ;;  %vm3855_vm0 = vweird.f32 %v10845_v13 }
 0x535   :  { %v10853_v24 = vpop.f32.mrf.mxu1  ;;  %v3807_v59 = vsub.f32 1.0, %v3806_v63  ;;  %v10856_v17 = vadd.f32 1.0, %v7809_v20  ;;  %7814 = vpow2.f32 %v6690_v18  ;;  %v10858_v30 = vpop.f32.mrf.mxu3  ;;  %v3699_v63 = vadd.f32 %v3633_v48, %v12836_v22  ;;  %vm3827_vm14 = vmor %vm3825_vm11, %vm3826_vm9 }
 0x536   :  { %v3822_v6 = vsub.f32 1.0, %v3821_v37  ;;  %v3859_v18 = vand.u32 2147483647, %v10845_v13 }
 0x537   :  { %v3808_v56 = vmul.f32 %v7805_v47, %v3807_v59  ;;  %7816 = vrcp.f32 %v10856_v17  ;;  %v3817_v59 = vor.u32 1.1754944e-38, %v3816_v61  ;;  %v3707_v3 = vadd.f32 %v3699_v63, %v12835_v15 }
 0x538   :  { %v3823_v0 = vmul.f32 %v7807_v46, %v3822_v6  ;;  %7818 = vtanh.f32 %v3703_v16  ;;  %v3709_v61 = vadd.f32 %v3659_v12, %v12415_v9  ;;  %v3874_v51 = vand.u32 2147483647, %v10856_v17 }
 0x539   :  { %v3809_v38 = vadd.f32 %v7805_v47, %v3808_v56  ;;  %v10862_v20 = vpop.eup %7810  ;;  %v3708_v56 = vadd.f32 %v3645_v39, %v12414_v27  ;;  %vm3870_vm2 = vweird.f32 %v10856_v17  ;;  %vm10898_vm4 = vcmp.eq.f32.partialorder %v3859_v18, 8.507059e+37 }
 0x53a   :  { %v3824_v55 = vadd.f32 %v7807_v46, %v3823_v0  ;;  %v7813_v6 = vpop.eup %7812  ;;  %v3836_v40 = vmul.f32 %v10862_v20, %v10843_v11  ;;  %vm3875_vm8 = vcmp.eq.f32.partialorder %v3874_v51, 8.507059e+37  ;;  %vm3841_vm9 = vweird.f32 %v10862_v20 }
 0x53b   :  { %v3813_v22 = vsel %vm10864_vm12, %v7805_v47, %v3809_v38  ;;  %v10875_v48 = vpop.f32.mrf.mxu2  ;;  %v7815_v33 = vpop.eup %7814  ;;  %v3851_v16 = vmul.f32 %v7813_v6, %v10845_v13  ;;  %vm3856_vm1 = vweird.f32 %v7813_v6  ;;  %vm10939_vm11 = vmor %vm3840_vm5, %vm3841_vm9 }
 0x53c   :  { %v3828_v2 = vsel %vm3827_vm14, %v7807_v46, %v3824_v55  ;;  %v3818_v38 = vsel %vm10868_vm13, %v3817_v59, %v3813_v22  ;;  %v10884_v47 = vadd.f32 1.0, %v7815_v33  ;;  %v3876_v46 = vand.u32 2147483648, %v10856_v17  ;;  %vm3857_vm6 = vmor %vm3855_vm0, %vm3856_vm1 }
 0x53d   :  { %v7817_v0 = vpop.eup %7816  ;;  %v3833_v50 = vsel %vm3830_vm15, %v3832_v26, %v3828_v2  ;;  %v3852_v37 = vsub.f32 1.0, %v3851_v16  ;;  %v3861_v26 = vand.u32 2147483648, %v10845_v13  ;;  %v10894_v2 = vpop.f32.mrf.mxu3  ;;  %v3837_v16 = vsub.f32 1.0, %v3836_v40 }
 0x53e   :  { %v3866_v55 = vmul.f32 %v7817_v0, %v10856_v17  ;;  %v7819_v12 = vpop.eup %7818  ;;  %7820 = vrcp.f32 %v10884_v47  ;;  %v3897_v59 = vmul.f32 %v3833_v50, %v10567_v32  ;;  %vm3871_vm3 = vweird.f32 %v7817_v0 }
 0x53f   :  { %v3899_v22 = vmul.f32 %v7819_v12, %v3818_v38  ;;  %7822 = vtanh.f32 %v3707_v3  ;;  %v3853_v39 = vmul.f32 %v7813_v6, %v3852_v37  ;;  %v3877_v44 = vor.u32 1.1754944e-38, %v3876_v46  ;;  %vm3872_vm7 = vmor %vm3870_vm2, %vm3871_vm3 }
 0x540   :  { %v3726_v63 = vpop.f32.mrf.mxu0  ;;  %v3740_v15 = vpop.f32.mrf.mxu1  ;;  %v3867_v33 = vsub.f32 1.0, %v3866_v55  ;;  %v3862_v32 = vor.u32 1.1754944e-38, %v3861_v26  ;;  %v3710_v3 = vadd.f32 %v10847_v54, %v12419_v8  ;;  %v3712_v54 = vadd.f32 %v10851_v35, %v12414_v27 }
 0x541   :  { %v3854_v19 = vadd.f32 %v7813_v6, %v3853_v39  ;;  %v10905_v40 = vadd.f32 %v3899_v22, %v3897_v59  ;;  %v3773_v50 = vadd.f32 %v3726_v63, %v3708_v56  ;;  %v3774_v37 = vadd.f32 %v3740_v15, %v3709_v61 }
 0x542   :  { %v3868_v53 = vmul.f32 %v7817_v0, %v3867_v33  ;;  %v3838_v39 = vmul.f32 %v10862_v20, %v3837_v16  ;;  %v3713_v56 = vadd.f32 %v10853_v24, %v12415_v9  ;;  %vm3885_vm12 = vweird.f32 %v10884_v47 }
 0x543   :  { %v3858_v46 = vsel %vm3857_vm6, %v7813_v6, %v3854_v19  ;;  %v6691_v51 = vmul.f32 -1.442695, %v3773_v50  ;;  %v6692_v6 = vmul.f32 -1.442695, %v3774_v37  ;;  %7824 = vtanh.f32 %v10905_v40 }
 0x544   :  { %v3869_v38 = vadd.f32 %v7817_v0, %v3868_v53  ;;  %v10909_v55 = vpop.eup %7820  ;;  %v3863_v53 = vsel %vm10898_vm4, %v3862_v32, %v3858_v46  ;;  %v3839_v16 = vadd.f32 %v10862_v20, %v3838_v39  ;;  %v3714_v50 = vadd.f32 %v10875_v48, %v12419_v8 }
 0x545   :  { %v7823_v18 = vpop.eup %7822  ;;  %v3881_v13 = vmul.f32 %v10909_v55, %v10884_v47  ;;  %7826 = vpow2.f32 %v6691_v51  ;;  %vm3886_vm10 = vweird.f32 %v10909_v55  ;;  %v3844_v39 = vand.u32 2147483647, %v10843_v11 }
 0x546   :  { %v3873_v15 = vsel %vm3872_vm7, %v7817_v0, %v3869_v38  ;;  %v3900_v19 = vmul.f32 %v7823_v18, %v3863_v53  ;;  %7828 = vpow2.f32 %v6692_v6  ;;  %v3889_v46 = vand.u32 2147483647, %v10884_v47  ;;  %vm10946_vm13 = vmor %vm3885_vm12, %vm3886_vm10 }
 0x547   :  { %v3754_v12 = vpop.f32.mrf.mxu2  ;;  %v3878_v63 = vsel %vm3875_vm8, %v3877_v44, %v3873_v15  ;;  %v3882_v35 = vsub.f32 1.0, %v3881_v13  ;;  %v3768_v33 = vpop.f32.mrf.mxu3  ;;  %v3843_v53 = vsel %vm10939_vm11, %v10862_v20, %v3839_v16  ;;  %vm3845_vm14 = vcmp.eq.f32.partialorder %v3844_v39, 8.507059e+37 }
 0x548   :  { %v3728_v61 = vpop.f32.mrf.mxu0  ;;  %v3742_v17 = vpop.f32.mrf.mxu1  ;;  %v3898_v26 = vmul.f32 %v3878_v63, %v10588_v42  ;;  %v3775_v59 = vadd.f32 %v3754_v12, %v3710_v3  ;;  %v3891_v3 = vand.u32 2147483648, %v10884_v47  ;;  %vm3890_vm15 = vcmp.eq.f32.partialorder %v3889_v46, 8.507059e+37 }
 0x549   :  { %v3777_v52 = vadd.f32 %v3728_v61, %v3712_v54  ;;  %v3778_v0 = vadd.f32 %v3742_v17, %v3713_v56  ;;  %v3883_v22 = vmul.f32 %v10909_v55, %v3882_v35  ;;  %v7825_v12 = vpop.eup %7824  ;;  %v12847_v56 = vand.u32 2147483648, %v10843_v11 }
 0x54a   :  { %v10926_v24 = vadd.f32 %v3900_v19, %v3898_v26  ;;  %v6693_v44 = vmul.f32 -1.442695, %v3775_v59  ;;  %v3892_v17 = vor.u32 1.1754944e-38, %v3891_v3 }
 0x54b   :  { %v6694_v32 = vmul.f32 -1.442695, %v3777_v52  ;;  %v6695_v38 = vmul.f32 -1.442695, %v3778_v0  ;;  %v3884_v42 = vadd.f32 %v10909_v55, %v3883_v22  ;;  %v7827_v13 = vpop.eup %7826  ;;  %v3847_v61 = vor.u32 1.1754944e-38, %v12847_v56 }
 0x54c   :  { %7830 = vtanh.f32 %v10926_v24  ;;  %v7829_v47 = vpop.eup %7828  ;;  %v10958_v63 = vadd.f32 1.0, %v7827_v13  ;;  %v3711_v52 = vadd.f32 %v10858_v30, %v12426_v4 }
 0x54d   :  { %7832 = vpow2.f32 %v6693_v44  ;;  %v3888_v15 = vsel %vm10946_vm13, %v10909_v55, %v3884_v42  ;;  %v10960_v19 = vadd.f32 1.0, %v7829_v47  ;;  %v3848_v35 = vsel %vm3845_vm14, %v3847_v61, %v3843_v53 }
 0x54e   :  { %7834 = vpow2.f32 %v6694_v32  ;;  %v3893_v20 = vsel %vm3890_vm15, %v3892_v17, %v3888_v15  ;;  %v3905_v55 = vmul.f32 %v7825_v12, %v3848_v35  ;;  %v3715_v32 = vadd.f32 %v10894_v2, %v12426_v4 }
 0x54f   :  { %v3756_v54 = vpop.f32.mrf.mxu2  ;;  %7836 = vpow2.f32 %v6695_v38  ;;  %v3770_v22 = vpop.f32.mrf.mxu3  ;;  %v3776_v42 = vadd.f32 %v3768_v33, %v3711_v52  ;;  %v3940_v33 = vand.u32 2147483647, %v10958_v63  ;;  %v3942_v39 = vand.u32 2147483648, %v10958_v63 }
 0x550   :  { %v3779_v48 = vadd.f32 %v3756_v54, %v3714_v50  ;;  %7838 = vrcp.f32 %v10958_v63  ;;  %v3780_v50 = vadd.f32 %v3770_v22, %v3715_v32  ;;  %v3957_v18 = vand.u32 2147483648, %v10960_v19 }
 0x551   :  { %7840 = vrcp.f32 %v10960_v19  ;;  %vm3951_vm0 = vweird.f32 %v10960_v19  ;;  %vm3936_vm1 = vweird.f32 %v10958_v63  ;;  %vm10999_vm3 = vcmp.eq.f32.partialorder %v3940_v33, 8.507059e+37 }
 0x552   :  { %v6696_v51 = vmul.f32 -1.442695, %v3779_v48  ;;  %v7831_v6 = vpop.eup %7830  ;;  %v3955_v48 = vand.u32 2147483647, %v10960_v19  ;;  %v3943_v61 = vor.u32 1.1754944e-38, %v3942_v39 }
 0x553   :  { %v7833_v26 = vpop.eup %7832  ;;  %v3906_v59 = vmul.f32 %v7831_v6, %v3893_v20  ;;  %v3958_v20 = vor.u32 1.1754944e-38, %v3957_v18 }
 0x554   :  { %v7835_v11 = vpop.eup %7834  ;;  %v10966_v0 = vadd.f32 1.0, %v7833_v26  ;;  %7842 = vpow2.f32 %v6696_v51  ;;  %vm11012_vm5 = vcmp.eq.f32.partialorder %v3955_v48, 8.507059e+37 }
 0x555   :  { %v7837_v44 = vpop.eup %7836  ;;  %v10968_v16 = vpack.c.bf16 %v3906_v59, %v3905_v55  ;;  %v10972_v38 = vadd.f32 1.0, %v7835_v11 }
 0x556   :  { %v10975_v3 = vadd.f32 1.0, %v7837_v44  ;;  %v7839_v30 = vpop.eup %7838 }
 0x557   :  { %7844 = vrcp.f32 %v10972_v38  ;;  %4042 = vmatmul.bf16.vlgmr.msra.gmra.mxu0 %v10968_v16  ;;  %4056 = vmatmul.bf16.vlgmr.msra.gmra.mxu1 %v10968_v16  ;;  %v7841_v2 = vpop.eup %7840  ;;  %v3932_v37 = vmul.f32 %v7839_v30, %v10958_v63  ;;  %vm3937_vm2 = vweird.f32 %v7839_v30  ;;  %vm3981_vm6 = vweird.f32 %v10972_v38 }
 0x558   :  { %7846 = vrcp.f32 %v10966_v0  ;;  %4070 = vmatmul.bf16.vlgmr.msra.gmra.mxu2 %v10968_v16  ;;  %4084 = vmatmul.bf16.vlgmr.msra.gmra.mxu3 %v10968_v16  ;;  %v3947_v46 = vmul.f32 %v7841_v2, %v10960_v19  ;;  %vm3952_vm4 = vweird.f32 %v7841_v2  ;;  %vm3938_vm7 = vmor %vm3936_vm1, %vm3937_vm2  ;;  %v3985_v44 = vand.u32 2147483647, %v10972_v38 }
 0x559   :  { %7848 = vrcp.f32 %v10975_v3  ;;  %4171 = vmatpush.bf16.msra.mxu0 %v12427_v5  ;;  %4185 = vmatpush.bf16.msra.mxu1 %v12428_v1  ;;  %v3933_v12 = vsub.f32 1.0, %v3932_v37  ;;  %vm3953_vm8 = vmor %vm3951_vm0, %vm3952_vm4  ;;  %v4002_v37 = vand.u32 2147483648, %v10975_v3  ;;  %v3987_v63 = vand.u32 2147483648, %v10972_v38 }
 0x55a   :  { %7850 = vtanh.f32 %v3776_v42  ;;  %4199 = vmatpush.bf16.msra.mxu2 %v12429_v14  ;;  %4213 = vmatpush.bf16.msra.mxu3 %v12430_v23  ;;  %v7843_v54 = vpop.eup %7842  ;;  %v3948_v13 = vsub.f32 1.0, %v3947_v46  ;;  %vm3996_vm12 = vweird.f32 %v10975_v3  ;;  %vm3986_vm13 = vcmp.eq.f32.partialorder %v3985_v44, 8.507059e+37 }
 0x55b   :  { %7852 = vtanh.f32 %v3780_v50  ;;  %v10995_v53 = vadd.f32 1.0, %v7843_v54  ;;  %v3934_v47 = vmul.f32 %v7839_v30, %v3933_v12  ;;  %v4000_v54 = vand.u32 2147483647, %v10975_v3 }
 0x55c   :  { %v3949_v51 = vmul.f32 %v7841_v2, %v3948_v13  ;;  %vm3966_vm2 = vweird.f32 %v10966_v0 }
 0x55d   :  { %v10997_v15 = vpop.eup %7844  ;;  %4172 = vmatpush.bf16.msra.mxu0 %v12433_v43  ;;  %4186 = vmatpush.bf16.msra.mxu1 %v12532_v60  ;;  %7854 = vrcp.f32 %v10995_v53  ;;  %v3935_v26 = vadd.f32 %v7839_v30, %v3934_v47  ;;  %vm4001_vm15 = vcmp.eq.f32.partialorder %v4000_v54, 8.507059e+37  ;;  %vm4011_vm4 = vweird.f32 %v10995_v53 }
 0x55e   :  { %v11005_v17 = vpop.eup %7846  ;;  %v3977_v6 = vmul.f32 %v10997_v15, %v10972_v38  ;;  %4200 = vmatpush.bf16.msra.mxu2 %v12533_v41  ;;  %4214 = vmatpush.bf16.msra.mxu3 %v12534_v29  ;;  %v3950_v11 = vadd.f32 %v7841_v2, %v3949_v51  ;;  %vm3982_vm10 = vweird.f32 %v10997_v15 }
 0x55f   :  { %v7849_v35 = vpop.eup %7848  ;;  %v3962_v42 = vmul.f32 %v11005_v17, %v10966_v0  ;;  %v3939_v50 = vsel %vm3938_vm7, %v7839_v30, %v3935_v26  ;;  %vm3983_vm11 = vmor %vm3981_vm6, %vm3982_vm10  ;;  %vm3967_vm0 = vweird.f32 %v11005_v17 }
 0x560   :  { %v7851_v59 = vpop.eup %7850  ;;  %v3978_v52 = vsub.f32 1.0, %v3977_v6  ;;  %v3992_v22 = vmul.f32 %v7849_v35, %v10975_v3  ;;  %v3944_v33 = vsel %vm10999_vm3, %v3943_v61, %v3939_v50  ;;  %v3954_v39 = vsel %vm3953_vm8, %v7841_v2, %v3950_v11  ;;  %vm11083_vm3 = vmor %vm3966_vm2, %vm3967_vm0 }
 0x561   :  { %v7853_v32 = vpop.eup %7852  ;;  %4173 = vmatpush.bf16.msra.mxu0 %v12537_v7  ;;  %4187 = vmatpush.bf16.msra.mxu1 %v12538_v36  ;;  %v3959_v30 = vsel %vm11012_vm5, %v3958_v20, %v3954_v39  ;;  %vm3997_vm9 = vweird.f32 %v7849_v35  ;;  %v4025_v2 = vmul.f32 %v7851_v59, %v3944_v33  ;;  %v3963_v47 = vsub.f32 1.0, %v3962_v42  ;;  %v12854_v42 = vld [vmem:[#allocation163_spill] sm:$0xff]  ;;  %v12877_v33 = vld [vmem:[#allocation74_spill] sm:$0xff] }
 0x562   :  { %v3993_v46 = vsub.f32 1.0, %v3992_v22  ;;  %v3979_v19 = vmul.f32 %v10997_v15, %v3978_v52  ;;  %4201 = vmatpush.bf16.msra.mxu2 %v9260_v25  ;;  %4215 = vmatpush.bf16.msra.mxu3 %v9269_v28  ;;  %v4023_v18 = vmul.f32 %v3959_v30, %v10721_v57  ;;  %v3988_v61 = vor.u32 1.1754944e-38, %v3987_v63  ;;  %vm3998_vm14 = vmor %vm3996_vm12, %vm3997_vm9  ;;  %v12856_v63 = vld [vmem:[#allocation166_spill] sm:$0xff]  ;;  %v12860_v30 = vld [vmem:[#allocation168_spill] sm:$0xff] }
 0x563   :  { %v11040_v12 = vpop.eup %7854  ;;  %v4003_v6 = vor.u32 1.1754944e-38, %v4002_v37  ;;  %v3964_v55 = vmul.f32 %v11005_v17, %v3963_v47  ;;  %v4017_v50 = vand.u32 2147483648, %v10995_v53  ;;  %v12855_v37 = vld [vmem:[#allocation165_spill] sm:$0xff]  ;;  %v3970_v39 = vand.u32 2147483647, %v10966_v0 }
 0x564   :  { %v3994_v48 = vmul.f32 %v7849_v35, %v3993_v46  ;;  %v3980_v13 = vadd.f32 %v10997_v15, %v3979_v19  ;;  %v4007_v56 = vmul.f32 %v11040_v12, %v10995_v53  ;;  %v11057_v26 = vadd.f32 %v4025_v2, %v4023_v18  ;;  %v12859_v19 = vld [vmem:[#allocation167_spill] sm:$0xff]  ;;  %v12861_v47 = vld [vmem:[#allocation169_spill] sm:$0xff] }
 0x565   :  { %4174 = vmatpush.bf16.msra.mxu0 %v9274_v58  ;;  %4188 = vmatpush.bf16.msra.mxu1 %v9276_v45  ;;  %v3965_v22 = vadd.f32 %v11005_v17, %v3964_v55  ;;  %vm4012_vm1 = vweird.f32 %v11040_v12  ;;  %v4015_v46 = vand.u32 2147483647, %v10995_v53  ;;  %vm3971_vm6 = vcmp.eq.f32.partialorder %v3970_v39, 8.507059e+37  ;;  %v12869_v55 = vld [vmem:[#allocation65_spill] sm:$0xff]  ;;  %v12878_v39 = vld [vmem:[#allocation75_spill] sm:$0xff] }
 0x566   :  { %v3984_v57 = vsel %vm3983_vm11, %v10997_v15, %v3980_v13  ;;  %v3995_v51 = vadd.f32 %v7849_v35, %v3994_v48  ;;  %4202 = vmatpush.bf16.msra.mxu2 %v9289_v10  ;;  %4216 = vmatpush.bf16.msra.mxu3 %v9291_v31  ;;  %v4008_v38 = vsub.f32 1.0, %v4007_v56  ;;  %7856 = vtanh.f32 %v11057_v26  ;;  %vm4013_vm5 = vmor %vm4011_vm4, %vm4012_vm1 }
 0x567   :  { %v3989_v20 = vsel %vm3986_vm13, %v3988_v61, %v3984_v57  ;;  %4098 = vmatmul.bf16.vlgmr.msrb.gmra.mxu0 %v10968_v16  ;;  %4112 = vmatmul.bf16.vlgmr.msrb.gmra.mxu1 %v10968_v16  ;;  %v3969_v54 = vsel %vm11083_vm3, %v11005_v17, %v3965_v22  ;;  %v4018_v13 = vor.u32 1.1754944e-38, %v4017_v50  ;;  %vm4016_vm7 = vcmp.eq.f32.partialorder %v4015_v46, 8.507059e+37  ;;  %v12863_v57 = vld [vmem:[#allocation171_spill] sm:$0xff]  ;;  %v12873_v22 = vld [vmem:[#allocation69_spill] sm:$0xff]  ;;  %v12879_v46 = vld [vmem:[#allocation76_spill] sm:$0xff] }
 0x568   :  { %v3999_v3 = vsel %vm3998_vm14, %v7849_v35, %v3995_v51  ;;  %v4026_v15 = vmul.f32 %v7853_v32, %v3989_v20  ;;  %4126 = vmatmul.bf16.vlgmr.msrb.gmra.mxu2 %v10968_v16  ;;  %4140 = vmatmul.bf16.vlgmr.msrb.gmra.mxu3 %v10968_v16  ;;  %v4009_v59 = vmul.f32 %v11040_v12, %v4008_v38  ;;  %v12852_v35 = vld [vmem:[#allocation161_spill] sm:$0xff]  ;;  %v12853_v32 = vld [vmem:[#allocation162_spill] sm:$0xff]  ;;  %v12864_v51 = vld [vmem:[#allocation172_spill] sm:$0xff] }
 0x569   :  { %v4004_v11 = vsel %vm4001_vm15, %v4003_v6, %v3999_v3  ;;  %4175 = vmatpush.bf16.msra.mxu0 %v9319_v21  ;;  %4189 = vmatpush.bf16.msra.mxu1 %v12440_v62  ;;  %v12865_v38 = vld [vmem:[#allocation173_spill] sm:$0xff]  ;;  %v12867_v3 = vld [vmem:[#allocation63_spill] sm:$0xff] }
 0x56a   :  { %v4024_v52 = vmul.f32 %v4004_v11, %v10734_v49  ;;  %4203 = vmatpush.bf16.msra.mxu2 %v12442_v34  ;;  %4217 = vmatpush.bf16.msra.mxu3 %v12852_v35  ;;  %v4010_v44 = vadd.f32 %v11040_v12, %v4009_v59  ;;  %v3972_v49 = vand.u32 2147483648, %v10966_v0  ;;  %v12862_v0 = vld [vmem:[#allocation170_spill] sm:$0xff]  ;;  %v12871_v11 = vld [vmem:[#allocation67_spill] sm:$0xff]  ;;  %v12876_v50 = vld [vmem:[#allocation73_spill] sm:$0xff] }
 0x56b   :  { %v12870_v59 = vld [vmem:[#allocation66_spill] sm:$0xff] }
 0x56c   :  { %v11070_v16 = vadd.f32 %v4026_v15, %v4024_v52  ;;  %v4014_v18 = vsel %vm4013_vm5, %v11040_v12, %v4010_v44  ;;  %v7857_v2 = vpop.eup %7856  ;;  %v3973_v48 = vor.u32 1.1754944e-38, %v3972_v49  ;;  %v12866_v12 = vld [vmem:[#allocation174_spill] sm:$0xff]  ;;  %v12868_v15 = vld [vmem:[#allocation64_spill] sm:$0xff]  ;;  %v12874_v44 = vld [vmem:[#allocation71_spill] sm:$0xff] }
 0x56d   :  { %4176 = vmatpush.bf16.msra.mxu0 %v12853_v32  ;;  %4190 = vmatpush.bf16.msra.mxu1 %v12854_v42  ;;  %v4019_v61 = vsel %vm4016_vm7, %v4018_v13, %v4014_v18  ;;  %v12872_v52 = vld [vmem:[#allocation68_spill] sm:$0xff]  ;;  %v12881_v18 = vld [vmem:[#allocation81_spill] sm:$0xff] }
 0x56e   :  { %7858 = vtanh.f32 %v11070_v16  ;;  %4204 = vmatpush.bf16.msra.mxu2 %v12855_v37  ;;  %4218 = vmatpush.bf16.msra.mxu3 %v12856_v63  ;;  %v3974_v56 = vsel %vm3971_vm6, %v3973_v48, %v3969_v54  ;;  %v12875_v49 = vld [vmem:[#allocation72_spill] sm:$0xff]  ;;  %v12880_v54 = vld [vmem:[#allocation77_spill] sm:$0xff]  ;;  %v12883_v48 = vld [vmem:[#allocation83_spill] sm:$0xff] }
 0x56f   :  { %v4031_v6 = vmul.f32 %v7857_v2, %v3974_v56  ;;  %v12882_v2 = vld [vmem:[#allocation82_spill] sm:$0xff]  ;;  %v12884_v13 = vld [vmem:[#allocation84_spill] sm:$0xff] }
 0x570   :  { %v12886_v56 = vld [vmem:[#allocation86_spill] sm:$0xff] }
 0x571   :  { %4177 = vmatpush.bf16.msra.mxu0 %v12859_v19  ;;  %4191 = vmatpush.bf16.msra.mxu1 %v12860_v30 }
 0x572   :  { %4205 = vmatpush.bf16.msra.mxu2 %v12861_v47  ;;  %4219 = vmatpush.bf16.msra.mxu3 %v12862_v0 }
 0x574   :  { %v7859_v53 = vpop.eup %7858 }
 0x575   :  { %4178 = vmatpush.bf16.msra.mxu0 %v12863_v57  ;;  %4192 = vmatpush.bf16.msra.mxu1 %v12864_v51  ;;  %v4032_v17 = vmul.f32 %v7859_v53, %v4019_v61  ;;  %v12885_v53 = vld [vmem:[#allocation85_spill] sm:$0xff]  ;;  %v12887_v61 = vld [vmem:[#allocation87_spill] sm:$0xff] }
 0x576   :  { %4206 = vmatpush.bf16.msra.mxu2 %v12865_v38  ;;  %4220 = vmatpush.bf16.msra.mxu3 %v12866_v12 }
 0x577   :  { %v4170_v20 = vpack.c.bf16 %v4032_v17, %v4031_v6  ;;  %v12888_v6 = vld [vmem:[#allocation88_spill] sm:$0xff] }
 0x578   :  { %v12889_v17 = vld [vmem:[#allocation92_spill] sm:$0xff] }
 0x579   :  { %4488 = vmatpush.bf16.msrb.mxu0 %v12867_v3  ;;  %4502 = vmatpush.bf16.msrb.mxu1 %v12868_v15  ;;  %v12891_v3 = vld [vmem:[#allocation95_spill] sm:$0xff]  ;;  %v12892_v15 = vld [vmem:[#allocation96_spill] sm:$0xff] }
 0x57a   :  { %4516 = vmatpush.bf16.msrb.mxu2 %v12869_v55  ;;  %4530 = vmatpush.bf16.msrb.mxu3 %v12870_v59  ;;  %v12893_v55 = vld [vmem:[#allocation97_spill] sm:$0xff]  ;;  %v12894_v59 = vld [vmem:[#allocation98_spill] sm:$0xff] }
 0x57b   :  { %4179 = vmatmul.bf16.vlgmr.msra.gmra.mxu0 %v4170_v20  ;;  %4193 = vmatmul.bf16.vlgmr.msra.gmra.mxu1 %v4170_v20 }
 0x57c   :  { %4207 = vmatmul.bf16.vlgmr.msra.gmra.mxu2 %v4170_v20  ;;  %4221 = vmatmul.bf16.vlgmr.msra.gmra.mxu3 %v4170_v20  ;;  %v12890_v20 = vld [vmem:[#allocation93_spill] sm:$0xff] }
 0x57d   :  { %4489 = vmatpush.bf16.msrb.mxu0 %v12871_v11  ;;  %4503 = vmatpush.bf16.msrb.mxu1 %v12872_v52  ;;  %v12895_v11 = vld [vmem:[#allocation99_spill] sm:$0xff]  ;;  %v12896_v52 = vld [vmem:[#allocation100_spill] sm:$0xff] }
 0x57e   :  { %4517 = vmatpush.bf16.msrb.mxu2 %v12873_v22  ;;  %4531 = vmatpush.bf16.msrb.mxu3 %v12874_v44  ;;  %v12897_v22 = vld [vmem:[#allocation101_spill] sm:$0xff]  ;;  %v12898_v44 = vld [vmem:[#allocation102_spill] sm:$0xff] }
 0x581   :  { %4490 = vmatpush.bf16.msrb.mxu0 %v12875_v49  ;;  %4504 = vmatpush.bf16.msrb.mxu1 %v12876_v50 }
 0x582   :  { %4518 = vmatpush.bf16.msrb.mxu2 %v12877_v33  ;;  %4532 = vmatpush.bf16.msrb.mxu3 %v12878_v39 }
 0x585   :  { %4491 = vmatpush.bf16.msrb.mxu0 %v12879_v46  ;;  %4505 = vmatpush.bf16.msrb.mxu1 %v12880_v54  ;;  %v12907_v46 = vld [vmem:[#allocation149_spill] sm:$0xff] }
 0x586   :  { %4519 = vmatpush.bf16.msrb.mxu2 %v12881_v18  ;;  %4533 = vmatpush.bf16.msrb.mxu3 %v12882_v2  ;;  %v12908_v18 = vld [vmem:[#allocation148_spill] sm:$0xff] }
 0x589   :  { %4492 = vmatpush.bf16.msrb.mxu0 %v12883_v48  ;;  %4506 = vmatpush.bf16.msrb.mxu1 %v12884_v13 }
 0x58a   :  { %4520 = vmatpush.bf16.msrb.mxu2 %v12885_v53  ;;  %4534 = vmatpush.bf16.msrb.mxu3 %v12886_v56 }
 0x58d   :  { %4493 = vmatpush.bf16.msrb.mxu0 %v12887_v61  ;;  %4507 = vmatpush.bf16.msrb.mxu1 %v12888_v6 }
 0x58e   :  { %4521 = vmatpush.bf16.msrb.mxu2 %v12889_v17  ;;  %4535 = vmatpush.bf16.msrb.mxu3 %v12890_v20 }
 0x591   :  { %4494 = vmatpush.bf16.msrb.mxu0 %v12891_v3  ;;  %4508 = vmatpush.bf16.msrb.mxu1 %v12892_v15 }
 0x592   :  { %4522 = vmatpush.bf16.msrb.mxu2 %v12893_v55  ;;  %4536 = vmatpush.bf16.msrb.mxu3 %v12894_v59  ;;  %v12909_v55 = vld [vmem:[#allocation58_spill] sm:$0xff] }
 0x595   :  { %4495 = vmatpush.bf16.msrb.mxu0 %v12895_v11  ;;  %4509 = vmatpush.bf16.msrb.mxu1 %v12896_v52 }
 0x596   :  { %4523 = vmatpush.bf16.msrb.mxu2 %v12897_v22  ;;  %4537 = vmatpush.bf16.msrb.mxu3 %v12898_v44 }
 0x599   :  { %4545 = vmatpush.bf16.msra.mxu0 %v12427_v5  ;;  %4559 = vmatpush.bf16.msra.mxu1 %v12428_v1  ;;  %v12902_v1 = vld [vmem:[#allocation49_spill] sm:$0xff] }
 0x59a   :  { %4573 = vmatpush.bf16.msra.mxu2 %v12429_v14  ;;  %4587 = vmatpush.bf16.msra.mxu3 %v12430_v23 }
 0x59d   :  { %4546 = vmatpush.bf16.msra.mxu0 %v12433_v43  ;;  %4560 = vmatpush.bf16.msra.mxu1 %v12532_v60 }
 0x59e   :  { %4574 = vmatpush.bf16.msra.mxu2 %v12533_v41  ;;  %4588 = vmatpush.bf16.msra.mxu3 %v12534_v29 }
 0x5a1   :  { %4547 = vmatpush.bf16.msra.mxu0 %v12537_v7  ;;  %4561 = vmatpush.bf16.msra.mxu1 %v12538_v36  ;;  %v12904_v7 = vld [vmem:[#allocation146_spill] sm:$0xff] }
 0x5a2   :  { %4575 = vmatpush.bf16.msra.mxu2 %v9260_v25  ;;  %4589 = vmatpush.bf16.msra.mxu3 %v9269_v28  ;;  %v12899_v25 = vld [vmem:[#allocation142_spill] sm:$0xff] }
 0x5a5   :  { %4548 = vmatpush.bf16.msra.mxu0 %v9274_v58  ;;  %4562 = vmatpush.bf16.msra.mxu1 %v9276_v45 }
 0x5a6   :  { %4576 = vmatpush.bf16.msra.mxu2 %v9289_v10  ;;  %4590 = vmatpush.bf16.msra.mxu3 %v9291_v31  ;;  %v12900_v10 = vld [vmem:[#allocation143_spill] sm:$0xff] }
 0x5a9   :  { %4549 = vmatpush.bf16.msra.mxu0 %v9319_v21  ;;  %4563 = vmatpush.bf16.msra.mxu1 %v12440_v62  ;;  %v12901_v21 = vld [vmem:[#allocation47_spill] sm:$0xff] }
 0x5aa   :  { %4577 = vmatpush.bf16.msra.mxu2 %v12442_v34  ;;  %4591 = vmatpush.bf16.msra.mxu3 %v12852_v35  ;;  %v12903_v34 = vld [vmem:[#allocation145_spill] sm:$0xff]  ;;  %v12905_v35 = vld [vmem:[#allocation147_spill] sm:$0xff] }
 0x5ad   :  { %4550 = vmatpush.bf16.msra.mxu0 %v12853_v32  ;;  %4564 = vmatpush.bf16.msra.mxu1 %v12854_v42  ;;  %v12906_v42 = vld [vmem:[#allocation52_spill] sm:$0xff] }
 0x5ae   :  { %4578 = vmatpush.bf16.msra.mxu2 %v12855_v37  ;;  %4592 = vmatpush.bf16.msra.mxu3 %v12856_v63 }
 0x5b1   :  { %4551 = vmatpush.bf16.msra.mxu0 %v12859_v19  ;;  %4565 = vmatpush.bf16.msra.mxu1 %v12860_v30 }
 0x5b2   :  { %4579 = vmatpush.bf16.msra.mxu2 %v12861_v47  ;;  %4593 = vmatpush.bf16.msra.mxu3 %v12862_v0 }
 0x5b5   :  { %4552 = vmatpush.bf16.msra.mxu0 %v12863_v57  ;;  %4566 = vmatpush.bf16.msra.mxu1 %v12864_v51 }
 0x5b6   :  { %4580 = vmatpush.bf16.msra.mxu2 %v12865_v38  ;;  %4594 = vmatpush.bf16.msra.mxu3 %v12866_v12 }
 0x5d4   :  { %v4043_v28 = vpop.f32.mrf.mxu0  ;;  %v4057_v45 = vpop.f32.mrf.mxu1 }
 0x5d5   :  { %v4146_v58 = vadd.f32 %v4043_v28, %v12899_v25  ;;  %v4147_v31 = vadd.f32 %v4057_v45, %v12900_v10 }
 0x5d7   :  { %v4154_v5 = vadd.f32 %v4146_v58, %v12901_v21  ;;  %v4155_v14 = vadd.f32 %v4147_v31, %v12902_v1 }
 0x5d9   :  { %v6697_v23 = vmul.f32 -1.442695, %v4154_v5  ;;  %v6698_v43 = vmul.f32 -1.442695, %v4155_v14 }
 0x5db   :  { %7860 = vpow2.f32 %v6697_v23  ;;  %v4071_v62 = vpop.f32.mrf.mxu2  ;;  %v4085_v63 = vpop.f32.mrf.mxu3 }
 0x5dc   :  { %7862 = vpow2.f32 %v6698_v43  ;;  %v4148_v60 = vadd.f32 %v4071_v62, %v12903_v34  ;;  %v4045_v41 = vpop.f32.mrf.mxu0  ;;  %v4059_v29 = vpop.f32.mrf.mxu1  ;;  %v4149_v2 = vadd.f32 %v4085_v63, %v12908_v18 }
 0x5dd   :  { %v4150_v36 = vadd.f32 %v4045_v41, %v12904_v7  ;;  %v4151_v32 = vadd.f32 %v4059_v29, %v12905_v35 }
 0x5de   :  { %v4156_v37 = vadd.f32 %v4148_v60, %v12906_v42  ;;  %v4157_v59 = vadd.f32 %v4149_v2, %v12909_v55 }
 0x5df   :  { %v4158_v19 = vadd.f32 %v4150_v36, %v12901_v21  ;;  %v4159_v30 = vadd.f32 %v4151_v32, %v12902_v1  ;;  %v12910_v1 = vld [vmem:[#allocation79_spill] sm:$0xff] }
 0x5e0   :  { %v6699_v47 = vmul.f32 -1.442695, %v4156_v37 }
 0x5e1   :  { %v7861_v0 = vpop.eup %7860  ;;  %v6700_v57 = vmul.f32 -1.442695, %v4158_v19  ;;  %v6701_v12 = vmul.f32 -1.442695, %v4159_v30 }
 0x5e2   :  { %v7863_v51 = vpop.eup %7862  ;;  %v4253_v38 = vadd.f32 1.0, %v7861_v0  ;;  %7864 = vpow2.f32 %v6699_v47 }
 0x5e3   :  { %v4254_v49 = vadd.f32 1.0, %v7863_v51  ;;  %7866 = vpow2.f32 %v6700_v57  ;;  %v4073_v50 = vpop.f32.mrf.mxu2  ;;  %v4087_v56 = vpop.f32.mrf.mxu3 }
 0x5e4   :  { %7868 = vrcp.f32 %v4253_v38  ;;  %v4099_v33 = vpop.f32.mrf.mxu0  ;;  %v4113_v39 = vpop.f32.mrf.mxu1  ;;  %v4152_v54 = vadd.f32 %v4073_v50, %v12907_v46  ;;  %v4268_v44 = vand.u32 2147483647, %v4253_v38  ;;  %v4270_v28 = vand.u32 2147483648, %v4253_v38 }
 0x5e5   :  { %7870 = vrcp.f32 %v4254_v49  ;;  %v4285_v10 = vand.u32 2147483648, %v4254_v49  ;;  %v4283_v5 = vand.u32 2147483647, %v4254_v49  ;;  %v4153_v14 = vadd.f32 %v4087_v56, %v12910_v1 }
 0x5e6   :  { %7872 = vpow2.f32 %v6701_v12  ;;  %v4160_v13 = vadd.f32 %v4152_v54, %v12906_v42  ;;  %vm4264_vm10 = vweird.f32 %v4253_v38  ;;  %vm4279_vm11 = vweird.f32 %v4254_v49 }
 0x5e7   :  { %vm11196_vm12 = vcmp.eq.f32.partialorder %v4268_v44, 8.507059e+37  ;;  %v4271_v60 = vor.u32 1.1754944e-38, %v4270_v28  ;;  %v4286_v29 = vor.u32 1.1754944e-38, %v4285_v10  ;;  %vm11204_vm14 = vcmp.eq.f32.partialorder %v4283_v5, 8.507059e+37 }
 0x5e8   :  { %v7865_v48 = vpop.eup %7864  ;;  %v6702_v20 = vmul.f32 -1.442695, %v4160_v13  ;;  %v4161_v32 = vadd.f32 %v4153_v14, %v12909_v55  ;;  %v4162_v30 = vadd.f32 %v4099_v33, %v12414_v27  ;;  %v4163_v47 = vadd.f32 %v4113_v39, %v12415_v9 }
 0x5e9   :  { %v7867_v53 = vpop.eup %7866  ;;  %v11179_v6 = vadd.f32 1.0, %v7865_v48 }
 0x5ea   :  { %v7869_v61 = vpop.eup %7868  ;;  %v11181_v17 = vadd.f32 1.0, %v7867_v53 }
 0x5eb   :  { %v7871_v3 = vpop.eup %7870  ;;  %v4260_v15 = vmul.f32 %v7869_v61, %v4253_v38  ;;  %v11184_v11 = vpop.f32.mrf.mxu2  ;;  %vm4265_vm8 = vweird.f32 %v7869_v61 }
 0x5ec   :  { %v7873_v52 = vpop.eup %7872  ;;  %v4275_v22 = vmul.f32 %v7871_v3, %v4254_v49  ;;  %7874 = vrcp.f32 %v11181_v17  ;;  %v11187_v45 = vpop.f32.mrf.mxu0  ;;  %vm4280_vm9 = vweird.f32 %v7871_v3  ;;  %vm11200_vm13 = vmor %vm4264_vm10, %vm4265_vm8  ;;  %v4313_v49 = vand.u32 2147483647, %v11181_v17 }
 0x5ed   :  { %v11189_v25 = vpop.f32.mrf.mxu1  ;;  %v4261_v58 = vsub.f32 1.0, %v4260_v15  ;;  %v11191_v31 = vadd.f32 1.0, %v7873_v52  ;;  %7876 = vpow2.f32 %v6702_v20  ;;  %vm11209_vm15 = vmor %vm4279_vm11, %vm4280_vm9  ;;  %v11218_v0 = vpop.f32.mrf.mxu3  ;;  %v4315_v50 = vand.u32 2147483648, %v11181_v17 }
 0x5ee   :  { %v4276_v21 = vsub.f32 1.0, %v4275_v22  ;;  %7878 = vrcp.f32 %v11179_v6  ;;  %vm4309_vm1 = vweird.f32 %v11181_v17  ;;  %vm11242_vm3 = vcmp.eq.f32.partialorder %v4313_v49, 8.507059e+37 }
 0x5ef   :  { %v4262_v23 = vmul.f32 %v7869_v61, %v4261_v58  ;;  %7880 = vrcp.f32 %v11191_v31  ;;  %vm4324_vm0 = vweird.f32 %v11191_v31  ;;  %v4330_v33 = vand.u32 2147483648, %v11191_v31 }
 0x5f0   :  { %v4277_v43 = vmul.f32 %v7871_v3, %v4276_v21  ;;  %7882 = vtanh.f32 %v4157_v59  ;;  %v4316_v55 = vor.u32 1.1754944e-38, %v4315_v50  ;;  %v4164_v1 = vadd.f32 %v11184_v11, %v12419_v8 }
 0x5f1   :  { %v4263_v62 = vadd.f32 %v7869_v61, %v4262_v23  ;;  %7884 = vtanh.f32 %v4161_v32  ;;  %v4331_v58 = vor.u32 1.1754944e-38, %v4330_v33  ;;  %v4167_v11 = vadd.f32 %v11189_v25, %v12415_v9 }
 0x5f2   :  { %v7875_v41 = vpop.eup %7874  ;;  %v4278_v36 = vadd.f32 %v7871_v3, %v4277_v43  ;;  %vm4294_vm11 = vweird.f32 %v11179_v6 }
 0x5f3   :  { %v7877_v42 = vpop.eup %7876  ;;  %v4267_v63 = vsel %vm11200_vm13, %v7869_v61, %v4263_v62  ;;  %v4305_v19 = vmul.f32 %v7875_v41, %v11181_v17  ;;  %v11220_v57 = vpop.f32.mrf.mxu2  ;;  %vm4310_vm2 = vweird.f32 %v7875_v41  ;;  %v4328_v61 = vand.u32 2147483647, %v11191_v31 }
 0x5f4   :  { %v11222_v51 = vpop.eup %7878  ;;  %v4282_v38 = vsel %vm11209_vm15, %v7871_v3, %v4278_v36  ;;  %v11226_v12 = vadd.f32 1.0, %v7877_v42  ;;  %v4272_v18 = vsel %vm11196_vm12, %v4271_v60, %v4267_v63  ;;  %vm4311_vm5 = vmor %vm4309_vm1, %vm4310_vm2 }
 0x5f5   :  { %v7881_v46 = vpop.eup %7880  ;;  %v4306_v54 = vsub.f32 1.0, %v4305_v19  ;;  %v4287_v2 = vsel %vm11204_vm14, %v4286_v29, %v4282_v38  ;;  %v4290_v20 = vmul.f32 %v11222_v51, %v11179_v6  ;;  %vm11249_vm6 = vcmp.eq.f32.partialorder %v4328_v61, 8.507059e+37  ;;  %v11266_v29 = vpop.f32.mrf.mxu3 }
 0x5f6   :  { %v7883_v39 = vpop.eup %7882  ;;  %v4320_v48 = vmul.f32 %v7881_v46, %v11191_v31  ;;  %7886 = vrcp.f32 %v11226_v12  ;;  %v4351_v59 = vmul.f32 %v4287_v2, %v10905_v40  ;;  %vm4325_vm4 = vweird.f32 %v7881_v46 }
 0x5f7   :  { %v4307_v56 = vmul.f32 %v7875_v41, %v4306_v54  ;;  %v4353_v52 = vmul.f32 %v7883_v39, %v4272_v18  ;;  %v7885_v40 = vpop.eup %7884  ;;  %v4291_v23 = vsub.f32 1.0, %v4290_v20  ;;  %vm4326_vm7 = vmor %vm4324_vm0, %vm4325_vm4  ;;  %vm4295_vm8 = vweird.f32 %v11222_v51 }
 0x5f8   :  { %v4180_v13 = vpop.f32.mrf.mxu0  ;;  %v4194_v53 = vpop.f32.mrf.mxu1  ;;  %v4321_v3 = vsub.f32 1.0, %v4320_v48  ;;  %v4345_v39 = vand.u32 2147483648, %v11226_v12  ;;  %v4343_v61 = vand.u32 2147483647, %v11226_v12  ;;  %v4300_v20 = vand.u32 2147483648, %v11179_v6  ;;  %vm11299_vm13 = vmor %vm4294_vm11, %vm4295_vm8 }
 0x5f9   :  { %v4308_v22 = vadd.f32 %v7875_v41, %v4307_v56  ;;  %v4227_v44 = vadd.f32 %v4180_v13, %v4162_v30  ;;  %v4228_v10 = vadd.f32 %v4194_v53, %v4163_v47  ;;  %v4355_v17 = vadd.f32 %v4353_v52, %v4351_v59 }
 0x5fa   :  { %v4322_v28 = vmul.f32 %v7881_v46, %v4321_v3  ;;  %v4292_v49 = vmul.f32 %v11222_v51, %v4291_v23  ;;  %v4168_v53 = vadd.f32 %v11220_v57, %v12419_v8  ;;  %vm4339_vm10 = vweird.f32 %v11226_v12 }
 0x5fb   :  { %v4312_v21 = vsel %vm4311_vm5, %v7875_v41, %v4308_v22  ;;  %v6703_v14 = vmul.f32 -1.442695, %v4227_v44  ;;  %v6704_v34 = vmul.f32 -1.442695, %v4228_v10  ;;  %v4166_v41 = vadd.f32 %v11187_v45, %v12414_v27 }
 0x5fc   :  { %v4317_v43 = vsel %vm11242_vm3, %v4316_v55, %v4312_v21  ;;  %v4323_v62 = vadd.f32 %v7881_v46, %v4322_v28  ;;  %v11257_v60 = vpop.eup %7886  ;;  %v4293_v56 = vadd.f32 %v11222_v51, %v4292_v49  ;;  %v4298_v59 = vand.u32 2147483647, %v11179_v6 }
 0x5fd   :  { %7888 = vpow2.f32 %v6703_v14  ;;  %v4335_v36 = vmul.f32 %v11257_v60, %v11226_v12  ;;  %v4354_v32 = vmul.f32 %v7885_v40, %v4317_v43  ;;  %vm4340_vm9 = vweird.f32 %v11257_v60 }
 0x5fe   :  { %v4327_v35 = vsel %vm4326_vm7, %v7881_v46, %v4323_v62  ;;  %7890 = vpow2.f32 %v6704_v34  ;;  %vm11292_vm12 = vmor %vm4339_vm10, %vm4340_vm9  ;;  %v4346_v12 = vor.u32 1.1754944e-38, %v4345_v39  ;;  %v4297_v10 = vsel %vm11299_vm13, %v11222_v51, %v4293_v56 }
 0x5ff   :  { %v4208_v7 = vpop.f32.mrf.mxu2  ;;  %v4332_v31 = vsel %vm11249_vm6, %v4331_v58, %v4327_v35  ;;  %v4336_v19 = vsub.f32 1.0, %v4335_v36  ;;  %7892 = vtanh.f32 %v4355_v17  ;;  %v4222_v57 = vpop.f32.mrf.mxu3  ;;  %vm4344_vm14 = vcmp.eq.f32.partialorder %v4343_v61, 8.507059e+37 }
 0x600   :  { %v4182_v42 = vpop.f32.mrf.mxu0  ;;  %v4196_v37 = vpop.f32.mrf.mxu1  ;;  %v4229_v63 = vadd.f32 %v4208_v7, %v4164_v1  ;;  %v4352_v25 = vmul.f32 %v4332_v31, %v10926_v24  ;;  %v4301_v21 = vor.u32 1.1754944e-38, %v4300_v20  ;;  %v4165_v14 = vadd.f32 %v11218_v0, %v12426_v4 }
 0x601   :  { %v4231_v45 = vadd.f32 %v4182_v42, %v4166_v41  ;;  %v4232_v30 = vadd.f32 %v4196_v37, %v4167_v11  ;;  %v4337_v50 = vmul.f32 %v11257_v60, %v4336_v19  ;;  %vm4299_vm15 = vcmp.eq.f32.partialorder %v4298_v59, 8.507059e+37 }
 0x602   :  { %v6705_v47 = vmul.f32 -1.442695, %v4229_v63  ;;  %v4356_v46 = vadd.f32 %v4354_v32, %v4352_v25  ;;  %v4230_v41 = vadd.f32 %v4222_v57, %v4165_v14  ;;  %v4169_v32 = vadd.f32 %v11266_v29, %v12426_v4 }
 0x603   :  { %v6706_v38 = vmul.f32 -1.442695, %v4231_v45  ;;  %v7889_v54 = vpop.eup %7888  ;;  %v6707_v24 = vmul.f32 -1.442695, %v4232_v30  ;;  %v4338_v13 = vadd.f32 %v11257_v60, %v4337_v50 }
 0x604   :  { %7894 = vpow2.f32 %v6705_v47  ;;  %v7891_v33 = vpop.eup %7890  ;;  %v11277_v18 = vadd.f32 1.0, %v7889_v54 }
 0x605   :  { %7896 = vtanh.f32 %v4356_v46  ;;  %v11280_v2 = vadd.f32 1.0, %v7891_v33  ;;  %v7893_v3 = vpop.eup %7892  ;;  %v4342_v44 = vsel %vm11292_vm12, %v11257_v60, %v4338_v13  ;;  %v4302_v60 = vsel %vm4299_vm15, %v4301_v21, %v4297_v10 }
 0x606   :  { %7898 = vpow2.f32 %v6706_v38  ;;  %v4347_v5 = vsel %vm4344_vm14, %v4346_v12, %v4342_v44  ;;  %v4359_v11 = vmul.f32 %v7893_v3, %v4302_v60  ;;  %v4396_v31 = vand.u32 2147483648, %v11277_v18 }
 0x607   :  { %v4210_v48 = vpop.f32.mrf.mxu2  ;;  %7900 = vrcp.f32 %v11277_v18  ;;  %v4224_v63 = vpop.f32.mrf.mxu3  ;;  %v4411_v19 = vand.u32 2147483648, %v11280_v2  ;;  %vm4390_vm2 = vweird.f32 %v11277_v18  ;;  %v4394_v29 = vand.u32 2147483647, %v11277_v18 }
 0x608   :  { %7902 = vrcp.f32 %v11280_v2  ;;  %v4233_v55 = vadd.f32 %v4210_v48, %v4168_v53  ;;  %vm4405_vm3 = vweird.f32 %v11280_v2  ;;  %v4409_v38 = vand.u32 2147483647, %v11280_v2 }
 0x609   :  { %7904 = vpow2.f32 %v6707_v24  ;;  %v4234_v33 = vadd.f32 %v4224_v63, %v4169_v32  ;;  %v4412_v13 = vor.u32 1.1754944e-38, %v4411_v19  ;;  %vm4395_vm6 = vcmp.eq.f32.partialorder %v4394_v29, 8.507059e+37 }
 0x60a   :  { %v7895_v52 = vpop.eup %7894  ;;  %v6708_v58 = vmul.f32 -1.442695, %v4233_v55  ;;  %vm4410_vm7 = vcmp.eq.f32.partialorder %v4409_v38, 8.507059e+37 }
 0x60b   :  { %v7897_v28 = vpop.eup %7896  ;;  %v11311_v40 = vadd.f32 1.0, %v7895_v52 }
 0x60c   :  { %v7899_v6 = vpop.eup %7898  ;;  %v4360_v23 = vmul.f32 %v7897_v28, %v4347_v5  ;;  %7906 = vpow2.f32 %v6708_v58 }
 0x60d   :  { %v7901_v1 = vpop.eup %7900  ;;  %v11314_v34 = vadd.f32 1.0, %v7899_v6 }
 0x60e   :  { %v7903_v43 = vpop.eup %7902  ;;  %v4386_v62 = vmul.f32 %v7901_v1, %v11277_v18  ;;  %v4487_v35 = vpack.c.bf16 %v4360_v23, %v4359_v11  ;;  %vm4391_vm0 = vweird.f32 %v7901_v1  ;;  %v4397_v18 = vor.u32 1.1754944e-38, %v4396_v31 }
 0x60f   :  { %v7905_v51 = vpop.eup %7904  ;;  %v4401_v17 = vmul.f32 %v7903_v43, %v11280_v2  ;;  %7908 = vrcp.f32 %v11314_v34  ;;  %vm4406_vm1 = vweird.f32 %v7903_v43  ;;  %vm11330_vm4 = vmor %vm4390_vm2, %vm4391_vm0  ;;  %v4441_v57 = vand.u32 2147483648, %v11314_v34 }
 0x610   :  { %v4387_v7 = vsub.f32 1.0, %v4386_v62  ;;  %v11318_v0 = vadd.f32 1.0, %v7905_v51  ;;  %7910 = vrcp.f32 %v11311_v40  ;;  %4496 = vmatmul.bf16.vlgmr.msrb.gmra.mxu0 %v4487_v35  ;;  %4510 = vmatmul.bf16.vlgmr.msrb.gmra.mxu1 %v4487_v35  ;;  %vm11338_vm5 = vmor %vm4405_vm3, %vm4406_vm1  ;;  %v4439_v52 = vand.u32 2147483647, %v11314_v34 }
 0x611   :  { %v4402_v36 = vsub.f32 1.0, %v4401_v17  ;;  %4524 = vmatmul.bf16.vlgmr.msrb.gmra.mxu2 %v4487_v35  ;;  %4538 = vmatmul.bf16.vlgmr.msrb.gmra.mxu3 %v4487_v35  ;;  %vm4435_vm9 = vweird.f32 %v11314_v34  ;;  %vm4420_vm2 = vweird.f32 %v11311_v40 }
 0x612   :  { %v4388_v42 = vmul.f32 %v7901_v1, %v4387_v7  ;;  %7912 = vrcp.f32 %v11318_v0  ;;  %v7907_v45 = vpop.eup %7906  ;;  %v4456_v12 = vand.u32 2147483648, %v11318_v0  ;;  %v4454_v44 = vand.u32 2147483647, %v11318_v0 }
 0x613   :  { %v4403_v37 = vmul.f32 %v7903_v43, %v4402_v36  ;;  %7914 = vtanh.f32 %v4230_v41  ;;  %v11335_v49 = vadd.f32 1.0, %v7907_v45  ;;  %vm4450_vm12 = vweird.f32 %v11318_v0 }
 0x614   :  { %v4389_v25 = vadd.f32 %v7901_v1, %v4388_v42  ;;  %vm4440_vm13 = vcmp.eq.f32.partialorder %v4439_v52, 8.507059e+37  ;;  %v4457_v62 = vor.u32 1.1754944e-38, %v4456_v12  ;;  %vm4455_vm15 = vcmp.eq.f32.partialorder %v4454_v44, 8.507059e+37  ;;  %v7340_v12 = vld [vmem:[#allocation11 + $0xec] sm:$0xf] }
 0x615   :  { %v4404_v47 = vadd.f32 %v7903_v43, %v4403_v37  ;;  %v7909_v50 = vpop.eup %7908  ;;  %7916 = vrcp.f32 %v11335_v49  ;;  %v4426_v42 = vand.u32 2147483648, %v11311_v40  ;;  %v4471_v37 = vand.u32 2147483648, %v11335_v49  ;;  %v6839_v44 = vld [vmem:[#allocation11 + $0xf8] sm:$0xf0] }
 0x616   :  { %v4393_v54 = vsel %vm11330_vm4, %v7901_v1, %v4389_v25  ;;  %v11344_v39 = vpop.eup %7910  ;;  %v4431_v2 = vmul.f32 %v7909_v50, %v11314_v34  ;;  %7918 = vtanh.f32 %v4234_v33  ;;  %vm4436_vm8 = vweird.f32 %v7909_v50 }
 0x617   :  { %v4408_v24 = vsel %vm11338_vm5, %v7903_v43, %v4404_v47  ;;  %v4398_v56 = vsel %vm4395_vm6, %v4397_v18, %v4393_v54  ;;  %v4416_v3 = vmul.f32 %v11344_v39, %v11311_v40  ;;  %vm4437_vm11 = vmor %vm4435_vm9, %vm4436_vm8  ;;  %v4442_v1 = vor.u32 1.1754944e-38, %v4441_v57  ;;  %v7342_v57 = vld [vmem:[#allocation11 + $0xf4] sm:$0xf0] }
 0x618   :  { %v7913_v48 = vpop.eup %7912  ;;  %v4432_v61 = vsub.f32 1.0, %v4431_v2  ;;  %v4413_v15 = vsel %vm4410_vm7, %v4412_v13, %v4408_v24  ;;  %vm4421_vm0 = vweird.f32 %v11344_v39  ;;  %vm4465_vm4 = vweird.f32 %v11335_v49  ;;  %v6829_v2 = vld [vmem:[#allocation11 + $0xe0] sm:$0xf]  ;;  %v7339_v13 = vld [vmem:[#allocation11 + $0xe4] sm:$0xf] }
 0x619   :  { %v7915_v53 = vpop.eup %7914  ;;  %v4446_v20 = vmul.f32 %v7913_v48, %v11318_v0  ;;  %v4477_v58 = vmul.f32 %v4413_v15, %v11057_v26  ;;  %vm4451_vm10 = vweird.f32 %v7913_v48  ;;  %v4417_v21 = vsub.f32 1.0, %v4416_v3  ;;  %vm4422_vm3 = vmor %vm4420_vm2, %vm4421_vm0  ;;  %v6831_v3 = vld [vmem:[#allocation11 + $0xf0] sm:$0xf0]  ;;  %v6837_v15 = vld [vmem:[#allocation11 + $0xe8] sm:$0xf] }
 0x61a   :  { %v4433_v59 = vmul.f32 %v7909_v50, %v4432_v61  ;;  %v4479_v22 = vmul.f32 %v7915_v53, %v4398_v56  ;;  %vm4452_vm14 = vmor %vm4450_vm12, %vm4451_vm10  ;;  %v4469_v31 = vand.u32 2147483647, %v11335_v49  ;;  %v4427_v25 = vor.u32 1.1754944e-38, %v4426_v42  ;;  %v7331_v42 = vld [vmem:[#allocation11 + $0xa4] sm:$0xf] }
 0x61b   :  { %v4447_v55 = vsub.f32 1.0, %v4446_v20  ;;  %v7917_v28 = vpop.eup %7916  ;;  %v4418_v41 = vmul.f32 %v11344_v39, %v4417_v21  ;;  %v4472_v29 = vor.u32 1.1754944e-38, %v4471_v37  ;;  %v6834_v52 = vor.u32 %v7339_v13, %v6831_v3  ;;  %v7337_v21 = vld [vmem:[#allocation11 + $0xcc] sm:$0xf0]  ;;  %v7327_v13 = vld [vmem:[#allocation11 + $0x84] sm:$0xf] }
 0x61c   :  { %v4434_v6 = vadd.f32 %v7909_v50, %v4433_v59  ;;  %v4461_v5 = vmul.f32 %v7917_v28, %v11335_v49  ;;  %v7919_v43 = vpop.eup %7918  ;;  %v11361_v51 = vadd.f32 %v4479_v22, %v4477_v58  ;;  %vm4466_vm1 = vweird.f32 %v7917_v28  ;;  %v6783_v3 = vld [vmem:[#allocation11 + $0x90] sm:$0xf0] }
 0x61d   :  { %v4448_v10 = vmul.f32 %v7913_v48, %v4447_v55  ;;  %v4419_v35 = vadd.f32 %v11344_v39, %v4418_v41  ;;  %vm4467_vm5 = vmor %vm4465_vm4, %vm4466_vm1  ;;  %vm4470_vm7 = vcmp.eq.f32.partialorder %v4469_v31, 8.507059e+37  ;;  %v6838_v22 = vor.u32 %v7342_v57, %v6837_v15  ;;  %4952 = vmatpush.bf16.msrb.mxu1 %v6834_v52  ;;  %v6789_v52 = vld [vmem:[#allocation11 + $0x88] sm:$0xf] }
 0x61e   :  { %v4438_v14 = vsel %vm4437_vm11, %v7909_v50, %v4434_v6  ;;  %v4462_v34 = vsub.f32 1.0, %v4461_v5  ;;  %7920 = vtanh.f32 %v11361_v51  ;;  %v6813_v6 = vld [vmem:[#allocation11 + $0xc0] sm:$0xf]  ;;  %v7335_v5 = vld [vmem:[#allocation11 + $0xc4] sm:$0xf] }
 0x61f   :  { %v4449_v23 = vadd.f32 %v7913_v48, %v4448_v10  ;;  %v4443_v60 = vsel %vm4440_vm13, %v4442_v1, %v4438_v14  ;;  %v4423_v63 = vsel %vm4422_vm3, %v11344_v39, %v4419_v35  ;;  %v6842_v10 = vor.u32 %v7340_v12, %v6839_v44  ;;  %4966 = vmatpush.bf16.msrb.mxu2 %v6838_v22  ;;  %v6797_v35 = vld [vmem:[#allocation11 + $0xa0] sm:$0xf]  ;;  %v7330_v22 = vld [vmem:[#allocation11 + $0x94] sm:$0xf0]  ;;  %v7328_v44 = vld [vmem:[#allocation11 + $0x8c] sm:$0xf] }
 0x620   :  { %v4480_v17 = vmul.f32 %v7919_v43, %v4443_v60  ;;  %v4463_v11 = vmul.f32 %v7917_v28, %v4462_v34  ;;  %v6815_v43 = vld [vmem:[#allocation11 + $0xd0] sm:$0xf0]  ;;  %v6821_v34 = vld [vmem:[#allocation11 + $0xc8] sm:$0xf]  ;;  %v7338_v60 = vld [vmem:[#allocation11 + $0xd4] sm:$0xf0] }
 0x621   :  { %v4453_v26 = vsel %vm4452_vm14, %v7913_v48, %v4449_v23  ;;  %v7341_v48 = vld [vmem:[#allocation11 + $0xec] sm:$0xf0]  ;;  %4980 = vmatpush.bf16.msrb.mxu3 %v6842_v10  ;;  %v6814_v23 = vor.u32 %v7337_v21, %v6813_v6  ;;  %v6822_v41 = vor.u32 %v7338_v60, %v6821_v34  ;;  %v7323_v21 = vld [vmem:[#allocation11 + $0x64] sm:$0xf]  ;;  %v7326_v60 = vld [vmem:[#allocation11 + $0x74] sm:$0xf0] }
 0x622   :  { %v4458_v7 = vsel %vm4455_vm15, %v4457_v62, %v4453_v26  ;;  %v4464_v32 = vadd.f32 %v7917_v28, %v4463_v11  ;;  %v6830_v20 = vor.u32 %v7341_v48, %v6829_v2  ;;  %v6818_v62 = vor.u32 %v7335_v5, %v6815_v43  ;;  %v7336_v26 = vld [vmem:[#allocation11 + $0xcc] sm:$0xf]  ;;  %v6823_v11 = vld [vmem:[#allocation11 + $0xd8] sm:$0xf0]  ;;  %v7325_v6 = vld [vmem:[#allocation11 + $0x6c] sm:$0xf0] }
 0x623   :  { %v4478_v36 = vmul.f32 %v4458_v7, %v11070_v16  ;;  %v4424_v16 = vand.u32 2147483647, %v11311_v40  ;;  %4967 = vmatpush.bf16.msrb.mxu2 %v6822_v41 }
 0x624   :  { %v4468_v45 = vsel %vm4467_vm5, %v7917_v28, %v4464_v32  ;;  %v7921_v19 = vpop.eup %7920  ;;  %4938 = vmatpush.bf16.msrb.mxu0 %v6830_v20  ;;  %4953 = vmatpush.bf16.msrb.mxu1 %v6818_v62  ;;  %v7333_v32 = vld [vmem:[#allocation11 + $0xac] sm:$0xf0] }
 0x625   :  { %v11367_v0 = vadd.f32 %v4480_v17, %v4478_v36  ;;  %vm4425_vm6 = vcmp.eq.f32.partialorder %v4424_v16, 8.507059e+37  ;;  %v4473_v38 = vsel %vm4470_vm7, %v4472_v29, %v4468_v45  ;;  %v6826_v36 = vor.u32 %v7336_v26, %v6823_v11  ;;  %v6799_v45 = vld [vmem:[#allocation11 + $0xb0] sm:$0xf0]  ;;  %v7324_v26 = vld [vmem:[#allocation11 + $0x6c] sm:$0xf] }
 0x626   :  { %v4428_v47 = vsel %vm4425_vm6, %v4427_v25, %v4423_v63  ;;  %v6798_v63 = vor.u32 %v7333_v32, %v6797_v35  ;;  %v7334_v25 = vld [vmem:[#allocation11 + $0xb4] sm:$0xf0] }
 0x627   :  { %7922 = vtanh.f32 %v11367_v0  ;;  %v4485_v50 = vmul.f32 %v7921_v19, %v4428_v47  ;;  %v6805_v19 = vld [vmem:[#allocation11 + $0xa8] sm:$0xf]  ;;  %4981 = vmatpush.bf16.msrb.mxu3 %v6826_v36  ;;  %v6775_v36 = vld [vmem:[#allocation11 + $0x78] sm:$0xf0] }
 0x628   :  { %4939 = vmatpush.bf16.msrb.mxu0 %v6814_v23 }
 0x62c   :  { %4940 = vmatpush.bf16.msrb.mxu0 %v6798_v63 }
 0x62d   :  { %v7923_v30 = vpop.eup %7922 }
 0x62e   :  { %v4486_v46 = vmul.f32 %v7923_v30, %v4473_v38  ;;  %v6802_v38 = vor.u32 %v7331_v42, %v6799_v45 }
 0x630   :  { %v4544_v54 = vpack.c.bf16 %v4486_v46, %v4485_v50  ;;  %v6806_v50 = vor.u32 %v7334_v25, %v6805_v19  ;;  %v7332_v46 = vld [vmem:[#allocation11 + $0xac] sm:$0xf]  ;;  %4954 = vmatpush.bf16.msrb.mxu1 %v6802_v38 }
 0x632   :  { %4553 = vmatmul.bf16.vlgmr.msra.gmra.mxu0 %v4544_v54  ;;  %4567 = vmatmul.bf16.vlgmr.msra.gmra.mxu1 %v4544_v54 }
 0x633   :  { %4581 = vmatmul.bf16.vlgmr.msra.gmra.mxu2 %v4544_v54  ;;  %4595 = vmatmul.bf16.vlgmr.msra.gmra.mxu3 %v4544_v54  ;;  %v6807_v54 = vld [vmem:[#allocation11 + $0xb8] sm:$0xf0] }
 0x634   :  { %4968 = vmatpush.bf16.msrb.mxu2 %v6806_v50 }
 0x68d   :  { %v4497_v40 = vpop.f32.mrf.mxu0  ;;  %v4511_v49 = vpop.f32.mrf.mxu1 }
 0x68e   :  { %v4498_v53 = vadd.f32 %v4497_v40, %v12414_v27  ;;  %v4512_v56 = vadd.f32 %v4511_v49, %v12415_v9 }
 0x694   :  { %v4525_v33 = vpop.f32.mrf.mxu2  ;;  %v11378_v24 = vpop.f32.mrf.mxu3 }
 0x695   :  { %v4499_v39 = vpop.f32.mrf.mxu0  ;;  %v4513_v18 = vpop.f32.mrf.mxu1  ;;  %v4526_v7 = vadd.f32 %v4525_v33, %v12419_v8  ;;  %v4540_v5 = vadd.f32 %v11378_v24, %v12426_v4  ;;  %v6778_v24 = vor.u32 %v7324_v26, %v6775_v36  ;;  %v7315_v26 = vld [vmem:[#allocation11 + $0x24] sm:$0xf] }
 0x696   :  { %v4500_v37 = vadd.f32 %v4499_v39, %v12414_v27  ;;  %v4514_v16 = vadd.f32 %v4513_v18, %v12415_v9  ;;  %v6810_v27 = vor.u32 %v7332_v46, %v6807_v54  ;;  %v6781_v9 = vld [vmem:[#allocation11 + $0x80] sm:$0xf]  ;;  %v7329_v39 = vld [vmem:[#allocation11 + $0x8c] sm:$0xf0] }
 0x697   :  { %v6782_v48 = vor.u32 %v7329_v39, %v6781_v9 }
 0x698   :  { %4982 = vmatpush.bf16.msrb.mxu3 %v6810_v27 }
 0x699   :  { %4941 = vmatpush.bf16.msrb.mxu0 %v6782_v48 }
 0x69c   :  { %v11382_v61 = vpop.f32.mrf.mxu2  ;;  %v11384_v17 = vpop.f32.mrf.mxu3 }
 0x69d   :  { %v4542_v63 = vadd.f32 %v11384_v17, %v12426_v4  ;;  %v6749_v4 = vld [vmem:[#allocation11 + $0x40] sm:$0xf]  ;;  %v7321_v17 = vld [vmem:[#allocation11 + $0x4c] sm:$0xf0] }
 0x69e   :  { %v6750_v48 = vor.u32 %v7321_v17, %v6749_v4 }
 0x6af   :  { %v4554_v55 = vpop.f32.mrf.mxu0  ;;  %v4568_v59 = vpop.f32.mrf.mxu1 }
 0x6b0   :  { %v4601_v28 = vadd.f32 %v4554_v55, %v4498_v53  ;;  %v4602_v58 = vadd.f32 %v4568_v59, %v4512_v56  ;;  %v6786_v55 = vor.u32 %v7327_v13, %v6783_v3  ;;  %v4528_v59 = vadd.f32 %v11382_v61, %v12419_v8  ;;  %v6767_v8 = vld [vmem:[#allocation11 + $0x70] sm:$0xf0]  ;;  %v6773_v61 = vld [vmem:[#allocation11 + $0x68] sm:$0xf] }
 0x6b1   :  { %v6770_v34 = vor.u32 %v7323_v21, %v6767_v8  ;;  %v7320_v21 = vld [vmem:[#allocation11 + $0x4c] sm:$0xf] }
 0x6b2   :  { %v6709_v1 = vmul.f32 -1.442695, %v4601_v28  ;;  %v6710_v14 = vmul.f32 -1.442695, %v4602_v58  ;;  %4955 = vmatpush.bf16.msrb.mxu1 %v6786_v55  ;;  %v6791_v28 = vld [vmem:[#allocation11 + $0x98] sm:$0xf0] }
 0x6b3   :  { %v6765_v58 = vld [vmem:[#allocation11 + $0x60] sm:$0xf]  ;;  %v6794_v43 = vor.u32 %v7328_v44, %v6791_v28  ;;  %v7319_v28 = vld [vmem:[#allocation11 + $0x44] sm:$0xf] }
 0x6b4   :  { %7924 = vpow2.f32 %v6709_v1  ;;  %v6790_v1 = vor.u32 %v7330_v22, %v6789_v52  ;;  %v6766_v62 = vor.u32 %v7325_v6, %v6765_v58  ;;  %v6751_v58 = vld [vmem:[#allocation11 + $0x50] sm:$0xf0]  ;;  %v7322_v6 = vld [vmem:[#allocation11 + $0x54] sm:$0xf0] }
 0x6b5   :  { %7926 = vpow2.f32 %v6710_v14  ;;  %4983 = vmatpush.bf16.msrb.mxu3 %v6794_v43 }
 0x6b6   :  { %v4582_v31 = vpop.f32.mrf.mxu2  ;;  %v4596_v57 = vpop.f32.mrf.mxu3  ;;  %4969 = vmatpush.bf16.msrb.mxu2 %v6790_v1  ;;  %4942 = vmatpush.bf16.msrb.mxu0 %v6766_v62 }
 0x6b7   :  { %v4603_v29 = vadd.f32 %v4582_v31, %v4526_v7  ;;  %v4556_v30 = vpop.f32.mrf.mxu0  ;;  %v4570_v47 = vpop.f32.mrf.mxu1  ;;  %v6774_v7 = vor.u32 %v7326_v60, %v6773_v61  ;;  %v4604_v32 = vadd.f32 %v4596_v57, %v4540_v5  ;;  %4956 = vmatpush.bf16.msrb.mxu1 %v6770_v34  ;;  %v6759_v5 = vld [vmem:[#allocation11 + $0x58] sm:$0xf0] }
 0x6b8   :  { %v4605_v40 = vadd.f32 %v4556_v30, %v4500_v37  ;;  %v4606_v49 = vadd.f32 %v4570_v47, %v4514_v16 }
 0x6b9   :  { %v6711_v33 = vmul.f32 -1.442695, %v4603_v29  ;;  %4984 = vmatpush.bf16.msrb.mxu3 %v6778_v24 }
 0x6ba   :  { %v7925_v18 = vpop.eup %7924  ;;  %v6712_v2 = vmul.f32 -1.442695, %v4605_v40  ;;  %v6713_v20 = vmul.f32 -1.442695, %v4606_v49  ;;  %4970 = vmatpush.bf16.msrb.mxu2 %v6774_v7  ;;  %4943 = vmatpush.bf16.msrb.mxu0 %v6750_v48  ;;  %v7314_v48 = vld [vmem:[#allocation11 + $0x14] sm:$0xf0] }
 0x6bb   :  { %v7927_v53 = vpop.eup %7926  ;;  %v11389_v56 = vadd.f32 1.0, %v7925_v18  ;;  %7928 = vpow2.f32 %v6711_v33 }
 0x6bc   :  { %v11391_v15 = vadd.f32 1.0, %v7927_v53  ;;  %7930 = vpow2.f32 %v6712_v2 }
 0x6bd   :  { %7932 = vrcp.f32 %v11389_v56  ;;  %v4642_v19 = vand.u32 2147483647, %v11389_v56  ;;  %v4644_v25 = vand.u32 2147483648, %v11389_v56  ;;  %vm4638_vm8 = vweird.f32 %v11389_v56 }
 0x6be   :  { %7934 = vrcp.f32 %v11391_v15  ;;  %v4584_v12 = vpop.f32.mrf.mxu2  ;;  %v4657_v30 = vand.u32 2147483647, %v11391_v15  ;;  %v4598_v38 = vpop.f32.mrf.mxu3  ;;  %v4659_v46 = vand.u32 2147483648, %v11391_v15  ;;  %vm4653_vm9 = vweird.f32 %v11391_v15 }
 0x6bf   :  { %7936 = vpow2.f32 %v6713_v20  ;;  %v4607_v10 = vadd.f32 %v4584_v12, %v4528_v59  ;;  %vm11418_vm12 = vcmp.eq.f32.partialorder %v4642_v19, 8.507059e+37  ;;  %v4608_v33 = vadd.f32 %v4598_v38, %v4542_v63  ;;  %v7316_v63 = vld [vmem:[#allocation11 + $0x2c] sm:$0xf]  ;;  %v6743_v38 = vld [vmem:[#allocation11 + $0x38] sm:$0xf0] }
 0x6c0   :  { %v4660_v13 = vor.u32 1.1754944e-38, %v4659_v46  ;;  %v4645_v53 = vor.u32 1.1754944e-38, %v4644_v25  ;;  %vm11429_vm14 = vcmp.eq.f32.partialorder %v4657_v30, 8.507059e+37  ;;  %v6754_v19 = vor.u32 %v7319_v28, %v6751_v58  ;;  %v7313_v46 = vld [vmem:[#allocation11 + $0xc] sm:$0xf0] }
 0x6c1   :  { %v7929_v14 = vpop.eup %7928  ;;  %v6714_v23 = vmul.f32 -1.442695, %v4607_v10  ;;  %v6757_v10 = vld [vmem:[#allocation11 + $0x48] sm:$0xf] }
 0x6c2   :  { %v7931_v41 = vpop.eup %7930  ;;  %v11399_v11 = vadd.f32 1.0, %v7929_v14  ;;  %v6733_v14 = vld [vmem:[#allocation11 + $0x20] sm:$0xf]  ;;  %v6758_v25 = vor.u32 %v7322_v6, %v6757_v10  ;;  %4957 = vmatpush.bf16.msrb.mxu1 %v6754_v19 }
 0x6c3   :  { %v7933_v35 = vpop.eup %7932  ;;  %v11401_v42 = vadd.f32 1.0, %v7931_v41  ;;  %7938 = vpow2.f32 %v6714_v23  ;;  %v7317_v23 = vld [vmem:[#allocation11 + $0x2c] sm:$0xf0] }
 0x6c4   :  { %v7935_v37 = vpop.eup %7934  ;;  %v4634_v16 = vmul.f32 %v7933_v35, %v11389_v56  ;;  %7940 = vrcp.f32 %v11399_v11  ;;  %vm4639_vm10 = vweird.f32 %v7933_v35  ;;  %v6734_v30 = vor.u32 %v7317_v23, %v6733_v14  ;;  %4971 = vmatpush.bf16.msrb.mxu2 %v6758_v25 }
 0x6c5   :  { %v7937_v31 = vpop.eup %7936  ;;  %v4649_v45 = vmul.f32 %v7935_v37, %v11391_v15  ;;  %7942 = vrcp.f32 %v11401_v42  ;;  %vm4654_vm11 = vweird.f32 %v7935_v37  ;;  %v4687_v2 = vand.u32 2147483647, %v11401_v42  ;;  %vm4640_vm13 = vmor %vm4638_vm8, %vm4639_vm10 }
 0x6c6   :  { %v4635_v29 = vsub.f32 1.0, %v4634_v16  ;;  %v11412_v47 = vadd.f32 1.0, %v7937_v31  ;;  %7944 = vtanh.f32 %v4604_v32  ;;  %vm11437_vm15 = vmor %vm4653_vm9, %vm4654_vm11  ;;  %v4689_v34 = vand.u32 2147483648, %v11401_v42  ;;  %v6741_v32 = vld [vmem:[#allocation11 + $0x28] sm:$0xf]  ;;  %4944 = vmatpush.bf16.msrb.mxu0 %v6734_v30 }
 0x6c7   :  { %v4650_v50 = vsub.f32 1.0, %v4649_v45  ;;  %vm11457_vm0 = vcmp.eq.f32.partialorder %v4687_v2, 8.507059e+37  ;;  %vm4683_vm1 = vweird.f32 %v11401_v42  ;;  %v7318_v31 = vld [vmem:[#allocation11 + $0x34] sm:$0xf0]  ;;  %v6725_v2 = vld [vmem:[#allocation11 + $0x8] sm:$0xf]  ;;  %vm4668_vm10 = vweird.f32 %v11399_v11 }
 0x6c8   :  { %v4636_v54 = vmul.f32 %v7933_v35, %v4635_v29  ;;  %7946 = vrcp.f32 %v11412_v47  ;;  %v4704_v52 = vand.u32 2147483648, %v11412_v47  ;;  %v4702_v60 = vand.u32 2147483647, %v11412_v47  ;;  %v6973_v30 = vld [vmem:[#allocation14 + $0xf8] sm:$0xf0] }
 0x6c9   :  { %v7939_v40 = vpop.eup %7938  ;;  %v4651_v49 = vmul.f32 %v7935_v37, %v4650_v50  ;;  %v6762_v29 = vor.u32 %v7320_v21, %v6759_v5  ;;  %v6717_v50 = vld [vmem:[#allocation11] sm:$0xf]  ;;  %v4690_v17 = vor.u32 1.1754944e-38, %v4689_v34  ;;  %vm4698_vm4 = vweird.f32 %v11412_v47 }
 0x6ca   :  { %v11422_v9 = vpop.eup %7940  ;;  %v4637_v39 = vadd.f32 %v7933_v35, %v4636_v54  ;;  %v11424_v18 = vadd.f32 1.0, %v7939_v40  ;;  %v4705_v36 = vor.u32 1.1754944e-38, %v4704_v52  ;;  %v7311_v54 = vld [vmem:[#allocation11 + $0x4] sm:$0xf]  ;;  %v6718_v3 = vor.u32 %v7313_v46, %v6717_v50  ;;  %v7312_v52 = vld [vmem:[#allocation11 + $0xc] sm:$0xf] }
 0x6cb   :  { %v4652_v20 = vadd.f32 %v7935_v37, %v4651_v49  ;;  %v11433_v57 = vpop.eup %7942  ;;  %v11443_v59 = vmul.f32 %v11422_v9, %v11399_v11  ;;  %4985 = vmatpush.bf16.msrb.mxu3 %v6762_v29  ;;  %vm4703_vm7 = vcmp.eq.f32.partialorder %v4702_v60, 8.507059e+37  ;;  %vm4669_vm8 = vweird.f32 %v11422_v9  ;;  %v7372_v29 = vld [vmem:[#allocation14 + $0xec] sm:$0xf] }
 0x6cc   :  { %v4641_v56 = vsel %vm4640_vm13, %v7933_v35, %v4637_v39  ;;  %7948 = vrcp.f32 %v11424_v18  ;;  %v7945_v22 = vpop.eup %7944  ;;  %v4679_v44 = vmul.f32 %v11433_v57, %v11401_v42  ;;  %v6735_v35 = vld [vmem:[#allocation11 + $0x30] sm:$0xf0]  ;;  %vm4684_vm2 = vweird.f32 %v11433_v57  ;;  %v6727_v42 = vld [vmem:[#allocation11 + $0x18] sm:$0xf0]  ;;  %4945 = vmatpush.bf16.msrb.mxu0 %v6718_v3  ;;  %vm4670_vm11 = vmor %vm4668_vm10, %vm4669_vm8 }
 0x6cd   :  { %v4646_v12 = vsel %vm11418_vm12, %v4645_v53, %v4641_v56  ;;  %v4656_v15 = vsel %vm11437_vm15, %v7935_v37, %v4652_v20  ;;  %7950 = vtanh.f32 %v4608_v33  ;;  %v4665_v41 = vsub.f32 1.0, %v11443_v59  ;;  %v6719_v39 = vld [vmem:[#allocation11 + $0x10] sm:$0xf0]  ;;  %vm4685_vm5 = vmor %vm4683_vm1, %vm4684_vm2 }
 0x6ce   :  { %v11453_v1 = vpop.eup %7946  ;;  %v4661_v8 = vsel %vm11429_vm14, %v4660_v13, %v4656_v15  ;;  %v4680_v43 = vsub.f32 1.0, %v4679_v44  ;;  %v4727_v7 = vmul.f32 %v7945_v22, %v4646_v12  ;;  %v6738_v27 = vor.u32 %v7315_v26, %v6735_v35 }
 0x6cf   :  { %v4694_v62 = vmul.f32 %v11453_v1, %v11412_v47  ;;  %v4725_v24 = vmul.f32 %v4661_v8, %v11361_v51  ;;  %vm4699_vm3 = vweird.f32 %v11453_v1  ;;  %v6742_v33 = vor.u32 %v7318_v31, %v6741_v32  ;;  %v6963_v32 = vld [vmem:[#allocation14 + $0xe0] sm:$0xf]  ;;  %v6965_v31 = vld [vmem:[#allocation14 + $0xf0] sm:$0xf0] }
 0x6d0   :  { %v4681_v16 = vmul.f32 %v11433_v57, %v4680_v43  ;;  %v6746_v20 = vor.u32 %v7316_v63, %v6743_v38  ;;  %v4666_v55 = vmul.f32 %v11422_v9, %v4665_v41  ;;  %vm4700_vm6 = vmor %vm4698_vm4, %vm4699_vm3  ;;  %v6722_v15 = vor.u32 %v7311_v54, %v6719_v39  ;;  %4958 = vmatpush.bf16.msrb.mxu1 %v6738_v27  ;;  %v6971_v63 = vld [vmem:[#allocation14 + $0xe8] sm:$0xf]  ;;  %v7369_v54 = vld [vmem:[#allocation14 + $0xcc] sm:$0xf0] }
 0x6d1   :  { %v4695_v37 = vsub.f32 1.0, %v4694_v62  ;;  %v4729_v59 = vadd.f32 %v4727_v7, %v4725_v24  ;;  %v6726_v44 = vor.u32 %v7314_v48, %v6725_v2  ;;  %4972 = vmatpush.bf16.msrb.mxu2 %v6742_v33  ;;  %v4672_v8 = vand.u32 2147483647, %v11399_v11  ;;  %v7373_v24 = vld [vmem:[#allocation14 + $0xec] sm:$0xf0] }
 0x6d2   :  { %v11470_v45 = vpop.eup %7948  ;;  %v4682_v49 = vadd.f32 %v11433_v57, %v4681_v16  ;;  %4986 = vmatpush.bf16.msrb.mxu3 %v6746_v20  ;;  %v4667_v21 = vadd.f32 %v11422_v9, %v4666_v55  ;;  %vm4713_vm12 = vweird.f32 %v11424_v18  ;;  %v4717_v61 = vand.u32 2147483647, %v11424_v18  ;;  %v6949_v27 = vld [vmem:[#allocation14 + $0xd0] sm:$0xf0]  ;;  %v6955_v33 = vld [vmem:[#allocation14 + $0xc8] sm:$0xf] }
 0x6d3   :  { %v4696_v4 = vmul.f32 %v11453_v1, %v4695_v37  ;;  %v4709_v51 = vmul.f32 %v11470_v45, %v11424_v18  ;;  %v7951_v40 = vpop.eup %7950  ;;  %7952 = vtanh.f32 %v4729_v59  ;;  %vm4714_vm9 = vweird.f32 %v11470_v45  ;;  %v7371_v37 = vld [vmem:[#allocation14 + $0xe4] sm:$0xf]  ;;  %v7370_v39 = vld [vmem:[#allocation14 + $0xd4] sm:$0xf0]  ;;  %v7368_v20 = vld [vmem:[#allocation14 + $0xcc] sm:$0xf] }
 0x6d4   :  { %v4686_v56 = vsel %vm4685_vm5, %v11433_v57, %v4682_v49  ;;  %v6730_v57 = vor.u32 %v7312_v52, %v6727_v42  ;;  %4959 = vmatpush.bf16.msrb.mxu1 %v6722_v15  ;;  %vm4715_vm13 = vmor %vm4713_vm12, %vm4714_vm9  ;;  %v4671_v14 = vsel %vm4670_vm11, %v11422_v9, %v4667_v21  ;;  %vm4673_vm14 = vcmp.eq.f32.partialorder %v4672_v8, 8.507059e+37  ;;  %v6957_v55 = vld [vmem:[#allocation14 + $0xd8] sm:$0xf0]  ;;  %v7365_v52 = vld [vmem:[#allocation14 + $0xac] sm:$0xf0] }
 0x6d5   :  { %v4710_v13 = vsub.f32 1.0, %v4709_v51  ;;  %v4697_v53 = vadd.f32 %v11453_v1, %v4696_v4  ;;  %v4691_v22 = vsel %vm11457_vm0, %v4690_v17, %v4686_v56  ;;  %4973 = vmatpush.bf16.msrb.mxu2 %v6726_v44  ;;  %vm4718_vm15 = vcmp.eq.f32.partialorder %v4717_v61, 8.507059e+37  ;;  %v6947_v17 = vld [vmem:[#allocation14 + $0xc0] sm:$0xf]  ;;  %v7363_v42 = vld [vmem:[#allocation14 + $0xa4] sm:$0xf] }
 0x6d6   :  { %v4728_v10 = vmul.f32 %v7951_v40, %v4691_v22  ;;  %4987 = vmatpush.bf16.msrb.mxu3 %v6730_v57  ;;  %v6964_v16 = vor.u32 %v7373_v24, %v6963_v32  ;;  %v6968_v19 = vor.u32 %v7371_v37, %v6965_v31  ;;  %v6976_v46 = vor.u32 %v7372_v29, %v6973_v30  ;;  %v7367_v40 = vld [vmem:[#allocation14 + $0xc4] sm:$0xf]  ;;  %v6931_v56 = vld [vmem:[#allocation14 + $0xa0] sm:$0xf]  ;;  %v6939_v15 = vld [vmem:[#allocation14 + $0xa8] sm:$0xf] }
 0x6d7   :  { %v4701_v12 = vsel %vm4700_vm6, %v11453_v1, %v4697_v53  ;;  %v4711_v28 = vmul.f32 %v11470_v45, %v4710_v13  ;;  %v4674_v1 = vand.u32 2147483648, %v11399_v11  ;;  %v6948_v49 = vor.u32 %v7369_v54, %v6947_v17  ;;  %v7366_v44 = vld [vmem:[#allocation14 + $0xb4] sm:$0xf0]  ;;  %v6941_v57 = vld [vmem:[#allocation14 + $0xb8] sm:$0xf0] }
 0x6d8   :  { %v4706_v58 = vsel %vm4703_vm7, %v4705_v36, %v4701_v12  ;;  %5323 = vmatpush.bf16.msra.mxu0 %v6964_v16  ;;  %5337 = vmatpush.bf16.msra.mxu1 %v6968_v19  ;;  %v6952_v13 = vor.u32 %v7367_v40, %v6949_v27  ;;  %v6956_v53 = vor.u32 %v7370_v39, %v6955_v33  ;;  %v6933_v12 = vld [vmem:[#allocation14 + $0xb0] sm:$0xf0]  ;;  %v6915_v61 = vld [vmem:[#allocation14 + $0x80] sm:$0xf]  ;;  %v6925_v37 = vld [vmem:[#allocation14 + $0x98] sm:$0xf0] }
 0x6d9   :  { %v4726_v47 = vmul.f32 %v4706_v58, %v11367_v0  ;;  %v4712_v5 = vadd.f32 %v11470_v45, %v4711_v28  ;;  %v4719_v0 = vand.u32 2147483648, %v11424_v18  ;;  %v7953_v43 = vpop.eup %7952  ;;  %v4675_v62 = vor.u32 1.1754944e-38, %v4674_v1  ;;  %v11506_v18 = vld [vmem:[#allocation13] sm:$0xf]  ;;  %v7357_v19 = vld [vmem:[#allocation14 + $0x6c] sm:$0xf0] }
 0x6da   :  { %v4770_v9 = vperm.slane %v11506_v18, 0  ;;  %v4771_v35 = vperm.slane %v11506_v18, 1  ;;  %5365 = vmatpush.bf16.msra.mxu3 %v6976_v46  ;;  %v4772_v3 = vperm.slane %v11506_v18, 2  ;;  %v6960_v59 = vor.u32 %v7368_v20, %v6957_v55  ;;  %v7355_v29 = vld [vmem:[#allocation14 + $0x64] sm:$0xf] }
 0x6db   :  { %v4730_v6 = vadd.f32 %v4728_v10, %v4726_v47  ;;  %v4716_v23 = vsel %vm4715_vm13, %v11470_v45, %v4712_v5  ;;  %v4720_v34 = vor.u32 1.1754944e-38, %v4719_v0  ;;  %v4676_v26 = vsel %vm4673_vm14, %v4675_v62, %v4671_v14  ;;  %v7374_v45 = vld [vmem:[#allocation14 + $0xf4] sm:$0xf0]  ;;  %v7364_v47 = vld [vmem:[#allocation14 + $0xac] sm:$0xf] }
 0x6dc   :  { %v4733_v7 = vmul.f32 %v7953_v43, %v4676_v26  ;;  %v6972_v25 = vor.u32 %v7374_v45, %v6971_v63  ;;  %5324 = vmatpush.bf16.msra.mxu0 %v6948_v49  ;;  %5338 = vmatpush.bf16.msra.mxu1 %v6952_v13  ;;  %v6932_v22 = vor.u32 %v7365_v52, %v6931_v56  ;;  %v7361_v14 = vld [vmem:[#allocation14 + $0x8c] sm:$0xf0]  ;;  %v6899_v45 = vld [vmem:[#allocation14 + $0x60] sm:$0xf]  ;;  %v6901_v30 = vld [vmem:[#allocation14 + $0x70] sm:$0xf0] }
 0x6dd   :  { %7954 = vtanh.f32 %v4730_v6  ;;  %v4721_v41 = vsel %vm4718_vm15, %v4720_v34, %v4716_v23  ;;  %v6936_v58 = vor.u32 %v7363_v42, %v6933_v12  ;;  %v6940_v10 = vor.u32 %v7366_v44, %v6939_v15  ;;  %v7359_v23 = vld [vmem:[#allocation14 + $0x84] sm:$0xf]  ;;  %v6917_v34 = vld [vmem:[#allocation14 + $0x90] sm:$0xf0]  ;;  %v6907_v46 = vld [vmem:[#allocation14 + $0x68] sm:$0xf] }
 0x6de   :  { %5351 = vmatpush.bf16.msra.mxu2 %v6972_v25  ;;  %5366 = vmatpush.bf16.msra.mxu3 %v6960_v59  ;;  %v6944_v1 = vor.u32 %v7364_v47, %v6941_v57  ;;  %v6916_v62 = vor.u32 %v7361_v14, %v6915_v61  ;;  %v7356_v17 = vld [vmem:[#allocation14 + $0x6c] sm:$0xf]  ;;  %v6909_v54 = vld [vmem:[#allocation14 + $0x78] sm:$0xf0]  ;;  %v6904_v27 = vor.u32 %v7355_v29, %v6901_v30  ;;  %v7351_v55 = vld [vmem:[#allocation14 + $0x44] sm:$0xf] }
 0x6df   :  { %v6912_v39 = vor.u32 %v7356_v17, %v6909_v54  ;;  %v7349_v29 = vld [vmem:[#allocation14 + $0x2c] sm:$0xf0]  ;;  %v7347_v30 = vld [vmem:[#allocation14 + $0x24] sm:$0xf]  ;;  %v7350_v17 = vld [vmem:[#allocation14 + $0x34] sm:$0xf0] }
 0x6e0   :  { %5325 = vmatpush.bf16.msra.mxu0 %v6932_v22  ;;  %5339 = vmatpush.bf16.msra.mxu1 %v6936_v58  ;;  %v7344_v14 = vld [vmem:[#allocation14 + $0xc] sm:$0xf] }
 0x6e2   :  { %5352 = vmatpush.bf16.msra.mxu2 %v6956_v53  ;;  %5367 = vmatpush.bf16.msra.mxu3 %v6944_v1 }
 0x6e3   :  { %v7955_v60 = vpop.eup %7954 }
 0x6e4   :  { %v4734_v36 = vmul.f32 %v7955_v60, %v4721_v41  ;;  %v6923_v60 = vld [vmem:[#allocation14 + $0x88] sm:$0xf]  ;;  %5326 = vmatpush.bf16.msra.mxu0 %v6916_v62 }
 0x6e6   :  { %v4735_v11 = vpack.c.bf16 %v4734_v36, %v4733_v7  ;;  %5353 = vmatpush.bf16.msra.mxu2 %v6940_v10  ;;  %v6920_v36 = vor.u32 %v7359_v23, %v6917_v34 }
 0x6e8   :  { %4946 = vmatmul.bf16.vlgmr.msrb.gmra.mxu0 %v4735_v11  ;;  %4960 = vmatmul.bf16.vlgmr.msrb.gmra.mxu1 %v4735_v11 }
 0x6e9   :  { %4974 = vmatmul.bf16.vlgmr.msrb.gmra.mxu2 %v4735_v11  ;;  %4988 = vmatmul.bf16.vlgmr.msrb.gmra.mxu3 %v4735_v11  ;;  %v7362_v11 = vld [vmem:[#allocation14 + $0x94] sm:$0xf0] }
 0x6ea   :  { %5340 = vmatpush.bf16.msra.mxu1 %v6920_v36 }
 0x6ee   :  { %5341 = vmatpush.bf16.msra.mxu1 %v6904_v27 }
 0x765   :  { %v4947_v38 = vpop.f32.mrf.mxu0  ;;  %v4961_v50 = vpop.f32.mrf.mxu1 }
 0x766   :  { %v4948_v4 = vadd.f32 %v4947_v38, %v4770_v9  ;;  %v4962_v51 = vadd.f32 %v4961_v50, %v4771_v35  ;;  %v4773_v38 = vperm.slane %v11506_v18, 3  ;;  %v6885_v18 = vld [vmem:[#allocation14 + $0x50] sm:$0xf0] }
 0x767   :  { %v6888_v52 = vor.u32 %v7351_v55, %v6885_v18 }
 0x768   :  { %v6843_v2 = vmul.f32 -1.442695, %v4948_v4  ;;  %v6844_v48 = vmul.f32 -1.442695, %v4962_v51  ;;  %v7358_v4 = vld [vmem:[#allocation14 + $0x74] sm:$0xf0]  ;;  %v6900_v51 = vor.u32 %v7357_v19, %v6899_v45 }
 0x769   :  { %v6908_v33 = vor.u32 %v7358_v4, %v6907_v46  ;;  %5342 = vmatpush.bf16.msra.mxu1 %v6888_v52  ;;  %v6893_v19 = vld [vmem:[#allocation14 + $0x58] sm:$0xf0]  ;;  %v7343_v52 = vld [vmem:[#allocation14 + $0x4] sm:$0xf] }
 0x76a   :  { %7956 = vpow2.f32 %v6843_v2  ;;  %v6883_v2 = vld [vmem:[#allocation14 + $0x40] sm:$0xf]  ;;  %5327 = vmatpush.bf16.msra.mxu0 %v6900_v51  ;;  %v6875_v51 = vld [vmem:[#allocation14 + $0x28] sm:$0xf] }
 0x76b   :  { %7958 = vpow2.f32 %v6844_v48  ;;  %v7353_v48 = vld [vmem:[#allocation14 + $0x4c] sm:$0xf0] }
 0x76c   :  { %v4975_v28 = vpop.f32.mrf.mxu2  ;;  %v4989_v63 = vpop.f32.mrf.mxu3  ;;  %v6884_v20 = vor.u32 %v7353_v48, %v6883_v2 }
 0x76d   :  { %v4976_v6 = vadd.f32 %v4975_v28, %v4772_v3  ;;  %v4949_v21 = vpop.f32.mrf.mxu0  ;;  %v4963_v5 = vpop.f32.mrf.mxu1  ;;  %v4990_v59 = vadd.f32 %v4989_v63, %v4773_v38 }
 0x76e   :  { %v4950_v0 = vadd.f32 %v4949_v21, %v4770_v9  ;;  %v4964_v8 = vadd.f32 %v4963_v5, %v4771_v35  ;;  %v6924_v9 = vor.u32 %v7362_v11, %v6923_v60  ;;  %v7360_v35 = vld [vmem:[#allocation14 + $0x8c] sm:$0xf]  ;;  %5328 = vmatpush.bf16.msra.mxu0 %v6884_v20  ;;  %v6891_v21 = vld [vmem:[#allocation14 + $0x48] sm:$0xf]  ;;  %v7354_v5 = vld [vmem:[#allocation14 + $0x54] sm:$0xf0] }
 0x76f   :  { %v6845_v43 = vmul.f32 -1.442695, %v4976_v6  ;;  %v6928_v31 = vor.u32 %v7360_v35, %v6925_v37  ;;  %v6892_v60 = vor.u32 %v7354_v5, %v6891_v21  ;;  %v6851_v20 = vld [vmem:[#allocation14] sm:$0xf] }
 0x770   :  { %v7957_v26 = vpop.eup %7956  ;;  %v6846_v41 = vmul.f32 -1.442695, %v4950_v0  ;;  %v6847_v7 = vmul.f32 -1.442695, %v4964_v8  ;;  %5354 = vmatpush.bf16.msra.mxu2 %v6924_v9 }
 0x771   :  { %v7959_v32 = vpop.eup %7958  ;;  %v11513_v24 = vadd.f32 1.0, %v7957_v26  ;;  %7960 = vpow2.f32 %v6845_v43  ;;  %5368 = vmatpush.bf16.msra.mxu3 %v6928_v31 }
 0x772   :  { %v11515_v16 = vadd.f32 1.0, %v7959_v32  ;;  %7962 = vpow2.f32 %v6846_v41 }
 0x773   :  { %7964 = vrcp.f32 %v11513_v24  ;;  %v5027_v44 = vand.u32 2147483647, %v11513_v24  ;;  %v5029_v58 = vand.u32 2147483648, %v11513_v24  ;;  %vm5023_vm0 = vweird.f32 %v11513_v24 }
 0x774   :  { %7966 = vrcp.f32 %v11515_v16  ;;  %v4977_v25 = vpop.f32.mrf.mxu2  ;;  %5355 = vmatpush.bf16.msra.mxu2 %v6908_v33  ;;  %v5044_v57 = vand.u32 2147483648, %v11515_v16  ;;  %v4991_v6 = vpop.f32.mrf.mxu3  ;;  %v5042_v0 = vand.u32 2147483647, %v11515_v16  ;;  %vm5038_vm2 = vweird.f32 %v11515_v16  ;;  %v7348_v33 = vld [vmem:[#allocation14 + $0x2c] sm:$0xf] }
 0x775   :  { %7968 = vpow2.f32 %v6847_v7  ;;  %v4978_v50 = vadd.f32 %v4977_v25, %v4772_v3  ;;  %5369 = vmatpush.bf16.msra.mxu3 %v6912_v39  ;;  %vm11548_vm3 = vcmp.eq.f32.partialorder %v5027_v44, 8.507059e+37  ;;  %v4992_v34 = vadd.f32 %v4991_v6, %v4773_v38  ;;  %v6867_v25 = vld [vmem:[#allocation14 + $0x20] sm:$0xf]  ;;  %v6869_v38 = vld [vmem:[#allocation14 + $0x30] sm:$0xf0] }
 0x776   :  { %v5045_v26 = vor.u32 1.1754944e-38, %v5044_v57  ;;  %v5030_v7 = vor.u32 1.1754944e-38, %v5029_v58  ;;  %vm11581_vm7 = vcmp.eq.f32.partialorder %v5042_v0, 8.507059e+37  ;;  %v6876_v44 = vor.u32 %v7350_v17, %v6875_v51  ;;  %v6859_v58 = vld [vmem:[#allocation14 + $0x8] sm:$0xf] }
 0x777   :  { %v7961_v40 = vpop.eup %7960  ;;  %v6848_v49 = vmul.f32 -1.442695, %v4978_v50 }
 0x778   :  { %v7963_v13 = vpop.eup %7962  ;;  %v11522_v53 = vadd.f32 1.0, %v7961_v40  ;;  %5356 = vmatpush.bf16.msra.mxu2 %v6892_v60 }
 0x779   :  { %v11524_v3 = vpop.eup %7964  ;;  %v11526_v56 = vadd.f32 1.0, %v7963_v13  ;;  %7970 = vpow2.f32 %v6848_v49  ;;  %v6877_v13 = vld [vmem:[#allocation14 + $0x38] sm:$0xf0] }
 0x77a   :  { %v11528_v42 = vpop.eup %7966  ;;  %v5019_v22 = vmul.f32 %v11524_v3, %v11513_v24  ;;  %7972 = vrcp.f32 %v11522_v53  ;;  %vm5024_vm1 = vweird.f32 %v11524_v3 }
 0x77b   :  { %v7969_v12 = vpop.eup %7968  ;;  %v5034_v15 = vmul.f32 %v11528_v42, %v11515_v16  ;;  %7974 = vrcp.f32 %v11526_v56  ;;  %vm5039_vm4 = vweird.f32 %v11528_v42  ;;  %vm11560_vm5 = vmor %vm5023_vm0, %vm5024_vm1  ;;  %v5072_v11 = vand.u32 2147483647, %v11526_v56  ;;  %v7352_v16 = vld [vmem:[#allocation14 + $0x4c] sm:$0xf] }
 0x77c   :  { %v5020_v28 = vsub.f32 1.0, %v5019_v22  ;;  %v11538_v10 = vadd.f32 1.0, %v7969_v12  ;;  %7976 = vtanh.f32 %v4990_v59  ;;  %vm11577_vm6 = vmor %vm5038_vm2, %vm5039_vm4  ;;  %vm5068_vm8 = vweird.f32 %v11526_v56  ;;  %v7345_v59 = vld [vmem:[#allocation14 + $0xc] sm:$0xf0]  ;;  %5357 = vmatpush.bf16.msra.mxu2 %v6876_v44 }
 0x77d   :  { %v5035_v47 = vsub.f32 1.0, %v5034_v15  ;;  %vm11599_vm9 = vcmp.eq.f32.partialorder %v5072_v11, 8.507059e+37  ;;  %v5074_v48 = vand.u32 2147483648, %v11526_v56  ;;  %v6896_v22 = vor.u32 %v7352_v16, %v6893_v19  ;;  %v7107_v44 = vld [vmem:[#allocation17 + $0x108] sm:$0xf0] }
 0x77e   :  { %v5021_v1 = vmul.f32 %v11524_v3, %v5020_v28  ;;  %7978 = vrcp.f32 %v11538_v10  ;;  %v5089_v4 = vand.u32 2147483648, %v11538_v10  ;;  %v5087_v27 = vand.u32 2147483647, %v11538_v10  ;;  %v6853_v28 = vld [vmem:[#allocation14 + $0x10] sm:$0xf0] }
 0x77f   :  { %v7971_v8 = vpop.eup %7970  ;;  %v5036_v61 = vmul.f32 %v11528_v42, %v5035_v47  ;;  %vm5083_vm10 = vweird.f32 %v11538_v10  ;;  %v6868_v12 = vor.u32 %v7349_v29, %v6867_v25  ;;  %v6872_v15 = vor.u32 %v7347_v30, %v6869_v38  ;;  %v7346_v47 = vld [vmem:[#allocation14 + $0x14] sm:$0xf0]  ;;  %5370 = vmatpush.bf16.msra.mxu3 %v6896_v22  ;;  %v7408_v22 = vld [vmem:[#allocation17 + $0x104] sm:$0xf0] }
 0x780   :  { %v11553_v23 = vpop.eup %7972  ;;  %v5022_v43 = vadd.f32 %v11524_v3, %v5021_v1  ;;  %v11556_v62 = vadd.f32 1.0, %v7971_v8  ;;  %v5075_v0 = vor.u32 1.1754944e-38, %v5074_v48  ;;  %v6880_v8 = vor.u32 %v7348_v33, %v6877_v13  ;;  %v7420_v33 = vld [vmem:[#allocation17 + $0x164] sm:$0xf0]  ;;  %v7129_v13 = vld [vmem:[#allocation17 + $0x120] sm:$0xf] }
 0x781   :  { %v5037_v36 = vadd.f32 %v11528_v42, %v5036_v61  ;;  %v11566_v32 = vpop.eup %7974  ;;  %v11570_v9 = vmul.f32 %v11553_v23, %v11522_v53  ;;  %5329 = vmatpush.bf16.msra.mxu0 %v6868_v12  ;;  %v6852_v61 = vor.u32 %v7345_v59, %v6851_v20  ;;  %5343 = vmatpush.bf16.msra.mxu1 %v6872_v15  ;;  %vm5088_vm15 = vcmp.eq.f32.partialorder %v5087_v27, 8.507059e+37  ;;  %v7414_v20 = vld [vmem:[#allocation17 + $0x134] sm:$0xf0]  ;;  %v7405_v12 = vld [vmem:[#allocation17 + $0xf4] sm:$0xf] }
 0x782   :  { %v5026_v35 = vsel %vm11560_vm5, %v11524_v3, %v5022_v43  ;;  %7980 = vrcp.f32 %v11556_v62  ;;  %v7977_v31 = vpop.eup %7976  ;;  %v5064_v45 = vmul.f32 %v11566_v32, %v11526_v56  ;;  %vm5069_vm11 = vweird.f32 %v11566_v32  ;;  %v6861_v43 = vld [vmem:[#allocation14 + $0x18] sm:$0xf0] }
 0x783   :  { %v5041_v63 = vsel %vm11577_vm6, %v11528_v42, %v5037_v36  ;;  %v5031_v46 = vsel %vm11548_vm3, %v5030_v7, %v5026_v35  ;;  %7982 = vtanh.f32 %v4992_v34  ;;  %v5050_v39 = vsub.f32 1.0, %v11570_v9  ;;  %vm5070_vm13 = vmor %vm5068_vm8, %vm5069_vm11  ;;  %5371 = vmatpush.bf16.msra.mxu3 %v6880_v8  ;;  %v7421_v8 = vld [vmem:[#allocation17 + $0x16c] sm:$0xf0] }
 0x784   :  { %v11591_v50 = vpop.eup %7978  ;;  %v5065_v54 = vsub.f32 1.0, %v5064_v45  ;;  %v5046_v2 = vsel %vm11581_vm7, %v5045_v26, %v5041_v63  ;;  %v5112_v55 = vmul.f32 %v7977_v31, %v5031_v46  ;;  %v6856_v26 = vor.u32 %v7343_v52, %v6853_v28  ;;  %v11645_v52 = vld [vmem:[#allocation16] sm:$0xf] }
 0x785   :  { %v5079_v40 = vmul.f32 %v11591_v50, %v11538_v10  ;;  %v5110_v57 = vmul.f32 0.0, %v5046_v2  ;;  %vm5084_vm12 = vweird.f32 %v11591_v50  ;;  %v6860_v41 = vor.u32 %v7346_v47, %v6859_v58  ;;  %5330 = vmatpush.bf16.msra.mxu0 %v6852_v61  ;;  %v7155_v2 = vld [vmem:[#allocation17 + $0x168] sm:$0xf0] }
 0x786   :  { %v5066_v3 = vmul.f32 %v11566_v32, %v5065_v54  ;;  %v5051_v7 = vmul.f32 %v11553_v23, %v5050_v39  ;;  %v5090_v36 = vor.u32 1.1754944e-38, %v5089_v4  ;;  %vm5085_vm14 = vmor %vm5083_vm10, %vm5084_vm12  ;;  %v6864_v24 = vor.u32 %v7344_v14, %v6861_v43  ;;  %5344 = vmatpush.bf16.msra.mxu1 %v6856_v26  ;;  %v7418_v43 = vld [vmem:[#allocation17 + $0x15c] sm:$0xf] }
 0x787   :  { %v5080_v18 = vsub.f32 1.0, %v5079_v40  ;;  %v5114_v9 = vadd.f32 %v5112_v55, %v5110_v57  ;;  %5358 = vmatpush.bf16.msra.mxu2 %v6860_v41  ;;  %vm5054_vm0 = vweird.f32 %v11553_v23  ;;  %vm5053_vm2 = vweird.f32 %v11522_v53  ;;  %v7411_v55 = vld [vmem:[#allocation17 + $0x124] sm:$0xf]  ;;  %v7081_v57 = vld [vmem:[#allocation17 + $0xc0] sm:$0xf] }
 0x788   :  { %v11611_v42 = vpop.eup %7980  ;;  %v5067_v1 = vadd.f32 %v11566_v32, %v5066_v3  ;;  %v5052_v45 = vadd.f32 %v11553_v23, %v5051_v7  ;;  %5372 = vmatpush.bf16.msra.mxu3 %v6864_v24  ;;  %v5059_v19 = vand.u32 2147483648, %v11522_v53  ;;  %v5104_v25 = vand.u32 2147483648, %v11556_v62  ;;  %vm5055_vm3 = vmor %vm5053_vm2, %vm5054_vm0  ;;  %v7131_v3 = vld [vmem:[#allocation17 + $0x138] sm:$0xf0]  ;;  %v7057_v7 = vld [vmem:[#allocation17 + $0x90] sm:$0xf] }
 0x789   :  { %v5081_v6 = vmul.f32 %v11591_v50, %v5080_v18  ;;  %v5094_v21 = vmul.f32 %v11611_v42, %v11556_v62  ;;  %v7983_v5 = vpop.eup %7982  ;;  %7984 = vtanh.f32 %v5114_v9  ;;  %vm5099_vm1 = vweird.f32 %v11611_v42  ;;  %v7059_v24 = vld [vmem:[#allocation17 + $0xa8] sm:$0xf0] }
 0x78a   :  { %v5071_v11 = vsel %vm5070_vm13, %v11566_v32, %v5067_v1  ;;  %v5057_v29 = vand.u32 2147483647, %v11522_v53  ;;  %vm5098_vm4 = vweird.f32 %v11556_v62  ;;  %v5102_v30 = vand.u32 2147483647, %v11556_v62  ;;  %v7153_v62 = vld [vmem:[#allocation17 + $0x150] sm:$0xf] }
 0x78b   :  { %v5095_v34 = vsub.f32 1.0, %v5094_v21  ;;  %v5082_v60 = vadd.f32 %v11591_v50, %v5081_v6  ;;  %v5076_v56 = vsel %vm11599_vm9, %v5075_v0, %v5071_v11  ;;  %vm5100_vm5 = vmor %vm5098_vm4, %vm5099_vm1  ;;  %v5056_v38 = vsel %vm5055_vm3, %v11553_v23, %v5052_v45  ;;  %v7417_v23 = vld [vmem:[#allocation17 + $0x154] sm:$0xf]  ;;  %v7402_v6 = vld [vmem:[#allocation17 + $0xd4] sm:$0xf0] }
 0x78c   :  { %v5113_v63 = vmul.f32 %v7983_v5, %v5076_v56  ;;  %v5060_v4 = vor.u32 1.1754944e-38, %v5059_v19  ;;  %v5105_v51 = vor.u32 1.1754944e-38, %v5104_v25  ;;  %vm5058_vm6 = vcmp.eq.f32.partialorder %v5057_v29, 8.507059e+37  ;;  %v7399_v21 = vld [vmem:[#allocation17 + $0xc4] sm:$0xf] }
 0x78d   :  { %v5086_v35 = vsel %vm5085_vm14, %v11591_v50, %v5082_v60  ;;  %v5096_v37 = vmul.f32 %v11611_v42, %v5095_v34  ;;  %vm5103_vm7 = vcmp.eq.f32.partialorder %v5102_v30, 8.507059e+37  ;;  %v7154_v39 = vor.u32 %v7420_v33, %v7153_v62  ;;  %v7083_v1 = vld [vmem:[#allocation17 + $0xd8] sm:$0xf0]  ;;  %v7161_v0 = vld [vmem:[#allocation17 + $0x158] sm:$0xf] }
 0x78e   :  { %v5091_v31 = vsel %vm5088_vm15, %v5090_v36, %v5086_v35  ;;  %v5061_v54 = vsel %vm5058_vm6, %v5060_v4, %v5056_v38  ;;  %v7158_v48 = vor.u32 %v7417_v23, %v7155_v2  ;;  %v7130_v18 = vor.u32 %v7414_v20, %v7129_v13  ;;  %v7163_v34 = vld [vmem:[#allocation17 + $0x170] sm:$0xf0]  ;;  %v7396_v36 = vld [vmem:[#allocation17 + $0xa4] sm:$0xf0]  ;;  %v7139_v45 = vld [vmem:[#allocation17 + $0x140] sm:$0xf0] }
 0x78f   :  { %v5111_v32 = vmul.f32 0.0, %v5091_v31  ;;  %v5097_v16 = vadd.f32 %v11611_v42, %v5096_v37  ;;  %v7985_v46 = vpop.eup %7984  ;;  %5808 = vmatpush.bf16.msrb.mxu0 %v7154_v39  ;;  %v7134_v59 = vor.u32 %v7411_v55, %v7131_v3  ;;  %v7110_v28 = vor.u32 %v7405_v12, %v7107_v44  ;;  %v7393_v11 = vld [vmem:[#allocation17 + $0x94] sm:$0xf]  ;;  %v7137_v37 = vld [vmem:[#allocation17 + $0x128] sm:$0xf] }
 0x790   :  { %v5118_v49 = vmul.f32 %v7985_v46, %v5061_v54  ;;  %5822 = vmatpush.bf16.msrb.mxu1 %v7158_v48  ;;  %v5155_v58 = vperm.slane %v11645_v52, 0  ;;  %v5156_v47 = vperm.slane %v11645_v52, 1  ;;  %v7082_v5 = vor.u32 %v7402_v6, %v7081_v57  ;;  %v7415_v31 = vld [vmem:[#allocation17 + $0x13c] sm:$0xf0]  ;;  %v7390_v38 = vld [vmem:[#allocation17 + $0x74] sm:$0xf0] }
 0x791   :  { %v5115_v10 = vadd.f32 %v5113_v63, %v5111_v32  ;;  %v5101_v50 = vsel %vm5100_vm5, %v11611_v42, %v5097_v16  ;;  %v7105_v42 = vld [vmem:[#allocation17 + $0xf0] sm:$0xf]  ;;  %v7086_v61 = vor.u32 %v7399_v21, %v7083_v1  ;;  %v7162_v14 = vor.u32 %v7421_v8, %v7161_v0  ;;  %v7033_v30 = vld [vmem:[#allocation17 + $0x60] sm:$0xf]  ;;  %v7035_v4 = vld [vmem:[#allocation17 + $0x78] sm:$0xf0] }
 0x792   :  { %v5106_v40 = vsel %vm5103_vm7, %v5105_v51, %v5101_v50  ;;  %v7106_v15 = vor.u32 %v7408_v22, %v7105_v42  ;;  %v7166_v60 = vor.u32 %v7418_v43, %v7163_v34  ;;  %v7058_v35 = vor.u32 %v7396_v36, %v7057_v7  ;;  %v7387_v50 = vld [vmem:[#allocation17 + $0x64] sm:$0xf]  ;;  %v7113_v51 = vld [vmem:[#allocation17 + $0xf8] sm:$0xf]  ;;  %v7009_v2 = vld [vmem:[#allocation17 + $0x30] sm:$0xf] }
 0x793   :  { %7986 = vtanh.f32 %v5115_v10  ;;  %5809 = vmatpush.bf16.msrb.mxu0 %v7130_v18  ;;  %5836 = vmatpush.bf16.msrb.mxu2 %v7162_v14  ;;  %v7062_v63 = vor.u32 %v7393_v11, %v7059_v24  ;;  %v7138_v32 = vor.u32 %v7415_v31, %v7137_v37  ;;  %v7412_v10 = vld [vmem:[#allocation17 + $0x12c] sm:$0xf]  ;;  %v5157_v25 = vperm.slane %v11645_v52, 2  ;;  %v7384_v48 = vld [vmem:[#allocation17 + $0x44] sm:$0xf0] }
 0x794   :  { %5823 = vmatpush.bf16.msrb.mxu1 %v7134_v59  ;;  %5850 = vmatpush.bf16.msrb.mxu3 %v7166_v60  ;;  %v7142_v29 = vor.u32 %v7412_v10, %v7139_v45  ;;  %v7034_v46 = vor.u32 %v7390_v38, %v7033_v30  ;;  %v7038_v54 = vor.u32 %v7387_v50, %v7035_v4  ;;  %v7381_v13 = vld [vmem:[#allocation17 + $0x34] sm:$0xf]  ;;  %v7011_v3 = vld [vmem:[#allocation17 + $0x48] sm:$0xf0]  ;;  %v7089_v59 = vld [vmem:[#allocation17 + $0xc8] sm:$0xf] }
 0x795   :  { %v7010_v18 = vor.u32 %v7384_v48, %v7009_v2  ;;  %v7403_v42 = vld [vmem:[#allocation17 + $0xdc] sm:$0xf0]  ;;  %v7014_v12 = vor.u32 %v7381_v13, %v7011_v3  ;;  %v7400_v44 = vld [vmem:[#allocation17 + $0xcc] sm:$0xf]  ;;  %v7378_v0 = vld [vmem:[#allocation17 + $0x14] sm:$0xf0] }
 0x796   :  { %v7375_v43 = vld [vmem:[#allocation17 + $0x4] sm:$0xf]  ;;  %v6987_v34 = vld [vmem:[#allocation17 + $0x18] sm:$0xf0]  ;;  %v5158_v7 = vperm.slane %v11645_v52, 3 }
 0x797   :  { %5810 = vmatpush.bf16.msrb.mxu0 %v7106_v15  ;;  %5837 = vmatpush.bf16.msrb.mxu2 %v7138_v32  ;;  %v7090_v15 = vor.u32 %v7403_v42, %v7089_v59  ;;  %v7394_v11 = vld [vmem:[#allocation17 + $0x9c] sm:$0xf]  ;;  %v7422_v24 = vld [vmem:[#allocation17 + $0x174] sm:$0xf0]  ;;  %v7419_v45 = vld [vmem:[#allocation17 + $0x164] sm:$0xf] }
 0x798   :  { %5824 = vmatpush.bf16.msrb.mxu1 %v7110_v28  ;;  %5851 = vmatpush.bf16.msrb.mxu3 %v7142_v29  ;;  %v7091_v28 = vld [vmem:[#allocation17 + $0xe0] sm:$0xf0]  ;;  %v7041_v38 = vld [vmem:[#allocation17 + $0x68] sm:$0xf]  ;;  %v7391_v52 = vld [vmem:[#allocation17 + $0x7c] sm:$0xf0] }
 0x799   :  { %v7987_v17 = vpop.eup %7986  ;;  %v7042_v4 = vor.u32 %v7391_v52, %v7041_v38  ;;  %v7388_v48 = vld [vmem:[#allocation17 + $0x6c] sm:$0xf]  ;;  %v7043_v13 = vld [vmem:[#allocation17 + $0x80] sm:$0xf0] }
 0x79a   :  { %v5119_v27 = vmul.f32 %v7987_v17, %v5106_v40  ;;  %v7409_v17 = vld [vmem:[#allocation17 + $0x10c] sm:$0xf0] }
 0x79b   :  { %5811 = vmatpush.bf16.msrb.mxu0 %v7082_v5  ;;  %v7114_v40 = vor.u32 %v7409_v17, %v7113_v51  ;;  %v7094_v5 = vor.u32 %v7400_v44, %v7091_v28  ;;  %v7046_v28 = vor.u32 %v7388_v48, %v7043_v13  ;;  %v7097_v48 = vld [vmem:[#allocation17 + $0xd0] sm:$0xf] }
 0x79c   :  { %v5120_v53 = vpack.c.bf16 %v5119_v27, %v5118_v49  ;;  %5825 = vmatpush.bf16.msrb.mxu1 %v7086_v61  ;;  %v7406_v49 = vld [vmem:[#allocation17 + $0xfc] sm:$0xf]  ;;  %v7115_v27 = vld [vmem:[#allocation17 + $0x110] sm:$0xf0] }
 0x79d   :  { %v7118_v62 = vor.u32 %v7406_v49, %v7115_v27  ;;  %5838 = vmatpush.bf16.msrb.mxu2 %v7114_v40 }
 0x79e   :  { %5331 = vmatmul.bf16.vlgmr.msra.gmra.mxu0 %v5120_v53  ;;  %5345 = vmatmul.bf16.vlgmr.msra.gmra.mxu1 %v5120_v53 }
 0x79f   :  { %5359 = vmatmul.bf16.vlgmr.msra.gmra.mxu2 %v5120_v53  ;;  %5373 = vmatmul.bf16.vlgmr.msra.gmra.mxu3 %v5120_v53 }
 0x7a0   :  { %5812 = vmatpush.bf16.msrb.mxu0 %v7058_v35  ;;  %5826 = vmatpush.bf16.msrb.mxu1 %v7062_v63  ;;  %v7169_v35 = vld [vmem:[#allocation17 + $0x160] sm:$0xf] }
 0x7a1   :  { %5852 = vmatpush.bf16.msrb.mxu3 %v7118_v62  ;;  %5839 = vmatpush.bf16.msrb.mxu2 %v7090_v15  ;;  %v7170_v10 = vor.u32 %v7422_v24, %v7169_v35 }
 0x7a4   :  { %5813 = vmatpush.bf16.msrb.mxu0 %v7034_v46  ;;  %5827 = vmatpush.bf16.msrb.mxu1 %v7038_v54 }
 0x7a5   :  { %5853 = vmatpush.bf16.msrb.mxu3 %v7094_v5 }
 0x7a8   :  { %5814 = vmatpush.bf16.msrb.mxu0 %v7010_v18  ;;  %5828 = vmatpush.bf16.msrb.mxu1 %v7014_v12 }
 0x81b   :  { %v5332_v26 = vpop.f32.mrf.mxu0  ;;  %v5346_v41 = vpop.f32.mrf.mxu1 }
 0x81c   :  { %v5333_v9 = vadd.f32 %v5332_v26, %v5155_v58  ;;  %v5347_v56 = vadd.f32 %v5346_v41, %v5156_v47  ;;  %v7065_v26 = vld [vmem:[#allocation17 + $0x98] sm:$0xf]  ;;  %v7397_v41 = vld [vmem:[#allocation17 + $0xac] sm:$0xf0] }
 0x81d   :  { %v7066_v63 = vor.u32 %v7397_v41, %v7065_v26  ;;  %v7416_v26 = vld [vmem:[#allocation17 + $0x144] sm:$0xf0]  ;;  %v7413_v41 = vld [vmem:[#allocation17 + $0x134] sm:$0xf] }
 0x81e   :  { %v6977_v16 = vmul.f32 -1.442695, %v5333_v9  ;;  %v6978_v19 = vmul.f32 -1.442695, %v5347_v56  ;;  %v7067_v9 = vld [vmem:[#allocation17 + $0xb0] sm:$0xf0]  ;;  %v6990_v56 = vor.u32 %v7375_v43, %v6987_v34 }
 0x81f   :  { %v7070_v32 = vor.u32 %v7394_v11, %v7067_v9  ;;  %5840 = vmatpush.bf16.msrb.mxu2 %v7066_v63  ;;  %v7017_v11 = vld [vmem:[#allocation17 + $0x38] sm:$0xf]  ;;  %v7385_v9 = vld [vmem:[#allocation17 + $0x4c] sm:$0xf0]  ;;  %v7019_v63 = vld [vmem:[#allocation17 + $0x50] sm:$0xf0] }
 0x820   :  { %7988 = vpow2.f32 %v6977_v16  ;;  %v7171_v16 = vld [vmem:[#allocation17 + $0x178] sm:$0xf0]  ;;  %5829 = vmatpush.bf16.msrb.mxu1 %v6990_v56 }
 0x821   :  { %7990 = vpow2.f32 %v6978_v19  ;;  %v7174_v30 = vor.u32 %v7419_v45, %v7171_v16  ;;  %5854 = vmatpush.bf16.msrb.mxu3 %v7070_v32  ;;  %v7382_v56 = vld [vmem:[#allocation17 + $0x3c] sm:$0xf] }
 0x822   :  { %v5360_v53 = vpop.f32.mrf.mxu2  ;;  %v5374_v14 = vpop.f32.mrf.mxu3 }
 0x823   :  { %v5361_v33 = vadd.f32 %v5360_v53, %v5157_v25  ;;  %v5334_v23 = vpop.f32.mrf.mxu0  ;;  %v5348_v39 = vpop.f32.mrf.mxu1  ;;  %v5375_v50 = vadd.f32 %v5374_v14, %v5158_v7  ;;  %5841 = vmatpush.bf16.msrb.mxu2 %v7042_v4 }
 0x824   :  { %v5335_v20 = vadd.f32 %v5334_v23, %v5155_v58  ;;  %v5349_v55 = vadd.f32 %v5348_v39, %v5156_v47  ;;  %v6985_v47 = vld [vmem:[#allocation17] sm:$0xf]  ;;  %5878 = vmatpush.bf16.msra.mxu1 %v7174_v30 }
 0x825   :  { %v6979_v22 = vmul.f32 -1.442695, %v5361_v33  ;;  %v6986_v61 = vor.u32 %v7378_v0, %v6985_v47  ;;  %5855 = vmatpush.bf16.msrb.mxu3 %v7046_v28 }
 0x826   :  { %v7989_v57 = vpop.eup %7988  ;;  %v6980_v6 = vmul.f32 -1.442695, %v5335_v20  ;;  %v6981_v21 = vmul.f32 -1.442695, %v5349_v55 }
 0x827   :  { %v7991_v1 = vpop.eup %7990  ;;  %v11660_v58 = vadd.f32 1.0, %v7989_v57  ;;  %7992 = vpow2.f32 %v6979_v22  ;;  %5815 = vmatpush.bf16.msrb.mxu0 %v6986_v61 }
 0x828   :  { %v11662_v8 = vadd.f32 1.0, %v7991_v1  ;;  %7994 = vpow2.f32 %v6980_v6 }
 0x829   :  { %7996 = vrcp.f32 %v11660_v58  ;;  %v5412_v54 = vand.u32 2147483647, %v11660_v58  ;;  %v5414_v53 = vand.u32 2147483648, %v11660_v58  ;;  %vm5408_vm9 = vweird.f32 %v11660_v58 }
 0x82a   :  { %7998 = vrcp.f32 %v11662_v8  ;;  %v5362_v60 = vpop.f32.mrf.mxu2  ;;  %v5429_v27 = vand.u32 2147483648, %v11662_v8  ;;  %v5427_v33 = vand.u32 2147483647, %v11662_v8  ;;  %vm5423_vm8 = vweird.f32 %v11662_v8  ;;  %v5376_v2 = vpop.f32.mrf.mxu3 }
 0x82b   :  { %8000 = vpow2.f32 %v6981_v21  ;;  %v5363_v36 = vadd.f32 %v5362_v60, %v5157_v25  ;;  %5864 = vmatpush.bf16.msra.mxu0 %v7170_v10  ;;  %vm11685_vm11 = vcmp.eq.f32.partialorder %v5412_v54, 8.507059e+37  ;;  %v5415_v42 = vor.u32 1.1754944e-38, %v5414_v53  ;;  %v7145_v60 = vld [vmem:[#allocation17 + $0x130] sm:$0xf]  ;;  %v7379_v53 = vld [vmem:[#allocation17 + $0x1c] sm:$0xf0] }
 0x82c   :  { %v5430_v59 = vor.u32 1.1754944e-38, %v5429_v27  ;;  %v5377_v44 = vadd.f32 %v5376_v2, %v5158_v7  ;;  %vm11696_vm14 = vcmp.eq.f32.partialorder %v5427_v33, 8.507059e+37  ;;  %v7147_v7 = vld [vmem:[#allocation17 + $0x148] sm:$0xf0]  ;;  %v7018_v54 = vor.u32 %v7385_v9, %v7017_v11  ;;  %v6993_v27 = vld [vmem:[#allocation17 + $0x8] sm:$0xf] }
 0x82d   :  { %v7993_v37 = vpop.eup %7992  ;;  %v6982_v31 = vmul.f32 -1.442695, %v5363_v36  ;;  %v6995_v2 = vld [vmem:[#allocation17 + $0x20] sm:$0xf0] }
 0x82e   :  { %v7995_v19 = vpop.eup %7994  ;;  %v11669_v29 = vadd.f32 1.0, %v7993_v37  ;;  %5842 = vmatpush.bf16.msrb.mxu2 %v7018_v54  ;;  %v7389_v37 = vld [vmem:[#allocation17 + $0x74] sm:$0xf]  ;;  %v7027_v54 = vld [vmem:[#allocation17 + $0x58] sm:$0xf0] }
 0x82f   :  { %v7997_v25 = vpop.eup %7996  ;;  %v11671_v46 = vadd.f32 1.0, %v7995_v19  ;;  %8002 = vpow2.f32 %v6982_v31  ;;  %v7121_v19 = vld [vmem:[#allocation17 + $0x100] sm:$0xf] }
 0x830   :  { %v7999_v51 = vpop.eup %7998  ;;  %v5404_v17 = vmul.f32 %v7997_v25, %v11660_v58  ;;  %8004 = vrcp.f32 %v11669_v29  ;;  %vm5409_vm10 = vweird.f32 %v7997_v25 }
 0x831   :  { %v8001_v40 = vpop.eup %8000  ;;  %v5419_v49 = vmul.f32 %v7999_v51, %v11662_v8  ;;  %8006 = vrcp.f32 %v11671_v46  ;;  %vm5424_vm12 = vweird.f32 %v7999_v51  ;;  %vm5410_vm13 = vmor %vm5408_vm9, %vm5409_vm10  ;;  %v5457_v5 = vand.u32 2147483647, %v11671_v46 }
 0x832   :  { %v5405_v62 = vsub.f32 1.0, %v5404_v17  ;;  %v11681_v23 = vadd.f32 1.0, %v8001_v40  ;;  %8008 = vtanh.f32 %v5375_v50  ;;  %vm5425_vm15 = vmor %vm5423_vm8, %vm5424_vm12  ;;  %v5459_v58 = vand.u32 2147483648, %v11671_v46  ;;  %v7407_v50 = vld [vmem:[#allocation17 + $0x104] sm:$0xf] }
 0x833   :  { %v5420_v39 = vsub.f32 1.0, %v5419_v49  ;;  %vm11720_vm0 = vcmp.eq.f32.partialorder %v5457_v5, 8.507059e+37  ;;  %v7150_v17 = vor.u32 %v7413_v41, %v7147_v7  ;;  %v7022_v40 = vor.u32 %v7382_v56, %v7019_v63  ;;  %v7123_v49 = vld [vmem:[#allocation17 + $0x118] sm:$0xf0] }
 0x834   :  { %v5406_v20 = vmul.f32 %v7997_v25, %v5405_v62  ;;  %8010 = vrcp.f32 %v11681_v23  ;;  %v5474_v21 = vand.u32 2147483648, %v11681_v23  ;;  %v5472_v31 = vand.u32 2147483647, %v11681_v23 }
 0x835   :  { %v8003_v18 = vpop.eup %8002  ;;  %v5421_v3 = vmul.f32 %v7999_v51, %v5420_v39  ;;  %v5460_v16 = vor.u32 1.1754944e-38, %v5459_v58  ;;  %vm5453_vm2 = vweird.f32 %v11671_v46  ;;  %v7376_v39 = vld [vmem:[#allocation17 + $0xc] sm:$0xf]  ;;  %vm5468_vm4 = vweird.f32 %v11681_v23  ;;  %5879 = vmatpush.bf16.msra.mxu1 %v7150_v17  ;;  %5856 = vmatpush.bf16.msrb.mxu3 %v7022_v40  ;;  %v7386_v17 = vld [vmem:[#allocation17 + $0x54] sm:$0xf0] }
 0x836   :  { %v11690_v22 = vpop.eup %8004  ;;  %v5407_v12 = vadd.f32 %v7997_v25, %v5406_v20  ;;  %v11692_v15 = vadd.f32 1.0, %v8003_v18  ;;  %v5475_v45 = vor.u32 1.1754944e-38, %v5474_v21  ;;  %v7126_v28 = vor.u32 %v7407_v50, %v7123_v49 }
 0x837   :  { %v5422_v57 = vadd.f32 %v7999_v51, %v5421_v3  ;;  %v11702_v1 = vpop.eup %8006  ;;  %v5434_v47 = vmul.f32 %v11690_v22, %v11669_v29  ;;  %v7404_v3 = vld [vmem:[#allocation17 + $0xe4] sm:$0xf0]  ;;  %vm5473_vm7 = vcmp.eq.f32.partialorder %v5472_v31, 8.507059e+37  ;;  %v6998_v5 = vor.u32 %v7376_v39, %v6995_v2  ;;  %v7051_v31 = vld [vmem:[#allocation17 + $0x88] sm:$0xf0] }
 0x838   :  { %v5411_v0 = vsel %vm5410_vm13, %v7997_v25, %v5407_v12  ;;  %8012 = vrcp.f32 %v11692_v15  ;;  %v8009_v61 = vpop.eup %8008  ;;  %v5449_v34 = vmul.f32 %v11702_v1, %v11671_v46  ;;  %vm5454_vm1 = vweird.f32 %v11702_v1  ;;  %v7410_v25 = vld [vmem:[#allocation17 + $0x114] sm:$0xf0]  ;;  %v7377_v39 = vld [vmem:[#allocation17 + $0x14] sm:$0xf]  ;;  %v7003_v2 = vld [vmem:[#allocation17 + $0x28] sm:$0xf0] }
 0x839   :  { %v5416_v14 = vsel %vm11685_vm11, %v5415_v42, %v5411_v0  ;;  %v5426_v43 = vsel %vm5425_vm15, %v7999_v51, %v5422_v57  ;;  %8014 = vtanh.f32 %v5377_v44  ;;  %v5435_v32 = vsub.f32 1.0, %v5434_v47  ;;  %v7099_v42 = vld [vmem:[#allocation17 + $0xe8] sm:$0xf0]  ;;  %vm5455_vm5 = vmor %vm5453_vm2, %vm5454_vm1  ;;  %5880 = vmatpush.bf16.msra.mxu1 %v7126_v28  ;;  %5857 = vmatpush.bf16.msrb.mxu3 %v6998_v5 }
 0x83a   :  { %v11714_v36 = vpop.eup %8010  ;;  %v5431_v8 = vsel %vm11696_vm14, %v5430_v59, %v5426_v43  ;;  %v5450_v35 = vsub.f32 1.0, %v5449_v34  ;;  %v5497_v10 = vmul.f32 %v8009_v61, %v5416_v14  ;;  %v7146_v51 = vor.u32 %v7416_v26, %v7145_v60  ;;  %v7401_v59 = vld [vmem:[#allocation17 + $0xd4] sm:$0xf]  ;;  %v7398_v34 = vld [vmem:[#allocation17 + $0xb4] sm:$0xf0] }
 0x83b   :  { %v5464_v24 = vmul.f32 %v11714_v36, %v11681_v23  ;;  %v5495_v30 = vmul.f32 0.0, %v5431_v8  ;;  %vm5469_vm3 = vweird.f32 %v11714_v36  ;;  %v5436_v20 = vmul.f32 %v11690_v22, %v5435_v32  ;;  %v7395_v23 = vld [vmem:[#allocation17 + $0xa4] sm:$0xf]  ;;  %v7075_v26 = vld [vmem:[#allocation17 + $0xb8] sm:$0xf0] }
 0x83c   :  { %v5451_v52 = vmul.f32 %v11702_v1, %v5450_v35  ;;  %5865 = vmatpush.bf16.msra.mxu0 %v7146_v51  ;;  %v7122_v18 = vor.u32 %v7410_v25, %v7121_v19  ;;  %v6994_v57 = vor.u32 %v7379_v53, %v6993_v27  ;;  %vm5470_vm6 = vmor %vm5468_vm4, %vm5469_vm3  ;;  %v7098_v0 = vor.u32 %v7404_v3, %v7097_v48  ;;  %v7049_v35 = vld [vmem:[#allocation17 + $0x70] sm:$0xf]  ;;  %v7025_v25 = vld [vmem:[#allocation17 + $0x40] sm:$0xf] }
 0x83d   :  { %v5465_v38 = vsub.f32 1.0, %v5464_v24  ;;  %v5499_v6 = vadd.f32 %v5497_v10, %v5495_v30  ;;  %v7102_v58 = vor.u32 %v7401_v59, %v7099_v42  ;;  %vm5439_vm8 = vweird.f32 %v11690_v22  ;;  %v7392_v24 = vld [vmem:[#allocation17 + $0x84] sm:$0xf0] }
 0x83e   :  { %v11727_v4 = vpop.eup %8012  ;;  %v5452_v55 = vadd.f32 %v11702_v1, %v5451_v52  ;;  %5843 = vmatpush.bf16.msrb.mxu2 %v6994_v57  ;;  %v5444_v41 = vand.u32 2147483648, %v11669_v29  ;;  %v5437_v7 = vadd.f32 %v11690_v22, %v5436_v20  ;;  %v7078_v56 = vor.u32 %v7395_v23, %v7075_v26 }
 0x83f   :  { %v5466_v62 = vmul.f32 %v11714_v36, %v5465_v38  ;;  %v5479_v33 = vmul.f32 %v11727_v4, %v11692_v15  ;;  %v8015_v13 = vpop.eup %8014  ;;  %8016 = vtanh.f32 %v5499_v6  ;;  %vm5484_vm9 = vweird.f32 %v11727_v4  ;;  %5881 = vmatpush.bf16.msra.mxu1 %v7102_v58 }
 0x840   :  { %v5456_v21 = vsel %vm5455_vm5, %v11702_v1, %v5452_v55  ;;  %5866 = vmatpush.bf16.msra.mxu0 %v7122_v18  ;;  %v7073_v1 = vld [vmem:[#allocation17 + $0xa0] sm:$0xf]  ;;  %vm5438_vm10 = vweird.f32 %v11669_v29  ;;  %v5442_v32 = vand.u32 2147483647, %v11669_v29  ;;  %vm5483_vm12 = vweird.f32 %v11692_v15  ;;  %v5554_v55 = vld [vmem:[%s11897_s11] sm:$0x3f] }
 0x841   :  { %v5480_v12 = vsub.f32 1.0, %v5479_v33  ;;  %v5467_v44 = vadd.f32 %v11714_v36, %v5466_v62  ;;  %v5461_v46 = vsel %vm11720_vm0, %v5460_v16, %v5456_v21  ;;  %v7074_v9 = vor.u32 %v7398_v34, %v7073_v1  ;;  %vm11760_vm11 = vmor %vm5438_vm10, %vm5439_vm8  ;;  %v7001_v62 = vld [vmem:[#allocation17 + $0x10] sm:$0xf]  ;;  %v7380_v33 = vld [vmem:[#allocation17 + $0x24] sm:$0xf0]  ;;  %s8364_s11 = smov [#allocation19]  }
 0x842   :  { %v5498_v43 = vmul.f32 %v8015_v13, %v5461_v46  ;;  %v5487_v10 = vand.u32 2147483647, %v11692_v15  ;;  %vm5485_vm13 = vmor %vm5483_vm12, %vm5484_vm9  ;;  %v7050_v19 = vor.u32 %v7392_v24, %v7049_v35  ;;  %v7054_v30 = vor.u32 %v7389_v37, %v7051_v31  ;;  %s6055_s16 = sshll.u32 %s8364_s11, 4  ;;  %s6056_s16 = int_to_ptr.vmem [resolvable:$true] %s6055_s16 }
 0x843   :  { %v5471_v47 = vsel %vm5470_vm6, %v11714_v36, %v5467_v44  ;;  %v5481_v61 = vmul.f32 %v11727_v4, %v5480_v12  ;;  %v5489_v36 = vand.u32 2147483648, %v11692_v15  ;;  %5882 = vmatpush.bf16.msra.mxu1 %v7078_v56  ;;  %v5445_v52 = vor.u32 1.1754944e-38, %v5444_v41 }
 0x844   :  { %v5476_v14 = vsel %vm5473_vm7, %v5475_v45, %v5471_v47  ;;  %5867 = vmatpush.bf16.msra.mxu0 %v7098_v0  ;;  %v5441_v45 = vsel %vm11760_vm11, %v11690_v22, %v5437_v7  ;;  %vm5443_vm14 = vcmp.eq.f32.partialorder %v5442_v32, 8.507059e+37  ;;  %vm5488_vm15 = vcmp.eq.f32.partialorder %v5487_v10, 8.507059e+37  ;;  %v7383_v22 = vld [vmem:[#allocation17 + $0x44] sm:$0xf] }
 0x845   :  { %v5496_v60 = vmul.f32 0.0, %v5476_v14  ;;  %v5482_v11 = vadd.f32 %v11727_v4, %v5481_v61  ;;  %v8017_v38 = vpop.eup %8016  ;;  %v5490_v29 = vor.u32 1.1754944e-38, %v5489_v36  ;;  %v5446_v50 = vsel %vm5443_vm14, %v5445_v52, %v5441_v45 }
 0x846   :  { %v5503_v40 = vmul.f32 %v8017_v38, %v5446_v50  ;;  %v7026_v27 = vor.u32 %v7386_v17, %v7025_v25  ;;  %v7030_v53 = vor.u32 %v7383_v22, %v7027_v54  ;;  %v7002_v48 = vor.u32 %v7380_v33, %v7001_v62 }
 0x847   :  { %v5500_v8 = vadd.f32 %v5498_v43, %v5496_v60  ;;  %v5486_v16 = vsel %vm5485_vm13, %v11727_v4, %v5482_v11  ;;  %5883 = vmatpush.bf16.msra.mxu1 %v7054_v30  ;;  %v7006_v13 = vor.u32 %v7377_v39, %v7003_v2  ;;  %v5892_v20 = vlaneseq }
 0x848   :  { %5868 = vmatpush.bf16.msra.mxu0 %v7074_v9  ;;  %v5491_v51 = vsel %vm5488_vm15, %v5490_v29, %v5486_v16  ;;  %v5556_v3 = vperm.slane %v5554_v55, 0  ;;  %v5557_v59 = vperm.slane %v5554_v55, 1  ;;  %v5558_v21 = vperm.slane %v5554_v55, 2 }
 0x849   :  { %8018 = vtanh.f32 %v5500_v8  ;;  %v11776_v18 = vand.u32 127, %v5892_v20  ;;  %v5559_v5 = vperm.slane %v5554_v55, 3  ;;  %v5560_v9 = vperm.slane %v5554_v55, 4 }
 0x84a   :  { %v5561_v35 = vperm.slane %v5554_v55, 5 }
 0x84b   :  { %5884 = vmatpush.bf16.msra.mxu1 %v7030_v53  ;;  %vm5894_vm0 = vcmp.lt.s32.totalorder %v11776_v18, 5 }
 0x84c   :  { %5869 = vmatpush.bf16.msra.mxu0 %v7050_v19 }
 0x84f   :  { %v8019_v15 = vpop.eup %8018  ;;  %5885 = vmatpush.bf16.msra.mxu1 %v7006_v13 }
 0x850   :  { %v5504_v49 = vmul.f32 %v8019_v15, %v5491_v51  ;;  %5870 = vmatpush.bf16.msra.mxu0 %v7026_v27 }
 0x852   :  { %v5505_v4 = vpack.c.bf16 %v5504_v49, %v5503_v40 }
 0x854   :  { %5816 = vmatmul.bf16.vlgmr.msrb.gmra.mxu0 %v5505_v4  ;;  %5830 = vmatmul.bf16.vlgmr.msrb.gmra.mxu1 %v5505_v4 }
 0x855   :  { %5844 = vmatmul.bf16.vlgmr.msrb.gmra.mxu2 %v5505_v4  ;;  %5858 = vmatmul.bf16.vlgmr.msrb.gmra.mxu3 %v5505_v4 }
 0x856   :  { %5871 = vmatpush.bf16.msra.mxu0 %v7002_v48 }
 0x864   :  { %5872 = vmatmul.bf16.vlgmr.msra.gmra.mxu0 %v5505_v4  ;;  %5886 = vmatmul.bf16.vlgmr.msra.gmra.mxu1 %v5505_v4 }
 0x8d1   :  { %v5817_v42 = vpop.f32.mrf.mxu0  ;;  %v5831_v12 = vpop.f32.mrf.mxu1 }
 0x8d2   :  { %v5818_v44 = vadd.f32 %v5817_v42, %v5556_v3  ;;  %v5832_v28 = vadd.f32 %v5831_v12, %v5557_v59 }
 0x8d4   :  { %v5919_v57 = vsel %vm5894_vm0, %v5832_v28, -1e+30  ;;  %v5895_v6 = vsel %vm5894_vm0, %v5818_v44, -1e+30 }
 0x8d5   :  { %5921 = vmax.xlane.f32.xlu1 %v5919_v57  ;;  %5897 = vmax.xlane.f32.xlu0 %v5895_v6 }
 0x8d8   :  { %v5845_v46 = vpop.f32.mrf.mxu2  ;;  %v5859_v47 = vpop.f32.mrf.mxu3 }
 0x8d9   :  { %v5846_v0 = vadd.f32 %v5845_v46, %v5558_v21  ;;  %v5860_v58 = vadd.f32 %v5859_v47, %v5559_v5  ;;  %v5819_v61 = vpop.f32.mrf.mxu0  ;;  %v5833_v14 = vpop.f32.mrf.mxu1 }
 0x8da   :  { %v5834_v43 = vadd.f32 %v5833_v14, %v5557_v59  ;;  %v5820_v23 = vadd.f32 %v5819_v61, %v5556_v3 }
 0x8db   :  { %v5943_v1 = vsel %vm5894_vm0, %v5846_v0, -1e+30  ;;  %v5967_v60 = vsel %vm5894_vm0, %v5860_v58, -1e+30 }
 0x8dc   :  { %5945 = vmax.xlane.f32.xlu2 %v5943_v1  ;;  %v5920_v34 = vsel %vm5894_vm0, %v5834_v43, -1e+30  ;;  %v5896_v37 = vsel %vm5894_vm0, %v5820_v23, -1e+30 }
 0x8dd   :  { %5923 = vmax.xlane.f32.xlu1 %v5920_v34  ;;  %5969 = vmax.xlane.f32.xlu0 %v5967_v60 }
 0x8e0   :  { %v5847_v26 = vpop.f32.mrf.mxu2  ;;  %v5861_v41 = vpop.f32.mrf.mxu3 }
 0x8e1   :  { %v5848_v7 = vadd.f32 %v5847_v26, %v5558_v21  ;;  %v5862_v36 = vadd.f32 %v5861_v41, %v5559_v5  ;;  %v5873_v8 = vpop.f32.mrf.mxu0  ;;  %v5887_v11 = vpop.f32.mrf.mxu1 }
 0x8e2   :  { %v5874_v31 = vadd.f32 %v5873_v8, %v5560_v9  ;;  %v11795_v63 = vadd.f32 %v5887_v11, %v5561_v35 }
 0x8e3   :  { %v5944_v56 = vsel %vm5894_vm0, %v5848_v7, -1e+30  ;;  %v5968_v24 = vsel %vm5894_vm0, %v5862_v36, -1e+30 }
 0x8e4   :  { %5947 = vmax.xlane.f32.xlu2 %v5944_v56  ;;  %v5991_v45 = vsel %vm5894_vm0, %v5874_v31, -1e+30  ;;  %v6015_v19 = vsel %vm5894_vm0, %v11795_v63, -1e+30 }
 0x8e5   :  { %5971 = vmax.xlane.f32.xlu1 %v5968_v24  ;;  %5899 = vmax.xlane.f32.xlu0 %v5896_v37 }
 0x8e9   :  { %v5875_v32 = vpop.f32.mrf.mxu0  ;;  %v5889_v16 = vpop.f32.mrf.mxu1 }
 0x8ea   :  { %v5876_v10 = vadd.f32 %v5875_v32, %v5560_v9  ;;  %v11804_v38 = vadd.f32 %v5889_v16, %v5561_v35 }
 0x8ec   :  { %5993 = vmax.xlane.f32.xlu2 %v5991_v45  ;;  %v5992_v30 = vsel %vm5894_vm0, %v5876_v10, -1e+30  ;;  %v6016_v52 = vsel %vm5894_vm0, %v11804_v38, -1e+30 }
 0x8ed   :  { %6017 = vmax.xlane.f32.xlu1 %v6015_v19  ;;  %5995 = vmax.xlane.f32.xlu0 %v5992_v30 }
 0x8f4   :  { %6019 = vmax.xlane.f32.xlu2 %v6016_v52 }
 0x948   :  { %v5922_v29 = vpop.xlane.xlu1 %5921  ;;  %v5898_v25 = vpop.xlane.xlu0 %5897 }
 0x949   :  { %v11809_v15 = vsub.f32 %v5832_v28, %v5922_v29  ;;  %v11811_v50 = vsub.f32 %v5818_v44, %v5898_v25 }
 0x94b   :  { %v5927_v51 = vmul.f32 1.442695, %v11809_v15  ;;  %v5903_v17 = vmul.f32 1.442695, %v11811_v50 }
 0x94d   :  { %8020 = vpow2.f32 %v5927_v51 }
 0x94e   :  { %8022 = vpow2.f32 %v5903_v17 }
 0x94f   :  { %v5946_v22 = vpop.xlane.xlu2 %5945 }
 0x950   :  { %v11815_v54 = vsub.f32 %v5846_v0, %v5946_v22  ;;  %v5924_v40 = vpop.xlane.xlu1 %5923  ;;  %v5970_v49 = vpop.xlane.xlu0 %5969 }
 0x951   :  { %v11817_v4 = vsub.f32 %v5860_v58, %v5970_v49  ;;  %v11820_v62 = vsub.f32 %v5834_v43, %v5924_v40 }
 0x952   :  { %v5951_v27 = vmul.f32 1.442695, %v11815_v54 }
 0x953   :  { %v8021_v53 = vpop.eup %8020  ;;  %v5975_v33 = vmul.f32 1.442695, %v11817_v4  ;;  %v5929_v13 = vmul.f32 1.442695, %v11820_v62 }
 0x954   :  { %v8023_v39 = vpop.eup %8022  ;;  %8024 = vpow2.f32 %v5951_v27  ;;  %v5931_v2 = vsel %vm5894_vm0, %v8021_v53, 0.0 }
 0x955   :  { %5933 = vadd.xlane.f32.xlu2 %v5931_v2  ;;  %v5907_v48 = vsel %vm5894_vm0, %v8023_v39, 0.0  ;;  %8026 = vpow2.f32 %v5975_v33 }
 0x956   :  { %5909 = vadd.xlane.f32.xlu0 %v5907_v48  ;;  %8028 = vpow2.f32 %v5929_v13 }
 0x957   :  { %v5948_v20 = vpop.xlane.xlu2 %5947 }
 0x958   :  { %v11828_v55 = vsub.f32 %v5848_v7, %v5948_v20  ;;  %v5972_v3 = vpop.xlane.xlu1 %5971  ;;  %v5900_v59 = vpop.xlane.xlu0 %5899 }
 0x959   :  { %v11830_v42 = vsub.f32 %v5820_v23, %v5900_v59  ;;  %v11833_v28 = vsub.f32 %v5862_v36, %v5972_v3 }
 0x95a   :  { %v8025_v12 = vpop.eup %8024  ;;  %v5953_v44 = vmul.f32 1.442695, %v11828_v55 }
 0x95b   :  { %v5905_v57 = vmul.f32 1.442695, %v11830_v42  ;;  %v5955_v6 = vsel %vm5894_vm0, %v8025_v12, 0.0  ;;  %v8027_v21 = vpop.eup %8026  ;;  %v5977_v46 = vmul.f32 1.442695, %v11833_v28 }
 0x95c   :  { %8030 = vpow2.f32 %v5953_v44  ;;  %5957 = vadd.xlane.f32.xlu1 %v5955_v6  ;;  %v5979_v5 = vsel %vm5894_vm0, %v8027_v21, 0.0  ;;  %v8029_v14 = vpop.eup %8028 }
 0x95d   :  { %8032 = vpow2.f32 %v5905_v57  ;;  %v5932_v7 = vsel %vm5894_vm0, %v8029_v14, 0.0 }
 0x95e   :  { %5981 = vadd.xlane.f32.xlu0 %v5979_v5  ;;  %8034 = vpow2.f32 %v5977_v46 }
 0x95f   :  { %v5994_v47 = vpop.xlane.xlu2 %5993 }
 0x960   :  { %v11841_v0 = vsub.f32 %v5874_v31, %v5994_v47  ;;  %v6018_v58 = vpop.xlane.xlu1 %6017  ;;  %v5996_v61 = vpop.xlane.xlu0 %5995 }
 0x961   :  { %v11843_v43 = vsub.f32 %v5876_v10, %v5996_v61  ;;  %v11847_v60 = vsub.f32 %v11795_v63, %v6018_v58 }
 0x962   :  { %v8031_v1 = vpop.eup %8030  ;;  %v5999_v34 = vmul.f32 1.442695, %v11841_v0 }
 0x963   :  { %v6001_v23 = vmul.f32 1.442695, %v11843_v43  ;;  %v5956_v26 = vsel %vm5894_vm0, %v8031_v1, 0.0  ;;  %v8033_v41 = vpop.eup %8032  ;;  %v6023_v8 = vmul.f32 1.442695, %v11847_v60 }
 0x964   :  { %8036 = vpow2.f32 %v5999_v34  ;;  %5959 = vadd.xlane.f32.xlu2 %v5956_v26  ;;  %v5908_v36 = vsel %vm5894_vm0, %v8033_v41, 0.0  ;;  %v8035_v56 = vpop.eup %8034 }
 0x965   :  { %8038 = vpow2.f32 %v6001_v23  ;;  %5911 = vadd.xlane.f32.xlu1 %v5908_v36  ;;  %v5980_v63 = vsel %vm5894_vm0, %v8035_v56, 0.0 }
 0x966   :  { %5935 = vadd.xlane.f32.xlu0 %v5932_v7  ;;  %8040 = vpow2.f32 %v6023_v8 }
 0x967   :  { %v6020_v11 = vpop.xlane.xlu2 %6019 }
 0x968   :  { %v11858_v9 = vsub.f32 %v11804_v38, %v6020_v11 }
 0x96a   :  { %v8037_v35 = vpop.eup %8036  ;;  %v6025_v24 = vmul.f32 1.442695, %v11858_v9 }
 0x96b   :  { %v6003_v37 = vsel %vm5894_vm0, %v8037_v35, 0.0  ;;  %v8039_v31 = vpop.eup %8038 }
 0x96c   :  { %8042 = vpow2.f32 %v6025_v24  ;;  %6005 = vadd.xlane.f32.xlu2 %v6003_v37  ;;  %v6004_v32 = vsel %vm5894_vm0, %v8039_v31, 0.0  ;;  %v8041_v10 = vpop.eup %8040 }
 0x96d   :  { %5983 = vadd.xlane.f32.xlu1 %v5980_v63  ;;  %v6027_v19 = vsel %vm5894_vm0, %v8041_v10, 0.0 }
 0x96e   :  { %6007 = vadd.xlane.f32.xlu0 %v6004_v32 }
 0x972   :  { %v8043_v45 = vpop.eup %8042 }
 0x973   :  { %v6028_v16 = vsel %vm5894_vm0, %v8043_v45, 0.0 }
 0x974   :  { %6031 = vadd.xlane.f32.xlu2 %v6028_v16 }
 0x975   :  { %6029 = vadd.xlane.f32.xlu1 %v6027_v19 }
 0x9c8   :  { %v5934_v30 = vpop.xlane.xlu2 %5933 }
 0x9c9   :  { %8044 = vlog2.f32 %v5934_v30  ;;  %v5910_v38 = vpop.xlane.xlu0 %5909 }
 0x9ca   :  { %8046 = vlog2.f32 %v5910_v38 }
 0x9cf   :  { %v8045_v52 = vpop.eup %8044  ;;  %v5958_v29 = vpop.xlane.xlu1 %5957 }
 0x9d0   :  { %v8047_v25 = vpop.eup %8046  ;;  %v5938_v51 = vmul.f32 0.6931472, %v8045_v52  ;;  %8048 = vlog2.f32 %v5958_v29 }
 0x9d1   :  { %v5914_v17 = vmul.f32 0.6931472, %v8047_v25  ;;  %v5982_v22 = vpop.xlane.xlu0 %5981 }
 0x9d2   :  { %v5941_v40 = vsub.f32 %v11809_v15, %v5938_v51  ;;  %8050 = vlog2.f32 %v5982_v22 }
 0x9d3   :  { %v5917_v49 = vsub.f32 %v11811_v50, %v5914_v17 }
 0x9d4   :  { %6040 = vst [vmem:[#allocation19 + $0x8] sm:$0xff] %v5941_v40 }
 0x9d5   :  { %6039 = vst [vmem:[#allocation19] sm:$0xff] %v5917_v49 }
 0x9d6   :  { %v8049_v18 = vpop.eup %8048 }
 0x9d7   :  { %v5962_v27 = vmul.f32 0.6931472, %v8049_v18  ;;  %v5960_v53 = vpop.xlane.xlu2 %5959 }
 0x9d8   :  { %v8051_v33 = vpop.eup %8050  ;;  %8052 = vlog2.f32 %v5960_v53  ;;  %v5912_v48 = vpop.xlane.xlu1 %5911 }
 0x9d9   :  { %v5965_v39 = vsub.f32 %v11815_v54, %v5962_v27  ;;  %v5986_v2 = vmul.f32 0.6931472, %v8051_v33  ;;  %v5936_v13 = vpop.xlane.xlu0 %5935  ;;  %8054 = vlog2.f32 %v5912_v48 }
 0x9da   :  { %8056 = vlog2.f32 %v5936_v13 }
 0x9db   :  { %6041 = vst [vmem:[#allocation19 + $0x10] sm:$0xff] %v5965_v39  ;;  %v5989_v20 = vsub.f32 %v11817_v4, %v5986_v2 }
 0x9dd   :  { %6042 = vst [vmem:[#allocation19 + $0x18] sm:$0xff] %v5989_v20 }
 0x9de   :  { %v8053_v15 = vpop.eup %8052 }
 0x9df   :  { %v5964_v50 = vmul.f32 0.6931472, %v8053_v15  ;;  %v6006_v3 = vpop.xlane.xlu2 %6005  ;;  %v8055_v59 = vpop.eup %8054 }
 0x9e0   :  { %8058 = vlog2.f32 %v6006_v3  ;;  %v8057_v12 = vpop.eup %8056  ;;  %v5916_v57 = vmul.f32 0.6931472, %v8055_v59  ;;  %v5984_v6 = vpop.xlane.xlu1 %5983 }
 0x9e1   :  { %v5966_v44 = vsub.f32 %v11828_v55, %v5964_v50  ;;  %v6008_v54 = vpop.xlane.xlu0 %6007  ;;  %v5940_v21 = vmul.f32 0.6931472, %v8057_v12  ;;  %8060 = vlog2.f32 %v5984_v6 }
 0x9e2   :  { %v5918_v5 = vsub.f32 %v11830_v42, %v5916_v57  ;;  %8062 = vlog2.f32 %v6008_v54 }
 0x9e3   :  { %6047 = vst [vmem:[#allocation19 + $0x40] sm:$0xff] %v5966_v44  ;;  %v5942_v4 = vsub.f32 %v11820_v62, %v5940_v21 }
 0x9e4   :  { %6045 = vst [vmem:[#allocation19 + $0x30] sm:$0xff] %v5918_v5 }
 0x9e5   :  { %6046 = vst [vmem:[#allocation19 + $0x38] sm:$0xff] %v5942_v4 }
 0x9e6   :  { %v8059_v46 = vpop.eup %8058 }
 0x9e7   :  { %v6010_v47 = vmul.f32 0.6931472, %v8059_v46  ;;  %v6032_v58 = vpop.xlane.xlu2 %6031  ;;  %v8061_v61 = vpop.eup %8060 }
 0x9e8   :  { %8064 = vlog2.f32 %v6032_v58  ;;  %v8063_v14 = vpop.eup %8062  ;;  %v5988_v1 = vmul.f32 0.6931472, %v8061_v61  ;;  %v6030_v34 = vpop.xlane.xlu1 %6029 }
 0x9e9   :  { %v6013_v55 = vsub.f32 %v11841_v0, %v6010_v47  ;;  %v6012_v23 = vmul.f32 0.6931472, %v8063_v14  ;;  %8066 = vlog2.f32 %v6030_v34 }
 0x9ea   :  { %v5990_v42 = vsub.f32 %v11833_v28, %v5988_v1 }
 0x9eb   :  { %6043 = vst [vmem:[#allocation19 + $0x20] sm:$0xff] %v6013_v55  ;;  %v6014_v26 = vsub.f32 %v11843_v43, %v6012_v23 }
 0x9ec   :  { %6048 = vst [vmem:[#allocation19 + $0x48] sm:$0xff] %v5990_v42 }
 0x9ed   :  { %6049 = vst [vmem:[#allocation19 + $0x50] sm:$0xff] %v6014_v26 }
 0x9ee   :  { %v8065_v62 = vpop.eup %8064 }
 0x9ef   :  { %v6036_v41 = vmul.f32 0.6931472, %v8065_v62  ;;  %v8067_v0 = vpop.eup %8066 }
 0x9f0   :  { %v6034_v36 = vmul.f32 0.6931472, %v8067_v0 }
 0x9f1   :  { %v6038_v7 = vsub.f32 %v11858_v9, %v6036_v41 }
 0x9f2   :  { %v6037_v28 = vsub.f32 %v11847_v60, %v6034_v36 }
 0x9f3   :  { %6050 = vst [vmem:[#allocation19 + $0x58] sm:$0xff] %v6038_v7 }
 0x9f4   :  { %6044 = vst [vmem:[#allocation19 + $0x28] sm:$0xff] %v6037_v28 }
 0x9f5   :  { %6063 = dma.vmem_to_hbm [thread:$0]  %s6056_s16, 1536, %s6058_s0, [#allocation4], %s8365_s18, %s8365_s18, %s8366_s29  }
 0x9f6   :  { %8344 = dma.done.wait [#allocation4], 1536  }
 0x9f7   :  { %8345 = vsyncadd [#allocation4], 4294965760 }
 0x9f8   :  { %6068 = vsyncpa [#allocation3], 1 }
 0x9f9   :  { %6069 = vsyncpa [#allocation6], 1 }
 0x9fa   :  { %6070 = vsyncpa [#allocation9], 1 }
 0x9fb   :  { %6071 = vsyncpa [#allocation12], 1 }
 0x9fc   :  { %6072 = vsyncpa [#allocation15], 1 }
 0x9fd   :  { %6073 = vsyncpa [#allocation18], 1 }
 0x9fe   :  { %6074 = vsyncpa [#allocation4], 1 }

</bundles_post_ra>
